<compile_context>
chip_gen: v7x
topology: tpu7x:2x2x1
jax: 0.10.0
libtpu: 0.0.40
codegen_flags: <defaults>
</compile_context>

<pallas_src>
import jax
import jax.numpy as jnp
from jax import lax
from jax.experimental import pallas as pl
from jax.experimental.pallas import tpu as pltpu

# ---- module hyper-parameters (small, consistent with Controller.__init__) ----
NUM_OPS = 5          # number of operation candidates
NUM_CMP = 3          # number of computation nodes in a cell
HIDDEN = 32          # lstm_hidden
N_SAMPLES_PER_CELL = 4 * NUM_CMP          # 2 idx + 2 op samples per node
N_SAMPLES = 2 * N_SAMPLES_PER_CELL        # normal cell + reduce cell


def _sample_col_stats(logits, u, length):
    """Column-oriented sampler. logits: (length, 1). u: (1,1) uniform in (0,1).
    Returns (idx (1,1) int32, cross_entropy (1,1), entropy (1,1), onehot (length,1))."""
    m = jnp.max(logits, axis=0, keepdims=True)
    z = logits - m
    e = jnp.exp(z)
    se = jnp.sum(e, axis=0, keepdims=True)
    p = e * pl.reciprocal(se, approx=True)
    logp = z - jnp.log(se)
    ent = -jnp.sum(p * logp, axis=0, keepdims=True)            # entropy_cal()
    # inverse-CDF multinomial sample (unrolled, length is small & static)
    idx = jnp.zeros((1, 1), jnp.int32)
    csum = jnp.zeros((1, 1), jnp.float32)
    for i in range(length - 1):
        csum = csum + p[i:i + 1, 0:1]
        idx = idx + (csum <= u).astype(jnp.int32)
    rows = lax.broadcasted_iota(jnp.int32, (length, 1), 0)
    onehot = (rows == idx).astype(jnp.float32)
    ce = -jnp.sum(onehot * logp, axis=0, keepdims=True)        # F.cross_entropy
    return idx, ce, ent, onehot


def _sample_row_stats(logits, u, length):
    """Row-oriented sampler. logits: (1, length). u: (1,1) uniform in (0,1).
    Returns (idx (1,1) int32, cross_entropy (1,1), entropy (1,1))."""
    m = jnp.max(logits, axis=1, keepdims=True)
    z = logits - m
    e = jnp.exp(z)
    se = jnp.sum(e, axis=1, keepdims=True)
    p = e * pl.reciprocal(se, approx=True)
    logp = z - jnp.log(se)
    ent = -jnp.sum(p * logp, axis=1, keepdims=True)
    idx = jnp.zeros((1, 1), jnp.int32)
    csum = jnp.zeros((1, 1), jnp.float32)
    for i in range(length - 1):
        csum = csum + p[0:1, i:i + 1]
        idx = idx + (csum <= u).astype(jnp.int32)
    lanes = lax.broadcasted_iota(jnp.int32, (1, length), 1)
    onehot = (lanes == idx).astype(jnp.float32)
    ce = -jnp.sum(onehot * logp, axis=1, keepdims=True)
    return idx, ce, ent


def _controller_kernel(wcat_ref, wsmall_ref, misc_ref,
                       seq_ref, ent_ref, lp_ref,
                       anch_scr, anchw1_scr):
    H = HIDDEN
    w_cat = wcat_ref[...]                           # (2H, 4H) bf16, gates (i,f,o,g)
    wsmall = wsmall_ref[...]                        # (H, 4H) bf16 slab
    w1_t = wsmall[:, 0:H]                           # (H, H)
    w2_t = wsmall[:, H:2 * H]                       # (H, H)
    wopt_t = wsmall[:, 2 * H:2 * H + NUM_OPS]       # (H, NUM_OPS)
    emb = wsmall[0:NUM_OPS + 1, 3 * H:4 * H]        # (NUM_OPS+1, H) bf16

    row0 = misc_ref[0:1, :]                         # (1, 4H) f32
    row1 = misc_ref[1:2, :]                         # (1, 4H) f32
    b = row0                                        # (1, 4H)  (= bih + bhh, permuted)
    v_row = row1[:, 0:H]                            # (1, H)
    bopt = row1[:, H:H + NUM_OPS]                   # (1, NUM_OPS)
    u_all = row1[:, 2 * H:2 * H + N_SAMPLES]        # (1, N_SAMPLES)

    x0 = emb[0:1, :].astype(jnp.float32)            # embedding(0)
    op_lanes = lax.broadcasted_iota(jnp.int32, (1, NUM_OPS + 1), 1)

    def lstm_step(x, h, c):
        # fused (1,2H)@(2H,4H) gate matmul, bf16 operands, f32 accumulation
        xh = jnp.concatenate([x, h], axis=1).astype(jnp.bfloat16)
        gates = jnp.dot(xh, w_cat, preferred_element_type=jnp.float32) + b
        # gate order (i, f, o, g): one wide sigmoid + one tanh
        sig = pl.reciprocal(1.0 + jnp.exp(-gates[:, 0:3 * H]), approx=True)
        i_g = sig[:, 0:H]
        f_g = sig[:, H:2 * H]
        o_g = sig[:, 2 * H:3 * H]
        g_g = jnp.tanh(gates[:, 3 * H:4 * H])
        c_new = f_g * c + i_g * g_g
        h_new = o_g * jnp.tanh(c_new)
        return h_new, c_new

    def w1_proj(h):
        return jnp.dot(h.astype(jnp.bfloat16), w1_t,
                       preferred_element_type=jnp.float32)

    def generate_cell(h, c, u_base, row_base):
        x = x0
        ent_acc = jnp.zeros((1, 1), jnp.float32)
        lp_acc = jnp.zeros((1, 1), jnp.float32)
        u_cnt = 0

        # --- warm-up: 2 lstm steps, anchors are zeros ---
        for s in range(2):
            h, c = lstm_step(x, h, c)
            anch_scr[s:s + 1, :] = jnp.zeros((1, H), jnp.float32)
            anchw1_scr[s:s + 1, :] = w1_proj(h)

        for s in range(2, NUM_CMP + 2):
            t_node = s - 2
            # --- two index (attention) samples ---
            for i in range(2):
                h, c = lstm_step(x, h, c)
                query = anchw1_scr[0:s, :]                     # (s, H)
                w2h = jnp.dot(h.astype(jnp.bfloat16), w2_t,
                              preferred_element_type=jnp.float32)
                th = jnp.tanh(w2h + query)                     # (s, H)
                logits = jnp.sum(th * v_row, axis=1, keepdims=True)   # (s,1) = v_attn
                u = u_all[0:1, u_base + u_cnt:u_base + u_cnt + 1]
                u_cnt += 1
                idx, ce, ent, onehot = _sample_col_stats(logits, u, s)
                lp_acc = lp_acc + ce
                ent_acc = ent_acc + ent
                col = 2 * t_node + i
                seq_ref[row_base:row_base + 1, col:col + 1] = idx
                # x = anchors[idx]
                x = jnp.sum(onehot * anch_scr[0:s, :], axis=0, keepdims=True)
            # --- two operation samples ---
            for i in range(2):
                h, c = lstm_step(x, h, c)
                logits = jnp.dot(h.astype(jnp.bfloat16), wopt_t,
                                 preferred_element_type=jnp.float32) + bopt  # (1,NUM_OPS)
                u = u_all[0:1, u_base + u_cnt:u_base + u_cnt + 1]
                u_cnt += 1
                op, ce, ent = _sample_row_stats(logits, u, NUM_OPS)
                lp_acc = lp_acc + ce
                ent_acc = ent_acc + ent
                col = 2 * t_node + i
                seq_ref[row_base + 1:row_base + 2, col:col + 1] = op
                # x = embedding(op + 1) as onehot_row @ emb (MXU)
                oh = (op_lanes == (op + 1)).astype(jnp.bfloat16)
                x = jnp.dot(oh, emb, preferred_element_type=jnp.float32)
            # --- anchor step ---
            h, c = lstm_step(x, h, c)
            anch_scr[s:s + 1, :] = h
            anchw1_scr[s:s + 1, :] = w1_proj(h)
            x = x0
        return ent_acc, lp_acc, h, c

    zeros = jnp.zeros((1, HIDDEN), jnp.float32)
    n_ent, n_lp, h, c = generate_cell(zeros, zeros, 0, 0)
    r_ent, r_lp, _, _ = generate_cell(h, c, N_SAMPLES_PER_CELL, 2)
    ent_ref[...] = n_ent + r_ent
    lp_ref[...] = n_lp + r_lp


def init_params(key):
    H = HIDDEN
    ks = jax.random.split(key, 10)
    s = float(1.0 / (H ** 0.5))
    return dict(
        emb=jax.random.uniform(ks[0], (NUM_OPS + 1, H), jnp.float32, -0.1, 0.1),
        wih=jax.random.uniform(ks[1], (4 * H, H), jnp.float32, -s, s),
        whh=jax.random.uniform(ks[2], (4 * H, H), jnp.float32, -s, s),
        bih=jax.random.uniform(ks[3], (4 * H,), jnp.float32, -s, s),
        bhh=jax.random.uniform(ks[4], (4 * H,), jnp.float32, -s, s),
        wopt=jax.random.uniform(ks[5], (NUM_OPS, H), jnp.float32, -s, s),
        bopt=jax.random.uniform(ks[6], (NUM_OPS,), jnp.float32, -s, s),
        w1=jax.random.uniform(ks[7], (H, H), jnp.float32, -s, s),
        w2=jax.random.uniform(ks[8], (H, H), jnp.float32, -s, s),
        v=jax.random.uniform(ks[9], (1, H), jnp.float32, -s, s),
    )


@jax.jit
def controller_forward(params, uniforms):
    """Parameter plumbing (glue): permute gates, fuse & pack weights into 3 slabs."""
    H = HIDDEN

    def perm_gates(w):
        # torch gate layout (i, f, g, o) -> (i, f, o, g) so sigmoid gates are contiguous
        return jnp.concatenate(
            [w[0:H], w[H:2 * H], w[3 * H:4 * H], w[2 * H:3 * H]], axis=0)

    wih_p = perm_gates(params["wih"])                       # (4H, H)
    whh_p = perm_gates(params["whh"])                       # (4H, H)
    b_p = perm_gates(params["bih"] + params["bhh"])         # (4H,)

    # fused LSTM weight: [x,h] @ W_cat, (2H, 4H), bf16 MXU operand
    w_cat = jnp.concatenate([wih_p.T, whh_p.T], axis=0).astype(jnp.bfloat16)

    # small-weights slab (H, 4H) bf16: w1_t | w2_t | wopt_t | emb
    wsmall = jnp.zeros((H, 4 * H), jnp.bfloat16)
    wsmall = wsmall.at[:, 0:H].set(params["w1"].T.astype(jnp.bfloat16))
    wsmall = wsmall.at[:, H:2 * H].set(params["w2"].T.astype(jnp.bfloat16))
    wsmall = wsmall.at[:, 2 * H:2 * H + NUM_OPS].set(
        params["wopt"].T.astype(jnp.bfloat16))
    wsmall = wsmall.at[0:NUM_OPS + 1, 3 * H:4 * H].set(
        params["emb"].astype(jnp.bfloat16))

    # misc f32 slab (2, 4H): bias row | [v_row, bopt, uniforms]
    misc = jnp.zeros((2, 4 * H), jnp.float32)
    misc = misc.at[0, :].set(b_p)
    misc = misc.at[1, 0:H].set(params["v"][0])
    misc = misc.at[1, H:H + NUM_OPS].set(params["bopt"])
    misc = misc.at[1, 2 * H:2 * H + N_SAMPLES].set(uniforms[0])

    seq, ent, lp = pl.pallas_call(
        _controller_kernel,
        out_shape=(
            jax.ShapeDtypeStruct((4, 2 * NUM_CMP), jnp.int32),
            jax.ShapeDtypeStruct((1, 1), jnp.float32),
            jax.ShapeDtypeStruct((1, 1), jnp.float32),
        ),
        in_specs=[pl.BlockSpec(memory_space=pltpu.MemorySpace.VMEM)] * 3,
        out_specs=(pl.BlockSpec(memory_space=pltpu.MemorySpace.VMEM),) * 3,
        scratch_shapes=[
            pltpu.VMEM((NUM_CMP + 2, HIDDEN), jnp.float32),   # anchors
            pltpu.VMEM((NUM_CMP + 2, HIDDEN), jnp.float32),   # w_attn_1(anchors)
        ],
    )(w_cat, wsmall, misc)

    normal_cell = (seq[0], seq[1])   # (idx_seq, opt_seq)
    reduce_cell = (seq[2], seq[3])
    return (normal_cell, reduce_cell), ent[0, 0], lp[0, 0]


if __name__ == "__main__":
    key = jax.random.PRNGKey(0)
    pkey, ukey = jax.random.split(key)
    params = init_params(pkey)
    # uniforms driving the multinomial samples (one per sampled token)
    uniforms = jax.random.uniform(ukey, (1, N_SAMPLES), jnp.float32,
                                  minval=1e-6, maxval=1.0 - 1e-6)

    (normal_cell, reduce_cell), entropy, log_prob = controller_forward(params, uniforms)
    jax.block_until_ready((normal_cell, reduce_cell, entropy, log_prob))

    # light sanity checks
    assert bool(jnp.isfinite(entropy)) and bool(jnp.isfinite(log_prob))
    assert normal_cell[0].shape == (2 * NUM_CMP,)
    assert int(jnp.max(normal_cell[1])) < NUM_OPS and int(jnp.min(normal_cell[1])) >= 0
    assert int(jnp.max(reduce_cell[0])) <= NUM_CMP  # idx < s <= NUM_CMP+1

    print("KERNEL_OK")
</pallas_src>

<mosaic_0001>
module attributes {stable_mosaic.version = 11 : i64} {
  func.func @_controller_kernel(%arg0: memref<64x128xbf16, #tpu.memory_space<vmem>>, %arg1: memref<32x128xbf16, #tpu.memory_space<vmem>>, %arg2: memref<2x128xf32, #tpu.memory_space<vmem>>, %arg3: memref<4x6xi32, #tpu.memory_space<vmem>>, %arg4: memref<1x1xf32, #tpu.memory_space<vmem>>, %arg5: memref<1x1xf32, #tpu.memory_space<vmem>>, %arg6: memref<5x32xf32, #tpu.memory_space<vmem>>, %arg7: memref<5x32xf32, #tpu.memory_space<vmem>>) attributes {dimension_semantics = [], scalar_prefetch = 0 : i64, scratch_operands = 2 : i64, tpu.core_type = #tpu.core_type<tc>} {
    %c0 = arith.constant 0 : index
    %c0_0 = arith.constant 0 : index
    %0 = vector.load %arg0[%c0, %c0_0] : memref<64x128xbf16, #tpu.memory_space<vmem>>, vector<64x128xbf16>
    %c0_1 = arith.constant 0 : index
    %c0_2 = arith.constant 0 : index
    %1 = vector.load %arg1[%c0_1, %c0_2] : memref<32x128xbf16, #tpu.memory_space<vmem>>, vector<32x128xbf16>
    %2 = vector.extract_strided_slice %1 {offsets = [0, 0], sizes = [32, 32], strides = [1, 1]} : vector<32x128xbf16> to vector<32x32xbf16>
    %3 = vector.extract_strided_slice %1 {offsets = [0, 32], sizes = [32, 32], strides = [1, 1]} : vector<32x128xbf16> to vector<32x32xbf16>
    %4 = vector.extract_strided_slice %1 {offsets = [0, 64], sizes = [32, 5], strides = [1, 1]} : vector<32x128xbf16> to vector<32x5xbf16>
    %5 = vector.extract_strided_slice %1 {offsets = [0, 96], sizes = [6, 32], strides = [1, 1]} : vector<32x128xbf16> to vector<6x32xbf16>
    %c0_3 = arith.constant 0 : index
    %c0_4 = arith.constant 0 : index
    %6 = vector.load %arg2[%c0_3, %c0_4] : memref<2x128xf32, #tpu.memory_space<vmem>>, vector<1x128xf32>
    %c1 = arith.constant 1 : index
    %c0_5 = arith.constant 0 : index
    %7 = vector.load %arg2[%c1, %c0_5] : memref<2x128xf32, #tpu.memory_space<vmem>>, vector<1x128xf32>
    %8 = vector.extract_strided_slice %7 {offsets = [0, 0], sizes = [1, 32], strides = [1, 1]} : vector<1x128xf32> to vector<1x32xf32>
    %9 = vector.extract_strided_slice %7 {offsets = [0, 32], sizes = [1, 5], strides = [1, 1]} : vector<1x128xf32> to vector<1x5xf32>
    %10 = vector.extract_strided_slice %7 {offsets = [0, 64], sizes = [1, 24], strides = [1, 1]} : vector<1x128xf32> to vector<1x24xf32>
    %11 = vector.extract_strided_slice %5 {offsets = [0, 0], sizes = [1, 32], strides = [1, 1]} : vector<6x32xbf16> to vector<1x32xbf16>
    %12 = arith.extf %11 : vector<1x32xbf16> to vector<1x32xf32>
    %13 = tpu.iota {dimensions = array<i32: 1>} : vector<1x6xi32>
    %cst = arith.constant 0.000000e+00 : f32
    %14 = vector.broadcast %cst : f32 to vector<1x32xf32>
    %cst_6 = arith.constant 0.000000e+00 : f32
    %15 = vector.broadcast %cst_6 : f32 to vector<1x1xf32>
    %cst_7 = arith.constant 0.000000e+00 : f32
    %16 = vector.broadcast %cst_7 : f32 to vector<1x1xf32>
    %17 = tpu.concatenate %12, %14 in 1 : vector<1x32xf32>, vector<1x32xf32> -> vector<1x64xf32>
    %18 = arith.truncf %17 : vector<1x64xf32> to vector<1x64xbf16>
    %cst_8 = arith.constant dense<0.000000e+00> : vector<1x128xf32>
    %19 = tpu.matmul %18, %0, %cst_8 {dimension_numbers = #tpu.dot_dimension_numbers<[1], [0], [0], [1], [0, 0, 1, 1], [], []>} : vector<1x64xbf16>, vector<64x128xbf16>, vector<1x128xf32> -> vector<1x128xf32>
    %20 = arith.addf %19, %6 : vector<1x128xf32>
    %21 = vector.extract_strided_slice %20 {offsets = [0, 0], sizes = [1, 96], strides = [1, 1]} : vector<1x128xf32> to vector<1x96xf32>
    %cst_9 = arith.constant 0.000000e+00 : f32
    %22 = vector.broadcast %cst_9 : f32 to vector<1x96xf32>
    %23 = arith.subf %22, %21 : vector<1x96xf32>
    %24 = math.exp %23 : vector<1x96xf32>
    %cst_10 = arith.constant 1.000000e+00 : f32
    %25 = vector.broadcast %cst_10 : f32 to vector<1x96xf32>
    %26 = arith.addf %25, %24 : vector<1x96xf32>
    %27 = tpu.reciprocal %26 {approx = true} : vector<1x96xf32> -> vector<1x96xf32>
    %28 = vector.extract_strided_slice %27 {offsets = [0, 0], sizes = [1, 32], strides = [1, 1]} : vector<1x96xf32> to vector<1x32xf32>
    %29 = vector.extract_strided_slice %27 {offsets = [0, 32], sizes = [1, 32], strides = [1, 1]} : vector<1x96xf32> to vector<1x32xf32>
    %30 = vector.extract_strided_slice %27 {offsets = [0, 64], sizes = [1, 32], strides = [1, 1]} : vector<1x96xf32> to vector<1x32xf32>
    %31 = vector.extract_strided_slice %20 {offsets = [0, 96], sizes = [1, 32], strides = [1, 1]} : vector<1x128xf32> to vector<1x32xf32>
    %32 = math.tanh %31 : vector<1x32xf32>
    %33 = arith.mulf %29, %14 : vector<1x32xf32>
    %34 = arith.mulf %28, %32 : vector<1x32xf32>
    %35 = arith.addf %33, %34 : vector<1x32xf32>
    %36 = math.tanh %35 : vector<1x32xf32>
    %37 = arith.mulf %30, %36 : vector<1x32xf32>
    %cst_11 = arith.constant 0.000000e+00 : f32
    %38 = vector.broadcast %cst_11 : f32 to vector<1x32xf32>
    %c0_12 = arith.constant 0 : index
    %c0_13 = arith.constant 0 : index
    %39 = vector.load %arg6[%c0_12, %c0_13] : memref<5x32xf32, #tpu.memory_space<vmem>>, vector<1x32xf32>
    tpu.vector_store %arg6[%c0_12, %c0_13], %38 {strides = array<i32>} : memref<5x32xf32, #tpu.memory_space<vmem>>, vector<1x32xf32>,
    %40 = arith.truncf %37 : vector<1x32xf32> to vector<1x32xbf16>
    %cst_14 = arith.constant dense<0.000000e+00> : vector<1x32xf32>
    %41 = tpu.matmul %40, %2, %cst_14 {dimension_numbers = #tpu.dot_dimension_numbers<[1], [0], [0], [1], [0, 0, 1, 1], [], []>} : vector<1x32xbf16>, vector<32x32xbf16>, vector<1x32xf32> -> vector<1x32xf32>
    %c0_15 = arith.constant 0 : index
    %c0_16 = arith.constant 0 : index
    %42 = vector.load %arg7[%c0_15, %c0_16] : memref<5x32xf32, #tpu.memory_space<vmem>>, vector<1x32xf32>
    tpu.vector_store %arg7[%c0_15, %c0_16], %41 {strides = array<i32>} : memref<5x32xf32, #tpu.memory_space<vmem>>, vector<1x32xf32>,
    %43 = tpu.concatenate %12, %37 in 1 : vector<1x32xf32>, vector<1x32xf32> -> vector<1x64xf32>
    %44 = arith.truncf %43 : vector<1x64xf32> to vector<1x64xbf16>
    %cst_17 = arith.constant dense<0.000000e+00> : vector<1x128xf32>
    %45 = tpu.matmul %44, %0, %cst_17 {dimension_numbers = #tpu.dot_dimension_numbers<[1], [0], [0], [1], [0, 0, 1, 1], [], []>} : vector<1x64xbf16>, vector<64x128xbf16>, vector<1x128xf32> -> vector<1x128xf32>
    %46 = arith.addf %45, %6 : vector<1x128xf32>
    %47 = vector.extract_strided_slice %46 {offsets = [0, 0], sizes = [1, 96], strides = [1, 1]} : vector<1x128xf32> to vector<1x96xf32>
    %cst_18 = arith.constant 0.000000e+00 : f32
    %48 = vector.broadcast %cst_18 : f32 to vector<1x96xf32>
    %49 = arith.subf %48, %47 : vector<1x96xf32>
    %50 = math.exp %49 : vector<1x96xf32>
    %cst_19 = arith.constant 1.000000e+00 : f32
    %51 = vector.broadcast %cst_19 : f32 to vector<1x96xf32>
    %52 = arith.addf %51, %50 : vector<1x96xf32>
    %53 = tpu.reciprocal %52 {approx = true} : vector<1x96xf32> -> vector<1x96xf32>
    %54 = vector.extract_strided_slice %53 {offsets = [0, 0], sizes = [1, 32], strides = [1, 1]} : vector<1x96xf32> to vector<1x32xf32>
    %55 = vector.extract_strided_slice %53 {offsets = [0, 32], sizes = [1, 32], strides = [1, 1]} : vector<1x96xf32> to vector<1x32xf32>
    %56 = vector.extract_strided_slice %53 {offsets = [0, 64], sizes = [1, 32], strides = [1, 1]} : vector<1x96xf32> to vector<1x32xf32>
    %57 = vector.extract_strided_slice %46 {offsets = [0, 96], sizes = [1, 32], strides = [1, 1]} : vector<1x128xf32> to vector<1x32xf32>
    %58 = math.tanh %57 : vector<1x32xf32>
    %59 = arith.mulf %55, %35 : vector<1x32xf32>
    %60 = arith.mulf %54, %58 : vector<1x32xf32>
    %61 = arith.addf %59, %60 : vector<1x32xf32>
    %62 = math.tanh %61 : vector<1x32xf32>
    %63 = arith.mulf %56, %62 : vector<1x32xf32>
    %cst_20 = arith.constant 0.000000e+00 : f32
    %64 = vector.broadcast %cst_20 : f32 to vector<1x32xf32>
    %c1_21 = arith.constant 1 : index
    %c0_22 = arith.constant 0 : index
    %65 = vector.load %arg6[%c1_21, %c0_22] : memref<5x32xf32, #tpu.memory_space<vmem>>, vector<1x32xf32>
    tpu.vector_store %arg6[%c1_21, %c0_22], %64 {strides = array<i32>} : memref<5x32xf32, #tpu.memory_space<vmem>>, vector<1x32xf32>,
    %66 = arith.truncf %63 : vector<1x32xf32> to vector<1x32xbf16>
    %cst_23 = arith.constant dense<0.000000e+00> : vector<1x32xf32>
    %67 = tpu.matmul %66, %2, %cst_23 {dimension_numbers = #tpu.dot_dimension_numbers<[1], [0], [0], [1], [0, 0, 1, 1], [], []>} : vector<1x32xbf16>, vector<32x32xbf16>, vector<1x32xf32> -> vector<1x32xf32>
    %c1_24 = arith.constant 1 : index
    %c0_25 = arith.constant 0 : index
    %68 = vector.load %arg7[%c1_24, %c0_25] : memref<5x32xf32, #tpu.memory_space<vmem>>, vector<1x32xf32>
    tpu.vector_store %arg7[%c1_24, %c0_25], %67 {strides = array<i32>} : memref<5x32xf32, #tpu.memory_space<vmem>>, vector<1x32xf32>,
    %69 = tpu.concatenate %12, %63 in 1 : vector<1x32xf32>, vector<1x32xf32> -> vector<1x64xf32>
    %70 = arith.truncf %69 : vector<1x64xf32> to vector<1x64xbf16>
    %cst_26 = arith.constant dense<0.000000e+00> : vector<1x128xf32>
    %71 = tpu.matmul %70, %0, %cst_26 {dimension_numbers = #tpu.dot_dimension_numbers<[1], [0], [0], [1], [0, 0, 1, 1], [], []>} : vector<1x64xbf16>, vector<64x128xbf16>, vector<1x128xf32> -> vector<1x128xf32>
    %72 = arith.addf %71, %6 : vector<1x128xf32>
    %73 = vector.extract_strided_slice %72 {offsets = [0, 0], sizes = [1, 96], strides = [1, 1]} : vector<1x128xf32> to vector<1x96xf32>
    %cst_27 = arith.constant 0.000000e+00 : f32
    %74 = vector.broadcast %cst_27 : f32 to vector<1x96xf32>
    %75 = arith.subf %74, %73 : vector<1x96xf32>
    %76 = math.exp %75 : vector<1x96xf32>
    %cst_28 = arith.constant 1.000000e+00 : f32
    %77 = vector.broadcast %cst_28 : f32 to vector<1x96xf32>
    %78 = arith.addf %77, %76 : vector<1x96xf32>
    %79 = tpu.reciprocal %78 {approx = true} : vector<1x96xf32> -> vector<1x96xf32>
    %80 = vector.extract_strided_slice %79 {offsets = [0, 0], sizes = [1, 32], strides = [1, 1]} : vector<1x96xf32> to vector<1x32xf32>
    %81 = vector.extract_strided_slice %79 {offsets = [0, 32], sizes = [1, 32], strides = [1, 1]} : vector<1x96xf32> to vector<1x32xf32>
    %82 = vector.extract_strided_slice %79 {offsets = [0, 64], sizes = [1, 32], strides = [1, 1]} : vector<1x96xf32> to vector<1x32xf32>
    %83 = vector.extract_strided_slice %72 {offsets = [0, 96], sizes = [1, 32], strides = [1, 1]} : vector<1x128xf32> to vector<1x32xf32>
    %84 = math.tanh %83 : vector<1x32xf32>
    %85 = arith.mulf %81, %61 : vector<1x32xf32>
    %86 = arith.mulf %80, %84 : vector<1x32xf32>
    %87 = arith.addf %85, %86 : vector<1x32xf32>
    %88 = math.tanh %87 : vector<1x32xf32>
    %89 = arith.mulf %82, %88 : vector<1x32xf32>
    %c0_29 = arith.constant 0 : index
    %c0_30 = arith.constant 0 : index
    %90 = vector.load %arg7[%c0_29, %c0_30] : memref<5x32xf32, #tpu.memory_space<vmem>>, vector<2x32xf32>
    %91 = arith.truncf %89 : vector<1x32xf32> to vector<1x32xbf16>
    %cst_31 = arith.constant dense<0.000000e+00> : vector<1x32xf32>
    %92 = tpu.matmul %91, %3, %cst_31 {dimension_numbers = #tpu.dot_dimension_numbers<[1], [0], [0], [1], [0, 0, 1, 1], [], []>} : vector<1x32xbf16>, vector<32x32xbf16>, vector<1x32xf32> -> vector<1x32xf32>
    %93 = vector.broadcast %92 : vector<1x32xf32> to vector<2x32xf32>
    %94 = arith.addf %93, %90 : vector<2x32xf32>
    %95 = math.tanh %94 : vector<2x32xf32>
    %96 = vector.broadcast %8 : vector<1x32xf32> to vector<2x32xf32>
    %97 = arith.mulf %95, %96 : vector<2x32xf32>
    %cst_32 = arith.constant dense<0.000000e+00> : vector<2xf32>
    %98 = vector.multi_reduction <add>, %97, %cst_32 [1] : vector<2x32xf32> to vector<2xf32>
    %99 = vector.shape_cast %98 : vector<2xf32> to vector<2x1xf32>
    %100 = vector.extract_strided_slice %10 {offsets = [0, 0], sizes = [1, 1], strides = [1, 1]} : vector<1x24xf32> to vector<1x1xf32>
    %cst_33 = arith.constant dense<0xFF800000> : vector<1xf32>
    %101 = vector.multi_reduction <maximumf>, %99, %cst_33 [0] : vector<2x1xf32> to vector<1xf32>
    %102 = vector.shape_cast %101 : vector<1xf32> to vector<1x1xf32>
    %103 = vector.broadcast %102 : vector<1x1xf32> to vector<2x1xf32>
    %104 = arith.subf %99, %103 : vector<2x1xf32>
    %105 = math.exp %104 : vector<2x1xf32>
    %cst_34 = arith.constant dense<0.000000e+00> : vector<1xf32>
    %106 = vector.multi_reduction <add>, %105, %cst_34 [0] : vector<2x1xf32> to vector<1xf32>
    %107 = vector.shape_cast %106 : vector<1xf32> to vector<1x1xf32>
    %108 = tpu.reciprocal %107 {approx = true} : vector<1x1xf32> -> vector<1x1xf32>
    %109 = vector.broadcast %108 : vector<1x1xf32> to vector<2x1xf32>
    %110 = arith.mulf %105, %109 : vector<2x1xf32>
    %111 = math.log %107 : vector<1x1xf32>
    %112 = vector.broadcast %111 : vector<1x1xf32> to vector<2x1xf32>
    %113 = arith.subf %104, %112 : vector<2x1xf32>
    %114 = arith.mulf %110, %113 : vector<2x1xf32>
    %cst_35 = arith.constant dense<0.000000e+00> : vector<1xf32>
    %115 = vector.multi_reduction <add>, %114, %cst_35 [0] : vector<2x1xf32> to vector<1xf32>
    %116 = vector.shape_cast %115 : vector<1xf32> to vector<1x1xf32>
    %cst_36 = arith.constant 0.000000e+00 : f32
    %117 = vector.broadcast %cst_36 : f32 to vector<1x1xf32>
    %118 = arith.subf %117, %116 : vector<1x1xf32>
    %c0_i32 = arith.constant 0 : i32
    %119 = vector.broadcast %c0_i32 : i32 to vector<1x1xi32>
    %cst_37 = arith.constant 0.000000e+00 : f32
    %120 = vector.broadcast %cst_37 : f32 to vector<1x1xf32>
    %121 = vector.extract_strided_slice %110 {offsets = [0, 0], sizes = [1, 1], strides = [1, 1]} : vector<2x1xf32> to vector<1x1xf32>
    %122 = arith.addf %120, %121 : vector<1x1xf32>
    %123 = arith.cmpf ole, %122, %100 : vector<1x1xf32>
    %124 = arith.extui %123 : vector<1x1xi1> to vector<1x1xi32>
    %125 = arith.addi %119, %124 : vector<1x1xi32>
    %126 = tpu.iota {dimensions = array<i32: 0>} : vector<2x1xi32>
    %127 = vector.broadcast %125 : vector<1x1xi32> to vector<2x1xi32>
    %128 = arith.cmpi eq, %126, %127 : vector<2x1xi32>
    %129 = arith.extui %128 : vector<2x1xi1> to vector<2x1xi32>
    %130 = arith.sitofp %129 : vector<2x1xi32> to vector<2x1xf32>
    %131 = arith.mulf %130, %113 : vector<2x1xf32>
    %cst_38 = arith.constant dense<0.000000e+00> : vector<1xf32>
    %132 = vector.multi_reduction <add>, %131, %cst_38 [0] : vector<2x1xf32> to vector<1xf32>
    %133 = vector.shape_cast %132 : vector<1xf32> to vector<1x1xf32>
    %cst_39 = arith.constant 0.000000e+00 : f32
    %134 = vector.broadcast %cst_39 : f32 to vector<1x1xf32>
    %135 = arith.subf %134, %133 : vector<1x1xf32>
    %136 = arith.addf %16, %135 : vector<1x1xf32>
    %137 = arith.addf %15, %118 : vector<1x1xf32>
    %c0_40 = arith.constant 0 : index
    %c0_41 = arith.constant 0 : index
    %138 = vector.load %arg3[%c0_40, %c0_41] : memref<4x6xi32, #tpu.memory_space<vmem>>, vector<1x1xi32>
    tpu.vector_store %arg3[%c0_40, %c0_41], %125 {strides = array<i32>} : memref<4x6xi32, #tpu.memory_space<vmem>>, vector<1x1xi32>,
    %c0_42 = arith.constant 0 : index
    %c0_43 = arith.constant 0 : index
    %139 = vector.load %arg6[%c0_42, %c0_43] : memref<5x32xf32, #tpu.memory_space<vmem>>, vector<2x32xf32>
    %140 = vector.broadcast %130 : vector<2x1xf32> to vector<2x32xf32>
    %141 = arith.mulf %140, %139 : vector<2x32xf32>
    %cst_44 = arith.constant dense<0.000000e+00> : vector<32xf32>
    %142 = vector.multi_reduction <add>, %141, %cst_44 [0] : vector<2x32xf32> to vector<32xf32>
    %143 = vector.shape_cast %142 : vector<32xf32> to vector<1x32xf32>
    %144 = tpu.concatenate %143, %89 in 1 : vector<1x32xf32>, vector<1x32xf32> -> vector<1x64xf32>
    %145 = arith.truncf %144 : vector<1x64xf32> to vector<1x64xbf16>
    %cst_45 = arith.constant dense<0.000000e+00> : vector<1x128xf32>
    %146 = tpu.matmul %145, %0, %cst_45 {dimension_numbers = #tpu.dot_dimension_numbers<[1], [0], [0], [1], [0, 0, 1, 1], [], []>} : vector<1x64xbf16>, vector<64x128xbf16>, vector<1x128xf32> -> vector<1x128xf32>
    %147 = arith.addf %146, %6 : vector<1x128xf32>
    %148 = vector.extract_strided_slice %147 {offsets = [0, 0], sizes = [1, 96], strides = [1, 1]} : vector<1x128xf32> to vector<1x96xf32>
    %cst_46 = arith.constant 0.000000e+00 : f32
    %149 = vector.broadcast %cst_46 : f32 to vector<1x96xf32>
    %150 = arith.subf %149, %148 : vector<1x96xf32>
    %151 = math.exp %150 : vector<1x96xf32>
    %cst_47 = arith.constant 1.000000e+00 : f32
    %152 = vector.broadcast %cst_47 : f32 to vector<1x96xf32>
    %153 = arith.addf %152, %151 : vector<1x96xf32>
    %154 = tpu.reciprocal %153 {approx = true} : vector<1x96xf32> -> vector<1x96xf32>
    %155 = vector.extract_strided_slice %154 {offsets = [0, 0], sizes = [1, 32], strides = [1, 1]} : vector<1x96xf32> to vector<1x32xf32>
    %156 = vector.extract_strided_slice %154 {offsets = [0, 32], sizes = [1, 32], strides = [1, 1]} : vector<1x96xf32> to vector<1x32xf32>
    %157 = vector.extract_strided_slice %154 {offsets = [0, 64], sizes = [1, 32], strides = [1, 1]} : vector<1x96xf32> to vector<1x32xf32>
    %158 = vector.extract_strided_slice %147 {offsets = [0, 96], sizes = [1, 32], strides = [1, 1]} : vector<1x128xf32> to vector<1x32xf32>
    %159 = math.tanh %158 : vector<1x32xf32>
    %160 = arith.mulf %156, %87 : vector<1x32xf32>
    %161 = arith.mulf %155, %159 : vector<1x32xf32>
    %162 = arith.addf %160, %161 : vector<1x32xf32>
    %163 = math.tanh %162 : vector<1x32xf32>
    %164 = arith.mulf %157, %163 : vector<1x32xf32>
    %c0_48 = arith.constant 0 : index
    %c0_49 = arith.constant 0 : index
    %165 = vector.load %arg7[%c0_48, %c0_49] : memref<5x32xf32, #tpu.memory_space<vmem>>, vector<2x32xf32>
    %166 = arith.truncf %164 : vector<1x32xf32> to vector<1x32xbf16>
    %cst_50 = arith.constant dense<0.000000e+00> : vector<1x32xf32>
    %167 = tpu.matmul %166, %3, %cst_50 {dimension_numbers = #tpu.dot_dimension_numbers<[1], [0], [0], [1], [0, 0, 1, 1], [], []>} : vector<1x32xbf16>, vector<32x32xbf16>, vector<1x32xf32> -> vector<1x32xf32>
    %168 = vector.broadcast %167 : vector<1x32xf32> to vector<2x32xf32>
    %169 = arith.addf %168, %165 : vector<2x32xf32>
    %170 = math.tanh %169 : vector<2x32xf32>
    %171 = vector.broadcast %8 : vector<1x32xf32> to vector<2x32xf32>
    %172 = arith.mulf %170, %171 : vector<2x32xf32>
    %cst_51 = arith.constant dense<0.000000e+00> : vector<2xf32>
    %173 = vector.multi_reduction <add>, %172, %cst_51 [1] : vector<2x32xf32> to vector<2xf32>
    %174 = vector.shape_cast %173 : vector<2xf32> to vector<2x1xf32>
    %175 = vector.extract_strided_slice %10 {offsets = [0, 1], sizes = [1, 1], strides = [1, 1]} : vector<1x24xf32> to vector<1x1xf32>
    %cst_52 = arith.constant dense<0xFF800000> : vector<1xf32>
    %176 = vector.multi_reduction <maximumf>, %174, %cst_52 [0] : vector<2x1xf32> to vector<1xf32>
    %177 = vector.shape_cast %176 : vector<1xf32> to vector<1x1xf32>
    %178 = vector.broadcast %177 : vector<1x1xf32> to vector<2x1xf32>
    %179 = arith.subf %174, %178 : vector<2x1xf32>
    %180 = math.exp %179 : vector<2x1xf32>
    %cst_53 = arith.constant dense<0.000000e+00> : vector<1xf32>
    %181 = vector.multi_reduction <add>, %180, %cst_53 [0] : vector<2x1xf32> to vector<1xf32>
    %182 = vector.shape_cast %181 : vector<1xf32> to vector<1x1xf32>
    %183 = tpu.reciprocal %182 {approx = true} : vector<1x1xf32> -> vector<1x1xf32>
    %184 = vector.broadcast %183 : vector<1x1xf32> to vector<2x1xf32>
    %185 = arith.mulf %180, %184 : vector<2x1xf32>
    %186 = math.log %182 : vector<1x1xf32>
    %187 = vector.broadcast %186 : vector<1x1xf32> to vector<2x1xf32>
    %188 = arith.subf %179, %187 : vector<2x1xf32>
    %189 = arith.mulf %185, %188 : vector<2x1xf32>
    %cst_54 = arith.constant dense<0.000000e+00> : vector<1xf32>
    %190 = vector.multi_reduction <add>, %189, %cst_54 [0] : vector<2x1xf32> to vector<1xf32>
    %191 = vector.shape_cast %190 : vector<1xf32> to vector<1x1xf32>
    %cst_55 = arith.constant 0.000000e+00 : f32
    %192 = vector.broadcast %cst_55 : f32 to vector<1x1xf32>
    %193 = arith.subf %192, %191 : vector<1x1xf32>
    %c0_i32_56 = arith.constant 0 : i32
    %194 = vector.broadcast %c0_i32_56 : i32 to vector<1x1xi32>
    %cst_57 = arith.constant 0.000000e+00 : f32
    %195 = vector.broadcast %cst_57 : f32 to vector<1x1xf32>
    %196 = vector.extract_strided_slice %185 {offsets = [0, 0], sizes = [1, 1], strides = [1, 1]} : vector<2x1xf32> to vector<1x1xf32>
    %197 = arith.addf %195, %196 : vector<1x1xf32>
    %198 = arith.cmpf ole, %197, %175 : vector<1x1xf32>
    %199 = arith.extui %198 : vector<1x1xi1> to vector<1x1xi32>
    %200 = arith.addi %194, %199 : vector<1x1xi32>
    %201 = tpu.iota {dimensions = array<i32: 0>} : vector<2x1xi32>
    %202 = vector.broadcast %200 : vector<1x1xi32> to vector<2x1xi32>
    %203 = arith.cmpi eq, %201, %202 : vector<2x1xi32>
    %204 = arith.extui %203 : vector<2x1xi1> to vector<2x1xi32>
    %205 = arith.sitofp %204 : vector<2x1xi32> to vector<2x1xf32>
    %206 = arith.mulf %205, %188 : vector<2x1xf32>
    %cst_58 = arith.constant dense<0.000000e+00> : vector<1xf32>
    %207 = vector.multi_reduction <add>, %206, %cst_58 [0] : vector<2x1xf32> to vector<1xf32>
    %208 = vector.shape_cast %207 : vector<1xf32> to vector<1x1xf32>
    %cst_59 = arith.constant 0.000000e+00 : f32
    %209 = vector.broadcast %cst_59 : f32 to vector<1x1xf32>
    %210 = arith.subf %209, %208 : vector<1x1xf32>
    %211 = arith.addf %136, %210 : vector<1x1xf32>
    %212 = arith.addf %137, %193 : vector<1x1xf32>
    %c0_60 = arith.constant 0 : index
    %c1_61 = arith.constant 1 : index
    %213 = vector.load %arg3[%c0_60, %c1_61] : memref<4x6xi32, #tpu.memory_space<vmem>>, vector<1x1xi32>
    tpu.vector_store %arg3[%c0_60, %c1_61], %200 {strides = array<i32>} : memref<4x6xi32, #tpu.memory_space<vmem>>, vector<1x1xi32>,
    %c0_62 = arith.constant 0 : index
    %c0_63 = arith.constant 0 : index
    %214 = vector.load %arg6[%c0_62, %c0_63] : memref<5x32xf32, #tpu.memory_space<vmem>>, vector<2x32xf32>
    %215 = vector.broadcast %205 : vector<2x1xf32> to vector<2x32xf32>
    %216 = arith.mulf %215, %214 : vector<2x32xf32>
    %cst_64 = arith.constant dense<0.000000e+00> : vector<32xf32>
    %217 = vector.multi_reduction <add>, %216, %cst_64 [0] : vector<2x32xf32> to vector<32xf32>
    %218 = vector.shape_cast %217 : vector<32xf32> to vector<1x32xf32>
    %219 = tpu.concatenate %218, %164 in 1 : vector<1x32xf32>, vector<1x32xf32> -> vector<1x64xf32>
    %220 = arith.truncf %219 : vector<1x64xf32> to vector<1x64xbf16>
    %cst_65 = arith.constant dense<0.000000e+00> : vector<1x128xf32>
    %221 = tpu.matmul %220, %0, %cst_65 {dimension_numbers = #tpu.dot_dimension_numbers<[1], [0], [0], [1], [0, 0, 1, 1], [], []>} : vector<1x64xbf16>, vector<64x128xbf16>, vector<1x128xf32> -> vector<1x128xf32>
    %222 = arith.addf %221, %6 : vector<1x128xf32>
    %223 = vector.extract_strided_slice %222 {offsets = [0, 0], sizes = [1, 96], strides = [1, 1]} : vector<1x128xf32> to vector<1x96xf32>
    %cst_66 = arith.constant 0.000000e+00 : f32
    %224 = vector.broadcast %cst_66 : f32 to vector<1x96xf32>
    %225 = arith.subf %224, %223 : vector<1x96xf32>
    %226 = math.exp %225 : vector<1x96xf32>
    %cst_67 = arith.constant 1.000000e+00 : f32
    %227 = vector.broadcast %cst_67 : f32 to vector<1x96xf32>
    %228 = arith.addf %227, %226 : vector<1x96xf32>
    %229 = tpu.reciprocal %228 {approx = true} : vector<1x96xf32> -> vector<1x96xf32>
    %230 = vector.extract_strided_slice %229 {offsets = [0, 0], sizes = [1, 32], strides = [1, 1]} : vector<1x96xf32> to vector<1x32xf32>
    %231 = vector.extract_strided_slice %229 {offsets = [0, 32], sizes = [1, 32], strides = [1, 1]} : vector<1x96xf32> to vector<1x32xf32>
    %232 = vector.extract_strided_slice %229 {offsets = [0, 64], sizes = [1, 32], strides = [1, 1]} : vector<1x96xf32> to vector<1x32xf32>
    %233 = vector.extract_strided_slice %222 {offsets = [0, 96], sizes = [1, 32], strides = [1, 1]} : vector<1x128xf32> to vector<1x32xf32>
    %234 = math.tanh %233 : vector<1x32xf32>
    %235 = arith.mulf %231, %162 : vector<1x32xf32>
    %236 = arith.mulf %230, %234 : vector<1x32xf32>
    %237 = arith.addf %235, %236 : vector<1x32xf32>
    %238 = math.tanh %237 : vector<1x32xf32>
    %239 = arith.mulf %232, %238 : vector<1x32xf32>
    %240 = arith.truncf %239 : vector<1x32xf32> to vector<1x32xbf16>
    %cst_68 = arith.constant dense<0.000000e+00> : vector<1x5xf32>
    %241 = tpu.matmul %240, %4, %cst_68 {dimension_numbers = #tpu.dot_dimension_numbers<[1], [0], [0], [1], [0, 0, 1, 1], [], []>} : vector<1x32xbf16>, vector<32x5xbf16>, vector<1x5xf32> -> vector<1x5xf32>
    %242 = arith.addf %241, %9 : vector<1x5xf32>
    %243 = vector.extract_strided_slice %10 {offsets = [0, 2], sizes = [1, 1], strides = [1, 1]} : vector<1x24xf32> to vector<1x1xf32>
    %cst_69 = arith.constant dense<0xFF800000> : vector<1xf32>
    %244 = vector.multi_reduction <maximumf>, %242, %cst_69 [1] : vector<1x5xf32> to vector<1xf32>
    %245 = vector.shape_cast %244 : vector<1xf32> to vector<1x1xf32>
    %246 = vector.broadcast %245 : vector<1x1xf32> to vector<1x5xf32>
    %247 = arith.subf %242, %246 : vector<1x5xf32>
    %248 = math.exp %247 : vector<1x5xf32>
    %cst_70 = arith.constant dense<0.000000e+00> : vector<1xf32>
    %249 = vector.multi_reduction <add>, %248, %cst_70 [1] : vector<1x5xf32> to vector<1xf32>
    %250 = vector.shape_cast %249 : vector<1xf32> to vector<1x1xf32>
    %251 = tpu.reciprocal %250 {approx = true} : vector<1x1xf32> -> vector<1x1xf32>
    %252 = vector.broadcast %251 : vector<1x1xf32> to vector<1x5xf32>
    %253 = arith.mulf %248, %252 : vector<1x5xf32>
    %254 = math.log %250 : vector<1x1xf32>
    %255 = vector.broadcast %254 : vector<1x1xf32> to vector<1x5xf32>
    %256 = arith.subf %247, %255 : vector<1x5xf32>
    %257 = arith.mulf %253, %256 : vector<1x5xf32>
    %cst_71 = arith.constant dense<0.000000e+00> : vector<1xf32>
    %258 = vector.multi_reduction <add>, %257, %cst_71 [1] : vector<1x5xf32> to vector<1xf32>
    %259 = vector.shape_cast %258 : vector<1xf32> to vector<1x1xf32>
    %cst_72 = arith.constant 0.000000e+00 : f32
    %260 = vector.broadcast %cst_72 : f32 to vector<1x1xf32>
    %261 = arith.subf %260, %259 : vector<1x1xf32>
    %c0_i32_73 = arith.constant 0 : i32
    %262 = vector.broadcast %c0_i32_73 : i32 to vector<1x1xi32>
    %cst_74 = arith.constant 0.000000e+00 : f32
    %263 = vector.broadcast %cst_74 : f32 to vector<1x1xf32>
    %264 = vector.extract_strided_slice %253 {offsets = [0, 0], sizes = [1, 1], strides = [1, 1]} : vector<1x5xf32> to vector<1x1xf32>
    %265 = arith.addf %263, %264 : vector<1x1xf32>
    %266 = arith.cmpf ole, %265, %243 : vector<1x1xf32>
    %267 = arith.extui %266 : vector<1x1xi1> to vector<1x1xi32>
    %268 = arith.addi %262, %267 : vector<1x1xi32>
    %269 = vector.extract_strided_slice %253 {offsets = [0, 1], sizes = [1, 1], strides = [1, 1]} : vector<1x5xf32> to vector<1x1xf32>
    %270 = arith.addf %265, %269 : vector<1x1xf32>
    %271 = arith.cmpf ole, %270, %243 : vector<1x1xf32>
    %272 = arith.extui %271 : vector<1x1xi1> to vector<1x1xi32>
    %273 = arith.addi %268, %272 : vector<1x1xi32>
    %274 = vector.extract_strided_slice %253 {offsets = [0, 2], sizes = [1, 1], strides = [1, 1]} : vector<1x5xf32> to vector<1x1xf32>
    %275 = arith.addf %270, %274 : vector<1x1xf32>
    %276 = arith.cmpf ole, %275, %243 : vector<1x1xf32>
    %277 = arith.extui %276 : vector<1x1xi1> to vector<1x1xi32>
    %278 = arith.addi %273, %277 : vector<1x1xi32>
    %279 = vector.extract_strided_slice %253 {offsets = [0, 3], sizes = [1, 1], strides = [1, 1]} : vector<1x5xf32> to vector<1x1xf32>
    %280 = arith.addf %275, %279 : vector<1x1xf32>
    %281 = arith.cmpf ole, %280, %243 : vector<1x1xf32>
    %282 = arith.extui %281 : vector<1x1xi1> to vector<1x1xi32>
    %283 = arith.addi %278, %282 : vector<1x1xi32>
    %284 = tpu.iota {dimensions = array<i32: 1>} : vector<1x5xi32>
    %285 = vector.broadcast %283 : vector<1x1xi32> to vector<1x5xi32>
    %286 = arith.cmpi eq, %284, %285 : vector<1x5xi32>
    %287 = arith.extui %286 : vector<1x5xi1> to vector<1x5xi32>
    %288 = arith.sitofp %287 : vector<1x5xi32> to vector<1x5xf32>
    %289 = arith.mulf %288, %256 : vector<1x5xf32>
    %cst_75 = arith.constant dense<0.000000e+00> : vector<1xf32>
    %290 = vector.multi_reduction <add>, %289, %cst_75 [1] : vector<1x5xf32> to vector<1xf32>
    %291 = vector.shape_cast %290 : vector<1xf32> to vector<1x1xf32>
    %cst_76 = arith.constant 0.000000e+00 : f32
    %292 = vector.broadcast %cst_76 : f32 to vector<1x1xf32>
    %293 = arith.subf %292, %291 : vector<1x1xf32>
    %294 = arith.addf %211, %293 : vector<1x1xf32>
    %295 = arith.addf %212, %261 : vector<1x1xf32>
    %c1_77 = arith.constant 1 : index
    %c0_78 = arith.constant 0 : index
    %296 = vector.load %arg3[%c1_77, %c0_78] : memref<4x6xi32, #tpu.memory_space<vmem>>, vector<1x1xi32>
    tpu.vector_store %arg3[%c1_77, %c0_78], %283 {strides = array<i32>} : memref<4x6xi32, #tpu.memory_space<vmem>>, vector<1x1xi32>,
    %c1_i32 = arith.constant 1 : i32
    %297 = vector.broadcast %c1_i32 : i32 to vector<1x1xi32>
    %298 = arith.addi %283, %297 : vector<1x1xi32>
    %299 = vector.broadcast %298 : vector<1x1xi32> to vector<1x6xi32>
    %300 = arith.cmpi eq, %13, %299 : vector<1x6xi32>
    %301 = arith.extui %300 : vector<1x6xi1> to vector<1x6xi32>
    %302 = arith.sitofp %301 : vector<1x6xi32> to vector<1x6xf32>
    %303 = arith.truncf %302 : vector<1x6xf32> to vector<1x6xbf16>
    %cst_79 = arith.constant dense<0.000000e+00> : vector<1x32xf32>
    %304 = tpu.matmul %303, %5, %cst_79 {dimension_numbers = #tpu.dot_dimension_numbers<[1], [0], [0], [1], [0, 0, 1, 1], [], []>} : vector<1x6xbf16>, vector<6x32xbf16>, vector<1x32xf32> -> vector<1x32xf32>
    %305 = tpu.concatenate %304, %239 in 1 : vector<1x32xf32>, vector<1x32xf32> -> vector<1x64xf32>
    %306 = arith.truncf %305 : vector<1x64xf32> to vector<1x64xbf16>
    %cst_80 = arith.constant dense<0.000000e+00> : vector<1x128xf32>
    %307 = tpu.matmul %306, %0, %cst_80 {dimension_numbers = #tpu.dot_dimension_numbers<[1], [0], [0], [1], [0, 0, 1, 1], [], []>} : vector<1x64xbf16>, vector<64x128xbf16>, vector<1x128xf32> -> vector<1x128xf32>
    %308 = arith.addf %307, %6 : vector<1x128xf32>
    %309 = vector.extract_strided_slice %308 {offsets = [0, 0], sizes = [1, 96], strides = [1, 1]} : vector<1x128xf32> to vector<1x96xf32>
    %cst_81 = arith.constant 0.000000e+00 : f32
    %310 = vector.broadcast %cst_81 : f32 to vector<1x96xf32>
    %311 = arith.subf %310, %309 : vector<1x96xf32>
    %312 = math.exp %311 : vector<1x96xf32>
    %cst_82 = arith.constant 1.000000e+00 : f32
    %313 = vector.broadcast %cst_82 : f32 to vector<1x96xf32>
    %314 = arith.addf %313, %312 : vector<1x96xf32>
    %315 = tpu.reciprocal %314 {approx = true} : vector<1x96xf32> -> vector<1x96xf32>
    %316 = vector.extract_strided_slice %315 {offsets = [0, 0], sizes = [1, 32], strides = [1, 1]} : vector<1x96xf32> to vector<1x32xf32>
    %317 = vector.extract_strided_slice %315 {offsets = [0, 32], sizes = [1, 32], strides = [1, 1]} : vector<1x96xf32> to vector<1x32xf32>
    %318 = vector.extract_strided_slice %315 {offsets = [0, 64], sizes = [1, 32], strides = [1, 1]} : vector<1x96xf32> to vector<1x32xf32>
    %319 = vector.extract_strided_slice %308 {offsets = [0, 96], sizes = [1, 32], strides = [1, 1]} : vector<1x128xf32> to vector<1x32xf32>
    %320 = math.tanh %319 : vector<1x32xf32>
    %321 = arith.mulf %317, %237 : vector<1x32xf32>
    %322 = arith.mulf %316, %320 : vector<1x32xf32>
    %323 = arith.addf %321, %322 : vector<1x32xf32>
    %324 = math.tanh %323 : vector<1x32xf32>
    %325 = arith.mulf %318, %324 : vector<1x32xf32>
    %326 = arith.truncf %325 : vector<1x32xf32> to vector<1x32xbf16>
    %cst_83 = arith.constant dense<0.000000e+00> : vector<1x5xf32>
    %327 = tpu.matmul %326, %4, %cst_83 {dimension_numbers = #tpu.dot_dimension_numbers<[1], [0], [0], [1], [0, 0, 1, 1], [], []>} : vector<1x32xbf16>, vector<32x5xbf16>, vector<1x5xf32> -> vector<1x5xf32>
    %328 = arith.addf %327, %9 : vector<1x5xf32>
    %329 = vector.extract_strided_slice %10 {offsets = [0, 3], sizes = [1, 1], strides = [1, 1]} : vector<1x24xf32> to vector<1x1xf32>
    %cst_84 = arith.constant dense<0xFF800000> : vector<1xf32>
    %330 = vector.multi_reduction <maximumf>, %328, %cst_84 [1] : vector<1x5xf32> to vector<1xf32>
    %331 = vector.shape_cast %330 : vector<1xf32> to vector<1x1xf32>
    %332 = vector.broadcast %331 : vector<1x1xf32> to vector<1x5xf32>
    %333 = arith.subf %328, %332 : vector<1x5xf32>
    %334 = math.exp %333 : vector<1x5xf32>
    %cst_85 = arith.constant dense<0.000000e+00> : vector<1xf32>
    %335 = vector.multi_reduction <add>, %334, %cst_85 [1] : vector<1x5xf32> to vector<1xf32>
    %336 = vector.shape_cast %335 : vector<1xf32> to vector<1x1xf32>
    %337 = tpu.reciprocal %336 {approx = true} : vector<1x1xf32> -> vector<1x1xf32>
    %338 = vector.broadcast %337 : vector<1x1xf32> to vector<1x5xf32>
    %339 = arith.mulf %334, %338 : vector<1x5xf32>
    %340 = math.log %336 : vector<1x1xf32>
    %341 = vector.broadcast %340 : vector<1x1xf32> to vector<1x5xf32>
    %342 = arith.subf %333, %341 : vector<1x5xf32>
    %343 = arith.mulf %339, %342 : vector<1x5xf32>
    %cst_86 = arith.constant dense<0.000000e+00> : vector<1xf32>
    %344 = vector.multi_reduction <add>, %343, %cst_86 [1] : vector<1x5xf32> to vector<1xf32>
    %345 = vector.shape_cast %344 : vector<1xf32> to vector<1x1xf32>
    %cst_87 = arith.constant 0.000000e+00 : f32
    %346 = vector.broadcast %cst_87 : f32 to vector<1x1xf32>
    %347 = arith.subf %346, %345 : vector<1x1xf32>
    %c0_i32_88 = arith.constant 0 : i32
    %348 = vector.broadcast %c0_i32_88 : i32 to vector<1x1xi32>
    %cst_89 = arith.constant 0.000000e+00 : f32
    %349 = vector.broadcast %cst_89 : f32 to vector<1x1xf32>
    %350 = vector.extract_strided_slice %339 {offsets = [0, 0], sizes = [1, 1], strides = [1, 1]} : vector<1x5xf32> to vector<1x1xf32>
    %351 = arith.addf %349, %350 : vector<1x1xf32>
    %352 = arith.cmpf ole, %351, %329 : vector<1x1xf32>
    %353 = arith.extui %352 : vector<1x1xi1> to vector<1x1xi32>
    %354 = arith.addi %348, %353 : vector<1x1xi32>
    %355 = vector.extract_strided_slice %339 {offsets = [0, 1], sizes = [1, 1], strides = [1, 1]} : vector<1x5xf32> to vector<1x1xf32>
    %356 = arith.addf %351, %355 : vector<1x1xf32>
    %357 = arith.cmpf ole, %356, %329 : vector<1x1xf32>
    %358 = arith.extui %357 : vector<1x1xi1> to vector<1x1xi32>
    %359 = arith.addi %354, %358 : vector<1x1xi32>
    %360 = vector.extract_strided_slice %339 {offsets = [0, 2], sizes = [1, 1], strides = [1, 1]} : vector<1x5xf32> to vector<1x1xf32>
    %361 = arith.addf %356, %360 : vector<1x1xf32>
    %362 = arith.cmpf ole, %361, %329 : vector<1x1xf32>
    %363 = arith.extui %362 : vector<1x1xi1> to vector<1x1xi32>
    %364 = arith.addi %359, %363 : vector<1x1xi32>
    %365 = vector.extract_strided_slice %339 {offsets = [0, 3], sizes = [1, 1], strides = [1, 1]} : vector<1x5xf32> to vector<1x1xf32>
    %366 = arith.addf %361, %365 : vector<1x1xf32>
    %367 = arith.cmpf ole, %366, %329 : vector<1x1xf32>
    %368 = arith.extui %367 : vector<1x1xi1> to vector<1x1xi32>
    %369 = arith.addi %364, %368 : vector<1x1xi32>
    %370 = tpu.iota {dimensions = array<i32: 1>} : vector<1x5xi32>
    %371 = vector.broadcast %369 : vector<1x1xi32> to vector<1x5xi32>
    %372 = arith.cmpi eq, %370, %371 : vector<1x5xi32>
    %373 = arith.extui %372 : vector<1x5xi1> to vector<1x5xi32>
    %374 = arith.sitofp %373 : vector<1x5xi32> to vector<1x5xf32>
    %375 = arith.mulf %374, %342 : vector<1x5xf32>
    %cst_90 = arith.constant dense<0.000000e+00> : vector<1xf32>
    %376 = vector.multi_reduction <add>, %375, %cst_90 [1] : vector<1x5xf32> to vector<1xf32>
    %377 = vector.shape_cast %376 : vector<1xf32> to vector<1x1xf32>
    %cst_91 = arith.constant 0.000000e+00 : f32
    %378 = vector.broadcast %cst_91 : f32 to vector<1x1xf32>
    %379 = arith.subf %378, %377 : vector<1x1xf32>
    %380 = arith.addf %294, %379 : vector<1x1xf32>
    %381 = arith.addf %295, %347 : vector<1x1xf32>
    %c1_92 = arith.constant 1 : index
    %c1_93 = arith.constant 1 : index
    %382 = vector.load %arg3[%c1_92, %c1_93] : memref<4x6xi32, #tpu.memory_space<vmem>>, vector<1x1xi32>
    tpu.vector_store %arg3[%c1_92, %c1_93], %369 {strides = array<i32>} : memref<4x6xi32, #tpu.memory_space<vmem>>, vector<1x1xi32>,
    %c1_i32_94 = arith.constant 1 : i32
    %383 = vector.broadcast %c1_i32_94 : i32 to vector<1x1xi32>
    %384 = arith.addi %369, %383 : vector<1x1xi32>
    %385 = vector.broadcast %384 : vector<1x1xi32> to vector<1x6xi32>
    %386 = arith.cmpi eq, %13, %385 : vector<1x6xi32>
    %387 = arith.extui %386 : vector<1x6xi1> to vector<1x6xi32>
    %388 = arith.sitofp %387 : vector<1x6xi32> to vector<1x6xf32>
    %389 = arith.truncf %388 : vector<1x6xf32> to vector<1x6xbf16>
    %cst_95 = arith.constant dense<0.000000e+00> : vector<1x32xf32>
    %390 = tpu.matmul %389, %5, %cst_95 {dimension_numbers = #tpu.dot_dimension_numbers<[1], [0], [0], [1], [0, 0, 1, 1], [], []>} : vector<1x6xbf16>, vector<6x32xbf16>, vector<1x32xf32> -> vector<1x32xf32>
    %391 = tpu.concatenate %390, %325 in 1 : vector<1x32xf32>, vector<1x32xf32> -> vector<1x64xf32>
    %392 = arith.truncf %391 : vector<1x64xf32> to vector<1x64xbf16>
    %cst_96 = arith.constant dense<0.000000e+00> : vector<1x128xf32>
    %393 = tpu.matmul %392, %0, %cst_96 {dimension_numbers = #tpu.dot_dimension_numbers<[1], [0], [0], [1], [0, 0, 1, 1], [], []>} : vector<1x64xbf16>, vector<64x128xbf16>, vector<1x128xf32> -> vector<1x128xf32>
    %394 = arith.addf %393, %6 : vector<1x128xf32>
    %395 = vector.extract_strided_slice %394 {offsets = [0, 0], sizes = [1, 96], strides = [1, 1]} : vector<1x128xf32> to vector<1x96xf32>
    %cst_97 = arith.constant 0.000000e+00 : f32
    %396 = vector.broadcast %cst_97 : f32 to vector<1x96xf32>
    %397 = arith.subf %396, %395 : vector<1x96xf32>
    %398 = math.exp %397 : vector<1x96xf32>
    %cst_98 = arith.constant 1.000000e+00 : f32
    %399 = vector.broadcast %cst_98 : f32 to vector<1x96xf32>
    %400 = arith.addf %399, %398 : vector<1x96xf32>
    %401 = tpu.reciprocal %400 {approx = true} : vector<1x96xf32> -> vector<1x96xf32>
    %402 = vector.extract_strided_slice %401 {offsets = [0, 0], sizes = [1, 32], strides = [1, 1]} : vector<1x96xf32> to vector<1x32xf32>
    %403 = vector.extract_strided_slice %401 {offsets = [0, 32], sizes = [1, 32], strides = [1, 1]} : vector<1x96xf32> to vector<1x32xf32>
    %404 = vector.extract_strided_slice %401 {offsets = [0, 64], sizes = [1, 32], strides = [1, 1]} : vector<1x96xf32> to vector<1x32xf32>
    %405 = vector.extract_strided_slice %394 {offsets = [0, 96], sizes = [1, 32], strides = [1, 1]} : vector<1x128xf32> to vector<1x32xf32>
    %406 = math.tanh %405 : vector<1x32xf32>
    %407 = arith.mulf %403, %323 : vector<1x32xf32>
    %408 = arith.mulf %402, %406 : vector<1x32xf32>
    %409 = arith.addf %407, %408 : vector<1x32xf32>
    %410 = math.tanh %409 : vector<1x32xf32>
    %411 = arith.mulf %404, %410 : vector<1x32xf32>
    %c2 = arith.constant 2 : index
    %c0_99 = arith.constant 0 : index
    %412 = vector.load %arg6[%c2, %c0_99] : memref<5x32xf32, #tpu.memory_space<vmem>>, vector<1x32xf32>
    tpu.vector_store %arg6[%c2, %c0_99], %411 {strides = array<i32>} : memref<5x32xf32, #tpu.memory_space<vmem>>, vector<1x32xf32>,
    %413 = arith.truncf %411 : vector<1x32xf32> to vector<1x32xbf16>
    %cst_100 = arith.constant dense<0.000000e+00> : vector<1x32xf32>
    %414 = tpu.matmul %413, %2, %cst_100 {dimension_numbers = #tpu.dot_dimension_numbers<[1], [0], [0], [1], [0, 0, 1, 1], [], []>} : vector<1x32xbf16>, vector<32x32xbf16>, vector<1x32xf32> -> vector<1x32xf32>
    %c2_101 = arith.constant 2 : index
    %c0_102 = arith.constant 0 : index
    %415 = vector.load %arg7[%c2_101, %c0_102] : memref<5x32xf32, #tpu.memory_space<vmem>>, vector<1x32xf32>
    tpu.vector_store %arg7[%c2_101, %c0_102], %414 {strides = array<i32>} : memref<5x32xf32, #tpu.memory_space<vmem>>, vector<1x32xf32>,
    %416 = tpu.concatenate %12, %411 in 1 : vector<1x32xf32>, vector<1x32xf32> -> vector<1x64xf32>
    %417 = arith.truncf %416 : vector<1x64xf32> to vector<1x64xbf16>
    %cst_103 = arith.constant dense<0.000000e+00> : vector<1x128xf32>
    %418 = tpu.matmul %417, %0, %cst_103 {dimension_numbers = #tpu.dot_dimension_numbers<[1], [0], [0], [1], [0, 0, 1, 1], [], []>} : vector<1x64xbf16>, vector<64x128xbf16>, vector<1x128xf32> -> vector<1x128xf32>
    %419 = arith.addf %418, %6 : vector<1x128xf32>
    %420 = vector.extract_strided_slice %419 {offsets = [0, 0], sizes = [1, 96], strides = [1, 1]} : vector<1x128xf32> to vector<1x96xf32>
    %cst_104 = arith.constant 0.000000e+00 : f32
    %421 = vector.broadcast %cst_104 : f32 to vector<1x96xf32>
    %422 = arith.subf %421, %420 : vector<1x96xf32>
    %423 = math.exp %422 : vector<1x96xf32>
    %cst_105 = arith.constant 1.000000e+00 : f32
    %424 = vector.broadcast %cst_105 : f32 to vector<1x96xf32>
    %425 = arith.addf %424, %423 : vector<1x96xf32>
    %426 = tpu.reciprocal %425 {approx = true} : vector<1x96xf32> -> vector<1x96xf32>
    %427 = vector.extract_strided_slice %426 {offsets = [0, 0], sizes = [1, 32], strides = [1, 1]} : vector<1x96xf32> to vector<1x32xf32>
    %428 = vector.extract_strided_slice %426 {offsets = [0, 32], sizes = [1, 32], strides = [1, 1]} : vector<1x96xf32> to vector<1x32xf32>
    %429 = vector.extract_strided_slice %426 {offsets = [0, 64], sizes = [1, 32], strides = [1, 1]} : vector<1x96xf32> to vector<1x32xf32>
    %430 = vector.extract_strided_slice %419 {offsets = [0, 96], sizes = [1, 32], strides = [1, 1]} : vector<1x128xf32> to vector<1x32xf32>
    %431 = math.tanh %430 : vector<1x32xf32>
    %432 = arith.mulf %428, %409 : vector<1x32xf32>
    %433 = arith.mulf %427, %431 : vector<1x32xf32>
    %434 = arith.addf %432, %433 : vector<1x32xf32>
    %435 = math.tanh %434 : vector<1x32xf32>
    %436 = arith.mulf %429, %435 : vector<1x32xf32>
    %c0_106 = arith.constant 0 : index
    %c0_107 = arith.constant 0 : index
    %437 = vector.load %arg7[%c0_106, %c0_107] : memref<5x32xf32, #tpu.memory_space<vmem>>, vector<3x32xf32>
    %438 = arith.truncf %436 : vector<1x32xf32> to vector<1x32xbf16>
    %cst_108 = arith.constant dense<0.000000e+00> : vector<1x32xf32>
    %439 = tpu.matmul %438, %3, %cst_108 {dimension_numbers = #tpu.dot_dimension_numbers<[1], [0], [0], [1], [0, 0, 1, 1], [], []>} : vector<1x32xbf16>, vector<32x32xbf16>, vector<1x32xf32> -> vector<1x32xf32>
    %440 = vector.broadcast %439 : vector<1x32xf32> to vector<3x32xf32>
    %441 = arith.addf %440, %437 : vector<3x32xf32>
    %442 = math.tanh %441 : vector<3x32xf32>
    %443 = vector.broadcast %8 : vector<1x32xf32> to vector<3x32xf32>
    %444 = arith.mulf %442, %443 : vector<3x32xf32>
    %cst_109 = arith.constant dense<0.000000e+00> : vector<3xf32>
    %445 = vector.multi_reduction <add>, %444, %cst_109 [1] : vector<3x32xf32> to vector<3xf32>
    %446 = vector.shape_cast %445 : vector<3xf32> to vector<3x1xf32>
    %447 = vector.extract_strided_slice %10 {offsets = [0, 4], sizes = [1, 1], strides = [1, 1]} : vector<1x24xf32> to vector<1x1xf32>
    %cst_110 = arith.constant dense<0xFF800000> : vector<1xf32>
    %448 = vector.multi_reduction <maximumf>, %446, %cst_110 [0] : vector<3x1xf32> to vector<1xf32>
    %449 = vector.shape_cast %448 : vector<1xf32> to vector<1x1xf32>
    %450 = vector.broadcast %449 : vector<1x1xf32> to vector<3x1xf32>
    %451 = arith.subf %446, %450 : vector<3x1xf32>
    %452 = math.exp %451 : vector<3x1xf32>
    %cst_111 = arith.constant dense<0.000000e+00> : vector<1xf32>
    %453 = vector.multi_reduction <add>, %452, %cst_111 [0] : vector<3x1xf32> to vector<1xf32>
    %454 = vector.shape_cast %453 : vector<1xf32> to vector<1x1xf32>
    %455 = tpu.reciprocal %454 {approx = true} : vector<1x1xf32> -> vector<1x1xf32>
    %456 = vector.broadcast %455 : vector<1x1xf32> to vector<3x1xf32>
    %457 = arith.mulf %452, %456 : vector<3x1xf32>
    %458 = math.log %454 : vector<1x1xf32>
    %459 = vector.broadcast %458 : vector<1x1xf32> to vector<3x1xf32>
    %460 = arith.subf %451, %459 : vector<3x1xf32>
    %461 = arith.mulf %457, %460 : vector<3x1xf32>
    %cst_112 = arith.constant dense<0.000000e+00> : vector<1xf32>
    %462 = vector.multi_reduction <add>, %461, %cst_112 [0] : vector<3x1xf32> to vector<1xf32>
    %463 = vector.shape_cast %462 : vector<1xf32> to vector<1x1xf32>
    %cst_113 = arith.constant 0.000000e+00 : f32
    %464 = vector.broadcast %cst_113 : f32 to vector<1x1xf32>
    %465 = arith.subf %464, %463 : vector<1x1xf32>
    %c0_i32_114 = arith.constant 0 : i32
    %466 = vector.broadcast %c0_i32_114 : i32 to vector<1x1xi32>
    %cst_115 = arith.constant 0.000000e+00 : f32
    %467 = vector.broadcast %cst_115 : f32 to vector<1x1xf32>
    %468 = vector.extract_strided_slice %457 {offsets = [0, 0], sizes = [1, 1], strides = [1, 1]} : vector<3x1xf32> to vector<1x1xf32>
    %469 = arith.addf %467, %468 : vector<1x1xf32>
    %470 = arith.cmpf ole, %469, %447 : vector<1x1xf32>
    %471 = arith.extui %470 : vector<1x1xi1> to vector<1x1xi32>
    %472 = arith.addi %466, %471 : vector<1x1xi32>
    %473 = vector.extract_strided_slice %457 {offsets = [1, 0], sizes = [1, 1], strides = [1, 1]} : vector<3x1xf32> to vector<1x1xf32>
    %474 = arith.addf %469, %473 : vector<1x1xf32>
    %475 = arith.cmpf ole, %474, %447 : vector<1x1xf32>
    %476 = arith.extui %475 : vector<1x1xi1> to vector<1x1xi32>
    %477 = arith.addi %472, %476 : vector<1x1xi32>
    %478 = tpu.iota {dimensions = array<i32: 0>} : vector<3x1xi32>
    %479 = vector.broadcast %477 : vector<1x1xi32> to vector<3x1xi32>
    %480 = arith.cmpi eq, %478, %479 : vector<3x1xi32>
    %481 = arith.extui %480 : vector<3x1xi1> to vector<3x1xi32>
    %482 = arith.sitofp %481 : vector<3x1xi32> to vector<3x1xf32>
    %483 = arith.mulf %482, %460 : vector<3x1xf32>
    %cst_116 = arith.constant dense<0.000000e+00> : vector<1xf32>
    %484 = vector.multi_reduction <add>, %483, %cst_116 [0] : vector<3x1xf32> to vector<1xf32>
    %485 = vector.shape_cast %484 : vector<1xf32> to vector<1x1xf32>
    %cst_117 = arith.constant 0.000000e+00 : f32
    %486 = vector.broadcast %cst_117 : f32 to vector<1x1xf32>
    %487 = arith.subf %486, %485 : vector<1x1xf32>
    %488 = arith.addf %380, %487 : vector<1x1xf32>
    %489 = arith.addf %381, %465 : vector<1x1xf32>
    %c0_118 = arith.constant 0 : index
    %c2_119 = arith.constant 2 : index
    %490 = vector.load %arg3[%c0_118, %c2_119] : memref<4x6xi32, #tpu.memory_space<vmem>>, vector<1x1xi32>
    tpu.vector_store %arg3[%c0_118, %c2_119], %477 {strides = array<i32>} : memref<4x6xi32, #tpu.memory_space<vmem>>, vector<1x1xi32>,
    %c0_120 = arith.constant 0 : index
    %c0_121 = arith.constant 0 : index
    %491 = vector.load %arg6[%c0_120, %c0_121] : memref<5x32xf32, #tpu.memory_space<vmem>>, vector<3x32xf32>
    %492 = vector.broadcast %482 : vector<3x1xf32> to vector<3x32xf32>
    %493 = arith.mulf %492, %491 : vector<3x32xf32>
    %cst_122 = arith.constant dense<0.000000e+00> : vector<32xf32>
    %494 = vector.multi_reduction <add>, %493, %cst_122 [0] : vector<3x32xf32> to vector<32xf32>
    %495 = vector.shape_cast %494 : vector<32xf32> to vector<1x32xf32>
    %496 = tpu.concatenate %495, %436 in 1 : vector<1x32xf32>, vector<1x32xf32> -> vector<1x64xf32>
    %497 = arith.truncf %496 : vector<1x64xf32> to vector<1x64xbf16>
    %cst_123 = arith.constant dense<0.000000e+00> : vector<1x128xf32>
    %498 = tpu.matmul %497, %0, %cst_123 {dimension_numbers = #tpu.dot_dimension_numbers<[1], [0], [0], [1], [0, 0, 1, 1], [], []>} : vector<1x64xbf16>, vector<64x128xbf16>, vector<1x128xf32> -> vector<1x128xf32>
    %499 = arith.addf %498, %6 : vector<1x128xf32>
    %500 = vector.extract_strided_slice %499 {offsets = [0, 0], sizes = [1, 96], strides = [1, 1]} : vector<1x128xf32> to vector<1x96xf32>
    %cst_124 = arith.constant 0.000000e+00 : f32
    %501 = vector.broadcast %cst_124 : f32 to vector<1x96xf32>
    %502 = arith.subf %501, %500 : vector<1x96xf32>
    %503 = math.exp %502 : vector<1x96xf32>
    %cst_125 = arith.constant 1.000000e+00 : f32
    %504 = vector.broadcast %cst_125 : f32 to vector<1x96xf32>
    %505 = arith.addf %504, %503 : vector<1x96xf32>
    %506 = tpu.reciprocal %505 {approx = true} : vector<1x96xf32> -> vector<1x96xf32>
    %507 = vector.extract_strided_slice %506 {offsets = [0, 0], sizes = [1, 32], strides = [1, 1]} : vector<1x96xf32> to vector<1x32xf32>
    %508 = vector.extract_strided_slice %506 {offsets = [0, 32], sizes = [1, 32], strides = [1, 1]} : vector<1x96xf32> to vector<1x32xf32>
    %509 = vector.extract_strided_slice %506 {offsets = [0, 64], sizes = [1, 32], strides = [1, 1]} : vector<1x96xf32> to vector<1x32xf32>
    %510 = vector.extract_strided_slice %499 {offsets = [0, 96], sizes = [1, 32], strides = [1, 1]} : vector<1x128xf32> to vector<1x32xf32>
    %511 = math.tanh %510 : vector<1x32xf32>
    %512 = arith.mulf %508, %434 : vector<1x32xf32>
    %513 = arith.mulf %507, %511 : vector<1x32xf32>
    %514 = arith.addf %512, %513 : vector<1x32xf32>
    %515 = math.tanh %514 : vector<1x32xf32>
    %516 = arith.mulf %509, %515 : vector<1x32xf32>
    %c0_126 = arith.constant 0 : index
    %c0_127 = arith.constant 0 : index
    %517 = vector.load %arg7[%c0_126, %c0_127] : memref<5x32xf32, #tpu.memory_space<vmem>>, vector<3x32xf32>
    %518 = arith.truncf %516 : vector<1x32xf32> to vector<1x32xbf16>
    %cst_128 = arith.constant dense<0.000000e+00> : vector<1x32xf32>
    %519 = tpu.matmul %518, %3, %cst_128 {dimension_numbers = #tpu.dot_dimension_numbers<[1], [0], [0], [1], [0, 0, 1, 1], [], []>} : vector<1x32xbf16>, vector<32x32xbf16>, vector<1x32xf32> -> vector<1x32xf32>
    %520 = vector.broadcast %519 : vector<1x32xf32> to vector<3x32xf32>
    %521 = arith.addf %520, %517 : vector<3x32xf32>
    %522 = math.tanh %521 : vector<3x32xf32>
    %523 = vector.broadcast %8 : vector<1x32xf32> to vector<3x32xf32>
    %524 = arith.mulf %522, %523 : vector<3x32xf32>
    %cst_129 = arith.constant dense<0.000000e+00> : vector<3xf32>
    %525 = vector.multi_reduction <add>, %524, %cst_129 [1] : vector<3x32xf32> to vector<3xf32>
    %526 = vector.shape_cast %525 : vector<3xf32> to vector<3x1xf32>
    %527 = vector.extract_strided_slice %10 {offsets = [0, 5], sizes = [1, 1], strides = [1, 1]} : vector<1x24xf32> to vector<1x1xf32>
    %cst_130 = arith.constant dense<0xFF800000> : vector<1xf32>
    %528 = vector.multi_reduction <maximumf>, %526, %cst_130 [0] : vector<3x1xf32> to vector<1xf32>
    %529 = vector.shape_cast %528 : vector<1xf32> to vector<1x1xf32>
    %530 = vector.broadcast %529 : vector<1x1xf32> to vector<3x1xf32>
    %531 = arith.subf %526, %530 : vector<3x1xf32>
    %532 = math.exp %531 : vector<3x1xf32>
    %cst_131 = arith.constant dense<0.000000e+00> : vector<1xf32>
    %533 = vector.multi_reduction <add>, %532, %cst_131 [0] : vector<3x1xf32> to vector<1xf32>
    %534 = vector.shape_cast %533 : vector<1xf32> to vector<1x1xf32>
    %535 = tpu.reciprocal %534 {approx = true} : vector<1x1xf32> -> vector<1x1xf32>
    %536 = vector.broadcast %535 : vector<1x1xf32> to vector<3x1xf32>
    %537 = arith.mulf %532, %536 : vector<3x1xf32>
    %538 = math.log %534 : vector<1x1xf32>
    %539 = vector.broadcast %538 : vector<1x1xf32> to vector<3x1xf32>
    %540 = arith.subf %531, %539 : vector<3x1xf32>
    %541 = arith.mulf %537, %540 : vector<3x1xf32>
    %cst_132 = arith.constant dense<0.000000e+00> : vector<1xf32>
    %542 = vector.multi_reduction <add>, %541, %cst_132 [0] : vector<3x1xf32> to vector<1xf32>
    %543 = vector.shape_cast %542 : vector<1xf32> to vector<1x1xf32>
    %cst_133 = arith.constant 0.000000e+00 : f32
    %544 = vector.broadcast %cst_133 : f32 to vector<1x1xf32>
    %545 = arith.subf %544, %543 : vector<1x1xf32>
    %c0_i32_134 = arith.constant 0 : i32
    %546 = vector.broadcast %c0_i32_134 : i32 to vector<1x1xi32>
    %cst_135 = arith.constant 0.000000e+00 : f32
    %547 = vector.broadcast %cst_135 : f32 to vector<1x1xf32>
    %548 = vector.extract_strided_slice %537 {offsets = [0, 0], sizes = [1, 1], strides = [1, 1]} : vector<3x1xf32> to vector<1x1xf32>
    %549 = arith.addf %547, %548 : vector<1x1xf32>
    %550 = arith.cmpf ole, %549, %527 : vector<1x1xf32>
    %551 = arith.extui %550 : vector<1x1xi1> to vector<1x1xi32>
    %552 = arith.addi %546, %551 : vector<1x1xi32>
    %553 = vector.extract_strided_slice %537 {offsets = [1, 0], sizes = [1, 1], strides = [1, 1]} : vector<3x1xf32> to vector<1x1xf32>
    %554 = arith.addf %549, %553 : vector<1x1xf32>
    %555 = arith.cmpf ole, %554, %527 : vector<1x1xf32>
    %556 = arith.extui %555 : vector<1x1xi1> to vector<1x1xi32>
    %557 = arith.addi %552, %556 : vector<1x1xi32>
    %558 = tpu.iota {dimensions = array<i32: 0>} : vector<3x1xi32>
    %559 = vector.broadcast %557 : vector<1x1xi32> to vector<3x1xi32>
    %560 = arith.cmpi eq, %558, %559 : vector<3x1xi32>
    %561 = arith.extui %560 : vector<3x1xi1> to vector<3x1xi32>
    %562 = arith.sitofp %561 : vector<3x1xi32> to vector<3x1xf32>
    %563 = arith.mulf %562, %540 : vector<3x1xf32>
    %cst_136 = arith.constant dense<0.000000e+00> : vector<1xf32>
    %564 = vector.multi_reduction <add>, %563, %cst_136 [0] : vector<3x1xf32> to vector<1xf32>
    %565 = vector.shape_cast %564 : vector<1xf32> to vector<1x1xf32>
    %cst_137 = arith.constant 0.000000e+00 : f32
    %566 = vector.broadcast %cst_137 : f32 to vector<1x1xf32>
    %567 = arith.subf %566, %565 : vector<1x1xf32>
    %568 = arith.addf %488, %567 : vector<1x1xf32>
    %569 = arith.addf %489, %545 : vector<1x1xf32>
    %c0_138 = arith.constant 0 : index
    %c3 = arith.constant 3 : index
    %570 = vector.load %arg3[%c0_138, %c3] : memref<4x6xi32, #tpu.memory_space<vmem>>, vector<1x1xi32>
    tpu.vector_store %arg3[%c0_138, %c3], %557 {strides = array<i32>} : memref<4x6xi32, #tpu.memory_space<vmem>>, vector<1x1xi32>,
    %c0_139 = arith.constant 0 : index
    %c0_140 = arith.constant 0 : index
    %571 = vector.load %arg6[%c0_139, %c0_140] : memref<5x32xf32, #tpu.memory_space<vmem>>, vector<3x32xf32>
    %572 = vector.broadcast %562 : vector<3x1xf32> to vector<3x32xf32>
    %573 = arith.mulf %572, %571 : vector<3x32xf32>
    %cst_141 = arith.constant dense<0.000000e+00> : vector<32xf32>
    %574 = vector.multi_reduction <add>, %573, %cst_141 [0] : vector<3x32xf32> to vector<32xf32>
    %575 = vector.shape_cast %574 : vector<32xf32> to vector<1x32xf32>
    %576 = tpu.concatenate %575, %516 in 1 : vector<1x32xf32>, vector<1x32xf32> -> vector<1x64xf32>
    %577 = arith.truncf %576 : vector<1x64xf32> to vector<1x64xbf16>
    %cst_142 = arith.constant dense<0.000000e+00> : vector<1x128xf32>
    %578 = tpu.matmul %577, %0, %cst_142 {dimension_numbers = #tpu.dot_dimension_numbers<[1], [0], [0], [1], [0, 0, 1, 1], [], []>} : vector<1x64xbf16>, vector<64x128xbf16>, vector<1x128xf32> -> vector<1x128xf32>
    %579 = arith.addf %578, %6 : vector<1x128xf32>
    %580 = vector.extract_strided_slice %579 {offsets = [0, 0], sizes = [1, 96], strides = [1, 1]} : vector<1x128xf32> to vector<1x96xf32>
    %cst_143 = arith.constant 0.000000e+00 : f32
    %581 = vector.broadcast %cst_143 : f32 to vector<1x96xf32>
    %582 = arith.subf %581, %580 : vector<1x96xf32>
    %583 = math.exp %582 : vector<1x96xf32>
    %cst_144 = arith.constant 1.000000e+00 : f32
    %584 = vector.broadcast %cst_144 : f32 to vector<1x96xf32>
    %585 = arith.addf %584, %583 : vector<1x96xf32>
    %586 = tpu.reciprocal %585 {approx = true} : vector<1x96xf32> -> vector<1x96xf32>
    %587 = vector.extract_strided_slice %586 {offsets = [0, 0], sizes = [1, 32], strides = [1, 1]} : vector<1x96xf32> to vector<1x32xf32>
    %588 = vector.extract_strided_slice %586 {offsets = [0, 32], sizes = [1, 32], strides = [1, 1]} : vector<1x96xf32> to vector<1x32xf32>
    %589 = vector.extract_strided_slice %586 {offsets = [0, 64], sizes = [1, 32], strides = [1, 1]} : vector<1x96xf32> to vector<1x32xf32>
    %590 = vector.extract_strided_slice %579 {offsets = [0, 96], sizes = [1, 32], strides = [1, 1]} : vector<1x128xf32> to vector<1x32xf32>
    %591 = math.tanh %590 : vector<1x32xf32>
    %592 = arith.mulf %588, %514 : vector<1x32xf32>
    %593 = arith.mulf %587, %591 : vector<1x32xf32>
    %594 = arith.addf %592, %593 : vector<1x32xf32>
    %595 = math.tanh %594 : vector<1x32xf32>
    %596 = arith.mulf %589, %595 : vector<1x32xf32>
    %597 = arith.truncf %596 : vector<1x32xf32> to vector<1x32xbf16>
    %cst_145 = arith.constant dense<0.000000e+00> : vector<1x5xf32>
    %598 = tpu.matmul %597, %4, %cst_145 {dimension_numbers = #tpu.dot_dimension_numbers<[1], [0], [0], [1], [0, 0, 1, 1], [], []>} : vector<1x32xbf16>, vector<32x5xbf16>, vector<1x5xf32> -> vector<1x5xf32>
    %599 = arith.addf %598, %9 : vector<1x5xf32>
    %600 = vector.extract_strided_slice %10 {offsets = [0, 6], sizes = [1, 1], strides = [1, 1]} : vector<1x24xf32> to vector<1x1xf32>
    %cst_146 = arith.constant dense<0xFF800000> : vector<1xf32>
    %601 = vector.multi_reduction <maximumf>, %599, %cst_146 [1] : vector<1x5xf32> to vector<1xf32>
    %602 = vector.shape_cast %601 : vector<1xf32> to vector<1x1xf32>
    %603 = vector.broadcast %602 : vector<1x1xf32> to vector<1x5xf32>
    %604 = arith.subf %599, %603 : vector<1x5xf32>
    %605 = math.exp %604 : vector<1x5xf32>
    %cst_147 = arith.constant dense<0.000000e+00> : vector<1xf32>
    %606 = vector.multi_reduction <add>, %605, %cst_147 [1] : vector<1x5xf32> to vector<1xf32>
    %607 = vector.shape_cast %606 : vector<1xf32> to vector<1x1xf32>
    %608 = tpu.reciprocal %607 {approx = true} : vector<1x1xf32> -> vector<1x1xf32>
    %609 = vector.broadcast %608 : vector<1x1xf32> to vector<1x5xf32>
    %610 = arith.mulf %605, %609 : vector<1x5xf32>
    %611 = math.log %607 : vector<1x1xf32>
    %612 = vector.broadcast %611 : vector<1x1xf32> to vector<1x5xf32>
    %613 = arith.subf %604, %612 : vector<1x5xf32>
    %614 = arith.mulf %610, %613 : vector<1x5xf32>
    %cst_148 = arith.constant dense<0.000000e+00> : vector<1xf32>
    %615 = vector.multi_reduction <add>, %614, %cst_148 [1] : vector<1x5xf32> to vector<1xf32>
    %616 = vector.shape_cast %615 : vector<1xf32> to vector<1x1xf32>
    %cst_149 = arith.constant 0.000000e+00 : f32
    %617 = vector.broadcast %cst_149 : f32 to vector<1x1xf32>
    %618 = arith.subf %617, %616 : vector<1x1xf32>
    %c0_i32_150 = arith.constant 0 : i32
    %619 = vector.broadcast %c0_i32_150 : i32 to vector<1x1xi32>
    %cst_151 = arith.constant 0.000000e+00 : f32
    %620 = vector.broadcast %cst_151 : f32 to vector<1x1xf32>
    %621 = vector.extract_strided_slice %610 {offsets = [0, 0], sizes = [1, 1], strides = [1, 1]} : vector<1x5xf32> to vector<1x1xf32>
    %622 = arith.addf %620, %621 : vector<1x1xf32>
    %623 = arith.cmpf ole, %622, %600 : vector<1x1xf32>
    %624 = arith.extui %623 : vector<1x1xi1> to vector<1x1xi32>
    %625 = arith.addi %619, %624 : vector<1x1xi32>
    %626 = vector.extract_strided_slice %610 {offsets = [0, 1], sizes = [1, 1], strides = [1, 1]} : vector<1x5xf32> to vector<1x1xf32>
    %627 = arith.addf %622, %626 : vector<1x1xf32>
    %628 = arith.cmpf ole, %627, %600 : vector<1x1xf32>
    %629 = arith.extui %628 : vector<1x1xi1> to vector<1x1xi32>
    %630 = arith.addi %625, %629 : vector<1x1xi32>
    %631 = vector.extract_strided_slice %610 {offsets = [0, 2], sizes = [1, 1], strides = [1, 1]} : vector<1x5xf32> to vector<1x1xf32>
    %632 = arith.addf %627, %631 : vector<1x1xf32>
    %633 = arith.cmpf ole, %632, %600 : vector<1x1xf32>
    %634 = arith.extui %633 : vector<1x1xi1> to vector<1x1xi32>
    %635 = arith.addi %630, %634 : vector<1x1xi32>
    %636 = vector.extract_strided_slice %610 {offsets = [0, 3], sizes = [1, 1], strides = [1, 1]} : vector<1x5xf32> to vector<1x1xf32>
    %637 = arith.addf %632, %636 : vector<1x1xf32>
    %638 = arith.cmpf ole, %637, %600 : vector<1x1xf32>
    %639 = arith.extui %638 : vector<1x1xi1> to vector<1x1xi32>
    %640 = arith.addi %635, %639 : vector<1x1xi32>
    %641 = tpu.iota {dimensions = array<i32: 1>} : vector<1x5xi32>
    %642 = vector.broadcast %640 : vector<1x1xi32> to vector<1x5xi32>
    %643 = arith.cmpi eq, %641, %642 : vector<1x5xi32>
    %644 = arith.extui %643 : vector<1x5xi1> to vector<1x5xi32>
    %645 = arith.sitofp %644 : vector<1x5xi32> to vector<1x5xf32>
    %646 = arith.mulf %645, %613 : vector<1x5xf32>
    %cst_152 = arith.constant dense<0.000000e+00> : vector<1xf32>
    %647 = vector.multi_reduction <add>, %646, %cst_152 [1] : vector<1x5xf32> to vector<1xf32>
    %648 = vector.shape_cast %647 : vector<1xf32> to vector<1x1xf32>
    %cst_153 = arith.constant 0.000000e+00 : f32
    %649 = vector.broadcast %cst_153 : f32 to vector<1x1xf32>
    %650 = arith.subf %649, %648 : vector<1x1xf32>
    %651 = arith.addf %568, %650 : vector<1x1xf32>
    %652 = arith.addf %569, %618 : vector<1x1xf32>
    %c1_154 = arith.constant 1 : index
    %c2_155 = arith.constant 2 : index
    %653 = vector.load %arg3[%c1_154, %c2_155] : memref<4x6xi32, #tpu.memory_space<vmem>>, vector<1x1xi32>
    tpu.vector_store %arg3[%c1_154, %c2_155], %640 {strides = array<i32>} : memref<4x6xi32, #tpu.memory_space<vmem>>, vector<1x1xi32>,
    %c1_i32_156 = arith.constant 1 : i32
    %654 = vector.broadcast %c1_i32_156 : i32 to vector<1x1xi32>
    %655 = arith.addi %640, %654 : vector<1x1xi32>
    %656 = vector.broadcast %655 : vector<1x1xi32> to vector<1x6xi32>
    %657 = arith.cmpi eq, %13, %656 : vector<1x6xi32>
    %658 = arith.extui %657 : vector<1x6xi1> to vector<1x6xi32>
    %659 = arith.sitofp %658 : vector<1x6xi32> to vector<1x6xf32>
    %660 = arith.truncf %659 : vector<1x6xf32> to vector<1x6xbf16>
    %cst_157 = arith.constant dense<0.000000e+00> : vector<1x32xf32>
    %661 = tpu.matmul %660, %5, %cst_157 {dimension_numbers = #tpu.dot_dimension_numbers<[1], [0], [0], [1], [0, 0, 1, 1], [], []>} : vector<1x6xbf16>, vector<6x32xbf16>, vector<1x32xf32> -> vector<1x32xf32>
    %662 = tpu.concatenate %661, %596 in 1 : vector<1x32xf32>, vector<1x32xf32> -> vector<1x64xf32>
    %663 = arith.truncf %662 : vector<1x64xf32> to vector<1x64xbf16>
    %cst_158 = arith.constant dense<0.000000e+00> : vector<1x128xf32>
    %664 = tpu.matmul %663, %0, %cst_158 {dimension_numbers = #tpu.dot_dimension_numbers<[1], [0], [0], [1], [0, 0, 1, 1], [], []>} : vector<1x64xbf16>, vector<64x128xbf16>, vector<1x128xf32> -> vector<1x128xf32>
    %665 = arith.addf %664, %6 : vector<1x128xf32>
    %666 = vector.extract_strided_slice %665 {offsets = [0, 0], sizes = [1, 96], strides = [1, 1]} : vector<1x128xf32> to vector<1x96xf32>
    %cst_159 = arith.constant 0.000000e+00 : f32
    %667 = vector.broadcast %cst_159 : f32 to vector<1x96xf32>
    %668 = arith.subf %667, %666 : vector<1x96xf32>
    %669 = math.exp %668 : vector<1x96xf32>
    %cst_160 = arith.constant 1.000000e+00 : f32
    %670 = vector.broadcast %cst_160 : f32 to vector<1x96xf32>
    %671 = arith.addf %670, %669 : vector<1x96xf32>
    %672 = tpu.reciprocal %671 {approx = true} : vector<1x96xf32> -> vector<1x96xf32>
    %673 = vector.extract_strided_slice %672 {offsets = [0, 0], sizes = [1, 32], strides = [1, 1]} : vector<1x96xf32> to vector<1x32xf32>
    %674 = vector.extract_strided_slice %672 {offsets = [0, 32], sizes = [1, 32], strides = [1, 1]} : vector<1x96xf32> to vector<1x32xf32>
    %675 = vector.extract_strided_slice %672 {offsets = [0, 64], sizes = [1, 32], strides = [1, 1]} : vector<1x96xf32> to vector<1x32xf32>
    %676 = vector.extract_strided_slice %665 {offsets = [0, 96], sizes = [1, 32], strides = [1, 1]} : vector<1x128xf32> to vector<1x32xf32>
    %677 = math.tanh %676 : vector<1x32xf32>
    %678 = arith.mulf %674, %594 : vector<1x32xf32>
    %679 = arith.mulf %673, %677 : vector<1x32xf32>
    %680 = arith.addf %678, %679 : vector<1x32xf32>
    %681 = math.tanh %680 : vector<1x32xf32>
    %682 = arith.mulf %675, %681 : vector<1x32xf32>
    %683 = arith.truncf %682 : vector<1x32xf32> to vector<1x32xbf16>
    %cst_161 = arith.constant dense<0.000000e+00> : vector<1x5xf32>
    %684 = tpu.matmul %683, %4, %cst_161 {dimension_numbers = #tpu.dot_dimension_numbers<[1], [0], [0], [1], [0, 0, 1, 1], [], []>} : vector<1x32xbf16>, vector<32x5xbf16>, vector<1x5xf32> -> vector<1x5xf32>
    %685 = arith.addf %684, %9 : vector<1x5xf32>
    %686 = vector.extract_strided_slice %10 {offsets = [0, 7], sizes = [1, 1], strides = [1, 1]} : vector<1x24xf32> to vector<1x1xf32>
    %cst_162 = arith.constant dense<0xFF800000> : vector<1xf32>
    %687 = vector.multi_reduction <maximumf>, %685, %cst_162 [1] : vector<1x5xf32> to vector<1xf32>
    %688 = vector.shape_cast %687 : vector<1xf32> to vector<1x1xf32>
    %689 = vector.broadcast %688 : vector<1x1xf32> to vector<1x5xf32>
    %690 = arith.subf %685, %689 : vector<1x5xf32>
    %691 = math.exp %690 : vector<1x5xf32>
    %cst_163 = arith.constant dense<0.000000e+00> : vector<1xf32>
    %692 = vector.multi_reduction <add>, %691, %cst_163 [1] : vector<1x5xf32> to vector<1xf32>
    %693 = vector.shape_cast %692 : vector<1xf32> to vector<1x1xf32>
    %694 = tpu.reciprocal %693 {approx = true} : vector<1x1xf32> -> vector<1x1xf32>
    %695 = vector.broadcast %694 : vector<1x1xf32> to vector<1x5xf32>
    %696 = arith.mulf %691, %695 : vector<1x5xf32>
    %697 = math.log %693 : vector<1x1xf32>
    %698 = vector.broadcast %697 : vector<1x1xf32> to vector<1x5xf32>
    %699 = arith.subf %690, %698 : vector<1x5xf32>
    %700 = arith.mulf %696, %699 : vector<1x5xf32>
    %cst_164 = arith.constant dense<0.000000e+00> : vector<1xf32>
    %701 = vector.multi_reduction <add>, %700, %cst_164 [1] : vector<1x5xf32> to vector<1xf32>
    %702 = vector.shape_cast %701 : vector<1xf32> to vector<1x1xf32>
    %cst_165 = arith.constant 0.000000e+00 : f32
    %703 = vector.broadcast %cst_165 : f32 to vector<1x1xf32>
    %704 = arith.subf %703, %702 : vector<1x1xf32>
    %c0_i32_166 = arith.constant 0 : i32
    %705 = vector.broadcast %c0_i32_166 : i32 to vector<1x1xi32>
    %cst_167 = arith.constant 0.000000e+00 : f32
    %706 = vector.broadcast %cst_167 : f32 to vector<1x1xf32>
    %707 = vector.extract_strided_slice %696 {offsets = [0, 0], sizes = [1, 1], strides = [1, 1]} : vector<1x5xf32> to vector<1x1xf32>
    %708 = arith.addf %706, %707 : vector<1x1xf32>
    %709 = arith.cmpf ole, %708, %686 : vector<1x1xf32>
    %710 = arith.extui %709 : vector<1x1xi1> to vector<1x1xi32>
    %711 = arith.addi %705, %710 : vector<1x1xi32>
    %712 = vector.extract_strided_slice %696 {offsets = [0, 1], sizes = [1, 1], strides = [1, 1]} : vector<1x5xf32> to vector<1x1xf32>
    %713 = arith.addf %708, %712 : vector<1x1xf32>
    %714 = arith.cmpf ole, %713, %686 : vector<1x1xf32>
    %715 = arith.extui %714 : vector<1x1xi1> to vector<1x1xi32>
    %716 = arith.addi %711, %715 : vector<1x1xi32>
    %717 = vector.extract_strided_slice %696 {offsets = [0, 2], sizes = [1, 1], strides = [1, 1]} : vector<1x5xf32> to vector<1x1xf32>
    %718 = arith.addf %713, %717 : vector<1x1xf32>
    %719 = arith.cmpf ole, %718, %686 : vector<1x1xf32>
    %720 = arith.extui %719 : vector<1x1xi1> to vector<1x1xi32>
    %721 = arith.addi %716, %720 : vector<1x1xi32>
    %722 = vector.extract_strided_slice %696 {offsets = [0, 3], sizes = [1, 1], strides = [1, 1]} : vector<1x5xf32> to vector<1x1xf32>
    %723 = arith.addf %718, %722 : vector<1x1xf32>
    %724 = arith.cmpf ole, %723, %686 : vector<1x1xf32>
    %725 = arith.extui %724 : vector<1x1xi1> to vector<1x1xi32>
    %726 = arith.addi %721, %725 : vector<1x1xi32>
    %727 = tpu.iota {dimensions = array<i32: 1>} : vector<1x5xi32>
    %728 = vector.broadcast %726 : vector<1x1xi32> to vector<1x5xi32>
    %729 = arith.cmpi eq, %727, %728 : vector<1x5xi32>
    %730 = arith.extui %729 : vector<1x5xi1> to vector<1x5xi32>
    %731 = arith.sitofp %730 : vector<1x5xi32> to vector<1x5xf32>
    %732 = arith.mulf %731, %699 : vector<1x5xf32>
    %cst_168 = arith.constant dense<0.000000e+00> : vector<1xf32>
    %733 = vector.multi_reduction <add>, %732, %cst_168 [1] : vector<1x5xf32> to vector<1xf32>
    %734 = vector.shape_cast %733 : vector<1xf32> to vector<1x1xf32>
    %cst_169 = arith.constant 0.000000e+00 : f32
    %735 = vector.broadcast %cst_169 : f32 to vector<1x1xf32>
    %736 = arith.subf %735, %734 : vector<1x1xf32>
    %737 = arith.addf %651, %736 : vector<1x1xf32>
    %738 = arith.addf %652, %704 : vector<1x1xf32>
    %c1_170 = arith.constant 1 : index
    %c3_171 = arith.constant 3 : index
    %739 = vector.load %arg3[%c1_170, %c3_171] : memref<4x6xi32, #tpu.memory_space<vmem>>, vector<1x1xi32>
    tpu.vector_store %arg3[%c1_170, %c3_171], %726 {strides = array<i32>} : memref<4x6xi32, #tpu.memory_space<vmem>>, vector<1x1xi32>,
    %c1_i32_172 = arith.constant 1 : i32
    %740 = vector.broadcast %c1_i32_172 : i32 to vector<1x1xi32>
    %741 = arith.addi %726, %740 : vector<1x1xi32>
    %742 = vector.broadcast %741 : vector<1x1xi32> to vector<1x6xi32>
    %743 = arith.cmpi eq, %13, %742 : vector<1x6xi32>
    %744 = arith.extui %743 : vector<1x6xi1> to vector<1x6xi32>
    %745 = arith.sitofp %744 : vector<1x6xi32> to vector<1x6xf32>
    %746 = arith.truncf %745 : vector<1x6xf32> to vector<1x6xbf16>
    %cst_173 = arith.constant dense<0.000000e+00> : vector<1x32xf32>
    %747 = tpu.matmul %746, %5, %cst_173 {dimension_numbers = #tpu.dot_dimension_numbers<[1], [0], [0], [1], [0, 0, 1, 1], [], []>} : vector<1x6xbf16>, vector<6x32xbf16>, vector<1x32xf32> -> vector<1x32xf32>
    %748 = tpu.concatenate %747, %682 in 1 : vector<1x32xf32>, vector<1x32xf32> -> vector<1x64xf32>
    %749 = arith.truncf %748 : vector<1x64xf32> to vector<1x64xbf16>
    %cst_174 = arith.constant dense<0.000000e+00> : vector<1x128xf32>
    %750 = tpu.matmul %749, %0, %cst_174 {dimension_numbers = #tpu.dot_dimension_numbers<[1], [0], [0], [1], [0, 0, 1, 1], [], []>} : vector<1x64xbf16>, vector<64x128xbf16>, vector<1x128xf32> -> vector<1x128xf32>
    %751 = arith.addf %750, %6 : vector<1x128xf32>
    %752 = vector.extract_strided_slice %751 {offsets = [0, 0], sizes = [1, 96], strides = [1, 1]} : vector<1x128xf32> to vector<1x96xf32>
    %cst_175 = arith.constant 0.000000e+00 : f32
    %753 = vector.broadcast %cst_175 : f32 to vector<1x96xf32>
    %754 = arith.subf %753, %752 : vector<1x96xf32>
    %755 = math.exp %754 : vector<1x96xf32>
    %cst_176 = arith.constant 1.000000e+00 : f32
    %756 = vector.broadcast %cst_176 : f32 to vector<1x96xf32>
    %757 = arith.addf %756, %755 : vector<1x96xf32>
    %758 = tpu.reciprocal %757 {approx = true} : vector<1x96xf32> -> vector<1x96xf32>
    %759 = vector.extract_strided_slice %758 {offsets = [0, 0], sizes = [1, 32], strides = [1, 1]} : vector<1x96xf32> to vector<1x32xf32>
    %760 = vector.extract_strided_slice %758 {offsets = [0, 32], sizes = [1, 32], strides = [1, 1]} : vector<1x96xf32> to vector<1x32xf32>
    %761 = vector.extract_strided_slice %758 {offsets = [0, 64], sizes = [1, 32], strides = [1, 1]} : vector<1x96xf32> to vector<1x32xf32>
    %762 = vector.extract_strided_slice %751 {offsets = [0, 96], sizes = [1, 32], strides = [1, 1]} : vector<1x128xf32> to vector<1x32xf32>
    %763 = math.tanh %762 : vector<1x32xf32>
    %764 = arith.mulf %760, %680 : vector<1x32xf32>
    %765 = arith.mulf %759, %763 : vector<1x32xf32>
    %766 = arith.addf %764, %765 : vector<1x32xf32>
    %767 = math.tanh %766 : vector<1x32xf32>
    %768 = arith.mulf %761, %767 : vector<1x32xf32>
    %c3_177 = arith.constant 3 : index
    %c0_178 = arith.constant 0 : index
    %769 = vector.load %arg6[%c3_177, %c0_178] : memref<5x32xf32, #tpu.memory_space<vmem>>, vector<1x32xf32>
    tpu.vector_store %arg6[%c3_177, %c0_178], %768 {strides = array<i32>} : memref<5x32xf32, #tpu.memory_space<vmem>>, vector<1x32xf32>,
    %770 = arith.truncf %768 : vector<1x32xf32> to vector<1x32xbf16>
    %cst_179 = arith.constant dense<0.000000e+00> : vector<1x32xf32>
    %771 = tpu.matmul %770, %2, %cst_179 {dimension_numbers = #tpu.dot_dimension_numbers<[1], [0], [0], [1], [0, 0, 1, 1], [], []>} : vector<1x32xbf16>, vector<32x32xbf16>, vector<1x32xf32> -> vector<1x32xf32>
    %c3_180 = arith.constant 3 : index
    %c0_181 = arith.constant 0 : index
    %772 = vector.load %arg7[%c3_180, %c0_181] : memref<5x32xf32, #tpu.memory_space<vmem>>, vector<1x32xf32>
    tpu.vector_store %arg7[%c3_180, %c0_181], %771 {strides = array<i32>} : memref<5x32xf32, #tpu.memory_space<vmem>>, vector<1x32xf32>,
    %773 = tpu.concatenate %12, %768 in 1 : vector<1x32xf32>, vector<1x32xf32> -> vector<1x64xf32>
    %774 = arith.truncf %773 : vector<1x64xf32> to vector<1x64xbf16>
    %cst_182 = arith.constant dense<0.000000e+00> : vector<1x128xf32>
    %775 = tpu.matmul %774, %0, %cst_182 {dimension_numbers = #tpu.dot_dimension_numbers<[1], [0], [0], [1], [0, 0, 1, 1], [], []>} : vector<1x64xbf16>, vector<64x128xbf16>, vector<1x128xf32> -> vector<1x128xf32>
    %776 = arith.addf %775, %6 : vector<1x128xf32>
    %777 = vector.extract_strided_slice %776 {offsets = [0, 0], sizes = [1, 96], strides = [1, 1]} : vector<1x128xf32> to vector<1x96xf32>
    %cst_183 = arith.constant 0.000000e+00 : f32
    %778 = vector.broadcast %cst_183 : f32 to vector<1x96xf32>
    %779 = arith.subf %778, %777 : vector<1x96xf32>
    %780 = math.exp %779 : vector<1x96xf32>
    %cst_184 = arith.constant 1.000000e+00 : f32
    %781 = vector.broadcast %cst_184 : f32 to vector<1x96xf32>
    %782 = arith.addf %781, %780 : vector<1x96xf32>
    %783 = tpu.reciprocal %782 {approx = true} : vector<1x96xf32> -> vector<1x96xf32>
    %784 = vector.extract_strided_slice %783 {offsets = [0, 0], sizes = [1, 32], strides = [1, 1]} : vector<1x96xf32> to vector<1x32xf32>
    %785 = vector.extract_strided_slice %783 {offsets = [0, 32], sizes = [1, 32], strides = [1, 1]} : vector<1x96xf32> to vector<1x32xf32>
    %786 = vector.extract_strided_slice %783 {offsets = [0, 64], sizes = [1, 32], strides = [1, 1]} : vector<1x96xf32> to vector<1x32xf32>
    %787 = vector.extract_strided_slice %776 {offsets = [0, 96], sizes = [1, 32], strides = [1, 1]} : vector<1x128xf32> to vector<1x32xf32>
    %788 = math.tanh %787 : vector<1x32xf32>
    %789 = arith.mulf %785, %766 : vector<1x32xf32>
    %790 = arith.mulf %784, %788 : vector<1x32xf32>
    %791 = arith.addf %789, %790 : vector<1x32xf32>
    %792 = math.tanh %791 : vector<1x32xf32>
    %793 = arith.mulf %786, %792 : vector<1x32xf32>
    %c0_185 = arith.constant 0 : index
    %c0_186 = arith.constant 0 : index
    %794 = vector.load %arg7[%c0_185, %c0_186] : memref<5x32xf32, #tpu.memory_space<vmem>>, vector<4x32xf32>
    %795 = arith.truncf %793 : vector<1x32xf32> to vector<1x32xbf16>
    %cst_187 = arith.constant dense<0.000000e+00> : vector<1x32xf32>
    %796 = tpu.matmul %795, %3, %cst_187 {dimension_numbers = #tpu.dot_dimension_numbers<[1], [0], [0], [1], [0, 0, 1, 1], [], []>} : vector<1x32xbf16>, vector<32x32xbf16>, vector<1x32xf32> -> vector<1x32xf32>
    %797 = vector.broadcast %796 : vector<1x32xf32> to vector<4x32xf32>
    %798 = arith.addf %797, %794 : vector<4x32xf32>
    %799 = math.tanh %798 : vector<4x32xf32>
    %800 = vector.broadcast %8 : vector<1x32xf32> to vector<4x32xf32>
    %801 = arith.mulf %799, %800 : vector<4x32xf32>
    %cst_188 = arith.constant dense<0.000000e+00> : vector<4xf32>
    %802 = vector.multi_reduction <add>, %801, %cst_188 [1] : vector<4x32xf32> to vector<4xf32>
    %803 = vector.shape_cast %802 : vector<4xf32> to vector<4x1xf32>
    %804 = vector.extract_strided_slice %10 {offsets = [0, 8], sizes = [1, 1], strides = [1, 1]} : vector<1x24xf32> to vector<1x1xf32>
    %cst_189 = arith.constant dense<0xFF800000> : vector<1xf32>
    %805 = vector.multi_reduction <maximumf>, %803, %cst_189 [0] : vector<4x1xf32> to vector<1xf32>
    %806 = vector.shape_cast %805 : vector<1xf32> to vector<1x1xf32>
    %807 = vector.broadcast %806 : vector<1x1xf32> to vector<4x1xf32>
    %808 = arith.subf %803, %807 : vector<4x1xf32>
    %809 = math.exp %808 : vector<4x1xf32>
    %cst_190 = arith.constant dense<0.000000e+00> : vector<1xf32>
    %810 = vector.multi_reduction <add>, %809, %cst_190 [0] : vector<4x1xf32> to vector<1xf32>
    %811 = vector.shape_cast %810 : vector<1xf32> to vector<1x1xf32>
    %812 = tpu.reciprocal %811 {approx = true} : vector<1x1xf32> -> vector<1x1xf32>
    %813 = vector.broadcast %812 : vector<1x1xf32> to vector<4x1xf32>
    %814 = arith.mulf %809, %813 : vector<4x1xf32>
    %815 = math.log %811 : vector<1x1xf32>
    %816 = vector.broadcast %815 : vector<1x1xf32> to vector<4x1xf32>
    %817 = arith.subf %808, %816 : vector<4x1xf32>
    %818 = arith.mulf %814, %817 : vector<4x1xf32>
    %cst_191 = arith.constant dense<0.000000e+00> : vector<1xf32>
    %819 = vector.multi_reduction <add>, %818, %cst_191 [0] : vector<4x1xf32> to vector<1xf32>
    %820 = vector.shape_cast %819 : vector<1xf32> to vector<1x1xf32>
    %cst_192 = arith.constant 0.000000e+00 : f32
    %821 = vector.broadcast %cst_192 : f32 to vector<1x1xf32>
    %822 = arith.subf %821, %820 : vector<1x1xf32>
    %c0_i32_193 = arith.constant 0 : i32
    %823 = vector.broadcast %c0_i32_193 : i32 to vector<1x1xi32>
    %cst_194 = arith.constant 0.000000e+00 : f32
    %824 = vector.broadcast %cst_194 : f32 to vector<1x1xf32>
    %825 = vector.extract_strided_slice %814 {offsets = [0, 0], sizes = [1, 1], strides = [1, 1]} : vector<4x1xf32> to vector<1x1xf32>
    %826 = arith.addf %824, %825 : vector<1x1xf32>
    %827 = arith.cmpf ole, %826, %804 : vector<1x1xf32>
    %828 = arith.extui %827 : vector<1x1xi1> to vector<1x1xi32>
    %829 = arith.addi %823, %828 : vector<1x1xi32>
    %830 = vector.extract_strided_slice %814 {offsets = [1, 0], sizes = [1, 1], strides = [1, 1]} : vector<4x1xf32> to vector<1x1xf32>
    %831 = arith.addf %826, %830 : vector<1x1xf32>
    %832 = arith.cmpf ole, %831, %804 : vector<1x1xf32>
    %833 = arith.extui %832 : vector<1x1xi1> to vector<1x1xi32>
    %834 = arith.addi %829, %833 : vector<1x1xi32>
    %835 = vector.extract_strided_slice %814 {offsets = [2, 0], sizes = [1, 1], strides = [1, 1]} : vector<4x1xf32> to vector<1x1xf32>
    %836 = arith.addf %831, %835 : vector<1x1xf32>
    %837 = arith.cmpf ole, %836, %804 : vector<1x1xf32>
    %838 = arith.extui %837 : vector<1x1xi1> to vector<1x1xi32>
    %839 = arith.addi %834, %838 : vector<1x1xi32>
    %840 = tpu.iota {dimensions = array<i32: 0>} : vector<4x1xi32>
    %841 = vector.broadcast %839 : vector<1x1xi32> to vector<4x1xi32>
    %842 = arith.cmpi eq, %840, %841 : vector<4x1xi32>
    %843 = arith.extui %842 : vector<4x1xi1> to vector<4x1xi32>
    %844 = arith.sitofp %843 : vector<4x1xi32> to vector<4x1xf32>
    %845 = arith.mulf %844, %817 : vector<4x1xf32>
    %cst_195 = arith.constant dense<0.000000e+00> : vector<1xf32>
    %846 = vector.multi_reduction <add>, %845, %cst_195 [0] : vector<4x1xf32> to vector<1xf32>
    %847 = vector.shape_cast %846 : vector<1xf32> to vector<1x1xf32>
    %cst_196 = arith.constant 0.000000e+00 : f32
    %848 = vector.broadcast %cst_196 : f32 to vector<1x1xf32>
    %849 = arith.subf %848, %847 : vector<1x1xf32>
    %850 = arith.addf %737, %849 : vector<1x1xf32>
    %851 = arith.addf %738, %822 : vector<1x1xf32>
    %c0_197 = arith.constant 0 : index
    %c4 = arith.constant 4 : index
    %852 = vector.load %arg3[%c0_197, %c4] : memref<4x6xi32, #tpu.memory_space<vmem>>, vector<1x1xi32>
    tpu.vector_store %arg3[%c0_197, %c4], %839 {strides = array<i32>} : memref<4x6xi32, #tpu.memory_space<vmem>>, vector<1x1xi32>,
    %c0_198 = arith.constant 0 : index
    %c0_199 = arith.constant 0 : index
    %853 = vector.load %arg6[%c0_198, %c0_199] : memref<5x32xf32, #tpu.memory_space<vmem>>, vector<4x32xf32>
    %854 = vector.broadcast %844 : vector<4x1xf32> to vector<4x32xf32>
    %855 = arith.mulf %854, %853 : vector<4x32xf32>
    %cst_200 = arith.constant dense<0.000000e+00> : vector<32xf32>
    %856 = vector.multi_reduction <add>, %855, %cst_200 [0] : vector<4x32xf32> to vector<32xf32>
    %857 = vector.shape_cast %856 : vector<32xf32> to vector<1x32xf32>
    %858 = tpu.concatenate %857, %793 in 1 : vector<1x32xf32>, vector<1x32xf32> -> vector<1x64xf32>
    %859 = arith.truncf %858 : vector<1x64xf32> to vector<1x64xbf16>
    %cst_201 = arith.constant dense<0.000000e+00> : vector<1x128xf32>
    %860 = tpu.matmul %859, %0, %cst_201 {dimension_numbers = #tpu.dot_dimension_numbers<[1], [0], [0], [1], [0, 0, 1, 1], [], []>} : vector<1x64xbf16>, vector<64x128xbf16>, vector<1x128xf32> -> vector<1x128xf32>
    %861 = arith.addf %860, %6 : vector<1x128xf32>
    %862 = vector.extract_strided_slice %861 {offsets = [0, 0], sizes = [1, 96], strides = [1, 1]} : vector<1x128xf32> to vector<1x96xf32>
    %cst_202 = arith.constant 0.000000e+00 : f32
    %863 = vector.broadcast %cst_202 : f32 to vector<1x96xf32>
    %864 = arith.subf %863, %862 : vector<1x96xf32>
    %865 = math.exp %864 : vector<1x96xf32>
    %cst_203 = arith.constant 1.000000e+00 : f32
    %866 = vector.broadcast %cst_203 : f32 to vector<1x96xf32>
    %867 = arith.addf %866, %865 : vector<1x96xf32>
    %868 = tpu.reciprocal %867 {approx = true} : vector<1x96xf32> -> vector<1x96xf32>
    %869 = vector.extract_strided_slice %868 {offsets = [0, 0], sizes = [1, 32], strides = [1, 1]} : vector<1x96xf32> to vector<1x32xf32>
    %870 = vector.extract_strided_slice %868 {offsets = [0, 32], sizes = [1, 32], strides = [1, 1]} : vector<1x96xf32> to vector<1x32xf32>
    %871 = vector.extract_strided_slice %868 {offsets = [0, 64], sizes = [1, 32], strides = [1, 1]} : vector<1x96xf32> to vector<1x32xf32>
    %872 = vector.extract_strided_slice %861 {offsets = [0, 96], sizes = [1, 32], strides = [1, 1]} : vector<1x128xf32> to vector<1x32xf32>
    %873 = math.tanh %872 : vector<1x32xf32>
    %874 = arith.mulf %870, %791 : vector<1x32xf32>
    %875 = arith.mulf %869, %873 : vector<1x32xf32>
    %876 = arith.addf %874, %875 : vector<1x32xf32>
    %877 = math.tanh %876 : vector<1x32xf32>
    %878 = arith.mulf %871, %877 : vector<1x32xf32>
    %c0_204 = arith.constant 0 : index
    %c0_205 = arith.constant 0 : index
    %879 = vector.load %arg7[%c0_204, %c0_205] : memref<5x32xf32, #tpu.memory_space<vmem>>, vector<4x32xf32>
    %880 = arith.truncf %878 : vector<1x32xf32> to vector<1x32xbf16>
    %cst_206 = arith.constant dense<0.000000e+00> : vector<1x32xf32>
    %881 = tpu.matmul %880, %3, %cst_206 {dimension_numbers = #tpu.dot_dimension_numbers<[1], [0], [0], [1], [0, 0, 1, 1], [], []>} : vector<1x32xbf16>, vector<32x32xbf16>, vector<1x32xf32> -> vector<1x32xf32>
    %882 = vector.broadcast %881 : vector<1x32xf32> to vector<4x32xf32>
    %883 = arith.addf %882, %879 : vector<4x32xf32>
    %884 = math.tanh %883 : vector<4x32xf32>
    %885 = vector.broadcast %8 : vector<1x32xf32> to vector<4x32xf32>
    %886 = arith.mulf %884, %885 : vector<4x32xf32>
    %cst_207 = arith.constant dense<0.000000e+00> : vector<4xf32>
    %887 = vector.multi_reduction <add>, %886, %cst_207 [1] : vector<4x32xf32> to vector<4xf32>
    %888 = vector.shape_cast %887 : vector<4xf32> to vector<4x1xf32>
    %889 = vector.extract_strided_slice %10 {offsets = [0, 9], sizes = [1, 1], strides = [1, 1]} : vector<1x24xf32> to vector<1x1xf32>
    %cst_208 = arith.constant dense<0xFF800000> : vector<1xf32>
    %890 = vector.multi_reduction <maximumf>, %888, %cst_208 [0] : vector<4x1xf32> to vector<1xf32>
    %891 = vector.shape_cast %890 : vector<1xf32> to vector<1x1xf32>
    %892 = vector.broadcast %891 : vector<1x1xf32> to vector<4x1xf32>
    %893 = arith.subf %888, %892 : vector<4x1xf32>
    %894 = math.exp %893 : vector<4x1xf32>
    %cst_209 = arith.constant dense<0.000000e+00> : vector<1xf32>
    %895 = vector.multi_reduction <add>, %894, %cst_209 [0] : vector<4x1xf32> to vector<1xf32>
    %896 = vector.shape_cast %895 : vector<1xf32> to vector<1x1xf32>
    %897 = tpu.reciprocal %896 {approx = true} : vector<1x1xf32> -> vector<1x1xf32>
    %898 = vector.broadcast %897 : vector<1x1xf32> to vector<4x1xf32>
    %899 = arith.mulf %894, %898 : vector<4x1xf32>
    %900 = math.log %896 : vector<1x1xf32>
    %901 = vector.broadcast %900 : vector<1x1xf32> to vector<4x1xf32>
    %902 = arith.subf %893, %901 : vector<4x1xf32>
    %903 = arith.mulf %899, %902 : vector<4x1xf32>
    %cst_210 = arith.constant dense<0.000000e+00> : vector<1xf32>
    %904 = vector.multi_reduction <add>, %903, %cst_210 [0] : vector<4x1xf32> to vector<1xf32>
    %905 = vector.shape_cast %904 : vector<1xf32> to vector<1x1xf32>
    %cst_211 = arith.constant 0.000000e+00 : f32
    %906 = vector.broadcast %cst_211 : f32 to vector<1x1xf32>
    %907 = arith.subf %906, %905 : vector<1x1xf32>
    %c0_i32_212 = arith.constant 0 : i32
    %908 = vector.broadcast %c0_i32_212 : i32 to vector<1x1xi32>
    %cst_213 = arith.constant 0.000000e+00 : f32
    %909 = vector.broadcast %cst_213 : f32 to vector<1x1xf32>
    %910 = vector.extract_strided_slice %899 {offsets = [0, 0], sizes = [1, 1], strides = [1, 1]} : vector<4x1xf32> to vector<1x1xf32>
    %911 = arith.addf %909, %910 : vector<1x1xf32>
    %912 = arith.cmpf ole, %911, %889 : vector<1x1xf32>
    %913 = arith.extui %912 : vector<1x1xi1> to vector<1x1xi32>
    %914 = arith.addi %908, %913 : vector<1x1xi32>
    %915 = vector.extract_strided_slice %899 {offsets = [1, 0], sizes = [1, 1], strides = [1, 1]} : vector<4x1xf32> to vector<1x1xf32>
    %916 = arith.addf %911, %915 : vector<1x1xf32>
    %917 = arith.cmpf ole, %916, %889 : vector<1x1xf32>
    %918 = arith.extui %917 : vector<1x1xi1> to vector<1x1xi32>
    %919 = arith.addi %914, %918 : vector<1x1xi32>
    %920 = vector.extract_strided_slice %899 {offsets = [2, 0], sizes = [1, 1], strides = [1, 1]} : vector<4x1xf32> to vector<1x1xf32>
    %921 = arith.addf %916, %920 : vector<1x1xf32>
    %922 = arith.cmpf ole, %921, %889 : vector<1x1xf32>
    %923 = arith.extui %922 : vector<1x1xi1> to vector<1x1xi32>
    %924 = arith.addi %919, %923 : vector<1x1xi32>
    %925 = tpu.iota {dimensions = array<i32: 0>} : vector<4x1xi32>
    %926 = vector.broadcast %924 : vector<1x1xi32> to vector<4x1xi32>
    %927 = arith.cmpi eq, %925, %926 : vector<4x1xi32>
    %928 = arith.extui %927 : vector<4x1xi1> to vector<4x1xi32>
    %929 = arith.sitofp %928 : vector<4x1xi32> to vector<4x1xf32>
    %930 = arith.mulf %929, %902 : vector<4x1xf32>
    %cst_214 = arith.constant dense<0.000000e+00> : vector<1xf32>
    %931 = vector.multi_reduction <add>, %930, %cst_214 [0] : vector<4x1xf32> to vector<1xf32>
    %932 = vector.shape_cast %931 : vector<1xf32> to vector<1x1xf32>
    %cst_215 = arith.constant 0.000000e+00 : f32
    %933 = vector.broadcast %cst_215 : f32 to vector<1x1xf32>
    %934 = arith.subf %933, %932 : vector<1x1xf32>
    %935 = arith.addf %850, %934 : vector<1x1xf32>
    %936 = arith.addf %851, %907 : vector<1x1xf32>
    %c0_216 = arith.constant 0 : index
    %c5 = arith.constant 5 : index
    %937 = vector.load %arg3[%c0_216, %c5] : memref<4x6xi32, #tpu.memory_space<vmem>>, vector<1x1xi32>
    tpu.vector_store %arg3[%c0_216, %c5], %924 {strides = array<i32>} : memref<4x6xi32, #tpu.memory_space<vmem>>, vector<1x1xi32>,
    %c0_217 = arith.constant 0 : index
    %c0_218 = arith.constant 0 : index
    %938 = vector.load %arg6[%c0_217, %c0_218] : memref<5x32xf32, #tpu.memory_space<vmem>>, vector<4x32xf32>
    %939 = vector.broadcast %929 : vector<4x1xf32> to vector<4x32xf32>
    %940 = arith.mulf %939, %938 : vector<4x32xf32>
    %cst_219 = arith.constant dense<0.000000e+00> : vector<32xf32>
    %941 = vector.multi_reduction <add>, %940, %cst_219 [0] : vector<4x32xf32> to vector<32xf32>
    %942 = vector.shape_cast %941 : vector<32xf32> to vector<1x32xf32>
    %943 = tpu.concatenate %942, %878 in 1 : vector<1x32xf32>, vector<1x32xf32> -> vector<1x64xf32>
    %944 = arith.truncf %943 : vector<1x64xf32> to vector<1x64xbf16>
    %cst_220 = arith.constant dense<0.000000e+00> : vector<1x128xf32>
    %945 = tpu.matmul %944, %0, %cst_220 {dimension_numbers = #tpu.dot_dimension_numbers<[1], [0], [0], [1], [0, 0, 1, 1], [], []>} : vector<1x64xbf16>, vector<64x128xbf16>, vector<1x128xf32> -> vector<1x128xf32>
    %946 = arith.addf %945, %6 : vector<1x128xf32>
    %947 = vector.extract_strided_slice %946 {offsets = [0, 0], sizes = [1, 96], strides = [1, 1]} : vector<1x128xf32> to vector<1x96xf32>
    %cst_221 = arith.constant 0.000000e+00 : f32
    %948 = vector.broadcast %cst_221 : f32 to vector<1x96xf32>
    %949 = arith.subf %948, %947 : vector<1x96xf32>
    %950 = math.exp %949 : vector<1x96xf32>
    %cst_222 = arith.constant 1.000000e+00 : f32
    %951 = vector.broadcast %cst_222 : f32 to vector<1x96xf32>
    %952 = arith.addf %951, %950 : vector<1x96xf32>
    %953 = tpu.reciprocal %952 {approx = true} : vector<1x96xf32> -> vector<1x96xf32>
    %954 = vector.extract_strided_slice %953 {offsets = [0, 0], sizes = [1, 32], strides = [1, 1]} : vector<1x96xf32> to vector<1x32xf32>
    %955 = vector.extract_strided_slice %953 {offsets = [0, 32], sizes = [1, 32], strides = [1, 1]} : vector<1x96xf32> to vector<1x32xf32>
    %956 = vector.extract_strided_slice %953 {offsets = [0, 64], sizes = [1, 32], strides = [1, 1]} : vector<1x96xf32> to vector<1x32xf32>
    %957 = vector.extract_strided_slice %946 {offsets = [0, 96], sizes = [1, 32], strides = [1, 1]} : vector<1x128xf32> to vector<1x32xf32>
    %958 = math.tanh %957 : vector<1x32xf32>
    %959 = arith.mulf %955, %876 : vector<1x32xf32>
    %960 = arith.mulf %954, %958 : vector<1x32xf32>
    %961 = arith.addf %959, %960 : vector<1x32xf32>
    %962 = math.tanh %961 : vector<1x32xf32>
    %963 = arith.mulf %956, %962 : vector<1x32xf32>
    %964 = arith.truncf %963 : vector<1x32xf32> to vector<1x32xbf16>
    %cst_223 = arith.constant dense<0.000000e+00> : vector<1x5xf32>
    %965 = tpu.matmul %964, %4, %cst_223 {dimension_numbers = #tpu.dot_dimension_numbers<[1], [0], [0], [1], [0, 0, 1, 1], [], []>} : vector<1x32xbf16>, vector<32x5xbf16>, vector<1x5xf32> -> vector<1x5xf32>
    %966 = arith.addf %965, %9 : vector<1x5xf32>
    %967 = vector.extract_strided_slice %10 {offsets = [0, 10], sizes = [1, 1], strides = [1, 1]} : vector<1x24xf32> to vector<1x1xf32>
    %cst_224 = arith.constant dense<0xFF800000> : vector<1xf32>
    %968 = vector.multi_reduction <maximumf>, %966, %cst_224 [1] : vector<1x5xf32> to vector<1xf32>
    %969 = vector.shape_cast %968 : vector<1xf32> to vector<1x1xf32>
    %970 = vector.broadcast %969 : vector<1x1xf32> to vector<1x5xf32>
    %971 = arith.subf %966, %970 : vector<1x5xf32>
    %972 = math.exp %971 : vector<1x5xf32>
    %cst_225 = arith.constant dense<0.000000e+00> : vector<1xf32>
    %973 = vector.multi_reduction <add>, %972, %cst_225 [1] : vector<1x5xf32> to vector<1xf32>
    %974 = vector.shape_cast %973 : vector<1xf32> to vector<1x1xf32>
    %975 = tpu.reciprocal %974 {approx = true} : vector<1x1xf32> -> vector<1x1xf32>
    %976 = vector.broadcast %975 : vector<1x1xf32> to vector<1x5xf32>
    %977 = arith.mulf %972, %976 : vector<1x5xf32>
    %978 = math.log %974 : vector<1x1xf32>
    %979 = vector.broadcast %978 : vector<1x1xf32> to vector<1x5xf32>
    %980 = arith.subf %971, %979 : vector<1x5xf32>
    %981 = arith.mulf %977, %980 : vector<1x5xf32>
    %cst_226 = arith.constant dense<0.000000e+00> : vector<1xf32>
    %982 = vector.multi_reduction <add>, %981, %cst_226 [1] : vector<1x5xf32> to vector<1xf32>
    %983 = vector.shape_cast %982 : vector<1xf32> to vector<1x1xf32>
    %cst_227 = arith.constant 0.000000e+00 : f32
    %984 = vector.broadcast %cst_227 : f32 to vector<1x1xf32>
    %985 = arith.subf %984, %983 : vector<1x1xf32>
    %c0_i32_228 = arith.constant 0 : i32
    %986 = vector.broadcast %c0_i32_228 : i32 to vector<1x1xi32>
    %cst_229 = arith.constant 0.000000e+00 : f32
    %987 = vector.broadcast %cst_229 : f32 to vector<1x1xf32>
    %988 = vector.extract_strided_slice %977 {offsets = [0, 0], sizes = [1, 1], strides = [1, 1]} : vector<1x5xf32> to vector<1x1xf32>
    %989 = arith.addf %987, %988 : vector<1x1xf32>
    %990 = arith.cmpf ole, %989, %967 : vector<1x1xf32>
    %991 = arith.extui %990 : vector<1x1xi1> to vector<1x1xi32>
    %992 = arith.addi %986, %991 : vector<1x1xi32>
    %993 = vector.extract_strided_slice %977 {offsets = [0, 1], sizes = [1, 1], strides = [1, 1]} : vector<1x5xf32> to vector<1x1xf32>
    %994 = arith.addf %989, %993 : vector<1x1xf32>
    %995 = arith.cmpf ole, %994, %967 : vector<1x1xf32>
    %996 = arith.extui %995 : vector<1x1xi1> to vector<1x1xi32>
    %997 = arith.addi %992, %996 : vector<1x1xi32>
    %998 = vector.extract_strided_slice %977 {offsets = [0, 2], sizes = [1, 1], strides = [1, 1]} : vector<1x5xf32> to vector<1x1xf32>
    %999 = arith.addf %994, %998 : vector<1x1xf32>
    %1000 = arith.cmpf ole, %999, %967 : vector<1x1xf32>
    %1001 = arith.extui %1000 : vector<1x1xi1> to vector<1x1xi32>
    %1002 = arith.addi %997, %1001 : vector<1x1xi32>
    %1003 = vector.extract_strided_slice %977 {offsets = [0, 3], sizes = [1, 1], strides = [1, 1]} : vector<1x5xf32> to vector<1x1xf32>
    %1004 = arith.addf %999, %1003 : vector<1x1xf32>
    %1005 = arith.cmpf ole, %1004, %967 : vector<1x1xf32>
    %1006 = arith.extui %1005 : vector<1x1xi1> to vector<1x1xi32>
    %1007 = arith.addi %1002, %1006 : vector<1x1xi32>
    %1008 = tpu.iota {dimensions = array<i32: 1>} : vector<1x5xi32>
    %1009 = vector.broadcast %1007 : vector<1x1xi32> to vector<1x5xi32>
    %1010 = arith.cmpi eq, %1008, %1009 : vector<1x5xi32>
    %1011 = arith.extui %1010 : vector<1x5xi1> to vector<1x5xi32>
    %1012 = arith.sitofp %1011 : vector<1x5xi32> to vector<1x5xf32>
    %1013 = arith.mulf %1012, %980 : vector<1x5xf32>
    %cst_230 = arith.constant dense<0.000000e+00> : vector<1xf32>
    %1014 = vector.multi_reduction <add>, %1013, %cst_230 [1] : vector<1x5xf32> to vector<1xf32>
    %1015 = vector.shape_cast %1014 : vector<1xf32> to vector<1x1xf32>
    %cst_231 = arith.constant 0.000000e+00 : f32
    %1016 = vector.broadcast %cst_231 : f32 to vector<1x1xf32>
    %1017 = arith.subf %1016, %1015 : vector<1x1xf32>
    %1018 = arith.addf %935, %1017 : vector<1x1xf32>
    %1019 = arith.addf %936, %985 : vector<1x1xf32>
    %c1_232 = arith.constant 1 : index
    %c4_233 = arith.constant 4 : index
    %1020 = vector.load %arg3[%c1_232, %c4_233] : memref<4x6xi32, #tpu.memory_space<vmem>>, vector<1x1xi32>
    tpu.vector_store %arg3[%c1_232, %c4_233], %1007 {strides = array<i32>} : memref<4x6xi32, #tpu.memory_space<vmem>>, vector<1x1xi32>,
    %c1_i32_234 = arith.constant 1 : i32
    %1021 = vector.broadcast %c1_i32_234 : i32 to vector<1x1xi32>
    %1022 = arith.addi %1007, %1021 : vector<1x1xi32>
    %1023 = vector.broadcast %1022 : vector<1x1xi32> to vector<1x6xi32>
    %1024 = arith.cmpi eq, %13, %1023 : vector<1x6xi32>
    %1025 = arith.extui %1024 : vector<1x6xi1> to vector<1x6xi32>
    %1026 = arith.sitofp %1025 : vector<1x6xi32> to vector<1x6xf32>
    %1027 = arith.truncf %1026 : vector<1x6xf32> to vector<1x6xbf16>
    %cst_235 = arith.constant dense<0.000000e+00> : vector<1x32xf32>
    %1028 = tpu.matmul %1027, %5, %cst_235 {dimension_numbers = #tpu.dot_dimension_numbers<[1], [0], [0], [1], [0, 0, 1, 1], [], []>} : vector<1x6xbf16>, vector<6x32xbf16>, vector<1x32xf32> -> vector<1x32xf32>
    %1029 = tpu.concatenate %1028, %963 in 1 : vector<1x32xf32>, vector<1x32xf32> -> vector<1x64xf32>
    %1030 = arith.truncf %1029 : vector<1x64xf32> to vector<1x64xbf16>
    %cst_236 = arith.constant dense<0.000000e+00> : vector<1x128xf32>
    %1031 = tpu.matmul %1030, %0, %cst_236 {dimension_numbers = #tpu.dot_dimension_numbers<[1], [0], [0], [1], [0, 0, 1, 1], [], []>} : vector<1x64xbf16>, vector<64x128xbf16>, vector<1x128xf32> -> vector<1x128xf32>
    %1032 = arith.addf %1031, %6 : vector<1x128xf32>
    %1033 = vector.extract_strided_slice %1032 {offsets = [0, 0], sizes = [1, 96], strides = [1, 1]} : vector<1x128xf32> to vector<1x96xf32>
    %cst_237 = arith.constant 0.000000e+00 : f32
    %1034 = vector.broadcast %cst_237 : f32 to vector<1x96xf32>
    %1035 = arith.subf %1034, %1033 : vector<1x96xf32>
    %1036 = math.exp %1035 : vector<1x96xf32>
    %cst_238 = arith.constant 1.000000e+00 : f32
    %1037 = vector.broadcast %cst_238 : f32 to vector<1x96xf32>
    %1038 = arith.addf %1037, %1036 : vector<1x96xf32>
    %1039 = tpu.reciprocal %1038 {approx = true} : vector<1x96xf32> -> vector<1x96xf32>
    %1040 = vector.extract_strided_slice %1039 {offsets = [0, 0], sizes = [1, 32], strides = [1, 1]} : vector<1x96xf32> to vector<1x32xf32>
    %1041 = vector.extract_strided_slice %1039 {offsets = [0, 32], sizes = [1, 32], strides = [1, 1]} : vector<1x96xf32> to vector<1x32xf32>
    %1042 = vector.extract_strided_slice %1039 {offsets = [0, 64], sizes = [1, 32], strides = [1, 1]} : vector<1x96xf32> to vector<1x32xf32>
    %1043 = vector.extract_strided_slice %1032 {offsets = [0, 96], sizes = [1, 32], strides = [1, 1]} : vector<1x128xf32> to vector<1x32xf32>
    %1044 = math.tanh %1043 : vector<1x32xf32>
    %1045 = arith.mulf %1041, %961 : vector<1x32xf32>
    %1046 = arith.mulf %1040, %1044 : vector<1x32xf32>
    %1047 = arith.addf %1045, %1046 : vector<1x32xf32>
    %1048 = math.tanh %1047 : vector<1x32xf32>
    %1049 = arith.mulf %1042, %1048 : vector<1x32xf32>
    %1050 = arith.truncf %1049 : vector<1x32xf32> to vector<1x32xbf16>
    %cst_239 = arith.constant dense<0.000000e+00> : vector<1x5xf32>
    %1051 = tpu.matmul %1050, %4, %cst_239 {dimension_numbers = #tpu.dot_dimension_numbers<[1], [0], [0], [1], [0, 0, 1, 1], [], []>} : vector<1x32xbf16>, vector<32x5xbf16>, vector<1x5xf32> -> vector<1x5xf32>
    %1052 = arith.addf %1051, %9 : vector<1x5xf32>
    %1053 = vector.extract_strided_slice %10 {offsets = [0, 11], sizes = [1, 1], strides = [1, 1]} : vector<1x24xf32> to vector<1x1xf32>
    %cst_240 = arith.constant dense<0xFF800000> : vector<1xf32>
    %1054 = vector.multi_reduction <maximumf>, %1052, %cst_240 [1] : vector<1x5xf32> to vector<1xf32>
    %1055 = vector.shape_cast %1054 : vector<1xf32> to vector<1x1xf32>
    %1056 = vector.broadcast %1055 : vector<1x1xf32> to vector<1x5xf32>
    %1057 = arith.subf %1052, %1056 : vector<1x5xf32>
    %1058 = math.exp %1057 : vector<1x5xf32>
    %cst_241 = arith.constant dense<0.000000e+00> : vector<1xf32>
    %1059 = vector.multi_reduction <add>, %1058, %cst_241 [1] : vector<1x5xf32> to vector<1xf32>
    %1060 = vector.shape_cast %1059 : vector<1xf32> to vector<1x1xf32>
    %1061 = tpu.reciprocal %1060 {approx = true} : vector<1x1xf32> -> vector<1x1xf32>
    %1062 = vector.broadcast %1061 : vector<1x1xf32> to vector<1x5xf32>
    %1063 = arith.mulf %1058, %1062 : vector<1x5xf32>
    %1064 = math.log %1060 : vector<1x1xf32>
    %1065 = vector.broadcast %1064 : vector<1x1xf32> to vector<1x5xf32>
    %1066 = arith.subf %1057, %1065 : vector<1x5xf32>
    %1067 = arith.mulf %1063, %1066 : vector<1x5xf32>
    %cst_242 = arith.constant dense<0.000000e+00> : vector<1xf32>
    %1068 = vector.multi_reduction <add>, %1067, %cst_242 [1] : vector<1x5xf32> to vector<1xf32>
    %1069 = vector.shape_cast %1068 : vector<1xf32> to vector<1x1xf32>
    %cst_243 = arith.constant 0.000000e+00 : f32
    %1070 = vector.broadcast %cst_243 : f32 to vector<1x1xf32>
    %1071 = arith.subf %1070, %1069 : vector<1x1xf32>
    %c0_i32_244 = arith.constant 0 : i32
    %1072 = vector.broadcast %c0_i32_244 : i32 to vector<1x1xi32>
    %cst_245 = arith.constant 0.000000e+00 : f32
    %1073 = vector.broadcast %cst_245 : f32 to vector<1x1xf32>
    %1074 = vector.extract_strided_slice %1063 {offsets = [0, 0], sizes = [1, 1], strides = [1, 1]} : vector<1x5xf32> to vector<1x1xf32>
    %1075 = arith.addf %1073, %1074 : vector<1x1xf32>
    %1076 = arith.cmpf ole, %1075, %1053 : vector<1x1xf32>
    %1077 = arith.extui %1076 : vector<1x1xi1> to vector<1x1xi32>
    %1078 = arith.addi %1072, %1077 : vector<1x1xi32>
    %1079 = vector.extract_strided_slice %1063 {offsets = [0, 1], sizes = [1, 1], strides = [1, 1]} : vector<1x5xf32> to vector<1x1xf32>
    %1080 = arith.addf %1075, %1079 : vector<1x1xf32>
    %1081 = arith.cmpf ole, %1080, %1053 : vector<1x1xf32>
    %1082 = arith.extui %1081 : vector<1x1xi1> to vector<1x1xi32>
    %1083 = arith.addi %1078, %1082 : vector<1x1xi32>
    %1084 = vector.extract_strided_slice %1063 {offsets = [0, 2], sizes = [1, 1], strides = [1, 1]} : vector<1x5xf32> to vector<1x1xf32>
    %1085 = arith.addf %1080, %1084 : vector<1x1xf32>
    %1086 = arith.cmpf ole, %1085, %1053 : vector<1x1xf32>
    %1087 = arith.extui %1086 : vector<1x1xi1> to vector<1x1xi32>
    %1088 = arith.addi %1083, %1087 : vector<1x1xi32>
    %1089 = vector.extract_strided_slice %1063 {offsets = [0, 3], sizes = [1, 1], strides = [1, 1]} : vector<1x5xf32> to vector<1x1xf32>
    %1090 = arith.addf %1085, %1089 : vector<1x1xf32>
    %1091 = arith.cmpf ole, %1090, %1053 : vector<1x1xf32>
    %1092 = arith.extui %1091 : vector<1x1xi1> to vector<1x1xi32>
    %1093 = arith.addi %1088, %1092 : vector<1x1xi32>
    %1094 = tpu.iota {dimensions = array<i32: 1>} : vector<1x5xi32>
    %1095 = vector.broadcast %1093 : vector<1x1xi32> to vector<1x5xi32>
    %1096 = arith.cmpi eq, %1094, %1095 : vector<1x5xi32>
    %1097 = arith.extui %1096 : vector<1x5xi1> to vector<1x5xi32>
    %1098 = arith.sitofp %1097 : vector<1x5xi32> to vector<1x5xf32>
    %1099 = arith.mulf %1098, %1066 : vector<1x5xf32>
    %cst_246 = arith.constant dense<0.000000e+00> : vector<1xf32>
    %1100 = vector.multi_reduction <add>, %1099, %cst_246 [1] : vector<1x5xf32> to vector<1xf32>
    %1101 = vector.shape_cast %1100 : vector<1xf32> to vector<1x1xf32>
    %cst_247 = arith.constant 0.000000e+00 : f32
    %1102 = vector.broadcast %cst_247 : f32 to vector<1x1xf32>
    %1103 = arith.subf %1102, %1101 : vector<1x1xf32>
    %1104 = arith.addf %1018, %1103 : vector<1x1xf32>
    %1105 = arith.addf %1019, %1071 : vector<1x1xf32>
    %c1_248 = arith.constant 1 : index
    %c5_249 = arith.constant 5 : index
    %1106 = vector.load %arg3[%c1_248, %c5_249] : memref<4x6xi32, #tpu.memory_space<vmem>>, vector<1x1xi32>
    tpu.vector_store %arg3[%c1_248, %c5_249], %1093 {strides = array<i32>} : memref<4x6xi32, #tpu.memory_space<vmem>>, vector<1x1xi32>,
    %c1_i32_250 = arith.constant 1 : i32
    %1107 = vector.broadcast %c1_i32_250 : i32 to vector<1x1xi32>
    %1108 = arith.addi %1093, %1107 : vector<1x1xi32>
    %1109 = vector.broadcast %1108 : vector<1x1xi32> to vector<1x6xi32>
    %1110 = arith.cmpi eq, %13, %1109 : vector<1x6xi32>
    %1111 = arith.extui %1110 : vector<1x6xi1> to vector<1x6xi32>
    %1112 = arith.sitofp %1111 : vector<1x6xi32> to vector<1x6xf32>
    %1113 = arith.truncf %1112 : vector<1x6xf32> to vector<1x6xbf16>
    %cst_251 = arith.constant dense<0.000000e+00> : vector<1x32xf32>
    %1114 = tpu.matmul %1113, %5, %cst_251 {dimension_numbers = #tpu.dot_dimension_numbers<[1], [0], [0], [1], [0, 0, 1, 1], [], []>} : vector<1x6xbf16>, vector<6x32xbf16>, vector<1x32xf32> -> vector<1x32xf32>
    %1115 = tpu.concatenate %1114, %1049 in 1 : vector<1x32xf32>, vector<1x32xf32> -> vector<1x64xf32>
    %1116 = arith.truncf %1115 : vector<1x64xf32> to vector<1x64xbf16>
    %cst_252 = arith.constant dense<0.000000e+00> : vector<1x128xf32>
    %1117 = tpu.matmul %1116, %0, %cst_252 {dimension_numbers = #tpu.dot_dimension_numbers<[1], [0], [0], [1], [0, 0, 1, 1], [], []>} : vector<1x64xbf16>, vector<64x128xbf16>, vector<1x128xf32> -> vector<1x128xf32>
    %1118 = arith.addf %1117, %6 : vector<1x128xf32>
    %1119 = vector.extract_strided_slice %1118 {offsets = [0, 0], sizes = [1, 96], strides = [1, 1]} : vector<1x128xf32> to vector<1x96xf32>
    %cst_253 = arith.constant 0.000000e+00 : f32
    %1120 = vector.broadcast %cst_253 : f32 to vector<1x96xf32>
    %1121 = arith.subf %1120, %1119 : vector<1x96xf32>
    %1122 = math.exp %1121 : vector<1x96xf32>
    %cst_254 = arith.constant 1.000000e+00 : f32
    %1123 = vector.broadcast %cst_254 : f32 to vector<1x96xf32>
    %1124 = arith.addf %1123, %1122 : vector<1x96xf32>
    %1125 = tpu.reciprocal %1124 {approx = true} : vector<1x96xf32> -> vector<1x96xf32>
    %1126 = vector.extract_strided_slice %1125 {offsets = [0, 0], sizes = [1, 32], strides = [1, 1]} : vector<1x96xf32> to vector<1x32xf32>
    %1127 = vector.extract_strided_slice %1125 {offsets = [0, 32], sizes = [1, 32], strides = [1, 1]} : vector<1x96xf32> to vector<1x32xf32>
    %1128 = vector.extract_strided_slice %1125 {offsets = [0, 64], sizes = [1, 32], strides = [1, 1]} : vector<1x96xf32> to vector<1x32xf32>
    %1129 = vector.extract_strided_slice %1118 {offsets = [0, 96], sizes = [1, 32], strides = [1, 1]} : vector<1x128xf32> to vector<1x32xf32>
    %1130 = math.tanh %1129 : vector<1x32xf32>
    %1131 = arith.mulf %1127, %1047 : vector<1x32xf32>
    %1132 = arith.mulf %1126, %1130 : vector<1x32xf32>
    %1133 = arith.addf %1131, %1132 : vector<1x32xf32>
    %1134 = math.tanh %1133 : vector<1x32xf32>
    %1135 = arith.mulf %1128, %1134 : vector<1x32xf32>
    %c4_255 = arith.constant 4 : index
    %c0_256 = arith.constant 0 : index
    %1136 = vector.load %arg6[%c4_255, %c0_256] : memref<5x32xf32, #tpu.memory_space<vmem>>, vector<1x32xf32>
    tpu.vector_store %arg6[%c4_255, %c0_256], %1135 {strides = array<i32>} : memref<5x32xf32, #tpu.memory_space<vmem>>, vector<1x32xf32>,
    %1137 = arith.truncf %1135 : vector<1x32xf32> to vector<1x32xbf16>
    %cst_257 = arith.constant dense<0.000000e+00> : vector<1x32xf32>
    %1138 = tpu.matmul %1137, %2, %cst_257 {dimension_numbers = #tpu.dot_dimension_numbers<[1], [0], [0], [1], [0, 0, 1, 1], [], []>} : vector<1x32xbf16>, vector<32x32xbf16>, vector<1x32xf32> -> vector<1x32xf32>
    %c4_258 = arith.constant 4 : index
    %c0_259 = arith.constant 0 : index
    %1139 = vector.load %arg7[%c4_258, %c0_259] : memref<5x32xf32, #tpu.memory_space<vmem>>, vector<1x32xf32>
    tpu.vector_store %arg7[%c4_258, %c0_259], %1138 {strides = array<i32>} : memref<5x32xf32, #tpu.memory_space<vmem>>, vector<1x32xf32>,
    %cst_260 = arith.constant 0.000000e+00 : f32
    %1140 = vector.broadcast %cst_260 : f32 to vector<1x1xf32>
    %cst_261 = arith.constant 0.000000e+00 : f32
    %1141 = vector.broadcast %cst_261 : f32 to vector<1x1xf32>
    %1142 = tpu.concatenate %12, %1135 in 1 : vector<1x32xf32>, vector<1x32xf32> -> vector<1x64xf32>
    %1143 = arith.truncf %1142 : vector<1x64xf32> to vector<1x64xbf16>
    %cst_262 = arith.constant dense<0.000000e+00> : vector<1x128xf32>
    %1144 = tpu.matmul %1143, %0, %cst_262 {dimension_numbers = #tpu.dot_dimension_numbers<[1], [0], [0], [1], [0, 0, 1, 1], [], []>} : vector<1x64xbf16>, vector<64x128xbf16>, vector<1x128xf32> -> vector<1x128xf32>
    %1145 = arith.addf %1144, %6 : vector<1x128xf32>
    %1146 = vector.extract_strided_slice %1145 {offsets = [0, 0], sizes = [1, 96], strides = [1, 1]} : vector<1x128xf32> to vector<1x96xf32>
    %cst_263 = arith.constant 0.000000e+00 : f32
    %1147 = vector.broadcast %cst_263 : f32 to vector<1x96xf32>
    %1148 = arith.subf %1147, %1146 : vector<1x96xf32>
    %1149 = math.exp %1148 : vector<1x96xf32>
    %cst_264 = arith.constant 1.000000e+00 : f32
    %1150 = vector.broadcast %cst_264 : f32 to vector<1x96xf32>
    %1151 = arith.addf %1150, %1149 : vector<1x96xf32>
    %1152 = tpu.reciprocal %1151 {approx = true} : vector<1x96xf32> -> vector<1x96xf32>
    %1153 = vector.extract_strided_slice %1152 {offsets = [0, 0], sizes = [1, 32], strides = [1, 1]} : vector<1x96xf32> to vector<1x32xf32>
    %1154 = vector.extract_strided_slice %1152 {offsets = [0, 32], sizes = [1, 32], strides = [1, 1]} : vector<1x96xf32> to vector<1x32xf32>
    %1155 = vector.extract_strided_slice %1152 {offsets = [0, 64], sizes = [1, 32], strides = [1, 1]} : vector<1x96xf32> to vector<1x32xf32>
    %1156 = vector.extract_strided_slice %1145 {offsets = [0, 96], sizes = [1, 32], strides = [1, 1]} : vector<1x128xf32> to vector<1x32xf32>
    %1157 = math.tanh %1156 : vector<1x32xf32>
    %1158 = arith.mulf %1154, %1133 : vector<1x32xf32>
    %1159 = arith.mulf %1153, %1157 : vector<1x32xf32>
    %1160 = arith.addf %1158, %1159 : vector<1x32xf32>
    %1161 = math.tanh %1160 : vector<1x32xf32>
    %1162 = arith.mulf %1155, %1161 : vector<1x32xf32>
    %cst_265 = arith.constant 0.000000e+00 : f32
    %1163 = vector.broadcast %cst_265 : f32 to vector<1x32xf32>
    %c0_266 = arith.constant 0 : index
    %c0_267 = arith.constant 0 : index
    %1164 = vector.load %arg6[%c0_266, %c0_267] : memref<5x32xf32, #tpu.memory_space<vmem>>, vector<1x32xf32>
    tpu.vector_store %arg6[%c0_266, %c0_267], %1163 {strides = array<i32>} : memref<5x32xf32, #tpu.memory_space<vmem>>, vector<1x32xf32>,
    %1165 = arith.truncf %1162 : vector<1x32xf32> to vector<1x32xbf16>
    %cst_268 = arith.constant dense<0.000000e+00> : vector<1x32xf32>
    %1166 = tpu.matmul %1165, %2, %cst_268 {dimension_numbers = #tpu.dot_dimension_numbers<[1], [0], [0], [1], [0, 0, 1, 1], [], []>} : vector<1x32xbf16>, vector<32x32xbf16>, vector<1x32xf32> -> vector<1x32xf32>
    %c0_269 = arith.constant 0 : index
    %c0_270 = arith.constant 0 : index
    %1167 = vector.load %arg7[%c0_269, %c0_270] : memref<5x32xf32, #tpu.memory_space<vmem>>, vector<1x32xf32>
    tpu.vector_store %arg7[%c0_269, %c0_270], %1166 {strides = array<i32>} : memref<5x32xf32, #tpu.memory_space<vmem>>, vector<1x32xf32>,
    %1168 = tpu.concatenate %12, %1162 in 1 : vector<1x32xf32>, vector<1x32xf32> -> vector<1x64xf32>
    %1169 = arith.truncf %1168 : vector<1x64xf32> to vector<1x64xbf16>
    %cst_271 = arith.constant dense<0.000000e+00> : vector<1x128xf32>
    %1170 = tpu.matmul %1169, %0, %cst_271 {dimension_numbers = #tpu.dot_dimension_numbers<[1], [0], [0], [1], [0, 0, 1, 1], [], []>} : vector<1x64xbf16>, vector<64x128xbf16>, vector<1x128xf32> -> vector<1x128xf32>
    %1171 = arith.addf %1170, %6 : vector<1x128xf32>
    %1172 = vector.extract_strided_slice %1171 {offsets = [0, 0], sizes = [1, 96], strides = [1, 1]} : vector<1x128xf32> to vector<1x96xf32>
    %cst_272 = arith.constant 0.000000e+00 : f32
    %1173 = vector.broadcast %cst_272 : f32 to vector<1x96xf32>
    %1174 = arith.subf %1173, %1172 : vector<1x96xf32>
    %1175 = math.exp %1174 : vector<1x96xf32>
    %cst_273 = arith.constant 1.000000e+00 : f32
    %1176 = vector.broadcast %cst_273 : f32 to vector<1x96xf32>
    %1177 = arith.addf %1176, %1175 : vector<1x96xf32>
    %1178 = tpu.reciprocal %1177 {approx = true} : vector<1x96xf32> -> vector<1x96xf32>
    %1179 = vector.extract_strided_slice %1178 {offsets = [0, 0], sizes = [1, 32], strides = [1, 1]} : vector<1x96xf32> to vector<1x32xf32>
    %1180 = vector.extract_strided_slice %1178 {offsets = [0, 32], sizes = [1, 32], strides = [1, 1]} : vector<1x96xf32> to vector<1x32xf32>
    %1181 = vector.extract_strided_slice %1178 {offsets = [0, 64], sizes = [1, 32], strides = [1, 1]} : vector<1x96xf32> to vector<1x32xf32>
    %1182 = vector.extract_strided_slice %1171 {offsets = [0, 96], sizes = [1, 32], strides = [1, 1]} : vector<1x128xf32> to vector<1x32xf32>
    %1183 = math.tanh %1182 : vector<1x32xf32>
    %1184 = arith.mulf %1180, %1160 : vector<1x32xf32>
    %1185 = arith.mulf %1179, %1183 : vector<1x32xf32>
    %1186 = arith.addf %1184, %1185 : vector<1x32xf32>
    %1187 = math.tanh %1186 : vector<1x32xf32>
    %1188 = arith.mulf %1181, %1187 : vector<1x32xf32>
    %cst_274 = arith.constant 0.000000e+00 : f32
    %1189 = vector.broadcast %cst_274 : f32 to vector<1x32xf32>
    %c1_275 = arith.constant 1 : index
    %c0_276 = arith.constant 0 : index
    %1190 = vector.load %arg6[%c1_275, %c0_276] : memref<5x32xf32, #tpu.memory_space<vmem>>, vector<1x32xf32>
    tpu.vector_store %arg6[%c1_275, %c0_276], %1189 {strides = array<i32>} : memref<5x32xf32, #tpu.memory_space<vmem>>, vector<1x32xf32>,
    %1191 = arith.truncf %1188 : vector<1x32xf32> to vector<1x32xbf16>
    %cst_277 = arith.constant dense<0.000000e+00> : vector<1x32xf32>
    %1192 = tpu.matmul %1191, %2, %cst_277 {dimension_numbers = #tpu.dot_dimension_numbers<[1], [0], [0], [1], [0, 0, 1, 1], [], []>} : vector<1x32xbf16>, vector<32x32xbf16>, vector<1x32xf32> -> vector<1x32xf32>
    %c1_278 = arith.constant 1 : index
    %c0_279 = arith.constant 0 : index
    %1193 = vector.load %arg7[%c1_278, %c0_279] : memref<5x32xf32, #tpu.memory_space<vmem>>, vector<1x32xf32>
    tpu.vector_store %arg7[%c1_278, %c0_279], %1192 {strides = array<i32>} : memref<5x32xf32, #tpu.memory_space<vmem>>, vector<1x32xf32>,
    %1194 = tpu.concatenate %12, %1188 in 1 : vector<1x32xf32>, vector<1x32xf32> -> vector<1x64xf32>
    %1195 = arith.truncf %1194 : vector<1x64xf32> to vector<1x64xbf16>
    %cst_280 = arith.constant dense<0.000000e+00> : vector<1x128xf32>
    %1196 = tpu.matmul %1195, %0, %cst_280 {dimension_numbers = #tpu.dot_dimension_numbers<[1], [0], [0], [1], [0, 0, 1, 1], [], []>} : vector<1x64xbf16>, vector<64x128xbf16>, vector<1x128xf32> -> vector<1x128xf32>
    %1197 = arith.addf %1196, %6 : vector<1x128xf32>
    %1198 = vector.extract_strided_slice %1197 {offsets = [0, 0], sizes = [1, 96], strides = [1, 1]} : vector<1x128xf32> to vector<1x96xf32>
    %cst_281 = arith.constant 0.000000e+00 : f32
    %1199 = vector.broadcast %cst_281 : f32 to vector<1x96xf32>
    %1200 = arith.subf %1199, %1198 : vector<1x96xf32>
    %1201 = math.exp %1200 : vector<1x96xf32>
    %cst_282 = arith.constant 1.000000e+00 : f32
    %1202 = vector.broadcast %cst_282 : f32 to vector<1x96xf32>
    %1203 = arith.addf %1202, %1201 : vector<1x96xf32>
    %1204 = tpu.reciprocal %1203 {approx = true} : vector<1x96xf32> -> vector<1x96xf32>
    %1205 = vector.extract_strided_slice %1204 {offsets = [0, 0], sizes = [1, 32], strides = [1, 1]} : vector<1x96xf32> to vector<1x32xf32>
    %1206 = vector.extract_strided_slice %1204 {offsets = [0, 32], sizes = [1, 32], strides = [1, 1]} : vector<1x96xf32> to vector<1x32xf32>
    %1207 = vector.extract_strided_slice %1204 {offsets = [0, 64], sizes = [1, 32], strides = [1, 1]} : vector<1x96xf32> to vector<1x32xf32>
    %1208 = vector.extract_strided_slice %1197 {offsets = [0, 96], sizes = [1, 32], strides = [1, 1]} : vector<1x128xf32> to vector<1x32xf32>
    %1209 = math.tanh %1208 : vector<1x32xf32>
    %1210 = arith.mulf %1206, %1186 : vector<1x32xf32>
    %1211 = arith.mulf %1205, %1209 : vector<1x32xf32>
    %1212 = arith.addf %1210, %1211 : vector<1x32xf32>
    %1213 = math.tanh %1212 : vector<1x32xf32>
    %1214 = arith.mulf %1207, %1213 : vector<1x32xf32>
    %c0_283 = arith.constant 0 : index
    %c0_284 = arith.constant 0 : index
    %1215 = vector.load %arg7[%c0_283, %c0_284] : memref<5x32xf32, #tpu.memory_space<vmem>>, vector<2x32xf32>
    %1216 = arith.truncf %1214 : vector<1x32xf32> to vector<1x32xbf16>
    %cst_285 = arith.constant dense<0.000000e+00> : vector<1x32xf32>
    %1217 = tpu.matmul %1216, %3, %cst_285 {dimension_numbers = #tpu.dot_dimension_numbers<[1], [0], [0], [1], [0, 0, 1, 1], [], []>} : vector<1x32xbf16>, vector<32x32xbf16>, vector<1x32xf32> -> vector<1x32xf32>
    %1218 = vector.broadcast %1217 : vector<1x32xf32> to vector<2x32xf32>
    %1219 = arith.addf %1218, %1215 : vector<2x32xf32>
    %1220 = math.tanh %1219 : vector<2x32xf32>
    %1221 = vector.broadcast %8 : vector<1x32xf32> to vector<2x32xf32>
    %1222 = arith.mulf %1220, %1221 : vector<2x32xf32>
    %cst_286 = arith.constant dense<0.000000e+00> : vector<2xf32>
    %1223 = vector.multi_reduction <add>, %1222, %cst_286 [1] : vector<2x32xf32> to vector<2xf32>
    %1224 = vector.shape_cast %1223 : vector<2xf32> to vector<2x1xf32>
    %1225 = vector.extract_strided_slice %10 {offsets = [0, 12], sizes = [1, 1], strides = [1, 1]} : vector<1x24xf32> to vector<1x1xf32>
    %cst_287 = arith.constant dense<0xFF800000> : vector<1xf32>
    %1226 = vector.multi_reduction <maximumf>, %1224, %cst_287 [0] : vector<2x1xf32> to vector<1xf32>
    %1227 = vector.shape_cast %1226 : vector<1xf32> to vector<1x1xf32>
    %1228 = vector.broadcast %1227 : vector<1x1xf32> to vector<2x1xf32>
    %1229 = arith.subf %1224, %1228 : vector<2x1xf32>
    %1230 = math.exp %1229 : vector<2x1xf32>
    %cst_288 = arith.constant dense<0.000000e+00> : vector<1xf32>
    %1231 = vector.multi_reduction <add>, %1230, %cst_288 [0] : vector<2x1xf32> to vector<1xf32>
    %1232 = vector.shape_cast %1231 : vector<1xf32> to vector<1x1xf32>
    %1233 = tpu.reciprocal %1232 {approx = true} : vector<1x1xf32> -> vector<1x1xf32>
    %1234 = vector.broadcast %1233 : vector<1x1xf32> to vector<2x1xf32>
    %1235 = arith.mulf %1230, %1234 : vector<2x1xf32>
    %1236 = math.log %1232 : vector<1x1xf32>
    %1237 = vector.broadcast %1236 : vector<1x1xf32> to vector<2x1xf32>
    %1238 = arith.subf %1229, %1237 : vector<2x1xf32>
    %1239 = arith.mulf %1235, %1238 : vector<2x1xf32>
    %cst_289 = arith.constant dense<0.000000e+00> : vector<1xf32>
    %1240 = vector.multi_reduction <add>, %1239, %cst_289 [0] : vector<2x1xf32> to vector<1xf32>
    %1241 = vector.shape_cast %1240 : vector<1xf32> to vector<1x1xf32>
    %cst_290 = arith.constant 0.000000e+00 : f32
    %1242 = vector.broadcast %cst_290 : f32 to vector<1x1xf32>
    %1243 = arith.subf %1242, %1241 : vector<1x1xf32>
    %c0_i32_291 = arith.constant 0 : i32
    %1244 = vector.broadcast %c0_i32_291 : i32 to vector<1x1xi32>
    %cst_292 = arith.constant 0.000000e+00 : f32
    %1245 = vector.broadcast %cst_292 : f32 to vector<1x1xf32>
    %1246 = vector.extract_strided_slice %1235 {offsets = [0, 0], sizes = [1, 1], strides = [1, 1]} : vector<2x1xf32> to vector<1x1xf32>
    %1247 = arith.addf %1245, %1246 : vector<1x1xf32>
    %1248 = arith.cmpf ole, %1247, %1225 : vector<1x1xf32>
    %1249 = arith.extui %1248 : vector<1x1xi1> to vector<1x1xi32>
    %1250 = arith.addi %1244, %1249 : vector<1x1xi32>
    %1251 = tpu.iota {dimensions = array<i32: 0>} : vector<2x1xi32>
    %1252 = vector.broadcast %1250 : vector<1x1xi32> to vector<2x1xi32>
    %1253 = arith.cmpi eq, %1251, %1252 : vector<2x1xi32>
    %1254 = arith.extui %1253 : vector<2x1xi1> to vector<2x1xi32>
    %1255 = arith.sitofp %1254 : vector<2x1xi32> to vector<2x1xf32>
    %1256 = arith.mulf %1255, %1238 : vector<2x1xf32>
    %cst_293 = arith.constant dense<0.000000e+00> : vector<1xf32>
    %1257 = vector.multi_reduction <add>, %1256, %cst_293 [0] : vector<2x1xf32> to vector<1xf32>
    %1258 = vector.shape_cast %1257 : vector<1xf32> to vector<1x1xf32>
    %cst_294 = arith.constant 0.000000e+00 : f32
    %1259 = vector.broadcast %cst_294 : f32 to vector<1x1xf32>
    %1260 = arith.subf %1259, %1258 : vector<1x1xf32>
    %1261 = arith.addf %1141, %1260 : vector<1x1xf32>
    %1262 = arith.addf %1140, %1243 : vector<1x1xf32>
    %c2_295 = arith.constant 2 : index
    %c0_296 = arith.constant 0 : index
    %1263 = vector.load %arg3[%c2_295, %c0_296] : memref<4x6xi32, #tpu.memory_space<vmem>>, vector<1x1xi32>
    tpu.vector_store %arg3[%c2_295, %c0_296], %1250 {strides = array<i32>} : memref<4x6xi32, #tpu.memory_space<vmem>>, vector<1x1xi32>,
    %c0_297 = arith.constant 0 : index
    %c0_298 = arith.constant 0 : index
    %1264 = vector.load %arg6[%c0_297, %c0_298] : memref<5x32xf32, #tpu.memory_space<vmem>>, vector<2x32xf32>
    %1265 = vector.broadcast %1255 : vector<2x1xf32> to vector<2x32xf32>
    %1266 = arith.mulf %1265, %1264 : vector<2x32xf32>
    %cst_299 = arith.constant dense<0.000000e+00> : vector<32xf32>
    %1267 = vector.multi_reduction <add>, %1266, %cst_299 [0] : vector<2x32xf32> to vector<32xf32>
    %1268 = vector.shape_cast %1267 : vector<32xf32> to vector<1x32xf32>
    %1269 = tpu.concatenate %1268, %1214 in 1 : vector<1x32xf32>, vector<1x32xf32> -> vector<1x64xf32>
    %1270 = arith.truncf %1269 : vector<1x64xf32> to vector<1x64xbf16>
    %cst_300 = arith.constant dense<0.000000e+00> : vector<1x128xf32>
    %1271 = tpu.matmul %1270, %0, %cst_300 {dimension_numbers = #tpu.dot_dimension_numbers<[1], [0], [0], [1], [0, 0, 1, 1], [], []>} : vector<1x64xbf16>, vector<64x128xbf16>, vector<1x128xf32> -> vector<1x128xf32>
    %1272 = arith.addf %1271, %6 : vector<1x128xf32>
    %1273 = vector.extract_strided_slice %1272 {offsets = [0, 0], sizes = [1, 96], strides = [1, 1]} : vector<1x128xf32> to vector<1x96xf32>
    %cst_301 = arith.constant 0.000000e+00 : f32
    %1274 = vector.broadcast %cst_301 : f32 to vector<1x96xf32>
    %1275 = arith.subf %1274, %1273 : vector<1x96xf32>
    %1276 = math.exp %1275 : vector<1x96xf32>
    %cst_302 = arith.constant 1.000000e+00 : f32
    %1277 = vector.broadcast %cst_302 : f32 to vector<1x96xf32>
    %1278 = arith.addf %1277, %1276 : vector<1x96xf32>
    %1279 = tpu.reciprocal %1278 {approx = true} : vector<1x96xf32> -> vector<1x96xf32>
    %1280 = vector.extract_strided_slice %1279 {offsets = [0, 0], sizes = [1, 32], strides = [1, 1]} : vector<1x96xf32> to vector<1x32xf32>
    %1281 = vector.extract_strided_slice %1279 {offsets = [0, 32], sizes = [1, 32], strides = [1, 1]} : vector<1x96xf32> to vector<1x32xf32>
    %1282 = vector.extract_strided_slice %1279 {offsets = [0, 64], sizes = [1, 32], strides = [1, 1]} : vector<1x96xf32> to vector<1x32xf32>
    %1283 = vector.extract_strided_slice %1272 {offsets = [0, 96], sizes = [1, 32], strides = [1, 1]} : vector<1x128xf32> to vector<1x32xf32>
    %1284 = math.tanh %1283 : vector<1x32xf32>
    %1285 = arith.mulf %1281, %1212 : vector<1x32xf32>
    %1286 = arith.mulf %1280, %1284 : vector<1x32xf32>
    %1287 = arith.addf %1285, %1286 : vector<1x32xf32>
    %1288 = math.tanh %1287 : vector<1x32xf32>
    %1289 = arith.mulf %1282, %1288 : vector<1x32xf32>
    %c0_303 = arith.constant 0 : index
    %c0_304 = arith.constant 0 : index
    %1290 = vector.load %arg7[%c0_303, %c0_304] : memref<5x32xf32, #tpu.memory_space<vmem>>, vector<2x32xf32>
    %1291 = arith.truncf %1289 : vector<1x32xf32> to vector<1x32xbf16>
    %cst_305 = arith.constant dense<0.000000e+00> : vector<1x32xf32>
    %1292 = tpu.matmul %1291, %3, %cst_305 {dimension_numbers = #tpu.dot_dimension_numbers<[1], [0], [0], [1], [0, 0, 1, 1], [], []>} : vector<1x32xbf16>, vector<32x32xbf16>, vector<1x32xf32> -> vector<1x32xf32>
    %1293 = vector.broadcast %1292 : vector<1x32xf32> to vector<2x32xf32>
    %1294 = arith.addf %1293, %1290 : vector<2x32xf32>
    %1295 = math.tanh %1294 : vector<2x32xf32>
    %1296 = vector.broadcast %8 : vector<1x32xf32> to vector<2x32xf32>
    %1297 = arith.mulf %1295, %1296 : vector<2x32xf32>
    %cst_306 = arith.constant dense<0.000000e+00> : vector<2xf32>
    %1298 = vector.multi_reduction <add>, %1297, %cst_306 [1] : vector<2x32xf32> to vector<2xf32>
    %1299 = vector.shape_cast %1298 : vector<2xf32> to vector<2x1xf32>
    %1300 = vector.extract_strided_slice %10 {offsets = [0, 13], sizes = [1, 1], strides = [1, 1]} : vector<1x24xf32> to vector<1x1xf32>
    %cst_307 = arith.constant dense<0xFF800000> : vector<1xf32>
    %1301 = vector.multi_reduction <maximumf>, %1299, %cst_307 [0] : vector<2x1xf32> to vector<1xf32>
    %1302 = vector.shape_cast %1301 : vector<1xf32> to vector<1x1xf32>
    %1303 = vector.broadcast %1302 : vector<1x1xf32> to vector<2x1xf32>
    %1304 = arith.subf %1299, %1303 : vector<2x1xf32>
    %1305 = math.exp %1304 : vector<2x1xf32>
    %cst_308 = arith.constant dense<0.000000e+00> : vector<1xf32>
    %1306 = vector.multi_reduction <add>, %1305, %cst_308 [0] : vector<2x1xf32> to vector<1xf32>
    %1307 = vector.shape_cast %1306 : vector<1xf32> to vector<1x1xf32>
    %1308 = tpu.reciprocal %1307 {approx = true} : vector<1x1xf32> -> vector<1x1xf32>
    %1309 = vector.broadcast %1308 : vector<1x1xf32> to vector<2x1xf32>
    %1310 = arith.mulf %1305, %1309 : vector<2x1xf32>
    %1311 = math.log %1307 : vector<1x1xf32>
    %1312 = vector.broadcast %1311 : vector<1x1xf32> to vector<2x1xf32>
    %1313 = arith.subf %1304, %1312 : vector<2x1xf32>
    %1314 = arith.mulf %1310, %1313 : vector<2x1xf32>
    %cst_309 = arith.constant dense<0.000000e+00> : vector<1xf32>
    %1315 = vector.multi_reduction <add>, %1314, %cst_309 [0] : vector<2x1xf32> to vector<1xf32>
    %1316 = vector.shape_cast %1315 : vector<1xf32> to vector<1x1xf32>
    %cst_310 = arith.constant 0.000000e+00 : f32
    %1317 = vector.broadcast %cst_310 : f32 to vector<1x1xf32>
    %1318 = arith.subf %1317, %1316 : vector<1x1xf32>
    %c0_i32_311 = arith.constant 0 : i32
    %1319 = vector.broadcast %c0_i32_311 : i32 to vector<1x1xi32>
    %cst_312 = arith.constant 0.000000e+00 : f32
    %1320 = vector.broadcast %cst_312 : f32 to vector<1x1xf32>
    %1321 = vector.extract_strided_slice %1310 {offsets = [0, 0], sizes = [1, 1], strides = [1, 1]} : vector<2x1xf32> to vector<1x1xf32>
    %1322 = arith.addf %1320, %1321 : vector<1x1xf32>
    %1323 = arith.cmpf ole, %1322, %1300 : vector<1x1xf32>
    %1324 = arith.extui %1323 : vector<1x1xi1> to vector<1x1xi32>
    %1325 = arith.addi %1319, %1324 : vector<1x1xi32>
    %1326 = tpu.iota {dimensions = array<i32: 0>} : vector<2x1xi32>
    %1327 = vector.broadcast %1325 : vector<1x1xi32> to vector<2x1xi32>
    %1328 = arith.cmpi eq, %1326, %1327 : vector<2x1xi32>
    %1329 = arith.extui %1328 : vector<2x1xi1> to vector<2x1xi32>
    %1330 = arith.sitofp %1329 : vector<2x1xi32> to vector<2x1xf32>
    %1331 = arith.mulf %1330, %1313 : vector<2x1xf32>
    %cst_313 = arith.constant dense<0.000000e+00> : vector<1xf32>
    %1332 = vector.multi_reduction <add>, %1331, %cst_313 [0] : vector<2x1xf32> to vector<1xf32>
    %1333 = vector.shape_cast %1332 : vector<1xf32> to vector<1x1xf32>
    %cst_314 = arith.constant 0.000000e+00 : f32
    %1334 = vector.broadcast %cst_314 : f32 to vector<1x1xf32>
    %1335 = arith.subf %1334, %1333 : vector<1x1xf32>
    %1336 = arith.addf %1261, %1335 : vector<1x1xf32>
    %1337 = arith.addf %1262, %1318 : vector<1x1xf32>
    %c2_315 = arith.constant 2 : index
    %c1_316 = arith.constant 1 : index
    %1338 = vector.load %arg3[%c2_315, %c1_316] : memref<4x6xi32, #tpu.memory_space<vmem>>, vector<1x1xi32>
    tpu.vector_store %arg3[%c2_315, %c1_316], %1325 {strides = array<i32>} : memref<4x6xi32, #tpu.memory_space<vmem>>, vector<1x1xi32>,
    %c0_317 = arith.constant 0 : index
    %c0_318 = arith.constant 0 : index
    %1339 = vector.load %arg6[%c0_317, %c0_318] : memref<5x32xf32, #tpu.memory_space<vmem>>, vector<2x32xf32>
    %1340 = vector.broadcast %1330 : vector<2x1xf32> to vector<2x32xf32>
    %1341 = arith.mulf %1340, %1339 : vector<2x32xf32>
    %cst_319 = arith.constant dense<0.000000e+00> : vector<32xf32>
    %1342 = vector.multi_reduction <add>, %1341, %cst_319 [0] : vector<2x32xf32> to vector<32xf32>
    %1343 = vector.shape_cast %1342 : vector<32xf32> to vector<1x32xf32>
    %1344 = tpu.concatenate %1343, %1289 in 1 : vector<1x32xf32>, vector<1x32xf32> -> vector<1x64xf32>
    %1345 = arith.truncf %1344 : vector<1x64xf32> to vector<1x64xbf16>
    %cst_320 = arith.constant dense<0.000000e+00> : vector<1x128xf32>
    %1346 = tpu.matmul %1345, %0, %cst_320 {dimension_numbers = #tpu.dot_dimension_numbers<[1], [0], [0], [1], [0, 0, 1, 1], [], []>} : vector<1x64xbf16>, vector<64x128xbf16>, vector<1x128xf32> -> vector<1x128xf32>
    %1347 = arith.addf %1346, %6 : vector<1x128xf32>
    %1348 = vector.extract_strided_slice %1347 {offsets = [0, 0], sizes = [1, 96], strides = [1, 1]} : vector<1x128xf32> to vector<1x96xf32>
    %cst_321 = arith.constant 0.000000e+00 : f32
    %1349 = vector.broadcast %cst_321 : f32 to vector<1x96xf32>
    %1350 = arith.subf %1349, %1348 : vector<1x96xf32>
    %1351 = math.exp %1350 : vector<1x96xf32>
    %cst_322 = arith.constant 1.000000e+00 : f32
    %1352 = vector.broadcast %cst_322 : f32 to vector<1x96xf32>
    %1353 = arith.addf %1352, %1351 : vector<1x96xf32>
    %1354 = tpu.reciprocal %1353 {approx = true} : vector<1x96xf32> -> vector<1x96xf32>
    %1355 = vector.extract_strided_slice %1354 {offsets = [0, 0], sizes = [1, 32], strides = [1, 1]} : vector<1x96xf32> to vector<1x32xf32>
    %1356 = vector.extract_strided_slice %1354 {offsets = [0, 32], sizes = [1, 32], strides = [1, 1]} : vector<1x96xf32> to vector<1x32xf32>
    %1357 = vector.extract_strided_slice %1354 {offsets = [0, 64], sizes = [1, 32], strides = [1, 1]} : vector<1x96xf32> to vector<1x32xf32>
    %1358 = vector.extract_strided_slice %1347 {offsets = [0, 96], sizes = [1, 32], strides = [1, 1]} : vector<1x128xf32> to vector<1x32xf32>
    %1359 = math.tanh %1358 : vector<1x32xf32>
    %1360 = arith.mulf %1356, %1287 : vector<1x32xf32>
    %1361 = arith.mulf %1355, %1359 : vector<1x32xf32>
    %1362 = arith.addf %1360, %1361 : vector<1x32xf32>
    %1363 = math.tanh %1362 : vector<1x32xf32>
    %1364 = arith.mulf %1357, %1363 : vector<1x32xf32>
    %1365 = arith.truncf %1364 : vector<1x32xf32> to vector<1x32xbf16>
    %cst_323 = arith.constant dense<0.000000e+00> : vector<1x5xf32>
    %1366 = tpu.matmul %1365, %4, %cst_323 {dimension_numbers = #tpu.dot_dimension_numbers<[1], [0], [0], [1], [0, 0, 1, 1], [], []>} : vector<1x32xbf16>, vector<32x5xbf16>, vector<1x5xf32> -> vector<1x5xf32>
    %1367 = arith.addf %1366, %9 : vector<1x5xf32>
    %1368 = vector.extract_strided_slice %10 {offsets = [0, 14], sizes = [1, 1], strides = [1, 1]} : vector<1x24xf32> to vector<1x1xf32>
    %cst_324 = arith.constant dense<0xFF800000> : vector<1xf32>
    %1369 = vector.multi_reduction <maximumf>, %1367, %cst_324 [1] : vector<1x5xf32> to vector<1xf32>
    %1370 = vector.shape_cast %1369 : vector<1xf32> to vector<1x1xf32>
    %1371 = vector.broadcast %1370 : vector<1x1xf32> to vector<1x5xf32>
    %1372 = arith.subf %1367, %1371 : vector<1x5xf32>
    %1373 = math.exp %1372 : vector<1x5xf32>
    %cst_325 = arith.constant dense<0.000000e+00> : vector<1xf32>
    %1374 = vector.multi_reduction <add>, %1373, %cst_325 [1] : vector<1x5xf32> to vector<1xf32>
    %1375 = vector.shape_cast %1374 : vector<1xf32> to vector<1x1xf32>
    %1376 = tpu.reciprocal %1375 {approx = true} : vector<1x1xf32> -> vector<1x1xf32>
    %1377 = vector.broadcast %1376 : vector<1x1xf32> to vector<1x5xf32>
    %1378 = arith.mulf %1373, %1377 : vector<1x5xf32>
    %1379 = math.log %1375 : vector<1x1xf32>
    %1380 = vector.broadcast %1379 : vector<1x1xf32> to vector<1x5xf32>
    %1381 = arith.subf %1372, %1380 : vector<1x5xf32>
    %1382 = arith.mulf %1378, %1381 : vector<1x5xf32>
    %cst_326 = arith.constant dense<0.000000e+00> : vector<1xf32>
    %1383 = vector.multi_reduction <add>, %1382, %cst_326 [1] : vector<1x5xf32> to vector<1xf32>
    %1384 = vector.shape_cast %1383 : vector<1xf32> to vector<1x1xf32>
    %cst_327 = arith.constant 0.000000e+00 : f32
    %1385 = vector.broadcast %cst_327 : f32 to vector<1x1xf32>
    %1386 = arith.subf %1385, %1384 : vector<1x1xf32>
    %c0_i32_328 = arith.constant 0 : i32
    %1387 = vector.broadcast %c0_i32_328 : i32 to vector<1x1xi32>
    %cst_329 = arith.constant 0.000000e+00 : f32
    %1388 = vector.broadcast %cst_329 : f32 to vector<1x1xf32>
    %1389 = vector.extract_strided_slice %1378 {offsets = [0, 0], sizes = [1, 1], strides = [1, 1]} : vector<1x5xf32> to vector<1x1xf32>
    %1390 = arith.addf %1388, %1389 : vector<1x1xf32>
    %1391 = arith.cmpf ole, %1390, %1368 : vector<1x1xf32>
    %1392 = arith.extui %1391 : vector<1x1xi1> to vector<1x1xi32>
    %1393 = arith.addi %1387, %1392 : vector<1x1xi32>
    %1394 = vector.extract_strided_slice %1378 {offsets = [0, 1], sizes = [1, 1], strides = [1, 1]} : vector<1x5xf32> to vector<1x1xf32>
    %1395 = arith.addf %1390, %1394 : vector<1x1xf32>
    %1396 = arith.cmpf ole, %1395, %1368 : vector<1x1xf32>
    %1397 = arith.extui %1396 : vector<1x1xi1> to vector<1x1xi32>
    %1398 = arith.addi %1393, %1397 : vector<1x1xi32>
    %1399 = vector.extract_strided_slice %1378 {offsets = [0, 2], sizes = [1, 1], strides = [1, 1]} : vector<1x5xf32> to vector<1x1xf32>
    %1400 = arith.addf %1395, %1399 : vector<1x1xf32>
    %1401 = arith.cmpf ole, %1400, %1368 : vector<1x1xf32>
    %1402 = arith.extui %1401 : vector<1x1xi1> to vector<1x1xi32>
    %1403 = arith.addi %1398, %1402 : vector<1x1xi32>
    %1404 = vector.extract_strided_slice %1378 {offsets = [0, 3], sizes = [1, 1], strides = [1, 1]} : vector<1x5xf32> to vector<1x1xf32>
    %1405 = arith.addf %1400, %1404 : vector<1x1xf32>
    %1406 = arith.cmpf ole, %1405, %1368 : vector<1x1xf32>
    %1407 = arith.extui %1406 : vector<1x1xi1> to vector<1x1xi32>
    %1408 = arith.addi %1403, %1407 : vector<1x1xi32>
    %1409 = tpu.iota {dimensions = array<i32: 1>} : vector<1x5xi32>
    %1410 = vector.broadcast %1408 : vector<1x1xi32> to vector<1x5xi32>
    %1411 = arith.cmpi eq, %1409, %1410 : vector<1x5xi32>
    %1412 = arith.extui %1411 : vector<1x5xi1> to vector<1x5xi32>
    %1413 = arith.sitofp %1412 : vector<1x5xi32> to vector<1x5xf32>
    %1414 = arith.mulf %1413, %1381 : vector<1x5xf32>
    %cst_330 = arith.constant dense<0.000000e+00> : vector<1xf32>
    %1415 = vector.multi_reduction <add>, %1414, %cst_330 [1] : vector<1x5xf32> to vector<1xf32>
    %1416 = vector.shape_cast %1415 : vector<1xf32> to vector<1x1xf32>
    %cst_331 = arith.constant 0.000000e+00 : f32
    %1417 = vector.broadcast %cst_331 : f32 to vector<1x1xf32>
    %1418 = arith.subf %1417, %1416 : vector<1x1xf32>
    %1419 = arith.addf %1336, %1418 : vector<1x1xf32>
    %1420 = arith.addf %1337, %1386 : vector<1x1xf32>
    %c3_332 = arith.constant 3 : index
    %c0_333 = arith.constant 0 : index
    %1421 = vector.load %arg3[%c3_332, %c0_333] : memref<4x6xi32, #tpu.memory_space<vmem>>, vector<1x1xi32>
    tpu.vector_store %arg3[%c3_332, %c0_333], %1408 {strides = array<i32>} : memref<4x6xi32, #tpu.memory_space<vmem>>, vector<1x1xi32>,
    %c1_i32_334 = arith.constant 1 : i32
    %1422 = vector.broadcast %c1_i32_334 : i32 to vector<1x1xi32>
    %1423 = arith.addi %1408, %1422 : vector<1x1xi32>
    %1424 = vector.broadcast %1423 : vector<1x1xi32> to vector<1x6xi32>
    %1425 = arith.cmpi eq, %13, %1424 : vector<1x6xi32>
    %1426 = arith.extui %1425 : vector<1x6xi1> to vector<1x6xi32>
    %1427 = arith.sitofp %1426 : vector<1x6xi32> to vector<1x6xf32>
    %1428 = arith.truncf %1427 : vector<1x6xf32> to vector<1x6xbf16>
    %cst_335 = arith.constant dense<0.000000e+00> : vector<1x32xf32>
    %1429 = tpu.matmul %1428, %5, %cst_335 {dimension_numbers = #tpu.dot_dimension_numbers<[1], [0], [0], [1], [0, 0, 1, 1], [], []>} : vector<1x6xbf16>, vector<6x32xbf16>, vector<1x32xf32> -> vector<1x32xf32>
    %1430 = tpu.concatenate %1429, %1364 in 1 : vector<1x32xf32>, vector<1x32xf32> -> vector<1x64xf32>
    %1431 = arith.truncf %1430 : vector<1x64xf32> to vector<1x64xbf16>
    %cst_336 = arith.constant dense<0.000000e+00> : vector<1x128xf32>
    %1432 = tpu.matmul %1431, %0, %cst_336 {dimension_numbers = #tpu.dot_dimension_numbers<[1], [0], [0], [1], [0, 0, 1, 1], [], []>} : vector<1x64xbf16>, vector<64x128xbf16>, vector<1x128xf32> -> vector<1x128xf32>
    %1433 = arith.addf %1432, %6 : vector<1x128xf32>
    %1434 = vector.extract_strided_slice %1433 {offsets = [0, 0], sizes = [1, 96], strides = [1, 1]} : vector<1x128xf32> to vector<1x96xf32>
    %cst_337 = arith.constant 0.000000e+00 : f32
    %1435 = vector.broadcast %cst_337 : f32 to vector<1x96xf32>
    %1436 = arith.subf %1435, %1434 : vector<1x96xf32>
    %1437 = math.exp %1436 : vector<1x96xf32>
    %cst_338 = arith.constant 1.000000e+00 : f32
    %1438 = vector.broadcast %cst_338 : f32 to vector<1x96xf32>
    %1439 = arith.addf %1438, %1437 : vector<1x96xf32>
    %1440 = tpu.reciprocal %1439 {approx = true} : vector<1x96xf32> -> vector<1x96xf32>
    %1441 = vector.extract_strided_slice %1440 {offsets = [0, 0], sizes = [1, 32], strides = [1, 1]} : vector<1x96xf32> to vector<1x32xf32>
    %1442 = vector.extract_strided_slice %1440 {offsets = [0, 32], sizes = [1, 32], strides = [1, 1]} : vector<1x96xf32> to vector<1x32xf32>
    %1443 = vector.extract_strided_slice %1440 {offsets = [0, 64], sizes = [1, 32], strides = [1, 1]} : vector<1x96xf32> to vector<1x32xf32>
    %1444 = vector.extract_strided_slice %1433 {offsets = [0, 96], sizes = [1, 32], strides = [1, 1]} : vector<1x128xf32> to vector<1x32xf32>
    %1445 = math.tanh %1444 : vector<1x32xf32>
    %1446 = arith.mulf %1442, %1362 : vector<1x32xf32>
    %1447 = arith.mulf %1441, %1445 : vector<1x32xf32>
    %1448 = arith.addf %1446, %1447 : vector<1x32xf32>
    %1449 = math.tanh %1448 : vector<1x32xf32>
    %1450 = arith.mulf %1443, %1449 : vector<1x32xf32>
    %1451 = arith.truncf %1450 : vector<1x32xf32> to vector<1x32xbf16>
    %cst_339 = arith.constant dense<0.000000e+00> : vector<1x5xf32>
    %1452 = tpu.matmul %1451, %4, %cst_339 {dimension_numbers = #tpu.dot_dimension_numbers<[1], [0], [0], [1], [0, 0, 1, 1], [], []>} : vector<1x32xbf16>, vector<32x5xbf16>, vector<1x5xf32> -> vector<1x5xf32>
    %1453 = arith.addf %1452, %9 : vector<1x5xf32>
    %1454 = vector.extract_strided_slice %10 {offsets = [0, 15], sizes = [1, 1], strides = [1, 1]} : vector<1x24xf32> to vector<1x1xf32>
    %cst_340 = arith.constant dense<0xFF800000> : vector<1xf32>
    %1455 = vector.multi_reduction <maximumf>, %1453, %cst_340 [1] : vector<1x5xf32> to vector<1xf32>
    %1456 = vector.shape_cast %1455 : vector<1xf32> to vector<1x1xf32>
    %1457 = vector.broadcast %1456 : vector<1x1xf32> to vector<1x5xf32>
    %1458 = arith.subf %1453, %1457 : vector<1x5xf32>
    %1459 = math.exp %1458 : vector<1x5xf32>
    %cst_341 = arith.constant dense<0.000000e+00> : vector<1xf32>
    %1460 = vector.multi_reduction <add>, %1459, %cst_341 [1] : vector<1x5xf32> to vector<1xf32>
    %1461 = vector.shape_cast %1460 : vector<1xf32> to vector<1x1xf32>
    %1462 = tpu.reciprocal %1461 {approx = true} : vector<1x1xf32> -> vector<1x1xf32>
    %1463 = vector.broadcast %1462 : vector<1x1xf32> to vector<1x5xf32>
    %1464 = arith.mulf %1459, %1463 : vector<1x5xf32>
    %1465 = math.log %1461 : vector<1x1xf32>
    %1466 = vector.broadcast %1465 : vector<1x1xf32> to vector<1x5xf32>
    %1467 = arith.subf %1458, %1466 : vector<1x5xf32>
    %1468 = arith.mulf %1464, %1467 : vector<1x5xf32>
    %cst_342 = arith.constant dense<0.000000e+00> : vector<1xf32>
    %1469 = vector.multi_reduction <add>, %1468, %cst_342 [1] : vector<1x5xf32> to vector<1xf32>
    %1470 = vector.shape_cast %1469 : vector<1xf32> to vector<1x1xf32>
    %cst_343 = arith.constant 0.000000e+00 : f32
    %1471 = vector.broadcast %cst_343 : f32 to vector<1x1xf32>
    %1472 = arith.subf %1471, %1470 : vector<1x1xf32>
    %c0_i32_344 = arith.constant 0 : i32
    %1473 = vector.broadcast %c0_i32_344 : i32 to vector<1x1xi32>
    %cst_345 = arith.constant 0.000000e+00 : f32
    %1474 = vector.broadcast %cst_345 : f32 to vector<1x1xf32>
    %1475 = vector.extract_strided_slice %1464 {offsets = [0, 0], sizes = [1, 1], strides = [1, 1]} : vector<1x5xf32> to vector<1x1xf32>
    %1476 = arith.addf %1474, %1475 : vector<1x1xf32>
    %1477 = arith.cmpf ole, %1476, %1454 : vector<1x1xf32>
    %1478 = arith.extui %1477 : vector<1x1xi1> to vector<1x1xi32>
    %1479 = arith.addi %1473, %1478 : vector<1x1xi32>
    %1480 = vector.extract_strided_slice %1464 {offsets = [0, 1], sizes = [1, 1], strides = [1, 1]} : vector<1x5xf32> to vector<1x1xf32>
    %1481 = arith.addf %1476, %1480 : vector<1x1xf32>
    %1482 = arith.cmpf ole, %1481, %1454 : vector<1x1xf32>
    %1483 = arith.extui %1482 : vector<1x1xi1> to vector<1x1xi32>
    %1484 = arith.addi %1479, %1483 : vector<1x1xi32>
    %1485 = vector.extract_strided_slice %1464 {offsets = [0, 2], sizes = [1, 1], strides = [1, 1]} : vector<1x5xf32> to vector<1x1xf32>
    %1486 = arith.addf %1481, %1485 : vector<1x1xf32>
    %1487 = arith.cmpf ole, %1486, %1454 : vector<1x1xf32>
    %1488 = arith.extui %1487 : vector<1x1xi1> to vector<1x1xi32>
    %1489 = arith.addi %1484, %1488 : vector<1x1xi32>
    %1490 = vector.extract_strided_slice %1464 {offsets = [0, 3], sizes = [1, 1], strides = [1, 1]} : vector<1x5xf32> to vector<1x1xf32>
    %1491 = arith.addf %1486, %1490 : vector<1x1xf32>
    %1492 = arith.cmpf ole, %1491, %1454 : vector<1x1xf32>
    %1493 = arith.extui %1492 : vector<1x1xi1> to vector<1x1xi32>
    %1494 = arith.addi %1489, %1493 : vector<1x1xi32>
    %1495 = tpu.iota {dimensions = array<i32: 1>} : vector<1x5xi32>
    %1496 = vector.broadcast %1494 : vector<1x1xi32> to vector<1x5xi32>
    %1497 = arith.cmpi eq, %1495, %1496 : vector<1x5xi32>
    %1498 = arith.extui %1497 : vector<1x5xi1> to vector<1x5xi32>
    %1499 = arith.sitofp %1498 : vector<1x5xi32> to vector<1x5xf32>
    %1500 = arith.mulf %1499, %1467 : vector<1x5xf32>
    %cst_346 = arith.constant dense<0.000000e+00> : vector<1xf32>
    %1501 = vector.multi_reduction <add>, %1500, %cst_346 [1] : vector<1x5xf32> to vector<1xf32>
    %1502 = vector.shape_cast %1501 : vector<1xf32> to vector<1x1xf32>
    %cst_347 = arith.constant 0.000000e+00 : f32
    %1503 = vector.broadcast %cst_347 : f32 to vector<1x1xf32>
    %1504 = arith.subf %1503, %1502 : vector<1x1xf32>
    %1505 = arith.addf %1419, %1504 : vector<1x1xf32>
    %1506 = arith.addf %1420, %1472 : vector<1x1xf32>
    %c3_348 = arith.constant 3 : index
    %c1_349 = arith.constant 1 : index
    %1507 = vector.load %arg3[%c3_348, %c1_349] : memref<4x6xi32, #tpu.memory_space<vmem>>, vector<1x1xi32>
    tpu.vector_store %arg3[%c3_348, %c1_349], %1494 {strides = array<i32>} : memref<4x6xi32, #tpu.memory_space<vmem>>, vector<1x1xi32>,
    %c1_i32_350 = arith.constant 1 : i32
    %1508 = vector.broadcast %c1_i32_350 : i32 to vector<1x1xi32>
    %1509 = arith.addi %1494, %1508 : vector<1x1xi32>
    %1510 = vector.broadcast %1509 : vector<1x1xi32> to vector<1x6xi32>
    %1511 = arith.cmpi eq, %13, %1510 : vector<1x6xi32>
    %1512 = arith.extui %1511 : vector<1x6xi1> to vector<1x6xi32>
    %1513 = arith.sitofp %1512 : vector<1x6xi32> to vector<1x6xf32>
    %1514 = arith.truncf %1513 : vector<1x6xf32> to vector<1x6xbf16>
    %cst_351 = arith.constant dense<0.000000e+00> : vector<1x32xf32>
    %1515 = tpu.matmul %1514, %5, %cst_351 {dimension_numbers = #tpu.dot_dimension_numbers<[1], [0], [0], [1], [0, 0, 1, 1], [], []>} : vector<1x6xbf16>, vector<6x32xbf16>, vector<1x32xf32> -> vector<1x32xf32>
    %1516 = tpu.concatenate %1515, %1450 in 1 : vector<1x32xf32>, vector<1x32xf32> -> vector<1x64xf32>
    %1517 = arith.truncf %1516 : vector<1x64xf32> to vector<1x64xbf16>
    %cst_352 = arith.constant dense<0.000000e+00> : vector<1x128xf32>
    %1518 = tpu.matmul %1517, %0, %cst_352 {dimension_numbers = #tpu.dot_dimension_numbers<[1], [0], [0], [1], [0, 0, 1, 1], [], []>} : vector<1x64xbf16>, vector<64x128xbf16>, vector<1x128xf32> -> vector<1x128xf32>
    %1519 = arith.addf %1518, %6 : vector<1x128xf32>
    %1520 = vector.extract_strided_slice %1519 {offsets = [0, 0], sizes = [1, 96], strides = [1, 1]} : vector<1x128xf32> to vector<1x96xf32>
    %cst_353 = arith.constant 0.000000e+00 : f32
    %1521 = vector.broadcast %cst_353 : f32 to vector<1x96xf32>
    %1522 = arith.subf %1521, %1520 : vector<1x96xf32>
    %1523 = math.exp %1522 : vector<1x96xf32>
    %cst_354 = arith.constant 1.000000e+00 : f32
    %1524 = vector.broadcast %cst_354 : f32 to vector<1x96xf32>
    %1525 = arith.addf %1524, %1523 : vector<1x96xf32>
    %1526 = tpu.reciprocal %1525 {approx = true} : vector<1x96xf32> -> vector<1x96xf32>
    %1527 = vector.extract_strided_slice %1526 {offsets = [0, 0], sizes = [1, 32], strides = [1, 1]} : vector<1x96xf32> to vector<1x32xf32>
    %1528 = vector.extract_strided_slice %1526 {offsets = [0, 32], sizes = [1, 32], strides = [1, 1]} : vector<1x96xf32> to vector<1x32xf32>
    %1529 = vector.extract_strided_slice %1526 {offsets = [0, 64], sizes = [1, 32], strides = [1, 1]} : vector<1x96xf32> to vector<1x32xf32>
    %1530 = vector.extract_strided_slice %1519 {offsets = [0, 96], sizes = [1, 32], strides = [1, 1]} : vector<1x128xf32> to vector<1x32xf32>
    %1531 = math.tanh %1530 : vector<1x32xf32>
    %1532 = arith.mulf %1528, %1448 : vector<1x32xf32>
    %1533 = arith.mulf %1527, %1531 : vector<1x32xf32>
    %1534 = arith.addf %1532, %1533 : vector<1x32xf32>
    %1535 = math.tanh %1534 : vector<1x32xf32>
    %1536 = arith.mulf %1529, %1535 : vector<1x32xf32>
    %c2_355 = arith.constant 2 : index
    %c0_356 = arith.constant 0 : index
    %1537 = vector.load %arg6[%c2_355, %c0_356] : memref<5x32xf32, #tpu.memory_space<vmem>>, vector<1x32xf32>
    tpu.vector_store %arg6[%c2_355, %c0_356], %1536 {strides = array<i32>} : memref<5x32xf32, #tpu.memory_space<vmem>>, vector<1x32xf32>,
    %1538 = arith.truncf %1536 : vector<1x32xf32> to vector<1x32xbf16>
    %cst_357 = arith.constant dense<0.000000e+00> : vector<1x32xf32>
    %1539 = tpu.matmul %1538, %2, %cst_357 {dimension_numbers = #tpu.dot_dimension_numbers<[1], [0], [0], [1], [0, 0, 1, 1], [], []>} : vector<1x32xbf16>, vector<32x32xbf16>, vector<1x32xf32> -> vector<1x32xf32>
    %c2_358 = arith.constant 2 : index
    %c0_359 = arith.constant 0 : index
    %1540 = vector.load %arg7[%c2_358, %c0_359] : memref<5x32xf32, #tpu.memory_space<vmem>>, vector<1x32xf32>
    tpu.vector_store %arg7[%c2_358, %c0_359], %1539 {strides = array<i32>} : memref<5x32xf32, #tpu.memory_space<vmem>>, vector<1x32xf32>,
    %1541 = tpu.concatenate %12, %1536 in 1 : vector<1x32xf32>, vector<1x32xf32> -> vector<1x64xf32>
    %1542 = arith.truncf %1541 : vector<1x64xf32> to vector<1x64xbf16>
    %cst_360 = arith.constant dense<0.000000e+00> : vector<1x128xf32>
    %1543 = tpu.matmul %1542, %0, %cst_360 {dimension_numbers = #tpu.dot_dimension_numbers<[1], [0], [0], [1], [0, 0, 1, 1], [], []>} : vector<1x64xbf16>, vector<64x128xbf16>, vector<1x128xf32> -> vector<1x128xf32>
    %1544 = arith.addf %1543, %6 : vector<1x128xf32>
    %1545 = vector.extract_strided_slice %1544 {offsets = [0, 0], sizes = [1, 96], strides = [1, 1]} : vector<1x128xf32> to vector<1x96xf32>
    %cst_361 = arith.constant 0.000000e+00 : f32
    %1546 = vector.broadcast %cst_361 : f32 to vector<1x96xf32>
    %1547 = arith.subf %1546, %1545 : vector<1x96xf32>
    %1548 = math.exp %1547 : vector<1x96xf32>
    %cst_362 = arith.constant 1.000000e+00 : f32
    %1549 = vector.broadcast %cst_362 : f32 to vector<1x96xf32>
    %1550 = arith.addf %1549, %1548 : vector<1x96xf32>
    %1551 = tpu.reciprocal %1550 {approx = true} : vector<1x96xf32> -> vector<1x96xf32>
    %1552 = vector.extract_strided_slice %1551 {offsets = [0, 0], sizes = [1, 32], strides = [1, 1]} : vector<1x96xf32> to vector<1x32xf32>
    %1553 = vector.extract_strided_slice %1551 {offsets = [0, 32], sizes = [1, 32], strides = [1, 1]} : vector<1x96xf32> to vector<1x32xf32>
    %1554 = vector.extract_strided_slice %1551 {offsets = [0, 64], sizes = [1, 32], strides = [1, 1]} : vector<1x96xf32> to vector<1x32xf32>
    %1555 = vector.extract_strided_slice %1544 {offsets = [0, 96], sizes = [1, 32], strides = [1, 1]} : vector<1x128xf32> to vector<1x32xf32>
    %1556 = math.tanh %1555 : vector<1x32xf32>
    %1557 = arith.mulf %1553, %1534 : vector<1x32xf32>
    %1558 = arith.mulf %1552, %1556 : vector<1x32xf32>
    %1559 = arith.addf %1557, %1558 : vector<1x32xf32>
    %1560 = math.tanh %1559 : vector<1x32xf32>
    %1561 = arith.mulf %1554, %1560 : vector<1x32xf32>
    %c0_363 = arith.constant 0 : index
    %c0_364 = arith.constant 0 : index
    %1562 = vector.load %arg7[%c0_363, %c0_364] : memref<5x32xf32, #tpu.memory_space<vmem>>, vector<3x32xf32>
    %1563 = arith.truncf %1561 : vector<1x32xf32> to vector<1x32xbf16>
    %cst_365 = arith.constant dense<0.000000e+00> : vector<1x32xf32>
    %1564 = tpu.matmul %1563, %3, %cst_365 {dimension_numbers = #tpu.dot_dimension_numbers<[1], [0], [0], [1], [0, 0, 1, 1], [], []>} : vector<1x32xbf16>, vector<32x32xbf16>, vector<1x32xf32> -> vector<1x32xf32>
    %1565 = vector.broadcast %1564 : vector<1x32xf32> to vector<3x32xf32>
    %1566 = arith.addf %1565, %1562 : vector<3x32xf32>
    %1567 = math.tanh %1566 : vector<3x32xf32>
    %1568 = vector.broadcast %8 : vector<1x32xf32> to vector<3x32xf32>
    %1569 = arith.mulf %1567, %1568 : vector<3x32xf32>
    %cst_366 = arith.constant dense<0.000000e+00> : vector<3xf32>
    %1570 = vector.multi_reduction <add>, %1569, %cst_366 [1] : vector<3x32xf32> to vector<3xf32>
    %1571 = vector.shape_cast %1570 : vector<3xf32> to vector<3x1xf32>
    %1572 = vector.extract_strided_slice %10 {offsets = [0, 16], sizes = [1, 1], strides = [1, 1]} : vector<1x24xf32> to vector<1x1xf32>
    %cst_367 = arith.constant dense<0xFF800000> : vector<1xf32>
    %1573 = vector.multi_reduction <maximumf>, %1571, %cst_367 [0] : vector<3x1xf32> to vector<1xf32>
    %1574 = vector.shape_cast %1573 : vector<1xf32> to vector<1x1xf32>
    %1575 = vector.broadcast %1574 : vector<1x1xf32> to vector<3x1xf32>
    %1576 = arith.subf %1571, %1575 : vector<3x1xf32>
    %1577 = math.exp %1576 : vector<3x1xf32>
    %cst_368 = arith.constant dense<0.000000e+00> : vector<1xf32>
    %1578 = vector.multi_reduction <add>, %1577, %cst_368 [0] : vector<3x1xf32> to vector<1xf32>
    %1579 = vector.shape_cast %1578 : vector<1xf32> to vector<1x1xf32>
    %1580 = tpu.reciprocal %1579 {approx = true} : vector<1x1xf32> -> vector<1x1xf32>
    %1581 = vector.broadcast %1580 : vector<1x1xf32> to vector<3x1xf32>
    %1582 = arith.mulf %1577, %1581 : vector<3x1xf32>
    %1583 = math.log %1579 : vector<1x1xf32>
    %1584 = vector.broadcast %1583 : vector<1x1xf32> to vector<3x1xf32>
    %1585 = arith.subf %1576, %1584 : vector<3x1xf32>
    %1586 = arith.mulf %1582, %1585 : vector<3x1xf32>
    %cst_369 = arith.constant dense<0.000000e+00> : vector<1xf32>
    %1587 = vector.multi_reduction <add>, %1586, %cst_369 [0] : vector<3x1xf32> to vector<1xf32>
    %1588 = vector.shape_cast %1587 : vector<1xf32> to vector<1x1xf32>
    %cst_370 = arith.constant 0.000000e+00 : f32
    %1589 = vector.broadcast %cst_370 : f32 to vector<1x1xf32>
    %1590 = arith.subf %1589, %1588 : vector<1x1xf32>
    %c0_i32_371 = arith.constant 0 : i32
    %1591 = vector.broadcast %c0_i32_371 : i32 to vector<1x1xi32>
    %cst_372 = arith.constant 0.000000e+00 : f32
    %1592 = vector.broadcast %cst_372 : f32 to vector<1x1xf32>
    %1593 = vector.extract_strided_slice %1582 {offsets = [0, 0], sizes = [1, 1], strides = [1, 1]} : vector<3x1xf32> to vector<1x1xf32>
    %1594 = arith.addf %1592, %1593 : vector<1x1xf32>
    %1595 = arith.cmpf ole, %1594, %1572 : vector<1x1xf32>
    %1596 = arith.extui %1595 : vector<1x1xi1> to vector<1x1xi32>
    %1597 = arith.addi %1591, %1596 : vector<1x1xi32>
    %1598 = vector.extract_strided_slice %1582 {offsets = [1, 0], sizes = [1, 1], strides = [1, 1]} : vector<3x1xf32> to vector<1x1xf32>
    %1599 = arith.addf %1594, %1598 : vector<1x1xf32>
    %1600 = arith.cmpf ole, %1599, %1572 : vector<1x1xf32>
    %1601 = arith.extui %1600 : vector<1x1xi1> to vector<1x1xi32>
    %1602 = arith.addi %1597, %1601 : vector<1x1xi32>
    %1603 = tpu.iota {dimensions = array<i32: 0>} : vector<3x1xi32>
    %1604 = vector.broadcast %1602 : vector<1x1xi32> to vector<3x1xi32>
    %1605 = arith.cmpi eq, %1603, %1604 : vector<3x1xi32>
    %1606 = arith.extui %1605 : vector<3x1xi1> to vector<3x1xi32>
    %1607 = arith.sitofp %1606 : vector<3x1xi32> to vector<3x1xf32>
    %1608 = arith.mulf %1607, %1585 : vector<3x1xf32>
    %cst_373 = arith.constant dense<0.000000e+00> : vector<1xf32>
    %1609 = vector.multi_reduction <add>, %1608, %cst_373 [0] : vector<3x1xf32> to vector<1xf32>
    %1610 = vector.shape_cast %1609 : vector<1xf32> to vector<1x1xf32>
    %cst_374 = arith.constant 0.000000e+00 : f32
    %1611 = vector.broadcast %cst_374 : f32 to vector<1x1xf32>
    %1612 = arith.subf %1611, %1610 : vector<1x1xf32>
    %1613 = arith.addf %1505, %1612 : vector<1x1xf32>
    %1614 = arith.addf %1506, %1590 : vector<1x1xf32>
    %c2_375 = arith.constant 2 : index
    %c2_376 = arith.constant 2 : index
    %1615 = vector.load %arg3[%c2_375, %c2_376] : memref<4x6xi32, #tpu.memory_space<vmem>>, vector<1x1xi32>
    tpu.vector_store %arg3[%c2_375, %c2_376], %1602 {strides = array<i32>} : memref<4x6xi32, #tpu.memory_space<vmem>>, vector<1x1xi32>,
    %c0_377 = arith.constant 0 : index
    %c0_378 = arith.constant 0 : index
    %1616 = vector.load %arg6[%c0_377, %c0_378] : memref<5x32xf32, #tpu.memory_space<vmem>>, vector<3x32xf32>
    %1617 = vector.broadcast %1607 : vector<3x1xf32> to vector<3x32xf32>
    %1618 = arith.mulf %1617, %1616 : vector<3x32xf32>
    %cst_379 = arith.constant dense<0.000000e+00> : vector<32xf32>
    %1619 = vector.multi_reduction <add>, %1618, %cst_379 [0] : vector<3x32xf32> to vector<32xf32>
    %1620 = vector.shape_cast %1619 : vector<32xf32> to vector<1x32xf32>
    %1621 = tpu.concatenate %1620, %1561 in 1 : vector<1x32xf32>, vector<1x32xf32> -> vector<1x64xf32>
    %1622 = arith.truncf %1621 : vector<1x64xf32> to vector<1x64xbf16>
    %cst_380 = arith.constant dense<0.000000e+00> : vector<1x128xf32>
    %1623 = tpu.matmul %1622, %0, %cst_380 {dimension_numbers = #tpu.dot_dimension_numbers<[1], [0], [0], [1], [0, 0, 1, 1], [], []>} : vector<1x64xbf16>, vector<64x128xbf16>, vector<1x128xf32> -> vector<1x128xf32>
    %1624 = arith.addf %1623, %6 : vector<1x128xf32>
    %1625 = vector.extract_strided_slice %1624 {offsets = [0, 0], sizes = [1, 96], strides = [1, 1]} : vector<1x128xf32> to vector<1x96xf32>
    %cst_381 = arith.constant 0.000000e+00 : f32
    %1626 = vector.broadcast %cst_381 : f32 to vector<1x96xf32>
    %1627 = arith.subf %1626, %1625 : vector<1x96xf32>
    %1628 = math.exp %1627 : vector<1x96xf32>
    %cst_382 = arith.constant 1.000000e+00 : f32
    %1629 = vector.broadcast %cst_382 : f32 to vector<1x96xf32>
    %1630 = arith.addf %1629, %1628 : vector<1x96xf32>
    %1631 = tpu.reciprocal %1630 {approx = true} : vector<1x96xf32> -> vector<1x96xf32>
    %1632 = vector.extract_strided_slice %1631 {offsets = [0, 0], sizes = [1, 32], strides = [1, 1]} : vector<1x96xf32> to vector<1x32xf32>
    %1633 = vector.extract_strided_slice %1631 {offsets = [0, 32], sizes = [1, 32], strides = [1, 1]} : vector<1x96xf32> to vector<1x32xf32>
    %1634 = vector.extract_strided_slice %1631 {offsets = [0, 64], sizes = [1, 32], strides = [1, 1]} : vector<1x96xf32> to vector<1x32xf32>
    %1635 = vector.extract_strided_slice %1624 {offsets = [0, 96], sizes = [1, 32], strides = [1, 1]} : vector<1x128xf32> to vector<1x32xf32>
    %1636 = math.tanh %1635 : vector<1x32xf32>
    %1637 = arith.mulf %1633, %1559 : vector<1x32xf32>
    %1638 = arith.mulf %1632, %1636 : vector<1x32xf32>
    %1639 = arith.addf %1637, %1638 : vector<1x32xf32>
    %1640 = math.tanh %1639 : vector<1x32xf32>
    %1641 = arith.mulf %1634, %1640 : vector<1x32xf32>
    %c0_383 = arith.constant 0 : index
    %c0_384 = arith.constant 0 : index
    %1642 = vector.load %arg7[%c0_383, %c0_384] : memref<5x32xf32, #tpu.memory_space<vmem>>, vector<3x32xf32>
    %1643 = arith.truncf %1641 : vector<1x32xf32> to vector<1x32xbf16>
    %cst_385 = arith.constant dense<0.000000e+00> : vector<1x32xf32>
    %1644 = tpu.matmul %1643, %3, %cst_385 {dimension_numbers = #tpu.dot_dimension_numbers<[1], [0], [0], [1], [0, 0, 1, 1], [], []>} : vector<1x32xbf16>, vector<32x32xbf16>, vector<1x32xf32> -> vector<1x32xf32>
    %1645 = vector.broadcast %1644 : vector<1x32xf32> to vector<3x32xf32>
    %1646 = arith.addf %1645, %1642 : vector<3x32xf32>
    %1647 = math.tanh %1646 : vector<3x32xf32>
    %1648 = vector.broadcast %8 : vector<1x32xf32> to vector<3x32xf32>
    %1649 = arith.mulf %1647, %1648 : vector<3x32xf32>
    %cst_386 = arith.constant dense<0.000000e+00> : vector<3xf32>
    %1650 = vector.multi_reduction <add>, %1649, %cst_386 [1] : vector<3x32xf32> to vector<3xf32>
    %1651 = vector.shape_cast %1650 : vector<3xf32> to vector<3x1xf32>
    %1652 = vector.extract_strided_slice %10 {offsets = [0, 17], sizes = [1, 1], strides = [1, 1]} : vector<1x24xf32> to vector<1x1xf32>
    %cst_387 = arith.constant dense<0xFF800000> : vector<1xf32>
    %1653 = vector.multi_reduction <maximumf>, %1651, %cst_387 [0] : vector<3x1xf32> to vector<1xf32>
    %1654 = vector.shape_cast %1653 : vector<1xf32> to vector<1x1xf32>
    %1655 = vector.broadcast %1654 : vector<1x1xf32> to vector<3x1xf32>
    %1656 = arith.subf %1651, %1655 : vector<3x1xf32>
    %1657 = math.exp %1656 : vector<3x1xf32>
    %cst_388 = arith.constant dense<0.000000e+00> : vector<1xf32>
    %1658 = vector.multi_reduction <add>, %1657, %cst_388 [0] : vector<3x1xf32> to vector<1xf32>
    %1659 = vector.shape_cast %1658 : vector<1xf32> to vector<1x1xf32>
    %1660 = tpu.reciprocal %1659 {approx = true} : vector<1x1xf32> -> vector<1x1xf32>
    %1661 = vector.broadcast %1660 : vector<1x1xf32> to vector<3x1xf32>
    %1662 = arith.mulf %1657, %1661 : vector<3x1xf32>
    %1663 = math.log %1659 : vector<1x1xf32>
    %1664 = vector.broadcast %1663 : vector<1x1xf32> to vector<3x1xf32>
    %1665 = arith.subf %1656, %1664 : vector<3x1xf32>
    %1666 = arith.mulf %1662, %1665 : vector<3x1xf32>
    %cst_389 = arith.constant dense<0.000000e+00> : vector<1xf32>
    %1667 = vector.multi_reduction <add>, %1666, %cst_389 [0] : vector<3x1xf32> to vector<1xf32>
    %1668 = vector.shape_cast %1667 : vector<1xf32> to vector<1x1xf32>
    %cst_390 = arith.constant 0.000000e+00 : f32
    %1669 = vector.broadcast %cst_390 : f32 to vector<1x1xf32>
    %1670 = arith.subf %1669, %1668 : vector<1x1xf32>
    %c0_i32_391 = arith.constant 0 : i32
    %1671 = vector.broadcast %c0_i32_391 : i32 to vector<1x1xi32>
    %cst_392 = arith.constant 0.000000e+00 : f32
    %1672 = vector.broadcast %cst_392 : f32 to vector<1x1xf32>
    %1673 = vector.extract_strided_slice %1662 {offsets = [0, 0], sizes = [1, 1], strides = [1, 1]} : vector<3x1xf32> to vector<1x1xf32>
    %1674 = arith.addf %1672, %1673 : vector<1x1xf32>
    %1675 = arith.cmpf ole, %1674, %1652 : vector<1x1xf32>
    %1676 = arith.extui %1675 : vector<1x1xi1> to vector<1x1xi32>
    %1677 = arith.addi %1671, %1676 : vector<1x1xi32>
    %1678 = vector.extract_strided_slice %1662 {offsets = [1, 0], sizes = [1, 1], strides = [1, 1]} : vector<3x1xf32> to vector<1x1xf32>
    %1679 = arith.addf %1674, %1678 : vector<1x1xf32>
    %1680 = arith.cmpf ole, %1679, %1652 : vector<1x1xf32>
    %1681 = arith.extui %1680 : vector<1x1xi1> to vector<1x1xi32>
    %1682 = arith.addi %1677, %1681 : vector<1x1xi32>
    %1683 = tpu.iota {dimensions = array<i32: 0>} : vector<3x1xi32>
    %1684 = vector.broadcast %1682 : vector<1x1xi32> to vector<3x1xi32>
    %1685 = arith.cmpi eq, %1683, %1684 : vector<3x1xi32>
    %1686 = arith.extui %1685 : vector<3x1xi1> to vector<3x1xi32>
    %1687 = arith.sitofp %1686 : vector<3x1xi32> to vector<3x1xf32>
    %1688 = arith.mulf %1687, %1665 : vector<3x1xf32>
    %cst_393 = arith.constant dense<0.000000e+00> : vector<1xf32>
    %1689 = vector.multi_reduction <add>, %1688, %cst_393 [0] : vector<3x1xf32> to vector<1xf32>
    %1690 = vector.shape_cast %1689 : vector<1xf32> to vector<1x1xf32>
    %cst_394 = arith.constant 0.000000e+00 : f32
    %1691 = vector.broadcast %cst_394 : f32 to vector<1x1xf32>
    %1692 = arith.subf %1691, %1690 : vector<1x1xf32>
    %1693 = arith.addf %1613, %1692 : vector<1x1xf32>
    %1694 = arith.addf %1614, %1670 : vector<1x1xf32>
    %c2_395 = arith.constant 2 : index
    %c3_396 = arith.constant 3 : index
    %1695 = vector.load %arg3[%c2_395, %c3_396] : memref<4x6xi32, #tpu.memory_space<vmem>>, vector<1x1xi32>
    tpu.vector_store %arg3[%c2_395, %c3_396], %1682 {strides = array<i32>} : memref<4x6xi32, #tpu.memory_space<vmem>>, vector<1x1xi32>,
    %c0_397 = arith.constant 0 : index
    %c0_398 = arith.constant 0 : index
    %1696 = vector.load %arg6[%c0_397, %c0_398] : memref<5x32xf32, #tpu.memory_space<vmem>>, vector<3x32xf32>
    %1697 = vector.broadcast %1687 : vector<3x1xf32> to vector<3x32xf32>
    %1698 = arith.mulf %1697, %1696 : vector<3x32xf32>
    %cst_399 = arith.constant dense<0.000000e+00> : vector<32xf32>
    %1699 = vector.multi_reduction <add>, %1698, %cst_399 [0] : vector<3x32xf32> to vector<32xf32>
    %1700 = vector.shape_cast %1699 : vector<32xf32> to vector<1x32xf32>
    %1701 = tpu.concatenate %1700, %1641 in 1 : vector<1x32xf32>, vector<1x32xf32> -> vector<1x64xf32>
    %1702 = arith.truncf %1701 : vector<1x64xf32> to vector<1x64xbf16>
    %cst_400 = arith.constant dense<0.000000e+00> : vector<1x128xf32>
    %1703 = tpu.matmul %1702, %0, %cst_400 {dimension_numbers = #tpu.dot_dimension_numbers<[1], [0], [0], [1], [0, 0, 1, 1], [], []>} : vector<1x64xbf16>, vector<64x128xbf16>, vector<1x128xf32> -> vector<1x128xf32>
    %1704 = arith.addf %1703, %6 : vector<1x128xf32>
    %1705 = vector.extract_strided_slice %1704 {offsets = [0, 0], sizes = [1, 96], strides = [1, 1]} : vector<1x128xf32> to vector<1x96xf32>
    %cst_401 = arith.constant 0.000000e+00 : f32
    %1706 = vector.broadcast %cst_401 : f32 to vector<1x96xf32>
    %1707 = arith.subf %1706, %1705 : vector<1x96xf32>
    %1708 = math.exp %1707 : vector<1x96xf32>
    %cst_402 = arith.constant 1.000000e+00 : f32
    %1709 = vector.broadcast %cst_402 : f32 to vector<1x96xf32>
    %1710 = arith.addf %1709, %1708 : vector<1x96xf32>
    %1711 = tpu.reciprocal %1710 {approx = true} : vector<1x96xf32> -> vector<1x96xf32>
    %1712 = vector.extract_strided_slice %1711 {offsets = [0, 0], sizes = [1, 32], strides = [1, 1]} : vector<1x96xf32> to vector<1x32xf32>
    %1713 = vector.extract_strided_slice %1711 {offsets = [0, 32], sizes = [1, 32], strides = [1, 1]} : vector<1x96xf32> to vector<1x32xf32>
    %1714 = vector.extract_strided_slice %1711 {offsets = [0, 64], sizes = [1, 32], strides = [1, 1]} : vector<1x96xf32> to vector<1x32xf32>
    %1715 = vector.extract_strided_slice %1704 {offsets = [0, 96], sizes = [1, 32], strides = [1, 1]} : vector<1x128xf32> to vector<1x32xf32>
    %1716 = math.tanh %1715 : vector<1x32xf32>
    %1717 = arith.mulf %1713, %1639 : vector<1x32xf32>
    %1718 = arith.mulf %1712, %1716 : vector<1x32xf32>
    %1719 = arith.addf %1717, %1718 : vector<1x32xf32>
    %1720 = math.tanh %1719 : vector<1x32xf32>
    %1721 = arith.mulf %1714, %1720 : vector<1x32xf32>
    %1722 = arith.truncf %1721 : vector<1x32xf32> to vector<1x32xbf16>
    %cst_403 = arith.constant dense<0.000000e+00> : vector<1x5xf32>
    %1723 = tpu.matmul %1722, %4, %cst_403 {dimension_numbers = #tpu.dot_dimension_numbers<[1], [0], [0], [1], [0, 0, 1, 1], [], []>} : vector<1x32xbf16>, vector<32x5xbf16>, vector<1x5xf32> -> vector<1x5xf32>
    %1724 = arith.addf %1723, %9 : vector<1x5xf32>
    %1725 = vector.extract_strided_slice %10 {offsets = [0, 18], sizes = [1, 1], strides = [1, 1]} : vector<1x24xf32> to vector<1x1xf32>
    %cst_404 = arith.constant dense<0xFF800000> : vector<1xf32>
    %1726 = vector.multi_reduction <maximumf>, %1724, %cst_404 [1] : vector<1x5xf32> to vector<1xf32>
    %1727 = vector.shape_cast %1726 : vector<1xf32> to vector<1x1xf32>
    %1728 = vector.broadcast %1727 : vector<1x1xf32> to vector<1x5xf32>
    %1729 = arith.subf %1724, %1728 : vector<1x5xf32>
    %1730 = math.exp %1729 : vector<1x5xf32>
    %cst_405 = arith.constant dense<0.000000e+00> : vector<1xf32>
    %1731 = vector.multi_reduction <add>, %1730, %cst_405 [1] : vector<1x5xf32> to vector<1xf32>
    %1732 = vector.shape_cast %1731 : vector<1xf32> to vector<1x1xf32>
    %1733 = tpu.reciprocal %1732 {approx = true} : vector<1x1xf32> -> vector<1x1xf32>
    %1734 = vector.broadcast %1733 : vector<1x1xf32> to vector<1x5xf32>
    %1735 = arith.mulf %1730, %1734 : vector<1x5xf32>
    %1736 = math.log %1732 : vector<1x1xf32>
    %1737 = vector.broadcast %1736 : vector<1x1xf32> to vector<1x5xf32>
    %1738 = arith.subf %1729, %1737 : vector<1x5xf32>
    %1739 = arith.mulf %1735, %1738 : vector<1x5xf32>
    %cst_406 = arith.constant dense<0.000000e+00> : vector<1xf32>
    %1740 = vector.multi_reduction <add>, %1739, %cst_406 [1] : vector<1x5xf32> to vector<1xf32>
    %1741 = vector.shape_cast %1740 : vector<1xf32> to vector<1x1xf32>
    %cst_407 = arith.constant 0.000000e+00 : f32
    %1742 = vector.broadcast %cst_407 : f32 to vector<1x1xf32>
    %1743 = arith.subf %1742, %1741 : vector<1x1xf32>
    %c0_i32_408 = arith.constant 0 : i32
    %1744 = vector.broadcast %c0_i32_408 : i32 to vector<1x1xi32>
    %cst_409 = arith.constant 0.000000e+00 : f32
    %1745 = vector.broadcast %cst_409 : f32 to vector<1x1xf32>
    %1746 = vector.extract_strided_slice %1735 {offsets = [0, 0], sizes = [1, 1], strides = [1, 1]} : vector<1x5xf32> to vector<1x1xf32>
    %1747 = arith.addf %1745, %1746 : vector<1x1xf32>
    %1748 = arith.cmpf ole, %1747, %1725 : vector<1x1xf32>
    %1749 = arith.extui %1748 : vector<1x1xi1> to vector<1x1xi32>
    %1750 = arith.addi %1744, %1749 : vector<1x1xi32>
    %1751 = vector.extract_strided_slice %1735 {offsets = [0, 1], sizes = [1, 1], strides = [1, 1]} : vector<1x5xf32> to vector<1x1xf32>
    %1752 = arith.addf %1747, %1751 : vector<1x1xf32>
    %1753 = arith.cmpf ole, %1752, %1725 : vector<1x1xf32>
    %1754 = arith.extui %1753 : vector<1x1xi1> to vector<1x1xi32>
    %1755 = arith.addi %1750, %1754 : vector<1x1xi32>
    %1756 = vector.extract_strided_slice %1735 {offsets = [0, 2], sizes = [1, 1], strides = [1, 1]} : vector<1x5xf32> to vector<1x1xf32>
    %1757 = arith.addf %1752, %1756 : vector<1x1xf32>
    %1758 = arith.cmpf ole, %1757, %1725 : vector<1x1xf32>
    %1759 = arith.extui %1758 : vector<1x1xi1> to vector<1x1xi32>
    %1760 = arith.addi %1755, %1759 : vector<1x1xi32>
    %1761 = vector.extract_strided_slice %1735 {offsets = [0, 3], sizes = [1, 1], strides = [1, 1]} : vector<1x5xf32> to vector<1x1xf32>
    %1762 = arith.addf %1757, %1761 : vector<1x1xf32>
    %1763 = arith.cmpf ole, %1762, %1725 : vector<1x1xf32>
    %1764 = arith.extui %1763 : vector<1x1xi1> to vector<1x1xi32>
    %1765 = arith.addi %1760, %1764 : vector<1x1xi32>
    %1766 = tpu.iota {dimensions = array<i32: 1>} : vector<1x5xi32>
    %1767 = vector.broadcast %1765 : vector<1x1xi32> to vector<1x5xi32>
    %1768 = arith.cmpi eq, %1766, %1767 : vector<1x5xi32>
    %1769 = arith.extui %1768 : vector<1x5xi1> to vector<1x5xi32>
    %1770 = arith.sitofp %1769 : vector<1x5xi32> to vector<1x5xf32>
    %1771 = arith.mulf %1770, %1738 : vector<1x5xf32>
    %cst_410 = arith.constant dense<0.000000e+00> : vector<1xf32>
    %1772 = vector.multi_reduction <add>, %1771, %cst_410 [1] : vector<1x5xf32> to vector<1xf32>
    %1773 = vector.shape_cast %1772 : vector<1xf32> to vector<1x1xf32>
    %cst_411 = arith.constant 0.000000e+00 : f32
    %1774 = vector.broadcast %cst_411 : f32 to vector<1x1xf32>
    %1775 = arith.subf %1774, %1773 : vector<1x1xf32>
    %1776 = arith.addf %1693, %1775 : vector<1x1xf32>
    %1777 = arith.addf %1694, %1743 : vector<1x1xf32>
    %c3_412 = arith.constant 3 : index
    %c2_413 = arith.constant 2 : index
    %1778 = vector.load %arg3[%c3_412, %c2_413] : memref<4x6xi32, #tpu.memory_space<vmem>>, vector<1x1xi32>
    tpu.vector_store %arg3[%c3_412, %c2_413], %1765 {strides = array<i32>} : memref<4x6xi32, #tpu.memory_space<vmem>>, vector<1x1xi32>,
    %c1_i32_414 = arith.constant 1 : i32
    %1779 = vector.broadcast %c1_i32_414 : i32 to vector<1x1xi32>
    %1780 = arith.addi %1765, %1779 : vector<1x1xi32>
    %1781 = vector.broadcast %1780 : vector<1x1xi32> to vector<1x6xi32>
    %1782 = arith.cmpi eq, %13, %1781 : vector<1x6xi32>
    %1783 = arith.extui %1782 : vector<1x6xi1> to vector<1x6xi32>
    %1784 = arith.sitofp %1783 : vector<1x6xi32> to vector<1x6xf32>
    %1785 = arith.truncf %1784 : vector<1x6xf32> to vector<1x6xbf16>
    %cst_415 = arith.constant dense<0.000000e+00> : vector<1x32xf32>
    %1786 = tpu.matmul %1785, %5, %cst_415 {dimension_numbers = #tpu.dot_dimension_numbers<[1], [0], [0], [1], [0, 0, 1, 1], [], []>} : vector<1x6xbf16>, vector<6x32xbf16>, vector<1x32xf32> -> vector<1x32xf32>
    %1787 = tpu.concatenate %1786, %1721 in 1 : vector<1x32xf32>, vector<1x32xf32> -> vector<1x64xf32>
    %1788 = arith.truncf %1787 : vector<1x64xf32> to vector<1x64xbf16>
    %cst_416 = arith.constant dense<0.000000e+00> : vector<1x128xf32>
    %1789 = tpu.matmul %1788, %0, %cst_416 {dimension_numbers = #tpu.dot_dimension_numbers<[1], [0], [0], [1], [0, 0, 1, 1], [], []>} : vector<1x64xbf16>, vector<64x128xbf16>, vector<1x128xf32> -> vector<1x128xf32>
    %1790 = arith.addf %1789, %6 : vector<1x128xf32>
    %1791 = vector.extract_strided_slice %1790 {offsets = [0, 0], sizes = [1, 96], strides = [1, 1]} : vector<1x128xf32> to vector<1x96xf32>
    %cst_417 = arith.constant 0.000000e+00 : f32
    %1792 = vector.broadcast %cst_417 : f32 to vector<1x96xf32>
    %1793 = arith.subf %1792, %1791 : vector<1x96xf32>
    %1794 = math.exp %1793 : vector<1x96xf32>
    %cst_418 = arith.constant 1.000000e+00 : f32
    %1795 = vector.broadcast %cst_418 : f32 to vector<1x96xf32>
    %1796 = arith.addf %1795, %1794 : vector<1x96xf32>
    %1797 = tpu.reciprocal %1796 {approx = true} : vector<1x96xf32> -> vector<1x96xf32>
    %1798 = vector.extract_strided_slice %1797 {offsets = [0, 0], sizes = [1, 32], strides = [1, 1]} : vector<1x96xf32> to vector<1x32xf32>
    %1799 = vector.extract_strided_slice %1797 {offsets = [0, 32], sizes = [1, 32], strides = [1, 1]} : vector<1x96xf32> to vector<1x32xf32>
    %1800 = vector.extract_strided_slice %1797 {offsets = [0, 64], sizes = [1, 32], strides = [1, 1]} : vector<1x96xf32> to vector<1x32xf32>
    %1801 = vector.extract_strided_slice %1790 {offsets = [0, 96], sizes = [1, 32], strides = [1, 1]} : vector<1x128xf32> to vector<1x32xf32>
    %1802 = math.tanh %1801 : vector<1x32xf32>
    %1803 = arith.mulf %1799, %1719 : vector<1x32xf32>
    %1804 = arith.mulf %1798, %1802 : vector<1x32xf32>
    %1805 = arith.addf %1803, %1804 : vector<1x32xf32>
    %1806 = math.tanh %1805 : vector<1x32xf32>
    %1807 = arith.mulf %1800, %1806 : vector<1x32xf32>
    %1808 = arith.truncf %1807 : vector<1x32xf32> to vector<1x32xbf16>
    %cst_419 = arith.constant dense<0.000000e+00> : vector<1x5xf32>
    %1809 = tpu.matmul %1808, %4, %cst_419 {dimension_numbers = #tpu.dot_dimension_numbers<[1], [0], [0], [1], [0, 0, 1, 1], [], []>} : vector<1x32xbf16>, vector<32x5xbf16>, vector<1x5xf32> -> vector<1x5xf32>
    %1810 = arith.addf %1809, %9 : vector<1x5xf32>
    %1811 = vector.extract_strided_slice %10 {offsets = [0, 19], sizes = [1, 1], strides = [1, 1]} : vector<1x24xf32> to vector<1x1xf32>
    %cst_420 = arith.constant dense<0xFF800000> : vector<1xf32>
    %1812 = vector.multi_reduction <maximumf>, %1810, %cst_420 [1] : vector<1x5xf32> to vector<1xf32>
    %1813 = vector.shape_cast %1812 : vector<1xf32> to vector<1x1xf32>
    %1814 = vector.broadcast %1813 : vector<1x1xf32> to vector<1x5xf32>
    %1815 = arith.subf %1810, %1814 : vector<1x5xf32>
    %1816 = math.exp %1815 : vector<1x5xf32>
    %cst_421 = arith.constant dense<0.000000e+00> : vector<1xf32>
    %1817 = vector.multi_reduction <add>, %1816, %cst_421 [1] : vector<1x5xf32> to vector<1xf32>
    %1818 = vector.shape_cast %1817 : vector<1xf32> to vector<1x1xf32>
    %1819 = tpu.reciprocal %1818 {approx = true} : vector<1x1xf32> -> vector<1x1xf32>
    %1820 = vector.broadcast %1819 : vector<1x1xf32> to vector<1x5xf32>
    %1821 = arith.mulf %1816, %1820 : vector<1x5xf32>
    %1822 = math.log %1818 : vector<1x1xf32>
    %1823 = vector.broadcast %1822 : vector<1x1xf32> to vector<1x5xf32>
    %1824 = arith.subf %1815, %1823 : vector<1x5xf32>
    %1825 = arith.mulf %1821, %1824 : vector<1x5xf32>
    %cst_422 = arith.constant dense<0.000000e+00> : vector<1xf32>
    %1826 = vector.multi_reduction <add>, %1825, %cst_422 [1] : vector<1x5xf32> to vector<1xf32>
    %1827 = vector.shape_cast %1826 : vector<1xf32> to vector<1x1xf32>
    %cst_423 = arith.constant 0.000000e+00 : f32
    %1828 = vector.broadcast %cst_423 : f32 to vector<1x1xf32>
    %1829 = arith.subf %1828, %1827 : vector<1x1xf32>
    %c0_i32_424 = arith.constant 0 : i32
    %1830 = vector.broadcast %c0_i32_424 : i32 to vector<1x1xi32>
    %cst_425 = arith.constant 0.000000e+00 : f32
    %1831 = vector.broadcast %cst_425 : f32 to vector<1x1xf32>
    %1832 = vector.extract_strided_slice %1821 {offsets = [0, 0], sizes = [1, 1], strides = [1, 1]} : vector<1x5xf32> to vector<1x1xf32>
    %1833 = arith.addf %1831, %1832 : vector<1x1xf32>
    %1834 = arith.cmpf ole, %1833, %1811 : vector<1x1xf32>
    %1835 = arith.extui %1834 : vector<1x1xi1> to vector<1x1xi32>
    %1836 = arith.addi %1830, %1835 : vector<1x1xi32>
    %1837 = vector.extract_strided_slice %1821 {offsets = [0, 1], sizes = [1, 1], strides = [1, 1]} : vector<1x5xf32> to vector<1x1xf32>
    %1838 = arith.addf %1833, %1837 : vector<1x1xf32>
    %1839 = arith.cmpf ole, %1838, %1811 : vector<1x1xf32>
    %1840 = arith.extui %1839 : vector<1x1xi1> to vector<1x1xi32>
    %1841 = arith.addi %1836, %1840 : vector<1x1xi32>
    %1842 = vector.extract_strided_slice %1821 {offsets = [0, 2], sizes = [1, 1], strides = [1, 1]} : vector<1x5xf32> to vector<1x1xf32>
    %1843 = arith.addf %1838, %1842 : vector<1x1xf32>
    %1844 = arith.cmpf ole, %1843, %1811 : vector<1x1xf32>
    %1845 = arith.extui %1844 : vector<1x1xi1> to vector<1x1xi32>
    %1846 = arith.addi %1841, %1845 : vector<1x1xi32>
    %1847 = vector.extract_strided_slice %1821 {offsets = [0, 3], sizes = [1, 1], strides = [1, 1]} : vector<1x5xf32> to vector<1x1xf32>
    %1848 = arith.addf %1843, %1847 : vector<1x1xf32>
    %1849 = arith.cmpf ole, %1848, %1811 : vector<1x1xf32>
    %1850 = arith.extui %1849 : vector<1x1xi1> to vector<1x1xi32>
    %1851 = arith.addi %1846, %1850 : vector<1x1xi32>
    %1852 = tpu.iota {dimensions = array<i32: 1>} : vector<1x5xi32>
    %1853 = vector.broadcast %1851 : vector<1x1xi32> to vector<1x5xi32>
    %1854 = arith.cmpi eq, %1852, %1853 : vector<1x5xi32>
    %1855 = arith.extui %1854 : vector<1x5xi1> to vector<1x5xi32>
    %1856 = arith.sitofp %1855 : vector<1x5xi32> to vector<1x5xf32>
    %1857 = arith.mulf %1856, %1824 : vector<1x5xf32>
    %cst_426 = arith.constant dense<0.000000e+00> : vector<1xf32>
    %1858 = vector.multi_reduction <add>, %1857, %cst_426 [1] : vector<1x5xf32> to vector<1xf32>
    %1859 = vector.shape_cast %1858 : vector<1xf32> to vector<1x1xf32>
    %cst_427 = arith.constant 0.000000e+00 : f32
    %1860 = vector.broadcast %cst_427 : f32 to vector<1x1xf32>
    %1861 = arith.subf %1860, %1859 : vector<1x1xf32>
    %1862 = arith.addf %1776, %1861 : vector<1x1xf32>
    %1863 = arith.addf %1777, %1829 : vector<1x1xf32>
    %c3_428 = arith.constant 3 : index
    %c3_429 = arith.constant 3 : index
    %1864 = vector.load %arg3[%c3_428, %c3_429] : memref<4x6xi32, #tpu.memory_space<vmem>>, vector<1x1xi32>
    tpu.vector_store %arg3[%c3_428, %c3_429], %1851 {strides = array<i32>} : memref<4x6xi32, #tpu.memory_space<vmem>>, vector<1x1xi32>,
    %c1_i32_430 = arith.constant 1 : i32
    %1865 = vector.broadcast %c1_i32_430 : i32 to vector<1x1xi32>
    %1866 = arith.addi %1851, %1865 : vector<1x1xi32>
    %1867 = vector.broadcast %1866 : vector<1x1xi32> to vector<1x6xi32>
    %1868 = arith.cmpi eq, %13, %1867 : vector<1x6xi32>
    %1869 = arith.extui %1868 : vector<1x6xi1> to vector<1x6xi32>
    %1870 = arith.sitofp %1869 : vector<1x6xi32> to vector<1x6xf32>
    %1871 = arith.truncf %1870 : vector<1x6xf32> to vector<1x6xbf16>
    %cst_431 = arith.constant dense<0.000000e+00> : vector<1x32xf32>
    %1872 = tpu.matmul %1871, %5, %cst_431 {dimension_numbers = #tpu.dot_dimension_numbers<[1], [0], [0], [1], [0, 0, 1, 1], [], []>} : vector<1x6xbf16>, vector<6x32xbf16>, vector<1x32xf32> -> vector<1x32xf32>
    %1873 = tpu.concatenate %1872, %1807 in 1 : vector<1x32xf32>, vector<1x32xf32> -> vector<1x64xf32>
    %1874 = arith.truncf %1873 : vector<1x64xf32> to vector<1x64xbf16>
    %cst_432 = arith.constant dense<0.000000e+00> : vector<1x128xf32>
    %1875 = tpu.matmul %1874, %0, %cst_432 {dimension_numbers = #tpu.dot_dimension_numbers<[1], [0], [0], [1], [0, 0, 1, 1], [], []>} : vector<1x64xbf16>, vector<64x128xbf16>, vector<1x128xf32> -> vector<1x128xf32>
    %1876 = arith.addf %1875, %6 : vector<1x128xf32>
    %1877 = vector.extract_strided_slice %1876 {offsets = [0, 0], sizes = [1, 96], strides = [1, 1]} : vector<1x128xf32> to vector<1x96xf32>
    %cst_433 = arith.constant 0.000000e+00 : f32
    %1878 = vector.broadcast %cst_433 : f32 to vector<1x96xf32>
    %1879 = arith.subf %1878, %1877 : vector<1x96xf32>
    %1880 = math.exp %1879 : vector<1x96xf32>
    %cst_434 = arith.constant 1.000000e+00 : f32
    %1881 = vector.broadcast %cst_434 : f32 to vector<1x96xf32>
    %1882 = arith.addf %1881, %1880 : vector<1x96xf32>
    %1883 = tpu.reciprocal %1882 {approx = true} : vector<1x96xf32> -> vector<1x96xf32>
    %1884 = vector.extract_strided_slice %1883 {offsets = [0, 0], sizes = [1, 32], strides = [1, 1]} : vector<1x96xf32> to vector<1x32xf32>
    %1885 = vector.extract_strided_slice %1883 {offsets = [0, 32], sizes = [1, 32], strides = [1, 1]} : vector<1x96xf32> to vector<1x32xf32>
    %1886 = vector.extract_strided_slice %1883 {offsets = [0, 64], sizes = [1, 32], strides = [1, 1]} : vector<1x96xf32> to vector<1x32xf32>
    %1887 = vector.extract_strided_slice %1876 {offsets = [0, 96], sizes = [1, 32], strides = [1, 1]} : vector<1x128xf32> to vector<1x32xf32>
    %1888 = math.tanh %1887 : vector<1x32xf32>
    %1889 = arith.mulf %1885, %1805 : vector<1x32xf32>
    %1890 = arith.mulf %1884, %1888 : vector<1x32xf32>
    %1891 = arith.addf %1889, %1890 : vector<1x32xf32>
    %1892 = math.tanh %1891 : vector<1x32xf32>
    %1893 = arith.mulf %1886, %1892 : vector<1x32xf32>
    %c3_435 = arith.constant 3 : index
    %c0_436 = arith.constant 0 : index
    %1894 = vector.load %arg6[%c3_435, %c0_436] : memref<5x32xf32, #tpu.memory_space<vmem>>, vector<1x32xf32>
    tpu.vector_store %arg6[%c3_435, %c0_436], %1893 {strides = array<i32>} : memref<5x32xf32, #tpu.memory_space<vmem>>, vector<1x32xf32>,
    %1895 = arith.truncf %1893 : vector<1x32xf32> to vector<1x32xbf16>
    %cst_437 = arith.constant dense<0.000000e+00> : vector<1x32xf32>
    %1896 = tpu.matmul %1895, %2, %cst_437 {dimension_numbers = #tpu.dot_dimension_numbers<[1], [0], [0], [1], [0, 0, 1, 1], [], []>} : vector<1x32xbf16>, vector<32x32xbf16>, vector<1x32xf32> -> vector<1x32xf32>
    %c3_438 = arith.constant 3 : index
    %c0_439 = arith.constant 0 : index
    %1897 = vector.load %arg7[%c3_438, %c0_439] : memref<5x32xf32, #tpu.memory_space<vmem>>, vector<1x32xf32>
    tpu.vector_store %arg7[%c3_438, %c0_439], %1896 {strides = array<i32>} : memref<5x32xf32, #tpu.memory_space<vmem>>, vector<1x32xf32>,
    %1898 = tpu.concatenate %12, %1893 in 1 : vector<1x32xf32>, vector<1x32xf32> -> vector<1x64xf32>
    %1899 = arith.truncf %1898 : vector<1x64xf32> to vector<1x64xbf16>
    %cst_440 = arith.constant dense<0.000000e+00> : vector<1x128xf32>
    %1900 = tpu.matmul %1899, %0, %cst_440 {dimension_numbers = #tpu.dot_dimension_numbers<[1], [0], [0], [1], [0, 0, 1, 1], [], []>} : vector<1x64xbf16>, vector<64x128xbf16>, vector<1x128xf32> -> vector<1x128xf32>
    %1901 = arith.addf %1900, %6 : vector<1x128xf32>
    %1902 = vector.extract_strided_slice %1901 {offsets = [0, 0], sizes = [1, 96], strides = [1, 1]} : vector<1x128xf32> to vector<1x96xf32>
    %cst_441 = arith.constant 0.000000e+00 : f32
    %1903 = vector.broadcast %cst_441 : f32 to vector<1x96xf32>
    %1904 = arith.subf %1903, %1902 : vector<1x96xf32>
    %1905 = math.exp %1904 : vector<1x96xf32>
    %cst_442 = arith.constant 1.000000e+00 : f32
    %1906 = vector.broadcast %cst_442 : f32 to vector<1x96xf32>
    %1907 = arith.addf %1906, %1905 : vector<1x96xf32>
    %1908 = tpu.reciprocal %1907 {approx = true} : vector<1x96xf32> -> vector<1x96xf32>
    %1909 = vector.extract_strided_slice %1908 {offsets = [0, 0], sizes = [1, 32], strides = [1, 1]} : vector<1x96xf32> to vector<1x32xf32>
    %1910 = vector.extract_strided_slice %1908 {offsets = [0, 32], sizes = [1, 32], strides = [1, 1]} : vector<1x96xf32> to vector<1x32xf32>
    %1911 = vector.extract_strided_slice %1908 {offsets = [0, 64], sizes = [1, 32], strides = [1, 1]} : vector<1x96xf32> to vector<1x32xf32>
    %1912 = vector.extract_strided_slice %1901 {offsets = [0, 96], sizes = [1, 32], strides = [1, 1]} : vector<1x128xf32> to vector<1x32xf32>
    %1913 = math.tanh %1912 : vector<1x32xf32>
    %1914 = arith.mulf %1910, %1891 : vector<1x32xf32>
    %1915 = arith.mulf %1909, %1913 : vector<1x32xf32>
    %1916 = arith.addf %1914, %1915 : vector<1x32xf32>
    %1917 = math.tanh %1916 : vector<1x32xf32>
    %1918 = arith.mulf %1911, %1917 : vector<1x32xf32>
    %c0_443 = arith.constant 0 : index
    %c0_444 = arith.constant 0 : index
    %1919 = vector.load %arg7[%c0_443, %c0_444] : memref<5x32xf32, #tpu.memory_space<vmem>>, vector<4x32xf32>
    %1920 = arith.truncf %1918 : vector<1x32xf32> to vector<1x32xbf16>
    %cst_445 = arith.constant dense<0.000000e+00> : vector<1x32xf32>
    %1921 = tpu.matmul %1920, %3, %cst_445 {dimension_numbers = #tpu.dot_dimension_numbers<[1], [0], [0], [1], [0, 0, 1, 1], [], []>} : vector<1x32xbf16>, vector<32x32xbf16>, vector<1x32xf32> -> vector<1x32xf32>
    %1922 = vector.broadcast %1921 : vector<1x32xf32> to vector<4x32xf32>
    %1923 = arith.addf %1922, %1919 : vector<4x32xf32>
    %1924 = math.tanh %1923 : vector<4x32xf32>
    %1925 = vector.broadcast %8 : vector<1x32xf32> to vector<4x32xf32>
    %1926 = arith.mulf %1924, %1925 : vector<4x32xf32>
    %cst_446 = arith.constant dense<0.000000e+00> : vector<4xf32>
    %1927 = vector.multi_reduction <add>, %1926, %cst_446 [1] : vector<4x32xf32> to vector<4xf32>
    %1928 = vector.shape_cast %1927 : vector<4xf32> to vector<4x1xf32>
    %1929 = vector.extract_strided_slice %10 {offsets = [0, 20], sizes = [1, 1], strides = [1, 1]} : vector<1x24xf32> to vector<1x1xf32>
    %cst_447 = arith.constant dense<0xFF800000> : vector<1xf32>
    %1930 = vector.multi_reduction <maximumf>, %1928, %cst_447 [0] : vector<4x1xf32> to vector<1xf32>
    %1931 = vector.shape_cast %1930 : vector<1xf32> to vector<1x1xf32>
    %1932 = vector.broadcast %1931 : vector<1x1xf32> to vector<4x1xf32>
    %1933 = arith.subf %1928, %1932 : vector<4x1xf32>
    %1934 = math.exp %1933 : vector<4x1xf32>
    %cst_448 = arith.constant dense<0.000000e+00> : vector<1xf32>
    %1935 = vector.multi_reduction <add>, %1934, %cst_448 [0] : vector<4x1xf32> to vector<1xf32>
    %1936 = vector.shape_cast %1935 : vector<1xf32> to vector<1x1xf32>
    %1937 = tpu.reciprocal %1936 {approx = true} : vector<1x1xf32> -> vector<1x1xf32>
    %1938 = vector.broadcast %1937 : vector<1x1xf32> to vector<4x1xf32>
    %1939 = arith.mulf %1934, %1938 : vector<4x1xf32>
    %1940 = math.log %1936 : vector<1x1xf32>
    %1941 = vector.broadcast %1940 : vector<1x1xf32> to vector<4x1xf32>
    %1942 = arith.subf %1933, %1941 : vector<4x1xf32>
    %1943 = arith.mulf %1939, %1942 : vector<4x1xf32>
    %cst_449 = arith.constant dense<0.000000e+00> : vector<1xf32>
    %1944 = vector.multi_reduction <add>, %1943, %cst_449 [0] : vector<4x1xf32> to vector<1xf32>
    %1945 = vector.shape_cast %1944 : vector<1xf32> to vector<1x1xf32>
    %cst_450 = arith.constant 0.000000e+00 : f32
    %1946 = vector.broadcast %cst_450 : f32 to vector<1x1xf32>
    %1947 = arith.subf %1946, %1945 : vector<1x1xf32>
    %c0_i32_451 = arith.constant 0 : i32
    %1948 = vector.broadcast %c0_i32_451 : i32 to vector<1x1xi32>
    %cst_452 = arith.constant 0.000000e+00 : f32
    %1949 = vector.broadcast %cst_452 : f32 to vector<1x1xf32>
    %1950 = vector.extract_strided_slice %1939 {offsets = [0, 0], sizes = [1, 1], strides = [1, 1]} : vector<4x1xf32> to vector<1x1xf32>
    %1951 = arith.addf %1949, %1950 : vector<1x1xf32>
    %1952 = arith.cmpf ole, %1951, %1929 : vector<1x1xf32>
    %1953 = arith.extui %1952 : vector<1x1xi1> to vector<1x1xi32>
    %1954 = arith.addi %1948, %1953 : vector<1x1xi32>
    %1955 = vector.extract_strided_slice %1939 {offsets = [1, 0], sizes = [1, 1], strides = [1, 1]} : vector<4x1xf32> to vector<1x1xf32>
    %1956 = arith.addf %1951, %1955 : vector<1x1xf32>
    %1957 = arith.cmpf ole, %1956, %1929 : vector<1x1xf32>
    %1958 = arith.extui %1957 : vector<1x1xi1> to vector<1x1xi32>
    %1959 = arith.addi %1954, %1958 : vector<1x1xi32>
    %1960 = vector.extract_strided_slice %1939 {offsets = [2, 0], sizes = [1, 1], strides = [1, 1]} : vector<4x1xf32> to vector<1x1xf32>
    %1961 = arith.addf %1956, %1960 : vector<1x1xf32>
    %1962 = arith.cmpf ole, %1961, %1929 : vector<1x1xf32>
    %1963 = arith.extui %1962 : vector<1x1xi1> to vector<1x1xi32>
    %1964 = arith.addi %1959, %1963 : vector<1x1xi32>
    %1965 = tpu.iota {dimensions = array<i32: 0>} : vector<4x1xi32>
    %1966 = vector.broadcast %1964 : vector<1x1xi32> to vector<4x1xi32>
    %1967 = arith.cmpi eq, %1965, %1966 : vector<4x1xi32>
    %1968 = arith.extui %1967 : vector<4x1xi1> to vector<4x1xi32>
    %1969 = arith.sitofp %1968 : vector<4x1xi32> to vector<4x1xf32>
    %1970 = arith.mulf %1969, %1942 : vector<4x1xf32>
    %cst_453 = arith.constant dense<0.000000e+00> : vector<1xf32>
    %1971 = vector.multi_reduction <add>, %1970, %cst_453 [0] : vector<4x1xf32> to vector<1xf32>
    %1972 = vector.shape_cast %1971 : vector<1xf32> to vector<1x1xf32>
    %cst_454 = arith.constant 0.000000e+00 : f32
    %1973 = vector.broadcast %cst_454 : f32 to vector<1x1xf32>
    %1974 = arith.subf %1973, %1972 : vector<1x1xf32>
    %1975 = arith.addf %1862, %1974 : vector<1x1xf32>
    %1976 = arith.addf %1863, %1947 : vector<1x1xf32>
    %c2_455 = arith.constant 2 : index
    %c4_456 = arith.constant 4 : index
    %1977 = vector.load %arg3[%c2_455, %c4_456] : memref<4x6xi32, #tpu.memory_space<vmem>>, vector<1x1xi32>
    tpu.vector_store %arg3[%c2_455, %c4_456], %1964 {strides = array<i32>} : memref<4x6xi32, #tpu.memory_space<vmem>>, vector<1x1xi32>,
    %c0_457 = arith.constant 0 : index
    %c0_458 = arith.constant 0 : index
    %1978 = vector.load %arg6[%c0_457, %c0_458] : memref<5x32xf32, #tpu.memory_space<vmem>>, vector<4x32xf32>
    %1979 = vector.broadcast %1969 : vector<4x1xf32> to vector<4x32xf32>
    %1980 = arith.mulf %1979, %1978 : vector<4x32xf32>
    %cst_459 = arith.constant dense<0.000000e+00> : vector<32xf32>
    %1981 = vector.multi_reduction <add>, %1980, %cst_459 [0] : vector<4x32xf32> to vector<32xf32>
    %1982 = vector.shape_cast %1981 : vector<32xf32> to vector<1x32xf32>
    %1983 = tpu.concatenate %1982, %1918 in 1 : vector<1x32xf32>, vector<1x32xf32> -> vector<1x64xf32>
    %1984 = arith.truncf %1983 : vector<1x64xf32> to vector<1x64xbf16>
    %cst_460 = arith.constant dense<0.000000e+00> : vector<1x128xf32>
    %1985 = tpu.matmul %1984, %0, %cst_460 {dimension_numbers = #tpu.dot_dimension_numbers<[1], [0], [0], [1], [0, 0, 1, 1], [], []>} : vector<1x64xbf16>, vector<64x128xbf16>, vector<1x128xf32> -> vector<1x128xf32>
    %1986 = arith.addf %1985, %6 : vector<1x128xf32>
    %1987 = vector.extract_strided_slice %1986 {offsets = [0, 0], sizes = [1, 96], strides = [1, 1]} : vector<1x128xf32> to vector<1x96xf32>
    %cst_461 = arith.constant 0.000000e+00 : f32
    %1988 = vector.broadcast %cst_461 : f32 to vector<1x96xf32>
    %1989 = arith.subf %1988, %1987 : vector<1x96xf32>
    %1990 = math.exp %1989 : vector<1x96xf32>
    %cst_462 = arith.constant 1.000000e+00 : f32
    %1991 = vector.broadcast %cst_462 : f32 to vector<1x96xf32>
    %1992 = arith.addf %1991, %1990 : vector<1x96xf32>
    %1993 = tpu.reciprocal %1992 {approx = true} : vector<1x96xf32> -> vector<1x96xf32>
    %1994 = vector.extract_strided_slice %1993 {offsets = [0, 0], sizes = [1, 32], strides = [1, 1]} : vector<1x96xf32> to vector<1x32xf32>
    %1995 = vector.extract_strided_slice %1993 {offsets = [0, 32], sizes = [1, 32], strides = [1, 1]} : vector<1x96xf32> to vector<1x32xf32>
    %1996 = vector.extract_strided_slice %1993 {offsets = [0, 64], sizes = [1, 32], strides = [1, 1]} : vector<1x96xf32> to vector<1x32xf32>
    %1997 = vector.extract_strided_slice %1986 {offsets = [0, 96], sizes = [1, 32], strides = [1, 1]} : vector<1x128xf32> to vector<1x32xf32>
    %1998 = math.tanh %1997 : vector<1x32xf32>
    %1999 = arith.mulf %1995, %1916 : vector<1x32xf32>
    %2000 = arith.mulf %1994, %1998 : vector<1x32xf32>
    %2001 = arith.addf %1999, %2000 : vector<1x32xf32>
    %2002 = math.tanh %2001 : vector<1x32xf32>
    %2003 = arith.mulf %1996, %2002 : vector<1x32xf32>
    %c0_463 = arith.constant 0 : index
    %c0_464 = arith.constant 0 : index
    %2004 = vector.load %arg7[%c0_463, %c0_464] : memref<5x32xf32, #tpu.memory_space<vmem>>, vector<4x32xf32>
    %2005 = arith.truncf %2003 : vector<1x32xf32> to vector<1x32xbf16>
    %cst_465 = arith.constant dense<0.000000e+00> : vector<1x32xf32>
    %2006 = tpu.matmul %2005, %3, %cst_465 {dimension_numbers = #tpu.dot_dimension_numbers<[1], [0], [0], [1], [0, 0, 1, 1], [], []>} : vector<1x32xbf16>, vector<32x32xbf16>, vector<1x32xf32> -> vector<1x32xf32>
    %2007 = vector.broadcast %2006 : vector<1x32xf32> to vector<4x32xf32>
    %2008 = arith.addf %2007, %2004 : vector<4x32xf32>
    %2009 = math.tanh %2008 : vector<4x32xf32>
    %2010 = vector.broadcast %8 : vector<1x32xf32> to vector<4x32xf32>
    %2011 = arith.mulf %2009, %2010 : vector<4x32xf32>
    %cst_466 = arith.constant dense<0.000000e+00> : vector<4xf32>
    %2012 = vector.multi_reduction <add>, %2011, %cst_466 [1] : vector<4x32xf32> to vector<4xf32>
    %2013 = vector.shape_cast %2012 : vector<4xf32> to vector<4x1xf32>
    %2014 = vector.extract_strided_slice %10 {offsets = [0, 21], sizes = [1, 1], strides = [1, 1]} : vector<1x24xf32> to vector<1x1xf32>
    %cst_467 = arith.constant dense<0xFF800000> : vector<1xf32>
    %2015 = vector.multi_reduction <maximumf>, %2013, %cst_467 [0] : vector<4x1xf32> to vector<1xf32>
    %2016 = vector.shape_cast %2015 : vector<1xf32> to vector<1x1xf32>
    %2017 = vector.broadcast %2016 : vector<1x1xf32> to vector<4x1xf32>
    %2018 = arith.subf %2013, %2017 : vector<4x1xf32>
    %2019 = math.exp %2018 : vector<4x1xf32>
    %cst_468 = arith.constant dense<0.000000e+00> : vector<1xf32>
    %2020 = vector.multi_reduction <add>, %2019, %cst_468 [0] : vector<4x1xf32> to vector<1xf32>
    %2021 = vector.shape_cast %2020 : vector<1xf32> to vector<1x1xf32>
    %2022 = tpu.reciprocal %2021 {approx = true} : vector<1x1xf32> -> vector<1x1xf32>
    %2023 = vector.broadcast %2022 : vector<1x1xf32> to vector<4x1xf32>
    %2024 = arith.mulf %2019, %2023 : vector<4x1xf32>
    %2025 = math.log %2021 : vector<1x1xf32>
    %2026 = vector.broadcast %2025 : vector<1x1xf32> to vector<4x1xf32>
    %2027 = arith.subf %2018, %2026 : vector<4x1xf32>
    %2028 = arith.mulf %2024, %2027 : vector<4x1xf32>
    %cst_469 = arith.constant dense<0.000000e+00> : vector<1xf32>
    %2029 = vector.multi_reduction <add>, %2028, %cst_469 [0] : vector<4x1xf32> to vector<1xf32>
    %2030 = vector.shape_cast %2029 : vector<1xf32> to vector<1x1xf32>
    %cst_470 = arith.constant 0.000000e+00 : f32
    %2031 = vector.broadcast %cst_470 : f32 to vector<1x1xf32>
    %2032 = arith.subf %2031, %2030 : vector<1x1xf32>
    %c0_i32_471 = arith.constant 0 : i32
    %2033 = vector.broadcast %c0_i32_471 : i32 to vector<1x1xi32>
    %cst_472 = arith.constant 0.000000e+00 : f32
    %2034 = vector.broadcast %cst_472 : f32 to vector<1x1xf32>
    %2035 = vector.extract_strided_slice %2024 {offsets = [0, 0], sizes = [1, 1], strides = [1, 1]} : vector<4x1xf32> to vector<1x1xf32>
    %2036 = arith.addf %2034, %2035 : vector<1x1xf32>
    %2037 = arith.cmpf ole, %2036, %2014 : vector<1x1xf32>
    %2038 = arith.extui %2037 : vector<1x1xi1> to vector<1x1xi32>
    %2039 = arith.addi %2033, %2038 : vector<1x1xi32>
    %2040 = vector.extract_strided_slice %2024 {offsets = [1, 0], sizes = [1, 1], strides = [1, 1]} : vector<4x1xf32> to vector<1x1xf32>
    %2041 = arith.addf %2036, %2040 : vector<1x1xf32>
    %2042 = arith.cmpf ole, %2041, %2014 : vector<1x1xf32>
    %2043 = arith.extui %2042 : vector<1x1xi1> to vector<1x1xi32>
    %2044 = arith.addi %2039, %2043 : vector<1x1xi32>
    %2045 = vector.extract_strided_slice %2024 {offsets = [2, 0], sizes = [1, 1], strides = [1, 1]} : vector<4x1xf32> to vector<1x1xf32>
    %2046 = arith.addf %2041, %2045 : vector<1x1xf32>
    %2047 = arith.cmpf ole, %2046, %2014 : vector<1x1xf32>
    %2048 = arith.extui %2047 : vector<1x1xi1> to vector<1x1xi32>
    %2049 = arith.addi %2044, %2048 : vector<1x1xi32>
    %2050 = tpu.iota {dimensions = array<i32: 0>} : vector<4x1xi32>
    %2051 = vector.broadcast %2049 : vector<1x1xi32> to vector<4x1xi32>
    %2052 = arith.cmpi eq, %2050, %2051 : vector<4x1xi32>
    %2053 = arith.extui %2052 : vector<4x1xi1> to vector<4x1xi32>
    %2054 = arith.sitofp %2053 : vector<4x1xi32> to vector<4x1xf32>
    %2055 = arith.mulf %2054, %2027 : vector<4x1xf32>
    %cst_473 = arith.constant dense<0.000000e+00> : vector<1xf32>
    %2056 = vector.multi_reduction <add>, %2055, %cst_473 [0] : vector<4x1xf32> to vector<1xf32>
    %2057 = vector.shape_cast %2056 : vector<1xf32> to vector<1x1xf32>
    %cst_474 = arith.constant 0.000000e+00 : f32
    %2058 = vector.broadcast %cst_474 : f32 to vector<1x1xf32>
    %2059 = arith.subf %2058, %2057 : vector<1x1xf32>
    %2060 = arith.addf %1975, %2059 : vector<1x1xf32>
    %2061 = arith.addf %1976, %2032 : vector<1x1xf32>
    %c2_475 = arith.constant 2 : index
    %c5_476 = arith.constant 5 : index
    %2062 = vector.load %arg3[%c2_475, %c5_476] : memref<4x6xi32, #tpu.memory_space<vmem>>, vector<1x1xi32>
    tpu.vector_store %arg3[%c2_475, %c5_476], %2049 {strides = array<i32>} : memref<4x6xi32, #tpu.memory_space<vmem>>, vector<1x1xi32>,
    %c0_477 = arith.constant 0 : index
    %c0_478 = arith.constant 0 : index
    %2063 = vector.load %arg6[%c0_477, %c0_478] : memref<5x32xf32, #tpu.memory_space<vmem>>, vector<4x32xf32>
    %2064 = vector.broadcast %2054 : vector<4x1xf32> to vector<4x32xf32>
    %2065 = arith.mulf %2064, %2063 : vector<4x32xf32>
    %cst_479 = arith.constant dense<0.000000e+00> : vector<32xf32>
    %2066 = vector.multi_reduction <add>, %2065, %cst_479 [0] : vector<4x32xf32> to vector<32xf32>
    %2067 = vector.shape_cast %2066 : vector<32xf32> to vector<1x32xf32>
    %2068 = tpu.concatenate %2067, %2003 in 1 : vector<1x32xf32>, vector<1x32xf32> -> vector<1x64xf32>
    %2069 = arith.truncf %2068 : vector<1x64xf32> to vector<1x64xbf16>
    %cst_480 = arith.constant dense<0.000000e+00> : vector<1x128xf32>
    %2070 = tpu.matmul %2069, %0, %cst_480 {dimension_numbers = #tpu.dot_dimension_numbers<[1], [0], [0], [1], [0, 0, 1, 1], [], []>} : vector<1x64xbf16>, vector<64x128xbf16>, vector<1x128xf32> -> vector<1x128xf32>
    %2071 = arith.addf %2070, %6 : vector<1x128xf32>
    %2072 = vector.extract_strided_slice %2071 {offsets = [0, 0], sizes = [1, 96], strides = [1, 1]} : vector<1x128xf32> to vector<1x96xf32>
    %cst_481 = arith.constant 0.000000e+00 : f32
    %2073 = vector.broadcast %cst_481 : f32 to vector<1x96xf32>
    %2074 = arith.subf %2073, %2072 : vector<1x96xf32>
    %2075 = math.exp %2074 : vector<1x96xf32>
    %cst_482 = arith.constant 1.000000e+00 : f32
    %2076 = vector.broadcast %cst_482 : f32 to vector<1x96xf32>
    %2077 = arith.addf %2076, %2075 : vector<1x96xf32>
    %2078 = tpu.reciprocal %2077 {approx = true} : vector<1x96xf32> -> vector<1x96xf32>
    %2079 = vector.extract_strided_slice %2078 {offsets = [0, 0], sizes = [1, 32], strides = [1, 1]} : vector<1x96xf32> to vector<1x32xf32>
    %2080 = vector.extract_strided_slice %2078 {offsets = [0, 32], sizes = [1, 32], strides = [1, 1]} : vector<1x96xf32> to vector<1x32xf32>
    %2081 = vector.extract_strided_slice %2078 {offsets = [0, 64], sizes = [1, 32], strides = [1, 1]} : vector<1x96xf32> to vector<1x32xf32>
    %2082 = vector.extract_strided_slice %2071 {offsets = [0, 96], sizes = [1, 32], strides = [1, 1]} : vector<1x128xf32> to vector<1x32xf32>
    %2083 = math.tanh %2082 : vector<1x32xf32>
    %2084 = arith.mulf %2080, %2001 : vector<1x32xf32>
    %2085 = arith.mulf %2079, %2083 : vector<1x32xf32>
    %2086 = arith.addf %2084, %2085 : vector<1x32xf32>
    %2087 = math.tanh %2086 : vector<1x32xf32>
    %2088 = arith.mulf %2081, %2087 : vector<1x32xf32>
    %2089 = arith.truncf %2088 : vector<1x32xf32> to vector<1x32xbf16>
    %cst_483 = arith.constant dense<0.000000e+00> : vector<1x5xf32>
    %2090 = tpu.matmul %2089, %4, %cst_483 {dimension_numbers = #tpu.dot_dimension_numbers<[1], [0], [0], [1], [0, 0, 1, 1], [], []>} : vector<1x32xbf16>, vector<32x5xbf16>, vector<1x5xf32> -> vector<1x5xf32>
    %2091 = arith.addf %2090, %9 : vector<1x5xf32>
    %2092 = vector.extract_strided_slice %10 {offsets = [0, 22], sizes = [1, 1], strides = [1, 1]} : vector<1x24xf32> to vector<1x1xf32>
    %cst_484 = arith.constant dense<0xFF800000> : vector<1xf32>
    %2093 = vector.multi_reduction <maximumf>, %2091, %cst_484 [1] : vector<1x5xf32> to vector<1xf32>
    %2094 = vector.shape_cast %2093 : vector<1xf32> to vector<1x1xf32>
    %2095 = vector.broadcast %2094 : vector<1x1xf32> to vector<1x5xf32>
    %2096 = arith.subf %2091, %2095 : vector<1x5xf32>
    %2097 = math.exp %2096 : vector<1x5xf32>
    %cst_485 = arith.constant dense<0.000000e+00> : vector<1xf32>
    %2098 = vector.multi_reduction <add>, %2097, %cst_485 [1] : vector<1x5xf32> to vector<1xf32>
    %2099 = vector.shape_cast %2098 : vector<1xf32> to vector<1x1xf32>
    %2100 = tpu.reciprocal %2099 {approx = true} : vector<1x1xf32> -> vector<1x1xf32>
    %2101 = vector.broadcast %2100 : vector<1x1xf32> to vector<1x5xf32>
    %2102 = arith.mulf %2097, %2101 : vector<1x5xf32>
    %2103 = math.log %2099 : vector<1x1xf32>
    %2104 = vector.broadcast %2103 : vector<1x1xf32> to vector<1x5xf32>
    %2105 = arith.subf %2096, %2104 : vector<1x5xf32>
    %2106 = arith.mulf %2102, %2105 : vector<1x5xf32>
    %cst_486 = arith.constant dense<0.000000e+00> : vector<1xf32>
    %2107 = vector.multi_reduction <add>, %2106, %cst_486 [1] : vector<1x5xf32> to vector<1xf32>
    %2108 = vector.shape_cast %2107 : vector<1xf32> to vector<1x1xf32>
    %cst_487 = arith.constant 0.000000e+00 : f32
    %2109 = vector.broadcast %cst_487 : f32 to vector<1x1xf32>
    %2110 = arith.subf %2109, %2108 : vector<1x1xf32>
    %c0_i32_488 = arith.constant 0 : i32
    %2111 = vector.broadcast %c0_i32_488 : i32 to vector<1x1xi32>
    %cst_489 = arith.constant 0.000000e+00 : f32
    %2112 = vector.broadcast %cst_489 : f32 to vector<1x1xf32>
    %2113 = vector.extract_strided_slice %2102 {offsets = [0, 0], sizes = [1, 1], strides = [1, 1]} : vector<1x5xf32> to vector<1x1xf32>
    %2114 = arith.addf %2112, %2113 : vector<1x1xf32>
    %2115 = arith.cmpf ole, %2114, %2092 : vector<1x1xf32>
    %2116 = arith.extui %2115 : vector<1x1xi1> to vector<1x1xi32>
    %2117 = arith.addi %2111, %2116 : vector<1x1xi32>
    %2118 = vector.extract_strided_slice %2102 {offsets = [0, 1], sizes = [1, 1], strides = [1, 1]} : vector<1x5xf32> to vector<1x1xf32>
    %2119 = arith.addf %2114, %2118 : vector<1x1xf32>
    %2120 = arith.cmpf ole, %2119, %2092 : vector<1x1xf32>
    %2121 = arith.extui %2120 : vector<1x1xi1> to vector<1x1xi32>
    %2122 = arith.addi %2117, %2121 : vector<1x1xi32>
    %2123 = vector.extract_strided_slice %2102 {offsets = [0, 2], sizes = [1, 1], strides = [1, 1]} : vector<1x5xf32> to vector<1x1xf32>
    %2124 = arith.addf %2119, %2123 : vector<1x1xf32>
    %2125 = arith.cmpf ole, %2124, %2092 : vector<1x1xf32>
    %2126 = arith.extui %2125 : vector<1x1xi1> to vector<1x1xi32>
    %2127 = arith.addi %2122, %2126 : vector<1x1xi32>
    %2128 = vector.extract_strided_slice %2102 {offsets = [0, 3], sizes = [1, 1], strides = [1, 1]} : vector<1x5xf32> to vector<1x1xf32>
    %2129 = arith.addf %2124, %2128 : vector<1x1xf32>
    %2130 = arith.cmpf ole, %2129, %2092 : vector<1x1xf32>
    %2131 = arith.extui %2130 : vector<1x1xi1> to vector<1x1xi32>
    %2132 = arith.addi %2127, %2131 : vector<1x1xi32>
    %2133 = tpu.iota {dimensions = array<i32: 1>} : vector<1x5xi32>
    %2134 = vector.broadcast %2132 : vector<1x1xi32> to vector<1x5xi32>
    %2135 = arith.cmpi eq, %2133, %2134 : vector<1x5xi32>
    %2136 = arith.extui %2135 : vector<1x5xi1> to vector<1x5xi32>
    %2137 = arith.sitofp %2136 : vector<1x5xi32> to vector<1x5xf32>
    %2138 = arith.mulf %2137, %2105 : vector<1x5xf32>
    %cst_490 = arith.constant dense<0.000000e+00> : vector<1xf32>
    %2139 = vector.multi_reduction <add>, %2138, %cst_490 [1] : vector<1x5xf32> to vector<1xf32>
    %2140 = vector.shape_cast %2139 : vector<1xf32> to vector<1x1xf32>
    %cst_491 = arith.constant 0.000000e+00 : f32
    %2141 = vector.broadcast %cst_491 : f32 to vector<1x1xf32>
    %2142 = arith.subf %2141, %2140 : vector<1x1xf32>
    %2143 = arith.addf %2060, %2142 : vector<1x1xf32>
    %2144 = arith.addf %2061, %2110 : vector<1x1xf32>
    %c3_492 = arith.constant 3 : index
    %c4_493 = arith.constant 4 : index
    %2145 = vector.load %arg3[%c3_492, %c4_493] : memref<4x6xi32, #tpu.memory_space<vmem>>, vector<1x1xi32>
    tpu.vector_store %arg3[%c3_492, %c4_493], %2132 {strides = array<i32>} : memref<4x6xi32, #tpu.memory_space<vmem>>, vector<1x1xi32>,
    %c1_i32_494 = arith.constant 1 : i32
    %2146 = vector.broadcast %c1_i32_494 : i32 to vector<1x1xi32>
    %2147 = arith.addi %2132, %2146 : vector<1x1xi32>
    %2148 = vector.broadcast %2147 : vector<1x1xi32> to vector<1x6xi32>
    %2149 = arith.cmpi eq, %13, %2148 : vector<1x6xi32>
    %2150 = arith.extui %2149 : vector<1x6xi1> to vector<1x6xi32>
    %2151 = arith.sitofp %2150 : vector<1x6xi32> to vector<1x6xf32>
    %2152 = arith.truncf %2151 : vector<1x6xf32> to vector<1x6xbf16>
    %cst_495 = arith.constant dense<0.000000e+00> : vector<1x32xf32>
    %2153 = tpu.matmul %2152, %5, %cst_495 {dimension_numbers = #tpu.dot_dimension_numbers<[1], [0], [0], [1], [0, 0, 1, 1], [], []>} : vector<1x6xbf16>, vector<6x32xbf16>, vector<1x32xf32> -> vector<1x32xf32>
    %2154 = tpu.concatenate %2153, %2088 in 1 : vector<1x32xf32>, vector<1x32xf32> -> vector<1x64xf32>
    %2155 = arith.truncf %2154 : vector<1x64xf32> to vector<1x64xbf16>
    %cst_496 = arith.constant dense<0.000000e+00> : vector<1x128xf32>
    %2156 = tpu.matmul %2155, %0, %cst_496 {dimension_numbers = #tpu.dot_dimension_numbers<[1], [0], [0], [1], [0, 0, 1, 1], [], []>} : vector<1x64xbf16>, vector<64x128xbf16>, vector<1x128xf32> -> vector<1x128xf32>
    %2157 = arith.addf %2156, %6 : vector<1x128xf32>
    %2158 = vector.extract_strided_slice %2157 {offsets = [0, 0], sizes = [1, 96], strides = [1, 1]} : vector<1x128xf32> to vector<1x96xf32>
    %cst_497 = arith.constant 0.000000e+00 : f32
    %2159 = vector.broadcast %cst_497 : f32 to vector<1x96xf32>
    %2160 = arith.subf %2159, %2158 : vector<1x96xf32>
    %2161 = math.exp %2160 : vector<1x96xf32>
    %cst_498 = arith.constant 1.000000e+00 : f32
    %2162 = vector.broadcast %cst_498 : f32 to vector<1x96xf32>
    %2163 = arith.addf %2162, %2161 : vector<1x96xf32>
    %2164 = tpu.reciprocal %2163 {approx = true} : vector<1x96xf32> -> vector<1x96xf32>
    %2165 = vector.extract_strided_slice %2164 {offsets = [0, 0], sizes = [1, 32], strides = [1, 1]} : vector<1x96xf32> to vector<1x32xf32>
    %2166 = vector.extract_strided_slice %2164 {offsets = [0, 32], sizes = [1, 32], strides = [1, 1]} : vector<1x96xf32> to vector<1x32xf32>
    %2167 = vector.extract_strided_slice %2164 {offsets = [0, 64], sizes = [1, 32], strides = [1, 1]} : vector<1x96xf32> to vector<1x32xf32>
    %2168 = vector.extract_strided_slice %2157 {offsets = [0, 96], sizes = [1, 32], strides = [1, 1]} : vector<1x128xf32> to vector<1x32xf32>
    %2169 = math.tanh %2168 : vector<1x32xf32>
    %2170 = arith.mulf %2166, %2086 : vector<1x32xf32>
    %2171 = arith.mulf %2165, %2169 : vector<1x32xf32>
    %2172 = arith.addf %2170, %2171 : vector<1x32xf32>
    %2173 = math.tanh %2172 : vector<1x32xf32>
    %2174 = arith.mulf %2167, %2173 : vector<1x32xf32>
    %2175 = arith.truncf %2174 : vector<1x32xf32> to vector<1x32xbf16>
    %cst_499 = arith.constant dense<0.000000e+00> : vector<1x5xf32>
    %2176 = tpu.matmul %2175, %4, %cst_499 {dimension_numbers = #tpu.dot_dimension_numbers<[1], [0], [0], [1], [0, 0, 1, 1], [], []>} : vector<1x32xbf16>, vector<32x5xbf16>, vector<1x5xf32> -> vector<1x5xf32>
    %2177 = arith.addf %2176, %9 : vector<1x5xf32>
    %2178 = vector.extract_strided_slice %10 {offsets = [0, 23], sizes = [1, 1], strides = [1, 1]} : vector<1x24xf32> to vector<1x1xf32>
    %cst_500 = arith.constant dense<0xFF800000> : vector<1xf32>
    %2179 = vector.multi_reduction <maximumf>, %2177, %cst_500 [1] : vector<1x5xf32> to vector<1xf32>
    %2180 = vector.shape_cast %2179 : vector<1xf32> to vector<1x1xf32>
    %2181 = vector.broadcast %2180 : vector<1x1xf32> to vector<1x5xf32>
    %2182 = arith.subf %2177, %2181 : vector<1x5xf32>
    %2183 = math.exp %2182 : vector<1x5xf32>
    %cst_501 = arith.constant dense<0.000000e+00> : vector<1xf32>
    %2184 = vector.multi_reduction <add>, %2183, %cst_501 [1] : vector<1x5xf32> to vector<1xf32>
    %2185 = vector.shape_cast %2184 : vector<1xf32> to vector<1x1xf32>
    %2186 = tpu.reciprocal %2185 {approx = true} : vector<1x1xf32> -> vector<1x1xf32>
    %2187 = vector.broadcast %2186 : vector<1x1xf32> to vector<1x5xf32>
    %2188 = arith.mulf %2183, %2187 : vector<1x5xf32>
    %2189 = math.log %2185 : vector<1x1xf32>
    %2190 = vector.broadcast %2189 : vector<1x1xf32> to vector<1x5xf32>
    %2191 = arith.subf %2182, %2190 : vector<1x5xf32>
    %2192 = arith.mulf %2188, %2191 : vector<1x5xf32>
    %cst_502 = arith.constant dense<0.000000e+00> : vector<1xf32>
    %2193 = vector.multi_reduction <add>, %2192, %cst_502 [1] : vector<1x5xf32> to vector<1xf32>
    %2194 = vector.shape_cast %2193 : vector<1xf32> to vector<1x1xf32>
    %cst_503 = arith.constant 0.000000e+00 : f32
    %2195 = vector.broadcast %cst_503 : f32 to vector<1x1xf32>
    %2196 = arith.subf %2195, %2194 : vector<1x1xf32>
    %c0_i32_504 = arith.constant 0 : i32
    %2197 = vector.broadcast %c0_i32_504 : i32 to vector<1x1xi32>
    %cst_505 = arith.constant 0.000000e+00 : f32
    %2198 = vector.broadcast %cst_505 : f32 to vector<1x1xf32>
    %2199 = vector.extract_strided_slice %2188 {offsets = [0, 0], sizes = [1, 1], strides = [1, 1]} : vector<1x5xf32> to vector<1x1xf32>
    %2200 = arith.addf %2198, %2199 : vector<1x1xf32>
    %2201 = arith.cmpf ole, %2200, %2178 : vector<1x1xf32>
    %2202 = arith.extui %2201 : vector<1x1xi1> to vector<1x1xi32>
    %2203 = arith.addi %2197, %2202 : vector<1x1xi32>
    %2204 = vector.extract_strided_slice %2188 {offsets = [0, 1], sizes = [1, 1], strides = [1, 1]} : vector<1x5xf32> to vector<1x1xf32>
    %2205 = arith.addf %2200, %2204 : vector<1x1xf32>
    %2206 = arith.cmpf ole, %2205, %2178 : vector<1x1xf32>
    %2207 = arith.extui %2206 : vector<1x1xi1> to vector<1x1xi32>
    %2208 = arith.addi %2203, %2207 : vector<1x1xi32>
    %2209 = vector.extract_strided_slice %2188 {offsets = [0, 2], sizes = [1, 1], strides = [1, 1]} : vector<1x5xf32> to vector<1x1xf32>
    %2210 = arith.addf %2205, %2209 : vector<1x1xf32>
    %2211 = arith.cmpf ole, %2210, %2178 : vector<1x1xf32>
    %2212 = arith.extui %2211 : vector<1x1xi1> to vector<1x1xi32>
    %2213 = arith.addi %2208, %2212 : vector<1x1xi32>
    %2214 = vector.extract_strided_slice %2188 {offsets = [0, 3], sizes = [1, 1], strides = [1, 1]} : vector<1x5xf32> to vector<1x1xf32>
    %2215 = arith.addf %2210, %2214 : vector<1x1xf32>
    %2216 = arith.cmpf ole, %2215, %2178 : vector<1x1xf32>
    %2217 = arith.extui %2216 : vector<1x1xi1> to vector<1x1xi32>
    %2218 = arith.addi %2213, %2217 : vector<1x1xi32>
    %2219 = tpu.iota {dimensions = array<i32: 1>} : vector<1x5xi32>
    %2220 = vector.broadcast %2218 : vector<1x1xi32> to vector<1x5xi32>
    %2221 = arith.cmpi eq, %2219, %2220 : vector<1x5xi32>
    %2222 = arith.extui %2221 : vector<1x5xi1> to vector<1x5xi32>
    %2223 = arith.sitofp %2222 : vector<1x5xi32> to vector<1x5xf32>
    %2224 = arith.mulf %2223, %2191 : vector<1x5xf32>
    %cst_506 = arith.constant dense<0.000000e+00> : vector<1xf32>
    %2225 = vector.multi_reduction <add>, %2224, %cst_506 [1] : vector<1x5xf32> to vector<1xf32>
    %2226 = vector.shape_cast %2225 : vector<1xf32> to vector<1x1xf32>
    %cst_507 = arith.constant 0.000000e+00 : f32
    %2227 = vector.broadcast %cst_507 : f32 to vector<1x1xf32>
    %2228 = arith.subf %2227, %2226 : vector<1x1xf32>
    %2229 = arith.addf %2143, %2228 : vector<1x1xf32>
    %2230 = arith.addf %2144, %2196 : vector<1x1xf32>
    %c3_508 = arith.constant 3 : index
    %c5_509 = arith.constant 5 : index
    %2231 = vector.load %arg3[%c3_508, %c5_509] : memref<4x6xi32, #tpu.memory_space<vmem>>, vector<1x1xi32>
    tpu.vector_store %arg3[%c3_508, %c5_509], %2218 {strides = array<i32>} : memref<4x6xi32, #tpu.memory_space<vmem>>, vector<1x1xi32>,
    %c1_i32_510 = arith.constant 1 : i32
    %2232 = vector.broadcast %c1_i32_510 : i32 to vector<1x1xi32>
    %2233 = arith.addi %2218, %2232 : vector<1x1xi32>
    %2234 = vector.broadcast %2233 : vector<1x1xi32> to vector<1x6xi32>
    %2235 = arith.cmpi eq, %13, %2234 : vector<1x6xi32>
    %2236 = arith.extui %2235 : vector<1x6xi1> to vector<1x6xi32>
    %2237 = arith.sitofp %2236 : vector<1x6xi32> to vector<1x6xf32>
    %2238 = arith.truncf %2237 : vector<1x6xf32> to vector<1x6xbf16>
    %cst_511 = arith.constant dense<0.000000e+00> : vector<1x32xf32>
    %2239 = tpu.matmul %2238, %5, %cst_511 {dimension_numbers = #tpu.dot_dimension_numbers<[1], [0], [0], [1], [0, 0, 1, 1], [], []>} : vector<1x6xbf16>, vector<6x32xbf16>, vector<1x32xf32> -> vector<1x32xf32>
    %2240 = tpu.concatenate %2239, %2174 in 1 : vector<1x32xf32>, vector<1x32xf32> -> vector<1x64xf32>
    %2241 = arith.truncf %2240 : vector<1x64xf32> to vector<1x64xbf16>
    %cst_512 = arith.constant dense<0.000000e+00> : vector<1x128xf32>
    %2242 = tpu.matmul %2241, %0, %cst_512 {dimension_numbers = #tpu.dot_dimension_numbers<[1], [0], [0], [1], [0, 0, 1, 1], [], []>} : vector<1x64xbf16>, vector<64x128xbf16>, vector<1x128xf32> -> vector<1x128xf32>
    %2243 = arith.addf %2242, %6 : vector<1x128xf32>
    %2244 = vector.extract_strided_slice %2243 {offsets = [0, 0], sizes = [1, 96], strides = [1, 1]} : vector<1x128xf32> to vector<1x96xf32>
    %cst_513 = arith.constant 0.000000e+00 : f32
    %2245 = vector.broadcast %cst_513 : f32 to vector<1x96xf32>
    %2246 = arith.subf %2245, %2244 : vector<1x96xf32>
    %2247 = math.exp %2246 : vector<1x96xf32>
    %cst_514 = arith.constant 1.000000e+00 : f32
    %2248 = vector.broadcast %cst_514 : f32 to vector<1x96xf32>
    %2249 = arith.addf %2248, %2247 : vector<1x96xf32>
    %2250 = tpu.reciprocal %2249 {approx = true} : vector<1x96xf32> -> vector<1x96xf32>
    %2251 = vector.extract_strided_slice %2250 {offsets = [0, 0], sizes = [1, 32], strides = [1, 1]} : vector<1x96xf32> to vector<1x32xf32>
    %2252 = vector.extract_strided_slice %2250 {offsets = [0, 32], sizes = [1, 32], strides = [1, 1]} : vector<1x96xf32> to vector<1x32xf32>
    %2253 = vector.extract_strided_slice %2250 {offsets = [0, 64], sizes = [1, 32], strides = [1, 1]} : vector<1x96xf32> to vector<1x32xf32>
    %2254 = vector.extract_strided_slice %2243 {offsets = [0, 96], sizes = [1, 32], strides = [1, 1]} : vector<1x128xf32> to vector<1x32xf32>
    %2255 = math.tanh %2254 : vector<1x32xf32>
    %2256 = arith.mulf %2252, %2172 : vector<1x32xf32>
    %2257 = arith.mulf %2251, %2255 : vector<1x32xf32>
    %2258 = arith.addf %2256, %2257 : vector<1x32xf32>
    %2259 = math.tanh %2258 : vector<1x32xf32>
    %2260 = arith.mulf %2253, %2259 : vector<1x32xf32>
    %c4_515 = arith.constant 4 : index
    %c0_516 = arith.constant 0 : index
    %2261 = vector.load %arg6[%c4_515, %c0_516] : memref<5x32xf32, #tpu.memory_space<vmem>>, vector<1x32xf32>
    tpu.vector_store %arg6[%c4_515, %c0_516], %2260 {strides = array<i32>} : memref<5x32xf32, #tpu.memory_space<vmem>>, vector<1x32xf32>,
    %2262 = arith.truncf %2260 : vector<1x32xf32> to vector<1x32xbf16>
    %cst_517 = arith.constant dense<0.000000e+00> : vector<1x32xf32>
    %2263 = tpu.matmul %2262, %2, %cst_517 {dimension_numbers = #tpu.dot_dimension_numbers<[1], [0], [0], [1], [0, 0, 1, 1], [], []>} : vector<1x32xbf16>, vector<32x32xbf16>, vector<1x32xf32> -> vector<1x32xf32>
    %c4_518 = arith.constant 4 : index
    %c0_519 = arith.constant 0 : index
    %2264 = vector.load %arg7[%c4_518, %c0_519] : memref<5x32xf32, #tpu.memory_space<vmem>>, vector<1x32xf32>
    tpu.vector_store %arg7[%c4_518, %c0_519], %2263 {strides = array<i32>} : memref<5x32xf32, #tpu.memory_space<vmem>>, vector<1x32xf32>,
    %2265 = arith.addf %1105, %2230 : vector<1x1xf32>
    %c0_520 = arith.constant 0 : index
    %c0_521 = arith.constant 0 : index
    %2266 = vector.load %arg4[%c0_520, %c0_521] : memref<1x1xf32, #tpu.memory_space<vmem>>, vector<1x1xf32>
    tpu.vector_store %arg4[%c0_520, %c0_521], %2265 {strides = array<i32>} : memref<1x1xf32, #tpu.memory_space<vmem>>, vector<1x1xf32>,
    %2267 = arith.addf %1104, %2229 : vector<1x1xf32>
    %c0_522 = arith.constant 0 : index
    %c0_523 = arith.constant 0 : index
    %2268 = vector.load %arg5[%c0_522, %c0_523] : memref<1x1xf32, #tpu.memory_space<vmem>>, vector<1x1xf32>
    tpu.vector_store %arg5[%c0_522, %c0_523], %2267 {strides = array<i32>} : memref<1x1xf32, #tpu.memory_space<vmem>>, vector<1x1xf32>,
    return
  }
}

</mosaic_0001>

<bundles_post_ra>
// kernel: controller_forward.1
= control target key start
LH: loop header
LB: loop body
LE: loop exit
PB: predicated region body
PF: predicated region fallthrough
CT: control target
= control target key end

     0   :  { %11 = vsyncpa [#allocation5], 0  ;;  %v11083_v4 = vmov 0.0   ;;  %vm8537_vm0 = vmmov 0   ;;  %s8538_s24 = smov 32   ;;  %s11077_s0 = inlined_call_operand.vmem [shape: bf16[64,128], index: 0, kind: input, shape index: {}]   ;;  %s11078_s1 = inlined_call_operand.vmem [shape: bf16[32,128], index: 1, kind: input, shape index: {}]   ;;  %s11079_s2 = inlined_call_operand.vmem [shape: f32[2,128], index: 2, kind: input, shape index: {}]   ;;  %s11080_s3 = inlined_call_operand.vmem [shape: s32[4,6], index: 3, kind: output, shape index: {0}]   ;;  %s11081_s4 = inlined_call_operand.hbm [shape: f32[1,1], index: 4, kind: output, shape index: {1}]   ;;  %s11082_s5 = inlined_call_operand.hbm [shape: f32[1,1], index: 5, kind: output, shape index: {2}]  }
   0x1   :  { %v8631_v0 = vld [vmem:[%s11078_s1] sm:$0xf]  ;;  %v29_v1 = vld [vmem:[%s11078_s1 + $0x4] sm:$0xf]  ;;  %7170 = vmatprep.subr.bf16.mxu0 %v11083_v4  ;;  %7182 = vmatprep.subr.bf16.mxu1 %v11083_v4  ;;  %v8656_v6 = vld [vmem:[%s11077_s0 + $0x8] sm:$0xff]  }
   0x2   :  { %v34_v2 = vunpack.c.l.bf16 %v8631_v0  ;;  %v8638_v3 = vcombine.low %v8631_v0, %v29_v1  ;;  %v8644_v5 = vld [vmem:[%s11077_s0] sm:$0xff]   ;;  %7178 = vmatprep.mubr.msk.bf16.mxu0 %vm8537_vm0, %v11083_v4  ;;  %7186 = vmatprep.mubr.msk.bf16.mxu1 %vm8537_vm0, %v11083_v4 }
   0x3   :  { %7171 = vmatpush3.bf16.msra.mxu0 %v8644_v5 }
   0x4   :  { %38 = vrot.lane.b32.xlu0 %v34_v2, %s8538_s24  ;;  %7172 = vmatprep.subr.bf16.mxu0 %v11083_v4 }
   0x5   :  { %7183 = vmatpush3.bf16.msra.mxu1 %v8638_v3 }
   0x6   :  { %7184 = vmatprep.subr.bf16.mxu1 %v11083_v4 }
   0x7   :  { %12 = vsyncpa [#allocation7], 0  ;;  %7173 = vmatpush3.bf16.msra.mxu0 %v8656_v6  ;;  %v8665_v7 = vld [vmem:[%s11077_s0 + $0x10] sm:$0xff]   ;;  %v8672_v8 = vld [vmem:[%s11077_s0 + $0x18] sm:$0xff]   ;;  %vm41_vm1 = vcmask 261120   ;;  %vm68_vm2 = vcmask 523264  }
   0x8   :  { %7174 = vmatprep.subr.bf16.mxu0 %v11083_v4  ;;  %v8689_v12 = vld [vmem:[%s11079_s2] sm:$0x1]  ;;  %v8697_v29 = vld [vmem:[%s11078_s1 + $0x8] sm:$0xff]   ;;  %s8539_s10 = smov 96   ;;  %s8540_s11 = smov 64   ;;  %vm135_vm3 = vcmask 253952  }
   0x9   :  { %7185 = vmatpush3.bf16.msra.mxu1 %v8697_v29  ;;  %136 = vst.msk [vmem:[#allocation2] sm:$0x1] %vm135_vm3, %v11083_v4  ;;  %269 = vst.msk [vmem:[#allocation2 + $0x1] sm:$0x1] %vm135_vm3, %v11083_v4  ;;  %vm455_vm4 = vcmask 254976   ;;  %vm459_vm5 = vcmask 1041408  }
   0xa   :  { %7190 = vmatprep.subr.bf16.mxu1 %v11083_v4  ;;  %vm867_vm10 = vcmask 32768   ;;  %s8544_s14 = smov 62   ;;  %s8545_s15 = smov 126   ;;  %vm944_vm14 = vcmask 1042432  }
   0xb   :  { %7175 = vmatpush3.bf16.msra.mxu0 %v8665_v7  ;;  %s8546_s16 = smov 127   ;;  %s8547_s17 = smov 125  }
   0xc   :  { %7176 = vmatprep.subr.bf16.mxu0 %v11083_v4  ;;  %s8548_s25 = smov 61   ;;  %s8549_s13 = smov 60  }
   0xd   :  { %s8551_s18 = smov 68   ;;  %s8552_s19 = smov 59  }
   0xe   :  { %s8554_s20 = smov 69   ;;  %s8555_s21 = smov 58  }
   0xf   :  { %7177 = vmatpush3.bf16.msra.mxu0 %v8672_v8  ;;  %s8556_s22 = smov 57   ;;  %s8557_s9 = smov 56  }
  0x10   :  { %7202 = vmatprep.subr.bf16.mxu0 %v11083_v4  ;;  %s8559_s12 = smov 72   ;;  %s8564_s23 = smov 53  }
  0x11   :  { %s8572_s26 = smov 47   ;;  %s8574_s27 = smov 81  }
  0x12   :  { %s8575_s28 = smov 46   ;;  %s8576_s29 = smov 45  }
  0x13   :  { %s8584_s30 = smov 41   ;;  %s8593_s6 = smov 116  }
  0x76   :  { %v8677_v9 = vpop.permute.xlu0 %38 }
  0x77   :  { %v42_v10 = vsel %vm41_vm1, %v8677_v9, 0.0 }
  0x78   :  { %v43_v11 = vpack.c.bf16 %v42_v10, %v42_v10 }
  0x7a   :  { %7179 = vmatmul.mubr.msk.bf16.vlgmr.msra.gmra.mrb[0].mxu0 %vm68_vm2, %v43_v11 }
  0x7b   :  { %7203 = vmatpush3.bf16.msra.mxu0 %v8638_v3  ;;  %7206 = vmatprep.mubr.msk.bf16.mxu0 %vm8537_vm0, %v11083_v4 }
  0x7c   :  { %7204 = vmatprep.subr.bf16.mxu0 %v11083_v4 }
  0x7f   :  { %7205 = vmatpush3.bf16.msra.mxu0 %v8697_v29 }
  0x80   :  { %7210 = vmatprep.subr.bf16.mxu0 %v11083_v4 }
 0x14d   :  { %v106_v13 = vpop.f32.mrb[0].mxu0 }
 0x14e   :  { %v107_v14 = vadd.f32 %v106_v13, %v8689_v12  ;;  %v7180_v15 = vpop.f32.mrb[1].mxu0 }
 0x14f   :  { %v109_v16 = vpop.f32.mrb[2].mxu0 }
 0x150   :  { %8014 = vtanh.f32 %v107_v14  ;;  %v7181_v17 = vpop.f32.mrb[3].mxu0  ;;  %v112_v19 = vsub.f32 0.0, %v107_v14 }
 0x152   :  { %v113_v20 = vmul.f32 1.442695, %v112_v19 }
 0x154   :  { %8016 = vpow2.f32 %v113_v20 }
 0x15a   :  { %v8015_v18 = vpop.eup %8014 }
 0x15b   :  { %120 = vrot.lane.b32.xlu0 %v8015_v18, %s8538_s24 }
 0x15e   :  { %v8017_v21 = vpop.eup %8016 }
 0x15f   :  { %v115_v22 = vadd.f32 1.0, %v8017_v21 }
 0x161   :  { %8018 = vrcp.f32 %v115_v22 }
 0x16b   :  { %v8019_v23 = vpop.eup %8018 }
 0x16c   :  { %v118_v26 = vmul.f32 0.0, %v8019_v23 }
 0x1cd   :  { %v121_v24 = vpop.permute.xlu0 %120 }
 0x1ce   :  { %v123_v25 = vmul.f32 %v8019_v23, %v121_v24 }
 0x1d0   :  { %125 = vrot.lane.b32.xlu1 %v123_v25, %s8538_s24 }
 0x242   :  { %v126_v27 = vpop.permute.xlu1 %125 }
 0x243   :  { %v128_v28 = vadd.f32 %v126_v27, %v118_v26 }
 0x245   :  { %8020 = vtanh.f32 %v128_v28 }
 0x24f   :  { %v8021_v30 = vpop.eup %8020 }
 0x250   :  { %131 = vrot.lane.b32.xlu1 %v8021_v30, %s8538_s24 }
 0x2c2   :  { %v132_v31 = vpop.permute.xlu1 %131 }
 0x2c3   :  { %v134_v32 = vmul.f32 %v8019_v23, %v132_v31 }
 0x2c5   :  { %v137_v33 = vpack.c.bf16 %v134_v32, %v134_v32  ;;  %198 = vrot.lane.b32.xlu1 %v134_v32, %s8539_s10 }
 0x2c7   :  { %139 = vrot.lane.b32.xlu0 %v137_v33, %s8540_s11 }
 0x337   :  { %v199_v35 = vpop.permute.xlu1 %198 }
 0x338   :  { %v201_v36 = vsel %vm41_vm1, %v8677_v9, %v199_v35 }
 0x339   :  { %v140_v34 = vpop.permute.xlu0 %139  ;;  %v202_v37 = vpack.c.bf16 %v201_v36, %v201_v36 }
 0x33a   :  { %7187 = vmatmul.mubr.msk.bf16.vlgmr.msra.gmra.mrb[0].mxu1 %vm41_vm1, %v140_v34 }
 0x33b   :  { %7191 = vmatpush3.bf16.msra.mxu1 %v8644_v5  ;;  %7198 = vmatprep.mubr.msk.bf16.mxu1 %vm8537_vm0, %v11083_v4 }
 0x33c   :  { %7192 = vmatprep.subr.bf16.mxu1 %v11083_v4 }
 0x33f   :  { %7193 = vmatpush3.bf16.msra.mxu1 %v8656_v6 }
 0x340   :  { %7194 = vmatprep.subr.bf16.mxu1 %v11083_v4 }
 0x343   :  { %7195 = vmatpush3.bf16.msra.mxu1 %v8665_v7 }
 0x344   :  { %7196 = vmatprep.subr.bf16.mxu1 %v11083_v4 }
 0x347   :  { %7197 = vmatpush3.bf16.msra.mxu1 %v8672_v8 }
 0x348   :  { %7222 = vmatprep.subr.bf16.mxu1 %v11083_v4 }
 0x34a   :  { %7199 = vmatmul.mubr.msk.bf16.vlgmr.msra.gmra.mrb[4].mxu1 %vm68_vm2, %v202_v37 }
 0x34b   :  { %7226 = vmatprep.mubr.msk.bf16.mxu1 %vm8537_vm0, %v11083_v4 }
 0x40d   :  { %v190_v38 = vpop.f32.mrb[0].mxu1 }
 0x40e   :  { %196 = vst.msk [vmem:[#allocation3] sm:$0x1] %vm135_vm3, %v190_v38  ;;  %v7188_v39 = vpop.f32.mrb[1].mxu1 }
 0x40f   :  { %v193_v40 = vpop.f32.mrb[2].mxu1  ;;  %v35_v39 = vlaneseq }
 0x410   :  { %v7189_v41 = vpop.f32.mrb[3].mxu1 }
 0x411   :  { %v8790_v40 = vshrl.u32 %v35_v39, 7 }
 0x413   :  { %v8793_v41 = vsub.s32 0, %v8790_v40 }
 0x41d   :  { %v240_v42 = vpop.f32.mrb[4].mxu1 }
 0x41e   :  { %v241_v43 = vadd.f32 %v240_v42, %v8689_v12  ;;  %v7200_v44 = vpop.f32.mrb[5].mxu1 }
 0x41f   :  { %v243_v45 = vpop.f32.mrb[6].mxu1 }
 0x420   :  { %8022 = vtanh.f32 %v241_v43  ;;  %v7201_v46 = vpop.f32.mrb[7].mxu1  ;;  %v246_v48 = vsub.f32 0.0, %v241_v43 }
 0x422   :  { %v247_v49 = vmul.f32 1.442695, %v246_v48 }
 0x424   :  { %8024 = vpow2.f32 %v247_v49  ;;  %v8799_v49 = vld [vmem:[%s11079_s2 + $0x1] sm:$0x1] }
 0x42a   :  { %v8023_v47 = vpop.eup %8022 }
 0x42b   :  { %254 = vrot.lane.b32.xlu0 %v8023_v47, %s8538_s24 }
 0x42e   :  { %v8025_v50 = vpop.eup %8024 }
 0x42f   :  { %v249_v51 = vadd.f32 1.0, %v8025_v50  ;;  %v8803_v50 = vrot.slane %v8799_v49, %v8793_v41 }
 0x431   :  { %8026 = vrcp.f32 %v249_v51 }
 0x43b   :  { %v8027_v52 = vpop.eup %8026 }
 0x43c   :  { %v252_v55 = vmul.f32 %v8027_v52, %v128_v28 }
 0x49d   :  { %v255_v53 = vpop.permute.xlu0 %254 }
 0x49e   :  { %v257_v54 = vmul.f32 %v8027_v52, %v255_v53 }
 0x4a0   :  { %259 = vrot.lane.b32.xlu1 %v257_v54, %s8538_s24  ;;  %v8541_v54 = vmov 64  }
 0x4a1   :  { %7984 = vset.pattern.permute.xlu0 %v8541_v54 }
 0x512   :  { %v260_v56 = vpop.permute.xlu1 %259 }
 0x513   :  { %v262_v57 = vadd.f32 %v260_v56, %v252_v55 }
 0x515   :  { %8028 = vtanh.f32 %v262_v57 }
 0x51f   :  { %v8029_v58 = vpop.eup %8028 }
 0x520   :  { %265 = vrot.lane.b32.xlu0 %v8029_v58, %s8538_s24 }
 0x592   :  { %v266_v59 = vpop.permute.xlu0 %265 }
 0x593   :  { %v268_v60 = vmul.f32 %v8027_v52, %v266_v59 }
 0x595   :  { %v270_v61 = vpack.c.bf16 %v268_v60, %v268_v60  ;;  %319 = vrot.lane.b32.xlu0 %v268_v60, %s8539_s10 }
 0x597   :  { %272 = vrot.lane.b32.xlu1 %v270_v61, %s8540_s11 }
 0x607   :  { %v320_v63 = vpop.permute.xlu0 %319 }
 0x608   :  { %v322_v1 = vsel %vm41_vm1, %v8677_v9, %v320_v63 }
 0x609   :  { %v273_v62 = vpop.permute.xlu1 %272  ;;  %v323_v2 = vpack.c.bf16 %v322_v1, %v322_v1 }
 0x60a   :  { %7207 = vmatmul.mubr.msk.bf16.vlgmr.msra.gmra.mrb[4].mxu0 %vm41_vm1, %v273_v62 }
 0x60b   :  { %7211 = vmatpush3.bf16.msra.mxu0 %v8644_v5  ;;  %7218 = vmatprep.mubr.msk.bf16.mxu0 %vm8537_vm0, %v11083_v4 }
 0x60c   :  { %7212 = vmatprep.subr.bf16.mxu0 %v11083_v4 }
 0x60f   :  { %7213 = vmatpush3.bf16.msra.mxu0 %v8656_v6 }
 0x610   :  { %7214 = vmatprep.subr.bf16.mxu0 %v11083_v4 }
 0x613   :  { %7215 = vmatpush3.bf16.msra.mxu0 %v8665_v7 }
 0x614   :  { %7216 = vmatprep.subr.bf16.mxu0 %v11083_v4 }
 0x617   :  { %7217 = vmatpush3.bf16.msra.mxu0 %v8672_v8 }
 0x618   :  { %7242 = vmatprep.subr.bf16.mxu0 %v11083_v4 }
 0x61a   :  { %7219 = vmatmul.mubr.msk.bf16.vlgmr.msra.gmra.mrb[8].mxu0 %vm68_vm2, %v323_v2 }
 0x61b   :  { %7246 = vmatprep.mubr.msk.bf16.mxu0 %vm8537_vm0, %v11083_v4 }
 0x6dd   :  { %v311_v10 = vpop.f32.mrb[4].mxu0 }
 0x6de   :  { %317 = vst.msk [vmem:[#allocation3 + $0x1] sm:$0x1] %vm135_vm3, %v311_v10  ;;  %v7208_v11 = vpop.f32.mrb[5].mxu0 }
 0x6df   :  { %v314_v13 = vpop.f32.mrb[6].mxu0 }
 0x6e0   :  { %v7209_v14 = vpop.f32.mrb[7].mxu0 }
 0x6e5   :  { %v390_v45 = vld [vmem:[#allocation3] sm:$0x3] }
 0x6ed   :  { %v361_v15 = vpop.f32.mrb[8].mxu0 }
 0x6ee   :  { %v362_v16 = vadd.f32 %v361_v15, %v8689_v12  ;;  %v7220_v17 = vpop.f32.mrb[9].mxu0 }
 0x6ef   :  { %v364_v18 = vpop.f32.mrb[10].mxu0 }
 0x6f0   :  { %8030 = vtanh.f32 %v362_v16  ;;  %v7221_v19 = vpop.f32.mrb[11].mxu0  ;;  %v367_v21 = vsub.f32 0.0, %v362_v16 }
 0x6f2   :  { %v368_v22 = vmul.f32 1.442695, %v367_v21 }
 0x6f4   :  { %8032 = vpow2.f32 %v368_v22 }
 0x6fa   :  { %v8031_v20 = vpop.eup %8030 }
 0x6fb   :  { %375 = vrot.lane.b32.xlu1 %v8031_v20, %s8538_s24 }
 0x6fe   :  { %v8033_v23 = vpop.eup %8032 }
 0x6ff   :  { %v370_v24 = vadd.f32 1.0, %v8033_v23  ;;  %v11085_v23 = vmov 0  }
 0x701   :  { %8034 = vrcp.f32 %v370_v24 }
 0x70b   :  { %v8035_v25 = vpop.eup %8034 }
 0x70c   :  { %v373_v28 = vmul.f32 %v8035_v25, %v262_v57 }
 0x76d   :  { %v376_v26 = vpop.permute.xlu1 %375 }
 0x76e   :  { %v378_v27 = vmul.f32 %v8035_v25, %v376_v26 }
 0x770   :  { %380 = vrot.lane.b32.xlu0 %v378_v27, %s8538_s24 }
 0x774   :  { %395 = vrot.lane.b32.xlu0 %v8638_v3, %s8539_s10 }
 0x7e2   :  { %v381_v30 = vpop.permute.xlu0 %380 }
 0x7e3   :  { %v8755_v31 = vadd.f32 %v381_v30, %v373_v28  ;;  %v519_v30 = vld [vmem:[#allocation2] sm:$0x3] }
 0x7e5   :  { %8036 = vtanh.f32 %v8755_v31 }
 0x7e6   :  { %v8758_v32 = vpop.permute.xlu0 %395 }
 0x7e7   :  { %7223 = vmatpush3.bf16.msra.mxu1 %v8758_v32  ;;  %7243 = vmatpush3.bf16.msra.mxu0 %v8758_v32 }
 0x7e8   :  { %7224 = vmatprep.subr.bf16.mxu1 %v11083_v4  ;;  %7244 = vmatprep.subr.bf16.mxu0 %v11083_v4 }
 0x7ef   :  { %v8037_v33 = vpop.eup %8036 }
 0x7f0   :  { %386 = vrot.lane.b32.xlu1 %v8037_v33, %s8538_s24 }
 0x7f4   :  { %397 = vrot.lane.b32.xlu1 %v8697_v29, %s8539_s10 }
 0x862   :  { %v387_v34 = vpop.permute.xlu1 %386 }
 0x863   :  { %v8767_v35 = vmul.f32 %v8035_v25, %v387_v34 }
 0x865   :  { %v391_v36 = vpack.c.bf16 %v8767_v35, %v8767_v35 }
 0x866   :  { %v8771_v37 = vpop.permute.xlu1 %397 }
 0x867   :  { %393 = vrot.lane.b32.xlu0 %v391_v36, %s8540_s11  ;;  %7225 = vmatpush3.bf16.msra.mxu1 %v8771_v37 }
 0x868   :  { %7245 = vmatpush3.bf16.msra.mxu0 %v8771_v37  ;;  %7230 = vmatprep.subr.bf16.mxu1 %v11083_v4 }
 0x869   :  { %7250 = vmatprep.subr.bf16.mxu0 %v11083_v4 }
 0x8d9   :  { %v394_v38 = vpop.permute.xlu0 %393 }
 0x8da   :  { %7227 = vmatmul.mubr.msk.bf16.vlgmr.msra.gmra.mrb[8].mxu1 %vm41_vm1, %v394_v38 }
 0x8db   :  { %7231 = vmatpush3.bf16.msra.mxu1 %v8644_v5  ;;  %7238 = vmatprep.mubr.msk.bf16.mxu1 %vm8537_vm0, %v11083_v4 }
 0x8dc   :  { %7232 = vmatprep.subr.bf16.mxu1 %v11083_v4 }
 0x8df   :  { %7233 = vmatpush3.bf16.msra.mxu1 %v8656_v6 }
 0x8e0   :  { %7234 = vmatprep.subr.bf16.mxu1 %v11083_v4 }
 0x8e3   :  { %7235 = vmatpush3.bf16.msra.mxu1 %v8665_v7 }
 0x8e4   :  { %7236 = vmatprep.subr.bf16.mxu1 %v11083_v4 }
 0x8e7   :  { %7237 = vmatpush3.bf16.msra.mxu1 %v8672_v8 }
 0x8e8   :  { %7262 = vmatprep.subr.bf16.mxu1 %v11083_v4 }
 0x9ad   :  { %v438_v42 = vpop.f32.mrb[8].mxu1 }
 0x9ae   :  { %v447_v43 = vrot.slane %v438_v42, %v8793_v41  ;;  %v7228_v44 = vpop.f32.mrb[9].mxu1 }
 0x9af   :  { %v441_v46 = vpop.f32.mrb[10].mxu1 }
 0x9b0   :  { %v448_v47 = vadd.f32 %v447_v43, %v390_v45  ;;  %v7229_v48 = vpop.f32.mrb[11].mxu1 }
 0x9b2   :  { %8038 = vtanh.f32 %v448_v47 }
 0x9bc   :  { %v8039_v51 = vpop.eup %8038 }
 0x9bd   :  { %v454_v52 = vmul.f32 %v8039_v51, %v8803_v50 }
 0x9bf   :  { %v456_v53 = vsel %vm455_vm4, %v454_v52, 0.0 }
 0x9c0   :  { %457 = vadd.xlane.f32.xlu1 %v456_v53 }
 0xa4d   :  { %v458_v55 = vpop.xlane.xlu1 %457 }
 0xa4e   :  { %v460_v56 = vsel %vm459_vm5, %v458_v55, -inf }
 0xa4f   :  { %v461_v57 = vrot.slane %v460_v56, 4 }
 0xa51   :  { %v462_v58 = vmax.f32 %v460_v56, %v461_v57 }
 0xa53   :  { %v463_v59 = vrot.slane %v462_v58, 2 }
 0xa55   :  { %v464_v60 = vmax.f32 %v462_v58, %v463_v59 }
 0xa57   :  { %v465_v61 = vrot.slane %v464_v60, 1 }
 0xa59   :  { %v466_v62 = vmax.f32 %v464_v60, %v465_v61 }
 0xa5b   :  { %v467_v63 = vsub.f32 %v458_v55, %v466_v62 }
 0xa5d   :  { %v468_v1 = vmul.f32 1.442695, %v467_v63 }
 0xa5f   :  { %8040 = vpow2.f32 %v468_v1 }
 0xa69   :  { %v8041_v2 = vpop.eup %8040 }
 0xa6a   :  { %v470_v10 = vsel %vm459_vm5, %v8041_v2, 0.0 }
 0xa6b   :  { %v471_v11 = vrot.slane %v470_v10, 4 }
 0xa6d   :  { %v472_v13 = vadd.f32 %v471_v11, %v470_v10 }
 0xa6f   :  { %v473_v14 = vrot.slane %v472_v13, 2 }
 0xa71   :  { %v474_v15 = vadd.f32 %v473_v14, %v472_v13 }
 0xa73   :  { %v475_v16 = vrot.slane %v474_v15, 1 }
 0xa75   :  { %v476_v17 = vadd.f32 %v475_v16, %v474_v15 }
 0xa77   :  { %8042 = vrcp.f32 %v476_v17 }
 0xa78   :  { %8044 = vlog2.f32 %v476_v17 }
 0xa81   :  { %v8043_v18 = vpop.eup %8042 }
 0xa82   :  { %v8045_v19 = vpop.eup %8044  ;;  %v478_v20 = vmul.f32 %v8043_v18, %v8041_v2 }
 0xa83   :  { %v480_v21 = vmul.f32 0.6931472, %v8045_v19  ;;  %v605_v19 = vld [vmem:[#allocation3] sm:$0x3] }
 0xa84   :  { %vm492_vm6 = vcmp.le.f32.partialorder %v478_v20, %v8799_v49 }
 0xa85   :  { %v481_v22 = vsub.f32 %v467_v63, %v480_v21  ;;  %v8811_v24 = vsel %vm492_vm6, 1, %v11085_v23  ;;  %vm517_vm6 = vcmask 0  }
 0xa86   :  { %v499_v25 = vrot.slane %v8811_v24, %v8793_v41 }
 0xa87   :  { %v8815_v26 = vmul.f32 %v481_v22, %v478_v20 }
 0xa88   :  { %vm500_vm7 = vcmp.eq.s32.totalorder %v8790_v40, %v499_v25 }
 0xa89   :  { %v6763_v27 = vsel %vm500_vm7, 1.0, %v11083_v4 }
 0xa8a   :  { %522 = vperm.xlu0 %7984, %v6763_v27   ;;  %v8819_v28 = vmul.f32 %v6763_v27, %v481_v22 }
 0xa8e   :  { %534 = vrot.lane.b32.xlu0 %v8767_v35, %s8539_s10 }
 0xa8f   :  { %7987 = vset.pattern.permute.xlu0 %v11085_v23 }
 0xb09   :  { %v523_v33 = vpop.permute.xlu0 %522 }
 0xb0a   :  { %v525_v34 = vmul.f32 %v523_v33, %v519_v30  ;;  %v8543_v33 = vmov 65  }
 0xb0b   :  { %7985 = vset.pattern.permute.xlu1 %v8543_v33 }
 0xb0c   :  { %v526_v36 = vsel %vm455_vm4, %v525_v34, 0.0 }
 0xb0d   :  { %v527_v38 = vrot.slane %v526_v36, 4  ;;  %v535_v47 = vpop.permute.xlu0 %534 }
 0xb0f   :  { %v528_v42 = vadd.f32 %v527_v38, %v526_v36 }
 0xb11   :  { %v529_v43 = vrot.slane %v528_v42, 2 }
 0xb13   :  { %v530_v44 = vadd.f32 %v529_v43, %v528_v42 }
 0xb15   :  { %v531_v45 = vrot.slane %v530_v44, 1 }
 0xb17   :  { %v532_v46 = vadd.f32 %v531_v45, %v530_v44 }
 0xb19   :  { %v537_v48 = vsel %vm41_vm1, %v532_v46, %v535_v47 }
 0xb1a   :  { %v538_v51 = vpack.c.bf16 %v537_v48, %v537_v48 }
 0xb1c   :  { %7239 = vmatmul.mubr.msk.bf16.vlgmr.msra.gmra.mrb[12].mxu1 %vm68_vm2, %v538_v51 }
 0xb1d   :  { %7266 = vmatprep.mubr.msk.bf16.mxu1 %vm8537_vm0, %v11083_v4 }
 0xbef   :  { %v576_v35 = vpop.f32.mrb[12].mxu1 }
 0xbf0   :  { %v577_v52 = vadd.f32 %v576_v35, %v8689_v12  ;;  %v7240_v53 = vpop.f32.mrb[13].mxu1 }
 0xbf1   :  { %v579_v54 = vpop.f32.mrb[14].mxu1 }
 0xbf2   :  { %8046 = vtanh.f32 %v577_v52  ;;  %v7241_v55 = vpop.f32.mrb[15].mxu1  ;;  %v582_v57 = vsub.f32 0.0, %v577_v52 }
 0xbf4   :  { %v583_v58 = vmul.f32 1.442695, %v582_v57 }
 0xbf6   :  { %8048 = vpow2.f32 %v583_v58  ;;  %v483_v58 = vsel %vm459_vm5, %v8815_v26, 0.0 }
 0xbfc   :  { %v8047_v56 = vpop.eup %8046 }
 0xbfd   :  { %590 = vrot.lane.b32.xlu0 %v8047_v56, %s8538_s24 }
 0xc00   :  { %v8049_v59 = vpop.eup %8048 }
 0xc01   :  { %v585_v60 = vadd.f32 1.0, %v8049_v59  ;;  %v484_v59 = vrot.slane %v483_v58, 4 }
 0xc03   :  { %8050 = vrcp.f32 %v585_v60 }
 0xc0d   :  { %v8051_v61 = vpop.eup %8050 }
 0xc0e   :  { %v588_v1 = vmul.f32 %v8051_v61, %v8755_v31 }
 0xc6f   :  { %v591_v62 = vpop.permute.xlu0 %590 }
 0xc70   :  { %v593_v63 = vmul.f32 %v8051_v61, %v591_v62  ;;  %v485_v62 = vadd.f32 %v484_v59, %v483_v58 }
 0xc72   :  { %595 = vrot.lane.b32.xlu0 %v593_v63, %s8538_s24 }
 0xce4   :  { %v596_v2 = vpop.permute.xlu0 %595 }
 0xce5   :  { %v8833_v10 = vadd.f32 %v596_v2, %v588_v1 }
 0xce7   :  { %8052 = vtanh.f32 %v8833_v10 }
 0xcf1   :  { %v8053_v11 = vpop.eup %8052 }
 0xcf2   :  { %601 = vrot.lane.b32.xlu0 %v8053_v11, %s8538_s24 }
 0xd64   :  { %v602_v13 = vpop.permute.xlu0 %601 }
 0xd65   :  { %v8837_v14 = vmul.f32 %v8051_v61, %v602_v13 }
 0xd67   :  { %v606_v15 = vpack.c.bf16 %v8837_v14, %v8837_v14 }
 0xd69   :  { %608 = vrot.lane.b32.xlu0 %v606_v15, %s8540_s11  ;;  %v486_v15 = vrot.slane %v485_v62, 2 }
 0xddb   :  { %v609_v16 = vpop.permute.xlu0 %608 }
 0xddc   :  { %7247 = vmatmul.mubr.msk.bf16.vlgmr.msra.gmra.mrb[12].mxu0 %vm41_vm1, %v609_v16 }
 0xddd   :  { %7251 = vmatpush3.bf16.msra.mxu0 %v8644_v5  ;;  %7258 = vmatprep.mubr.msk.bf16.mxu0 %vm8537_vm0, %v11083_v4 }
 0xdde   :  { %7252 = vmatprep.subr.bf16.mxu0 %v11083_v4 }
 0xde1   :  { %7253 = vmatpush3.bf16.msra.mxu0 %v8656_v6 }
 0xde2   :  { %7254 = vmatprep.subr.bf16.mxu0 %v11083_v4 }
 0xde5   :  { %7255 = vmatpush3.bf16.msra.mxu0 %v8665_v7 }
 0xde6   :  { %7256 = vmatprep.subr.bf16.mxu0 %v11083_v4 }
 0xde9   :  { %7257 = vmatpush3.bf16.msra.mxu0 %v8672_v8 }
 0xdea   :  { %7276 = vmatprep.subr.bf16.mxu0 %v11083_v4 }
 0xeaf   :  { %v647_v31 = vpop.f32.mrb[12].mxu0 }
 0xeb0   :  { %v656_v17 = vrot.slane %v647_v31, %v8793_v41  ;;  %v7248_v18 = vpop.f32.mrb[13].mxu0 }
 0xeb1   :  { %v650_v20 = vpop.f32.mrb[14].mxu0 }
 0xeb2   :  { %v657_v21 = vadd.f32 %v656_v17, %v605_v19  ;;  %v7249_v22 = vpop.f32.mrb[15].mxu0  ;;  %v487_v19 = vadd.f32 %v486_v15, %v485_v62 }
 0xeb4   :  { %8054 = vtanh.f32 %v657_v21  ;;  %v488_v21 = vrot.slane %v487_v19, 1 }
 0xebe   :  { %v8055_v25 = vpop.eup %8054 }
 0xebf   :  { %v659_v27 = vmul.f32 %v8055_v25, %v8803_v50 }
 0xec1   :  { %v660_v30 = vsel %vm455_vm4, %v659_v27, 0.0  ;;  %v489_v27 = vadd.f32 %v488_v21, %v487_v19 }
 0xec2   :  { %661 = vadd.xlane.f32.xlu0 %v660_v30 }
 0xf4f   :  { %v662_v34 = vpop.xlane.xlu0 %661 }
 0xf50   :  { %v663_v36 = vsel %vm459_vm5, %v662_v34, -inf }
 0xf51   :  { %v664_v38 = vrot.slane %v663_v36, 4 }
 0xf53   :  { %v665_v42 = vmax.f32 %v663_v36, %v664_v38 }
 0xf55   :  { %v666_v43 = vrot.slane %v665_v42, 2 }
 0xf57   :  { %v667_v44 = vmax.f32 %v665_v42, %v666_v43  ;;  %v724_v42 = vld [vmem:[#allocation2] sm:$0x3] }
 0xf59   :  { %v668_v45 = vrot.slane %v667_v44, 1 }
 0xf5b   :  { %v669_v46 = vmax.f32 %v667_v44, %v668_v45 }
 0xf5d   :  { %v670_v47 = vsub.f32 %v662_v34, %v669_v46  ;;  %v490_v34 = vsub.f32 0.0, %v489_v27 }
 0xf5f   :  { %v671_v48 = vmul.f32 1.442695, %v670_v47 }
 0xf61   :  { %8056 = vpow2.f32 %v671_v48 }
 0xf6b   :  { %v8057_v51 = vpop.eup %8056 }
 0xf6c   :  { %v673_v35 = vsel %vm459_vm5, %v8057_v51, 0.0 }
 0xf6d   :  { %v674_v52 = vrot.slane %v673_v35, 4 }
 0xf6f   :  { %v675_v53 = vadd.f32 %v674_v52, %v673_v35 }
 0xf71   :  { %v676_v54 = vrot.slane %v675_v53, 2 }
 0xf73   :  { %v677_v55 = vadd.f32 %v676_v54, %v675_v53 }
 0xf75   :  { %v678_v56 = vrot.slane %v677_v55, 1 }
 0xf77   :  { %v679_v57 = vadd.f32 %v678_v56, %v677_v55 }
 0xf79   :  { %8058 = vrcp.f32 %v679_v57 }
 0xf7a   :  { %8060 = vlog2.f32 %v679_v57 }
 0xf83   :  { %v8059_v60 = vpop.eup %8058 }
 0xf84   :  { %v8061_v61 = vpop.eup %8060  ;;  %v681_v63 = vmul.f32 %v8059_v60, %v8057_v51 }
 0xf85   :  { %v683_v1 = vmul.f32 0.6931472, %v8061_v61 }
 0xf86   :  { %vm695_vm8 = vcmp.le.f32.partialorder %v681_v63, %v8799_v49 }
 0xf87   :  { %v684_v2 = vsub.f32 %v670_v47, %v683_v1  ;;  %v8862_v11 = vsel %vm695_vm8, 1, %v11085_v23  ;;  %vm940_vm8 = vcmask 48128  }
 0xf88   :  { %v700_v13 = vrot.slane %v8862_v11, %v8793_v41 }
 0xf89   :  { %v685_v16 = vmul.f32 %v684_v2, %v681_v63 }
 0xf8a   :  { %vm701_vm9 = vcmp.eq.s32.totalorder %v8790_v40, %v700_v13 }
 0xf8b   :  { %v6766_v26 = vsel %vm701_vm9, 1.0, %v11083_v4  ;;  %v686_v31 = vsel %vm459_vm5, %v685_v16, 0.0 }
 0xf8c   :  { %727 = vperm.xlu1 %7985, %v6766_v26   ;;  %v687_v17 = vrot.slane %v686_v31, 4  ;;  %v8869_v18 = vmul.f32 %v6766_v26, %v684_v2 }
 0xf8e   :  { %v688_v20 = vadd.f32 %v687_v17, %v686_v31 }
 0xf90   :  { %739 = vrot.lane.b32.xlu1 %v8837_v14, %s8539_s10  ;;  %v689_v22 = vrot.slane %v688_v20, 2 }
 0xf91   :  { %7986 = vset.pattern.permute.xlu1 %v11085_v23 }
 0xf92   :  { %v690_v25 = vadd.f32 %v689_v22, %v688_v20 }
 0xf94   :  { %v691_v30 = vrot.slane %v690_v25, 1 }
 0xf96   :  { %v692_v33 = vadd.f32 %v691_v30, %v690_v25 }
 0xf98   :  { %v693_v36 = vsub.f32 0.0, %v692_v33 }
 0xf9a   :  { %v8874_v38 = vadd.f32 %v693_v36, %v490_v34 }
 0xf9c   :  { %11139 = vst [vmem:[#allocation10_spill] sm:$0xff] %v8874_v38 }
0x100b   :  { %v728_v43 = vpop.permute.xlu1 %727 }
0x100c   :  { %v730_v44 = vmul.f32 %v728_v43, %v724_v42 }
0x100e   :  { %v731_v45 = vsel %vm455_vm4, %v730_v44, 0.0 }
0x100f   :  { %v732_v46 = vrot.slane %v731_v45, 4  ;;  %v740_v52 = vpop.permute.xlu1 %739 }
0x1011   :  { %v733_v47 = vadd.f32 %v732_v46, %v731_v45 }
0x1013   :  { %v734_v14 = vrot.slane %v733_v47, 2 }
0x1015   :  { %v735_v48 = vadd.f32 %v734_v14, %v733_v47 }
0x1017   :  { %v736_v51 = vrot.slane %v735_v48, 1 }
0x1019   :  { %v737_v35 = vadd.f32 %v736_v51, %v735_v48  ;;  %v6771_v48 = vcombine.low %v8631_v0, %v8631_v0 }
0x101b   :  { %v742_v53 = vsel %vm41_vm1, %v737_v35, %v740_v52 }
0x101c   :  { %v743_v54 = vpack.c.bf16 %v742_v53, %v742_v53 }
0x101e   :  { %7259 = vmatmul.mubr.msk.bf16.vlgmr.msra.gmra.mrb[16].mxu0 %vm68_vm2, %v743_v54 }
0x101f   :  { %7277 = vmatpush3.bf16.msra.mxu0 %v8644_v5  ;;  %7284 = vmatprep.mubr.msk.bf16.mxu0 %vm8537_vm0, %v11083_v4 }
0x1020   :  { %7278 = vmatprep.subr.bf16.mxu0 %v11083_v4 }
0x1023   :  { %7279 = vmatpush3.bf16.msra.mxu0 %v8656_v6 }
0x1024   :  { %7280 = vmatprep.subr.bf16.mxu0 %v11083_v4 }
0x1027   :  { %7281 = vmatpush3.bf16.msra.mxu0 %v8665_v7 }
0x1028   :  { %7282 = vmatprep.subr.bf16.mxu0 %v11083_v4 }
0x102b   :  { %7283 = vmatpush3.bf16.msra.mxu0 %v8672_v8 }
0x102c   :  { %7302 = vmatprep.subr.bf16.mxu0 %v11083_v4 }
0x10f1   :  { %v781_v55 = vpop.f32.mrb[16].mxu0 }
0x10f2   :  { %v782_v5 = vadd.f32 %v781_v55, %v8689_v12  ;;  %v7260_v56 = vpop.f32.mrb[17].mxu0 }
0x10f3   :  { %v784_v57 = vpop.f32.mrb[18].mxu0 }
0x10f4   :  { %8062 = vtanh.f32 %v782_v5  ;;  %v7261_v58 = vpop.f32.mrb[19].mxu0  ;;  %v787_v6 = vsub.f32 0.0, %v782_v5 }
0x10f6   :  { %v788_v60 = vmul.f32 1.442695, %v787_v6 }
0x10f8   :  { %8064 = vpow2.f32 %v788_v60 }
0x10fe   :  { %v8063_v59 = vpop.eup %8062 }
0x10ff   :  { %795 = vrot.lane.b32.xlu1 %v8063_v59, %s8538_s24 }
0x1102   :  { %v8065_v61 = vpop.eup %8064 }
0x1103   :  { %v790_v62 = vadd.f32 1.0, %v8065_v61 }
0x1105   :  { %8066 = vrcp.f32 %v790_v62 }
0x110f   :  { %v8067_v63 = vpop.eup %8066 }
0x1110   :  { %v793_v13 = vmul.f32 %v8067_v63, %v8833_v10 }
0x1171   :  { %v796_v1 = vpop.permute.xlu1 %795 }
0x1172   :  { %v798_v2 = vmul.f32 %v8067_v63, %v796_v1  ;;  %v8965_v1 = vand.u32 127, %v35_v39 }
0x1174   :  { %800 = vrot.lane.b32.xlu1 %v798_v2, %s8538_s24 }
0x1178   :  { %814 = vrot.lane.b32.xlu1 %v8638_v3, %s8540_s11 }
0x117c   :  { %816 = vrot.lane.b32.xlu1 %v8697_v29, %s8540_s11 }
0x11e6   :  { %v801_v15 = vpop.permute.xlu1 %800 }
0x11e7   :  { %v8897_v16 = vadd.f32 %v801_v15, %v793_v13 }
0x11e9   :  { %8068 = vtanh.f32 %v8897_v16 }
0x11ea   :  { %v8900_v26 = vpop.permute.xlu1 %814 }
0x11eb   :  { %7263 = vmatpush3.bf16.msra.mxu1 %v8900_v26 }
0x11ec   :  { %7264 = vmatprep.subr.bf16.mxu1 %v11083_v4 }
0x11ee   :  { %v8904_v31 = vpop.permute.xlu1 %816 }
0x11ef   :  { %7265 = vmatpush3.bf16.msra.mxu1 %v8904_v31 }
0x11f0   :  { %7270 = vmatprep.subr.bf16.mxu1 %v11083_v4 }
0x11f3   :  { %v8069_v29 = vpop.eup %8068 }
0x11f4   :  { %806 = vrot.lane.b32.xlu0 %v8069_v29, %s8538_s24 }
0x1266   :  { %v807_v10 = vpop.permute.xlu0 %806 }
0x1267   :  { %v8909_v17 = vmul.f32 %v8067_v63, %v807_v10 }
0x1269   :  { %v810_v19 = vpack.c.bf16 %v8909_v17, %v8909_v17 }
0x126b   :  { %812 = vrot.lane.b32.xlu1 %v810_v19, %s8540_s11 }
0x126f   :  { %821 = vrot.lane.b32.xlu1 %v8799_v49, %s8539_s10 }
0x12dd   :  { %v813_v20 = vpop.permute.xlu1 %812 }
0x12de   :  { %7267 = vmatmul.mubr.msk.bf16.vlgmr.msra.gmra.mrb[16].mxu1 %vm41_vm1, %v813_v20 }
0x12df   :  { %7272 = vmatprep.mubr.msk.bf16.mxu1 %vm8537_vm0, %v11083_v4 }
0x12e1   :  { %v8919_v21 = vpop.permute.xlu1 %821 }
0x13b1   :  { %v861_v22 = vpop.f32.mrb[16].mxu1 }
0x13b2   :  { %v7268_v25 = vpop.f32.mrb[17].mxu1  ;;  %v862_v27 = vadd.f32 %v861_v22, %v8919_v21 }
0x13b3   :  { %v864_v30 = vpop.f32.mrb[18].mxu1  ;;  %v8981_v25 = vld [vmem:[%s11077_s0] sm:$0xff]  }
0x13b4   :  { %v7269_v33 = vpop.f32.mrb[19].mxu1  ;;  %v868_v34 = vsel %vm867_vm10, %v862_v27, -inf }
0x13b5   :  { %869 = vmax.xlane.f32.xlu1 %v868_v34 }
0x13c6   :  { %888 = vrot.lane.b32.xlu1 %v8799_v49, %s8544_s14 }
0x1442   :  { %v870_v36 = vpop.xlane.xlu1 %869 }
0x1443   :  { %v8925_v42 = vsub.f32 %v862_v27, %v870_v36  ;;  %v8990_v27 = vld [vmem:[%s11077_s0 + $0x8] sm:$0xff]  }
0x1445   :  { %v872_v43 = vmul.f32 1.442695, %v8925_v42 }
0x1446   :  { %v889_v51 = vpop.permute.xlu1 %888 }
0x1447   :  { %8070 = vpow2.f32 %v872_v43 }
0x1451   :  { %v8071_v44 = vpop.eup %8070 }
0x1452   :  { %v874_v45 = vsel %vm867_vm10, %v8071_v44, 0.0 }
0x1453   :  { %875 = vadd.xlane.f32.xlu0 %v874_v45 }
0x14e0   :  { %v8929_v46 = vpop.xlane.xlu0 %875 }
0x14e1   :  { %8072 = vrcp.f32 %v8929_v46 }
0x14eb   :  { %v8073_v47 = vpop.eup %8072 }
0x14ec   :  { %v8932_v14 = vmul.f32 %v8073_v47, %v8071_v44 }
0x14ee   :  { %901 = vrot.lane.b32.xlu1 %v8932_v14, %s8545_s15  ;;  %894 = vrot.lane.b32.xlu0 %v8932_v14, %s8546_s16  ;;  %vm891_vm11 = vcmp.le.f32.partialorder %v8932_v14, %v889_v51 }
0x14ef   :  { %v892_v55 = vsel %vm891_vm11, 1, %v11085_v23 }
0x14f2   :  { %908 = vrot.lane.b32.xlu0 %v8932_v14, %s8547_s17 }
0x14f6   :  { %938 = vrot.lane.b32.xlu0 %v6771_v48, %s8538_s24 }
0x1560   :  { %v895_v35 = vpop.permute.xlu0 %894  ;;  %v902_v53 = vpop.permute.xlu1 %901 }
0x1561   :  { %v897_v52 = vadd.f32 %v895_v35, %v8932_v14 }
0x1563   :  { %vm898_vm12 = vcmp.le.f32.partialorder %v897_v52, %v889_v51  ;;  %v904_v54 = vadd.f32 %v902_v53, %v897_v52 }
0x1564   :  { %v899_v5 = vsel %vm898_vm12, 1, %v11085_v23  ;;  %v909_v56 = vpop.permute.xlu0 %908 }
0x1565   :  { %v900_v57 = vadd.s32 %v899_v5, %v892_v55  ;;  %vm905_vm13 = vcmp.le.f32.partialorder %v904_v54, %v889_v51  ;;  %v911_v58 = vadd.f32 %v909_v56, %v904_v54 }
0x1566   :  { %v906_v0 = vsel %vm905_vm13, 1, %v11085_v23 }
0x1567   :  { %v907_v59 = vadd.s32 %v906_v0, %v900_v57  ;;  %vm912_vm15 = vcmp.le.f32.partialorder %v911_v58, %v889_v51 }
0x1568   :  { %v913_v6 = vsel %vm912_vm15, 1, %v11085_v23  ;;  %v939_v60 = vpop.permute.xlu0 %938 }
0x1569   :  { %v8949_v61 = vadd.s32 %v913_v6, %v907_v59  ;;  %v8952_v62 = vsel %vm944_vm14, %v939_v60, 0 }
0x156a   :  { %7271 = vmatpush3.bf16.msra.mxu1 %v8952_v62 }
0x156b   :  { %v929_v63 = vadd.s32 1, %v8949_v61  ;;  %7288 = vmatprep.subr.bf16.mxu1 %v11083_v4  ;;  %928 = vst.msk [vmem:[%s11080_s3 + $0x1] sm:$0x1] %vm517_vm6, %v8949_v61 }
0x156d   :  { %931 = vperm.xlu1 %7986, %v929_v63  }
0x1571   :  { %989 = vrot.lane.b32.xlu1 %v8909_v17, %s8539_s10 }
0x15ec   :  { %v932_v2 = vpop.permute.xlu1 %931 }
0x15ed   :  { %vm933_vm7 = vcmp.eq.s32.totalorder %v8965_v1, %v932_v2 }
0x15ee   :  { %v6770_v13 = vsel %vm933_vm7, 1.0, %v11083_v4  ;;  %vm1472_vm7 = vcmask 256000  }
0x15ef   :  { %v936_v15 = vpack.c.bf16 %v6770_v13, %v6770_v13 }
0x15f0   :  { %v990_v39 = vpop.permute.xlu1 %989 }
0x15f1   :  { %7273 = vmatmul.mubr.msk.bf16.vlgmr.msra.gmra.mrb[20].mxu1 %vm940_vm8, %v936_v15 }
0x15f2   :  { %7289 = vmatpush3.bf16.msra.mxu1 %v8900_v26  ;;  %7292 = vmatprep.mubr.msk.bf16.mxu1 %vm8537_vm0, %v11083_v4 }
0x15f3   :  { %7290 = vmatprep.subr.bf16.mxu1 %v11083_v4 }
0x15f6   :  { %7291 = vmatpush3.bf16.msra.mxu1 %v8904_v31 }
0x15f7   :  { %7296 = vmatprep.subr.bf16.mxu1 %v11083_v4 }
0x16c4   :  { %v982_v29 = vpop.f32.mrb[20].mxu1 }
0x16c5   :  { %v992_v10 = vsel %vm41_vm1, %v982_v29, %v990_v39  ;;  %v7274_v17 = vpop.f32.mrb[21].mxu1 }
0x16c6   :  { %v993_v19 = vpack.c.bf16 %v992_v10, %v992_v10  ;;  %v985_v20 = vpop.f32.mrb[22].mxu1 }
0x16c7   :  { %v7275_v22 = vpop.f32.mrb[23].mxu1 }
0x16c8   :  { %7285 = vmatmul.mubr.msk.bf16.vlgmr.msra.gmra.mrb[20].mxu0 %vm68_vm2, %v993_v19 }
0x16c9   :  { %7303 = vmatpush3.bf16.msra.mxu0 %v8981_v25  ;;  %7310 = vmatprep.mubr.msk.bf16.mxu0 %vm8537_vm0, %v11083_v4 }
0x16ca   :  { %7304 = vmatprep.subr.bf16.mxu0 %v11083_v4 }
0x16cd   :  { %7305 = vmatpush3.bf16.msra.mxu0 %v8990_v27 }
0x16ce   :  { %7306 = vmatprep.subr.bf16.mxu0 %v11083_v4 }
0x16d1   :  { %7307 = vmatpush3.bf16.msra.mxu0 %v8665_v7 }
0x16d2   :  { %7308 = vmatprep.subr.bf16.mxu0 %v11083_v4 }
0x16d5   :  { %7309 = vmatpush3.bf16.msra.mxu0 %v8672_v8 }
0x16d6   :  { %7334 = vmatprep.subr.bf16.mxu0 %v11083_v4 }
0x179b   :  { %v1031_v30 = vpop.f32.mrb[20].mxu0 }
0x179c   :  { %v1032_v33 = vadd.f32 %v1031_v30, %v8689_v12  ;;  %v7286_v34 = vpop.f32.mrb[21].mxu0 }
0x179d   :  { %v1034_v36 = vpop.f32.mrb[22].mxu0 }
0x179e   :  { %8074 = vtanh.f32 %v1032_v33  ;;  %v7287_v43 = vpop.f32.mrb[23].mxu0  ;;  %v1037_v45 = vsub.f32 0.0, %v1032_v33 }
0x17a0   :  { %v1038_v47 = vmul.f32 1.442695, %v1037_v45 }
0x17a2   :  { %8076 = vpow2.f32 %v1038_v47 }
0x17a8   :  { %v8075_v44 = vpop.eup %8074 }
0x17a9   :  { %1045 = vrot.lane.b32.xlu0 %v8075_v44, %s8538_s24 }
0x17ac   :  { %v8077_v7 = vpop.eup %8076 }
0x17ad   :  { %v1040_v48 = vadd.f32 1.0, %v8077_v7 }
0x17af   :  { %8078 = vrcp.f32 %v1040_v48 }
0x17b9   :  { %v8079_v51 = vpop.eup %8078 }
0x17ba   :  { %v1043_v12 = vmul.f32 %v8079_v51, %v8897_v16 }
0x181b   :  { %v1046_v8 = vpop.permute.xlu0 %1045 }
0x181c   :  { %v1048_v35 = vmul.f32 %v8079_v51, %v1046_v8 }
0x181e   :  { %1050 = vrot.lane.b32.xlu1 %v1048_v35, %s8538_s24 }
0x1890   :  { %v1051_v52 = vpop.permute.xlu1 %1050 }
0x1891   :  { %v9002_v53 = vadd.f32 %v1051_v52, %v1043_v12  ;;  %v9050_v52 = vld [vmem:[%s11078_s1 + $0x8] sm:$0xff]  }
0x1893   :  { %8080 = vtanh.f32 %v9002_v53 }
0x189d   :  { %v8081_v54 = vpop.eup %8080 }
0x189e   :  { %1056 = vrot.lane.b32.xlu0 %v8081_v54, %s8538_s24 }
0x1910   :  { %v1057_v55 = vpop.permute.xlu0 %1056 }
0x1911   :  { %v1059_v5 = vmul.f32 %v8079_v51, %v1057_v55 }
0x1913   :  { %v1060_v56 = vpack.c.bf16 %v1059_v5, %v1059_v5 }
0x1915   :  { %1062 = vrot.lane.b32.xlu1 %v1060_v56, %s8540_s11 }
0x1987   :  { %v1063_v57 = vpop.permute.xlu1 %1062 }
0x1988   :  { %7293 = vmatmul.mubr.msk.bf16.vlgmr.msra.gmra.mrb[24].mxu1 %vm41_vm1, %v1063_v57 }
0x1989   :  { %7297 = vmatpush3.bf16.msra.mxu1 %v8952_v62  ;;  %7298 = vmatprep.mubr.msk.bf16.mxu1 %vm8537_vm0, %v11083_v4 }
0x198a   :  { %7314 = vmatprep.subr.bf16.mxu1 %v11083_v4 }
0x1a5b   :  { %v1101_v16 = vpop.f32.mrb[24].mxu1 }
0x1a5c   :  { %v1102_v58 = vadd.f32 %v1101_v16, %v8919_v21  ;;  %v7294_v0 = vpop.f32.mrb[25].mxu1 }
0x1a5d   :  { %v1104_v59 = vpop.f32.mrb[26].mxu1 }
0x1a5e   :  { %v7295_v6 = vpop.f32.mrb[27].mxu1  ;;  %v1107_v60 = vsel %vm867_vm10, %v1102_v58, -inf  ;;  %v9065_v59 = vld [vmem:[%s11079_s2] sm:$0x1] }
0x1a5f   :  { %1108 = vmax.xlane.f32.xlu0 %v1107_v60 }
0x1aec   :  { %v1109_v63 = vpop.xlane.xlu0 %1108 }
0x1aed   :  { %v9014_v2 = vsub.f32 %v1102_v58, %v1109_v63 }
0x1aef   :  { %v1111_v13 = vmul.f32 1.442695, %v9014_v2 }
0x1af1   :  { %8082 = vpow2.f32 %v1111_v13 }
0x1afb   :  { %v8083_v15 = vpop.eup %8082 }
0x1afc   :  { %v1113_v39 = vsel %vm867_vm10, %v8083_v15, 0.0 }
0x1afd   :  { %1114 = vadd.xlane.f32.xlu1 %v1113_v39 }
0x1b0e   :  { %1127 = vrot.lane.b32.xlu1 %v8799_v49, %s8548_s25  ;;  %s8568_s25 = smov 49  }
0x1b8a   :  { %v9019_v29 = vpop.xlane.xlu1 %1114 }
0x1b8b   :  { %8084 = vrcp.f32 %v9019_v29 }
0x1b8e   :  { %v1128_v19 = vpop.permute.xlu1 %1127 }
0x1b95   :  { %v8085_v10 = vpop.eup %8084 }
0x1b96   :  { %v9022_v17 = vmul.f32 %v8085_v10, %v8083_v15 }
0x1b98   :  { %1147 = vrot.lane.b32.xlu1 %v9022_v17, %s8547_s17  ;;  %1133 = vrot.lane.b32.xlu0 %v9022_v17, %s8546_s16  ;;  %vm1130_vm9 = vcmp.le.f32.partialorder %v9022_v17, %v1128_v19 }
0x1b99   :  { %v1131_v34 = vsel %vm1130_vm9, 1, %v11085_v23 }
0x1b9c   :  { %1222 = vrot.lane.b32.xlu1 %v1059_v5, %s8539_s10  ;;  %1140 = vrot.lane.b32.xlu0 %v9022_v17, %s8545_s15 }
0x1c0a   :  { %v1134_v49 = vpop.permute.xlu0 %1133  ;;  %v1148_v36 = vpop.permute.xlu1 %1147 }
0x1c0b   :  { %v1136_v20 = vadd.f32 %v1134_v49, %v9022_v17 }
0x1c0d   :  { %vm1137_vm11 = vcmp.le.f32.partialorder %v1136_v20, %v1128_v19 }
0x1c0e   :  { %v1138_v22 = vsel %vm1137_vm11, 1, %v11085_v23  ;;  %v1141_v30 = vpop.permute.xlu0 %1140  ;;  %v1223_v54 = vpop.permute.xlu1 %1222 }
0x1c0f   :  { %v1143_v33 = vadd.f32 %v1141_v30, %v1136_v20  ;;  %v1139_v43 = vadd.s32 %v1138_v22, %v1131_v34 }
0x1c11   :  { %vm1144_vm12 = vcmp.le.f32.partialorder %v1143_v33, %v1128_v19  ;;  %v1150_v44 = vadd.f32 %v1148_v36, %v1143_v33 }
0x1c12   :  { %v1145_v45 = vsel %vm1144_vm12, 1, %v11085_v23 }
0x1c13   :  { %v1146_v47 = vadd.s32 %v1145_v45, %v1139_v43  ;;  %vm1151_vm13 = vcmp.le.f32.partialorder %v1150_v44, %v1128_v19 }
0x1c14   :  { %v1152_v7 = vsel %vm1151_vm13, 1, %v11085_v23 }
0x1c15   :  { %v9037_v48 = vadd.s32 %v1152_v7, %v1146_v47 }
0x1c17   :  { %v1170_v51 = vadd.s32 1, %v9037_v48 }
0x1c19   :  { %1172 = vperm.xlu0 %7987, %v1170_v51   ;;  %v9089_v51 = vld [vmem:[%s11077_s0 + $0x10] sm:$0xff]  }
0x1c98   :  { %v1173_v8 = vpop.permute.xlu0 %1172 }
0x1c99   :  { %vm1174_vm15 = vcmp.eq.s32.totalorder %v8965_v1, %v1173_v8 }
0x1c9a   :  { %v6776_v35 = vsel %vm1174_vm15, 1.0, %v11083_v4 }
0x1c9b   :  { %v1177_v12 = vpack.c.bf16 %v6776_v35, %v6776_v35  ;;  %v9098_v35 = vld [vmem:[%s11077_s0 + $0x18] sm:$0xff]  }
0x1c9d   :  { %7299 = vmatmul.mubr.msk.bf16.vlgmr.msra.gmra.mrb[28].mxu1 %vm940_vm8, %v1177_v12 }
0x1c9e   :  { %7315 = vmatpush3.bf16.msra.mxu1 %v8638_v3  ;;  %7318 = vmatprep.mubr.msk.bf16.mxu1 %vm8537_vm0, %v11083_v4 }
0x1c9f   :  { %7316 = vmatprep.subr.bf16.mxu1 %v11083_v4 }
0x1ca2   :  { %7317 = vmatpush3.bf16.msra.mxu1 %v9050_v52 }
0x1ca3   :  { %7322 = vmatprep.subr.bf16.mxu1 %v11083_v4 }
0x1d70   :  { %v1215_v55 = vpop.f32.mrb[28].mxu1 }
0x1d71   :  { %v1225_v5 = vsel %vm41_vm1, %v1215_v55, %v1223_v54  ;;  %v7300_v56 = vpop.f32.mrb[29].mxu1 }
0x1d72   :  { %v1226_v57 = vpack.c.bf16 %v1225_v5, %v1225_v5  ;;  %v1218_v16 = vpop.f32.mrb[30].mxu1 }
0x1d73   :  { %v7301_v58 = vpop.f32.mrb[31].mxu1 }
0x1d74   :  { %7311 = vmatmul.mubr.msk.bf16.vlgmr.msra.gmra.mrb[24].mxu0 %vm68_vm2, %v1226_v57 }
0x1d75   :  { %7335 = vmatpush3.bf16.msra.mxu0 %v8758_v32  ;;  %7338 = vmatprep.mubr.msk.bf16.mxu0 %vm8537_vm0, %v11083_v4 }
0x1d76   :  { %7336 = vmatprep.subr.bf16.mxu0 %v11083_v4 }
0x1d79   :  { %7337 = vmatpush3.bf16.msra.mxu0 %v8771_v37 }
0x1d7a   :  { %7342 = vmatprep.subr.bf16.mxu0 %v11083_v4 }
0x1e47   :  { %v1264_v0 = vpop.f32.mrb[24].mxu0 }
0x1e48   :  { %v1265_v6 = vadd.f32 %v9065_v59, %v1264_v0  ;;  %v7312_v60 = vpop.f32.mrb[25].mxu0 }
0x1e49   :  { %v1267_v63 = vpop.f32.mrb[26].mxu0 }
0x1e4a   :  { %8086 = vtanh.f32 %v1265_v6  ;;  %v7313_v13 = vpop.f32.mrb[27].mxu0  ;;  %v1270_v39 = vsub.f32 0.0, %v1265_v6 }
0x1e4c   :  { %v1271_v10 = vmul.f32 1.442695, %v1270_v39 }
0x1e4e   :  { %8088 = vpow2.f32 %v1271_v10 }
0x1e54   :  { %v8087_v15 = vpop.eup %8086 }
0x1e55   :  { %1278 = vrot.lane.b32.xlu1 %v8087_v15, %s8538_s24 }
0x1e58   :  { %v8089_v19 = vpop.eup %8088 }
0x1e59   :  { %v1273_v49 = vadd.f32 1.0, %v8089_v19 }
0x1e5b   :  { %8090 = vrcp.f32 %v1273_v49 }
0x1e65   :  { %v8091_v20 = vpop.eup %8090 }
0x1e66   :  { %v1276_v33 = vmul.f32 %v8091_v20, %v9002_v53 }
0x1ec7   :  { %v1279_v22 = vpop.permute.xlu1 %1278 }
0x1ec8   :  { %v1281_v30 = vmul.f32 %v8091_v20, %v1279_v22 }
0x1eca   :  { %1283 = vrot.lane.b32.xlu0 %v1281_v30, %s8538_s24 }
0x1f3c   :  { %v1284_v34 = vpop.permute.xlu0 %1283 }
0x1f3d   :  { %v1286_v36 = vadd.f32 %v1284_v34, %v1276_v33 }
0x1f3f   :  { %8092 = vtanh.f32 %v1286_v36 }
0x1f49   :  { %v8093_v43 = vpop.eup %8092 }
0x1f4a   :  { %1289 = vrot.lane.b32.xlu1 %v8093_v43, %s8538_s24 }
0x1fbc   :  { %v1290_v44 = vpop.permute.xlu1 %1289 }
0x1fbd   :  { %v9072_v45 = vmul.f32 %v8091_v20, %v1290_v44 }
0x1fbf   :  { %1346 = vrot.lane.b32.xlu1 %v9072_v45, %s8539_s10  ;;  %v1298_v47 = vpack.c.bf16 %v9072_v45, %v9072_v45 }
0x1fc1   :  { %1300 = vrot.lane.b32.xlu0 %v1298_v47, %s8540_s11 }
0x2031   :  { %v1347_v53 = vpop.permute.xlu1 %1346 }
0x2032   :  { %v1349_v8 = vsel %vm41_vm1, %v8677_v9, %v1347_v53 }
0x2033   :  { %v1301_v7 = vpop.permute.xlu0 %1300  ;;  %v1350_v12 = vpack.c.bf16 %v1349_v8, %v1349_v8 }
0x2034   :  { %7319 = vmatmul.mubr.msk.bf16.vlgmr.msra.gmra.mrb[32].mxu1 %vm41_vm1, %v1301_v7 }
0x2035   :  { %7323 = vmatpush3.bf16.msra.mxu1 %v8981_v25  ;;  %7330 = vmatprep.mubr.msk.bf16.mxu1 %vm8537_vm0, %v11083_v4 }
0x2036   :  { %7324 = vmatprep.subr.bf16.mxu1 %v11083_v4 }
0x2039   :  { %7325 = vmatpush3.bf16.msra.mxu1 %v8990_v27 }
0x203a   :  { %7326 = vmatprep.subr.bf16.mxu1 %v11083_v4 }
0x203d   :  { %7327 = vmatpush3.bf16.msra.mxu1 %v9089_v51 }
0x203e   :  { %7328 = vmatprep.subr.bf16.mxu1 %v11083_v4 }
0x2041   :  { %7329 = vmatpush3.bf16.msra.mxu1 %v9098_v35 }
0x2042   :  { %7354 = vmatprep.subr.bf16.mxu1 %v11083_v4 }
0x2044   :  { %7331 = vmatmul.mubr.msk.bf16.vlgmr.msra.gmra.mrb[36].mxu1 %vm68_vm2, %v1350_v12 }
0x2045   :  { %7355 = vmatpush3.bf16.msra.mxu1 %v8758_v32  ;;  %7358 = vmatprep.mubr.msk.bf16.mxu1 %vm8537_vm0, %v11083_v4 }
0x2046   :  { %7356 = vmatprep.subr.bf16.mxu1 %v11083_v4 }
0x2049   :  { %7357 = vmatpush3.bf16.msra.mxu1 %v8771_v37 }
0x204a   :  { %7362 = vmatprep.subr.bf16.mxu1 %v11083_v4 }
0x2107   :  { %v1339_v54 = vpop.f32.mrb[32].mxu1 }
0x2108   :  { %1345 = vst.msk [vmem:[#allocation3 + $0x2] sm:$0x1] %vm135_vm3, %v1339_v54  ;;  %v7320_v55 = vpop.f32.mrb[33].mxu1 }
0x2109   :  { %v1342_v5 = vpop.f32.mrb[34].mxu1 }
0x210a   :  { %v7321_v56 = vpop.f32.mrb[35].mxu1 }
0x210f   :  { %v1417_v12 = vld [vmem:[#allocation3] sm:$0x7] }
0x2117   :  { %v1388_v57 = vpop.f32.mrb[36].mxu1 }
0x2118   :  { %v1389_v16 = vadd.f32 %v9065_v59, %v1388_v57  ;;  %v7332_v58 = vpop.f32.mrb[37].mxu1 }
0x2119   :  { %v1391_v0 = vpop.f32.mrb[38].mxu1 }
0x211a   :  { %8094 = vtanh.f32 %v1389_v16  ;;  %v7333_v6 = vpop.f32.mrb[39].mxu1  ;;  %v1394_v63 = vsub.f32 0.0, %v1389_v16 }
0x211c   :  { %v1395_v13 = vmul.f32 1.442695, %v1394_v63 }
0x211e   :  { %8096 = vpow2.f32 %v1395_v13 }
0x2124   :  { %v8095_v60 = vpop.eup %8094 }
0x2125   :  { %1402 = vrot.lane.b32.xlu0 %v8095_v60, %s8538_s24 }
0x2128   :  { %v8097_v15 = vpop.eup %8096 }
0x2129   :  { %v1397_v39 = vadd.f32 1.0, %v8097_v15 }
0x212b   :  { %8098 = vrcp.f32 %v1397_v39 }
0x2135   :  { %v8099_v10 = vpop.eup %8098 }
0x2136   :  { %v1400_v20 = vmul.f32 %v8099_v10, %v1286_v36  ;;  %v9136_v36 = vld [vmem:[%s11079_s2 + $0x1] sm:$0x1] }
0x2197   :  { %v1403_v19 = vpop.permute.xlu0 %1402 }
0x2198   :  { %v1405_v49 = vmul.f32 %v8099_v10, %v1403_v19 }
0x219a   :  { %1407 = vrot.lane.b32.xlu1 %v1405_v49, %s8538_s24 }
0x220c   :  { %v1408_v22 = vpop.permute.xlu1 %1407 }
0x220d   :  { %v9113_v30 = vadd.f32 %v1408_v22, %v1400_v20 }
0x220f   :  { %8100 = vtanh.f32 %v9113_v30 }
0x2219   :  { %v8101_v33 = vpop.eup %8100 }
0x221a   :  { %1413 = vrot.lane.b32.xlu0 %v8101_v33, %s8538_s24 }
0x228c   :  { %v1414_v34 = vpop.permute.xlu0 %1413 }
0x228d   :  { %v9117_v43 = vmul.f32 %v8099_v10, %v1414_v34 }
0x228f   :  { %v1418_v44 = vpack.c.bf16 %v9117_v43, %v9117_v43 }
0x2291   :  { %1420 = vrot.lane.b32.xlu1 %v1418_v44, %s8540_s11 }
0x2295   :  { %1514 = vrot.lane.b32.xlu1 %v9136_v36, %s8549_s13 }
0x2303   :  { %v1421_v47 = vpop.permute.xlu1 %1420 }
0x2304   :  { %7339 = vmatmul.mubr.msk.bf16.vlgmr.msra.gmra.mrb[28].mxu0 %vm41_vm1, %v1421_v47 }
0x2305   :  { %7343 = vmatpush3.bf16.msra.mxu0 %v8981_v25  ;;  %7350 = vmatprep.mubr.msk.bf16.mxu0 %vm8537_vm0, %v11083_v4 }
0x2306   :  { %7344 = vmatprep.subr.bf16.mxu0 %v11083_v4 }
0x2309   :  { %7345 = vmatpush3.bf16.msra.mxu0 %v8990_v27 }
0x230a   :  { %7346 = vmatprep.subr.bf16.mxu0 %v11083_v4 }
0x230d   :  { %7347 = vmatpush3.bf16.msra.mxu0 %v9089_v51 }
0x230e   :  { %7348 = vmatprep.subr.bf16.mxu0 %v11083_v4 }
0x2311   :  { %7349 = vmatpush3.bf16.msra.mxu0 %v9098_v35 }
0x2312   :  { %7374 = vmatprep.subr.bf16.mxu0 %v11083_v4 }
0x23d7   :  { %v1459_v7 = vpop.f32.mrb[28].mxu0 }
0x23d8   :  { %v1468_v53 = vrot.slane %v1459_v7, %v8793_v41  ;;  %v7340_v8 = vpop.f32.mrb[29].mxu0 }
0x23d9   :  { %v1462_v54 = vpop.f32.mrb[30].mxu0 }
0x23da   :  { %v1469_v55 = vadd.f32 %v1468_v53, %v1417_v12  ;;  %v7341_v5 = vpop.f32.mrb[31].mxu0  ;;  %v8550_v54 = vmov 68  }
0x23db   :  { %7988 = vset.pattern.permute.xlu1 %v8550_v54 }
0x23dc   :  { %8102 = vtanh.f32 %v1469_v55 }
0x23e6   :  { %v8103_v56 = vpop.eup %8102 }
0x23e7   :  { %v1471_v57 = vmul.f32 %v8103_v56, %v8803_v50  ;;  %v1515_v56 = vpop.permute.xlu1 %1514 }
0x23e9   :  { %v1473_v16 = vsel %vm1472_vm7, %v1471_v57, 0.0 }
0x23ea   :  { %1474 = vadd.xlane.f32.xlu0 %v1473_v16 }
0x2477   :  { %v1475_v58 = vpop.xlane.xlu0 %1474 }
0x2478   :  { %v1476_v0 = vsel %vm944_vm14, %v1475_v58, -inf }
0x2479   :  { %v1477_v6 = vrot.slane %v1476_v0, 4 }
0x247b   :  { %v1478_v60 = vmax.f32 %v1476_v0, %v1477_v6 }
0x247d   :  { %v1479_v63 = vrot.slane %v1478_v60, 2 }
0x247f   :  { %v1480_v13 = vmax.f32 %v1478_v60, %v1479_v63 }
0x2481   :  { %v1481_v15 = vrot.slane %v1480_v13, 1 }
0x2483   :  { %v1482_v39 = vmax.f32 %v1480_v13, %v1481_v15 }
0x2485   :  { %v1483_v10 = vsub.f32 %v1475_v58, %v1482_v39 }
0x2487   :  { %v1484_v19 = vmul.f32 1.442695, %v1483_v10 }
0x2489   :  { %8104 = vpow2.f32 %v1484_v19 }
0x2493   :  { %v8105_v49 = vpop.eup %8104 }
0x2494   :  { %v1486_v20 = vsel %vm944_vm14, %v8105_v49, 0.0 }
0x2495   :  { %v1487_v22 = vrot.slane %v1486_v20, 4 }
0x2497   :  { %v1488_v33 = vadd.f32 %v1487_v22, %v1486_v20 }
0x2499   :  { %v1489_v34 = vrot.slane %v1488_v33, 2 }
0x249b   :  { %v1490_v44 = vadd.f32 %v1489_v34, %v1488_v33 }
0x249d   :  { %v1491_v47 = vrot.slane %v1490_v44, 1 }
0x249f   :  { %v1492_v7 = vadd.f32 %v1491_v47, %v1490_v44 }
0x24a1   :  { %8106 = vrcp.f32 %v1492_v7 }
0x24a2   :  { %8108 = vlog2.f32 %v1492_v7 }
0x24ab   :  { %v8107_v53 = vpop.eup %8106 }
0x24ac   :  { %v8109_v8 = vpop.eup %8108  ;;  %v9145_v12 = vmul.f32 %v8107_v53, %v8105_v49 }
0x24ad   :  { %v1496_v55 = vmul.f32 0.6931472, %v8109_v8 }
0x24ae   :  { %v1511_v5 = vrot.slane %v9145_v12, 1  ;;  %vm1508_vm11 = vcmp.le.f32.partialorder %v9145_v12, %v9136_v36 }
0x24af   :  { %v9148_v57 = vsub.f32 %v1483_v10, %v1496_v55  ;;  %v1509_v6 = vsel %vm1508_vm11, 1, %v11085_v23 }
0x24b0   :  { %v1513_v16 = vadd.f32 %v1511_v5, %v9145_v12 }
0x24b2   :  { %vm1517_vm9 = vcmp.le.f32.partialorder %v1513_v16, %v1515_v56 }
0x24b3   :  { %v1518_v58 = vsel %vm1517_vm9, 1, %v11085_v23 }
0x24b4   :  { %1519 = vrot.lane.b32.xlu1 %v1518_v58, %s8551_s18 }
0x24b8   :  { %1294 = vrot.lane.b32.xlu1 %v9072_v45, %s8540_s11 }
0x2526   :  { %v1520_v0 = vpop.permute.xlu1 %1519 }
0x2527   :  { %v9157_v60 = vadd.s32 %v1520_v0, %v1509_v6 }
0x2529   :  { %v1525_v63 = vrot.slane %v9157_v60, %v8793_v41 }
0x252a   :  { %v1295_v13 = vpop.permute.xlu1 %1294 }
0x252b   :  { %1297 = vst.msk [vmem:[#allocation2 + $0x2] sm:$0x1] %vm135_vm3, %v1295_v13  ;;  %vm1526_vm12 = vcmp.eq.s32.totalorder %v8790_v40, %v1525_v63 }
0x252c   :  { %v9164_v15 = vsel %vm1526_vm12, 1.0, %v11083_v4 }
0x252d   :  { %1552 = vperm.xlu1 %7988, %v9164_v15  }
0x2531   :  { %1564 = vrot.lane.b32.xlu1 %v9117_v43, %s8539_s10 }
0x2532   :  { %7991 = vset.pattern.permute.xlu1 %v11085_v23  ;;  %v1549_v45 = vld [vmem:[#allocation2] sm:$0x7] }
0x25ac   :  { %v1553_v39 = vpop.permute.xlu1 %1552 }
0x25ad   :  { %v1555_v10 = vmul.f32 %v1553_v39, %v1549_v45 }
0x25af   :  { %v1556_v19 = vsel %vm1472_vm7, %v1555_v10, 0.0 }
0x25b0   :  { %v1557_v49 = vrot.slane %v1556_v19, 4  ;;  %v1565_v47 = vpop.permute.xlu1 %1564 }
0x25b2   :  { %v1558_v20 = vadd.f32 %v1557_v49, %v1556_v19 }
0x25b4   :  { %v1559_v22 = vrot.slane %v1558_v20, 2 }
0x25b6   :  { %v1560_v33 = vadd.f32 %v1559_v22, %v1558_v20 }
0x25b8   :  { %v1561_v34 = vrot.slane %v1560_v33, 1 }
0x25ba   :  { %v1562_v44 = vadd.f32 %v1561_v34, %v1560_v33 }
0x25bc   :  { %v1567_v7 = vsel %vm41_vm1, %v1562_v44, %v1565_v47 }
0x25bd   :  { %v1568_v53 = vpack.c.bf16 %v1567_v7, %v1567_v7  ;;  %v1635_v7 = vld [vmem:[#allocation3] sm:$0x7] }
0x25bf   :  { %7351 = vmatmul.mubr.msk.bf16.vlgmr.msra.gmra.mrb[32].mxu0 %vm68_vm2, %v1568_v53 }
0x25c0   :  { %7375 = vmatpush3.bf16.msra.mxu0 %v8900_v26  ;;  %7378 = vmatprep.mubr.msk.bf16.mxu0 %vm8537_vm0, %v11083_v4 }
0x25c1   :  { %7376 = vmatprep.subr.bf16.mxu0 %v11083_v4 }
0x25c4   :  { %7377 = vmatpush3.bf16.msra.mxu0 %v8904_v31 }
0x25c5   :  { %7382 = vmatprep.subr.bf16.mxu0 %v11083_v4 }
0x2692   :  { %v1606_v43 = vpop.f32.mrb[32].mxu0 }
0x2693   :  { %v1607_v8 = vadd.f32 %v9065_v59, %v1606_v43  ;;  %v7352_v54 = vpop.f32.mrb[33].mxu0 }
0x2694   :  { %v1609_v55 = vpop.f32.mrb[34].mxu0 }
0x2695   :  { %8110 = vtanh.f32 %v1607_v8  ;;  %v7353_v5 = vpop.f32.mrb[35].mxu0  ;;  %v1612_v16 = vsub.f32 0.0, %v1607_v8 }
0x2697   :  { %v1613_v58 = vmul.f32 1.442695, %v1612_v16 }
0x2699   :  { %8112 = vpow2.f32 %v1613_v58 }
0x269f   :  { %v8111_v56 = vpop.eup %8110 }
0x26a0   :  { %1620 = vrot.lane.b32.xlu1 %v8111_v56, %s8538_s24 }
0x26a3   :  { %v8113_v0 = vpop.eup %8112 }
0x26a4   :  { %v1615_v6 = vadd.f32 1.0, %v8113_v0 }
0x26a6   :  { %8114 = vrcp.f32 %v1615_v6 }
0x26b0   :  { %v8115_v63 = vpop.eup %8114 }
0x26b1   :  { %v1618_v39 = vmul.f32 %v8115_v63, %v9113_v30 }
0x2712   :  { %v1621_v13 = vpop.permute.xlu1 %1620 }
0x2713   :  { %v1623_v45 = vmul.f32 %v8115_v63, %v1621_v13 }
0x2715   :  { %1625 = vrot.lane.b32.xlu1 %v1623_v45, %s8538_s24 }
0x2787   :  { %v1626_v10 = vpop.permute.xlu1 %1625 }
0x2788   :  { %v9183_v19 = vadd.f32 %v1626_v10, %v1618_v39 }
0x278a   :  { %8116 = vtanh.f32 %v9183_v19 }
0x2794   :  { %v8117_v49 = vpop.eup %8116 }
0x2795   :  { %1631 = vrot.lane.b32.xlu1 %v8117_v49, %s8538_s24 }
0x2807   :  { %v1632_v20 = vpop.permute.xlu1 %1631 }
0x2808   :  { %v1634_v22 = vmul.f32 %v8115_v63, %v1632_v20 }
0x280a   :  { %v1636_v33 = vpack.c.bf16 %v1634_v22, %v1634_v22 }
0x280c   :  { %1638 = vrot.lane.b32.xlu0 %v1636_v33, %s8540_s11 }
0x2810   :  { %1731 = vrot.lane.b32.xlu0 %v9136_v36, %s8552_s19 }
0x287e   :  { %v1639_v34 = vpop.permute.xlu0 %1638 }
0x287f   :  { %7359 = vmatmul.mubr.msk.bf16.vlgmr.msra.gmra.mrb[40].mxu1 %vm41_vm1, %v1639_v34 }
0x2880   :  { %7363 = vmatpush3.bf16.msra.mxu1 %v8981_v25  ;;  %7370 = vmatprep.mubr.msk.bf16.mxu1 %vm8537_vm0, %v11083_v4 }
0x2881   :  { %7364 = vmatprep.subr.bf16.mxu1 %v11083_v4 }
0x2884   :  { %7365 = vmatpush3.bf16.msra.mxu1 %v8990_v27 }
0x2885   :  { %7366 = vmatprep.subr.bf16.mxu1 %v11083_v4 }
0x2888   :  { %7367 = vmatpush3.bf16.msra.mxu1 %v9089_v51 }
0x2889   :  { %7368 = vmatprep.subr.bf16.mxu1 %v11083_v4 }
0x288c   :  { %7369 = vmatpush3.bf16.msra.mxu1 %v9098_v35 }
0x288d   :  { %7388 = vmatprep.subr.bf16.mxu1 %v11083_v4 }
0x2952   :  { %v1677_v30 = vpop.f32.mrb[40].mxu1 }
0x2953   :  { %v1686_v44 = vrot.slane %v1677_v30, %v8793_v41  ;;  %v7360_v47 = vpop.f32.mrb[41].mxu1 }
0x2954   :  { %v1680_v53 = vpop.f32.mrb[42].mxu1 }
0x2955   :  { %v1687_v43 = vadd.f32 %v1686_v44, %v1635_v7  ;;  %v7361_v8 = vpop.f32.mrb[43].mxu1  ;;  %v8553_v7 = vmov 69  }
0x2956   :  { %7989 = vset.pattern.permute.xlu0 %v8553_v7 }
0x2957   :  { %8118 = vtanh.f32 %v1687_v43 }
0x2961   :  { %v8119_v54 = vpop.eup %8118 }
0x2962   :  { %v1689_v55 = vmul.f32 %v8119_v54, %v8803_v50 }
0x2964   :  { %v1690_v5 = vsel %vm1472_vm7, %v1689_v55, 0.0 }
0x2965   :  { %1691 = vadd.xlane.f32.xlu1 %v1690_v5  ;;  %v1732_v5 = vpop.permute.xlu0 %1731 }
0x2976   :  { %1781 = vrot.lane.b32.xlu1 %v1634_v22, %s8539_s10 }
0x29f2   :  { %v1692_v56 = vpop.xlane.xlu1 %1691 }
0x29f3   :  { %v1693_v16 = vsel %vm944_vm14, %v1692_v56, -inf }
0x29f4   :  { %v1694_v58 = vrot.slane %v1693_v16, 4 }
0x29f6   :  { %v1695_v0 = vmax.f32 %v1693_v16, %v1694_v58  ;;  %v1782_v7 = vpop.permute.xlu1 %1781 }
0x29f8   :  { %v1696_v6 = vrot.slane %v1695_v0, 2 }
0x29fa   :  { %v1697_v63 = vmax.f32 %v1695_v0, %v1696_v6 }
0x29fc   :  { %v1698_v13 = vrot.slane %v1697_v63, 1 }
0x29fe   :  { %v1699_v45 = vmax.f32 %v1697_v63, %v1698_v13 }
0x2a00   :  { %v1700_v39 = vsub.f32 %v1692_v56, %v1699_v45 }
0x2a02   :  { %v1701_v10 = vmul.f32 1.442695, %v1700_v39 }
0x2a04   :  { %8120 = vpow2.f32 %v1701_v10 }
0x2a0e   :  { %v8121_v49 = vpop.eup %8120 }
0x2a0f   :  { %v1703_v20 = vsel %vm944_vm14, %v8121_v49, 0.0 }
0x2a10   :  { %v1704_v33 = vrot.slane %v1703_v20, 4 }
0x2a12   :  { %v1705_v34 = vadd.f32 %v1704_v33, %v1703_v20 }
0x2a14   :  { %v1706_v30 = vrot.slane %v1705_v34, 2 }
0x2a16   :  { %v1707_v44 = vadd.f32 %v1706_v30, %v1705_v34 }
0x2a18   :  { %v1708_v22 = vrot.slane %v1707_v44, 1 }
0x2a1a   :  { %v1709_v47 = vadd.f32 %v1708_v22, %v1707_v44 }
0x2a1c   :  { %8122 = vrcp.f32 %v1709_v47 }
0x2a1d   :  { %8124 = vlog2.f32 %v1709_v47 }
0x2a26   :  { %v8123_v53 = vpop.eup %8122 }
0x2a27   :  { %v8125_v43 = vpop.eup %8124  ;;  %v9206_v8 = vmul.f32 %v8123_v53, %v8121_v49 }
0x2a28   :  { %v1713_v54 = vmul.f32 0.6931472, %v8125_v43 }
0x2a29   :  { %v1728_v55 = vrot.slane %v9206_v8, 1  ;;  %vm1725_vm15 = vcmp.le.f32.partialorder %v9206_v8, %v9136_v36 }
0x2a2a   :  { %v9209_v56 = vsub.f32 %v1700_v39, %v1713_v54  ;;  %v1726_v0 = vsel %vm1725_vm15, 1, %v11085_v23  ;;  %v1766_v39 = vld [vmem:[#allocation2] sm:$0x7] }
0x2a2b   :  { %v1730_v16 = vadd.f32 %v1728_v55, %v9206_v8 }
0x2a2c   :  { %11140 = vst [vmem:[#allocation11_spill] sm:$0xff] %v9209_v56 }
0x2a2d   :  { %vm1734_vm13 = vcmp.le.f32.partialorder %v1730_v16, %v1732_v5 }
0x2a2e   :  { %v1735_v58 = vsel %vm1734_vm13, 1, %v11085_v23 }
0x2a2f   :  { %1736 = vrot.lane.b32.xlu0 %v1735_v58, %s8554_s20  ;;  %s8560_s20 = smov 55  }
0x2aa1   :  { %v1737_v6 = vpop.permute.xlu0 %1736 }
0x2aa2   :  { %v9216_v63 = vadd.s32 %v1737_v6, %v1726_v0 }
0x2aa4   :  { %v1742_v13 = vrot.slane %v9216_v63, %v8793_v41 }
0x2aa6   :  { %vm1743_vm9 = vcmp.eq.s32.totalorder %v8790_v40, %v1742_v13 }
0x2aa7   :  { %v9222_v45 = vsel %vm1743_vm9, 1.0, %v11083_v4 }
0x2aa8   :  { %11141 = vst [vmem:[#allocation12_spill] sm:$0xff] %v9222_v45  ;;  %1769 = vperm.xlu0 %7989, %v9222_v45  }
0x2aac   :  { %7990 = vset.pattern.permute.xlu0 %v11085_v23 }
0x2b27   :  { %v1770_v10 = vpop.permute.xlu0 %1769 }
0x2b28   :  { %v1772_v49 = vmul.f32 %v1770_v10, %v1766_v39 }
0x2b2a   :  { %v1773_v20 = vsel %vm1472_vm7, %v1772_v49, 0.0 }
0x2b2b   :  { %v1774_v33 = vrot.slane %v1773_v20, 4 }
0x2b2d   :  { %v1775_v34 = vadd.f32 %v1774_v33, %v1773_v20 }
0x2b2f   :  { %v1776_v30 = vrot.slane %v1775_v34, 2 }
0x2b31   :  { %v1777_v44 = vadd.f32 %v1776_v30, %v1775_v34 }
0x2b33   :  { %v1778_v22 = vrot.slane %v1777_v44, 1 }
0x2b35   :  { %v1779_v47 = vadd.f32 %v1778_v22, %v1777_v44 }
0x2b37   :  { %v1784_v53 = vsel %vm41_vm1, %v1779_v47, %v1782_v7 }
0x2b38   :  { %v1785_v43 = vpack.c.bf16 %v1784_v53, %v1784_v53 }
0x2b3a   :  { %7371 = vmatmul.mubr.msk.bf16.vlgmr.msra.gmra.mrb[44].mxu1 %vm68_vm2, %v1785_v43 }
0x2b3b   :  { %7389 = vmatpush3.bf16.msra.mxu1 %v8981_v25  ;;  %7396 = vmatprep.mubr.msk.bf16.mxu1 %vm8537_vm0, %v11083_v4 }
0x2b3c   :  { %7390 = vmatprep.subr.bf16.mxu1 %v11083_v4 }
0x2b3f   :  { %7391 = vmatpush3.bf16.msra.mxu1 %v8990_v27 }
0x2b40   :  { %7392 = vmatprep.subr.bf16.mxu1 %v11083_v4 }
0x2b43   :  { %7393 = vmatpush3.bf16.msra.mxu1 %v9089_v51 }
0x2b44   :  { %7394 = vmatprep.subr.bf16.mxu1 %v11083_v4 }
0x2b47   :  { %7395 = vmatpush3.bf16.msra.mxu1 %v9098_v35 }
0x2b48   :  { %7414 = vmatprep.subr.bf16.mxu1 %v11083_v4 }
0x2c0d   :  { %v1823_v54 = vpop.f32.mrb[44].mxu1 }
0x2c0e   :  { %v1824_v55 = vadd.f32 %v9065_v59, %v1823_v54  ;;  %v7372_v5 = vpop.f32.mrb[45].mxu1 }
0x2c0f   :  { %v1826_v16 = vpop.f32.mrb[46].mxu1 }
0x2c10   :  { %8126 = vtanh.f32 %v1824_v55  ;;  %v7373_v58 = vpop.f32.mrb[47].mxu1  ;;  %v1829_v6 = vsub.f32 0.0, %v1824_v55 }
0x2c12   :  { %v1830_v13 = vmul.f32 1.442695, %v1829_v6 }
0x2c14   :  { %8128 = vpow2.f32 %v1830_v13 }
0x2c1a   :  { %v8127_v0 = vpop.eup %8126 }
0x2c1b   :  { %1837 = vrot.lane.b32.xlu0 %v8127_v0, %s8538_s24 }
0x2c1e   :  { %v8129_v39 = vpop.eup %8128 }
0x2c1f   :  { %v1832_v10 = vadd.f32 1.0, %v8129_v39 }
0x2c21   :  { %8130 = vrcp.f32 %v1832_v10 }
0x2c2b   :  { %v8131_v49 = vpop.eup %8130 }
0x2c2c   :  { %v1835_v34 = vmul.f32 %v8131_v49, %v9183_v19 }
0x2c8d   :  { %v1838_v20 = vpop.permute.xlu0 %1837 }
0x2c8e   :  { %v1840_v33 = vmul.f32 %v8131_v49, %v1838_v20 }
0x2c90   :  { %1842 = vrot.lane.b32.xlu0 %v1840_v33, %s8538_s24 }
0x2d02   :  { %v1843_v30 = vpop.permute.xlu0 %1842 }
0x2d03   :  { %v9243_v44 = vadd.f32 %v1843_v30, %v1835_v34 }
0x2d05   :  { %8132 = vtanh.f32 %v9243_v44 }
0x2d0f   :  { %v8133_v22 = vpop.eup %8132 }
0x2d10   :  { %1848 = vrot.lane.b32.xlu0 %v8133_v22, %s8538_s24 }
0x2d82   :  { %v1849_v47 = vpop.permute.xlu0 %1848 }
0x2d83   :  { %v1851_v7 = vmul.f32 %v8131_v49, %v1849_v47 }
0x2d85   :  { %v1852_v53 = vpack.c.bf16 %v1851_v7, %v1851_v7 }
0x2d87   :  { %1854 = vrot.lane.b32.xlu0 %v1852_v53, %s8540_s11 }
0x2df9   :  { %v1855_v43 = vpop.permute.xlu0 %1854 }
0x2dfa   :  { %7379 = vmatmul.mubr.msk.bf16.vlgmr.msra.gmra.mrb[36].mxu0 %vm41_vm1, %v1855_v43 }
0x2dfb   :  { %7383 = vmatpush3.bf16.msra.mxu0 %v8952_v62  ;;  %7384 = vmatprep.mubr.msk.bf16.mxu0 %vm8537_vm0, %v11083_v4 }
0x2dfc   :  { %7400 = vmatprep.subr.bf16.mxu0 %v11083_v4 }
0x2ecd   :  { %v1893_v19 = vpop.f32.mrb[36].mxu0 }
0x2ece   :  { %v1894_v54 = vadd.f32 %v1893_v19, %v8919_v21  ;;  %v7380_v55 = vpop.f32.mrb[37].mxu0 }
0x2ecf   :  { %v1896_v5 = vpop.f32.mrb[38].mxu0 }
0x2ed0   :  { %v7381_v16 = vpop.f32.mrb[39].mxu0  ;;  %v1899_v58 = vsel %vm867_vm10, %v1894_v54, -inf }
0x2ed1   :  { %1900 = vmax.xlane.f32.xlu0 %v1899_v58 }
0x2f5e   :  { %v1901_v0 = vpop.xlane.xlu0 %1900 }
0x2f5f   :  { %v9255_v6 = vsub.f32 %v1894_v54, %v1901_v0 }
0x2f61   :  { %11142 = vst [vmem:[#allocation13_spill] sm:$0xff] %v9255_v6  ;;  %v1903_v13 = vmul.f32 1.442695, %v9255_v6 }
0x2f63   :  { %8134 = vpow2.f32 %v1903_v13 }
0x2f6d   :  { %v8135_v39 = vpop.eup %8134 }
0x2f6e   :  { %v1905_v10 = vsel %vm867_vm10, %v8135_v39, 0.0 }
0x2f6f   :  { %1906 = vadd.xlane.f32.xlu1 %v1905_v10 }
0x2f80   :  { %1919 = vrot.lane.b32.xlu1 %v9136_v36, %s8555_s21  ;;  %s8562_s21 = smov 73  }
0x2ffc   :  { %v9260_v49 = vpop.xlane.xlu1 %1906 }
0x2ffd   :  { %11143 = vst [vmem:[#allocation14_spill] sm:$0xff] %v9260_v49  ;;  %8136 = vrcp.f32 %v9260_v49 }
0x3000   :  { %v1920_v34 = vpop.permute.xlu1 %1919 }
0x3007   :  { %v8137_v20 = vpop.eup %8136 }
0x3008   :  { %v9263_v33 = vmul.f32 %v8137_v20, %v8135_v39 }
0x300a   :  { %11144 = vst [vmem:[#allocation15_spill] sm:$0xff] %v9263_v33  ;;  %1939 = vrot.lane.b32.xlu1 %v9263_v33, %s8547_s17  ;;  %1925 = vrot.lane.b32.xlu0 %v9263_v33, %s8546_s16  ;;  %vm1922_vm11 = vcmp.le.f32.partialorder %v9263_v33, %v1920_v34 }
0x300b   :  { %v1923_v19 = vsel %vm1922_vm11, 1, %v11085_v23 }
0x300e   :  { %2014 = vrot.lane.b32.xlu1 %v1851_v7, %s8539_s10  ;;  %1932 = vrot.lane.b32.xlu0 %v9263_v33, %s8545_s15 }
0x307c   :  { %v1926_v30 = vpop.permute.xlu0 %1925  ;;  %v1940_v54 = vpop.permute.xlu1 %1939 }
0x307d   :  { %v1928_v22 = vadd.f32 %v1926_v30, %v9263_v33 }
0x307f   :  { %vm1929_vm12 = vcmp.le.f32.partialorder %v1928_v22, %v1920_v34 }
0x3080   :  { %v1930_v47 = vsel %vm1929_vm12, 1, %v11085_v23  ;;  %v1933_v53 = vpop.permute.xlu0 %1932 }
0x3081   :  { %v1935_v43 = vadd.f32 %v1933_v53, %v1928_v22  ;;  %v1931_v55 = vadd.s32 %v1930_v47, %v1923_v19 }
0x3083   :  { %vm1936_vm13 = vcmp.le.f32.partialorder %v1935_v43, %v1920_v34  ;;  %v1942_v7 = vadd.f32 %v1940_v54, %v1935_v43 }
0x3084   :  { %v1937_v5 = vsel %vm1936_vm13, 1, %v11085_v23 }
0x3085   :  { %v1938_v16 = vadd.s32 %v1937_v5, %v1931_v55  ;;  %vm1943_vm15 = vcmp.le.f32.partialorder %v1942_v7, %v1920_v34  ;;  %v2015_v34 = vpop.permute.xlu1 %2014 }
0x3086   :  { %v1944_v58 = vsel %vm1943_vm15, 1, %v11085_v23 }
0x3087   :  { %v9278_v0 = vadd.s32 %v1944_v58, %v1938_v16 }
0x3089   :  { %v1962_v13 = vadd.s32 1, %v9278_v0 }
0x308b   :  { %1964 = vperm.xlu0 %7990, %v1962_v13  }
0x310a   :  { %v1965_v39 = vpop.permute.xlu0 %1964 }
0x310b   :  { %vm1966_vm9 = vcmp.eq.s32.totalorder %v8965_v1, %v1965_v39 }
0x310c   :  { %v6789_v10 = vsel %vm1966_vm9, 1.0, %v11083_v4 }
0x310d   :  { %v1969_v20 = vpack.c.bf16 %v6789_v10, %v6789_v10 }
0x310f   :  { %7385 = vmatmul.mubr.msk.bf16.vlgmr.msra.gmra.mrb[40].mxu0 %vm940_vm8, %v1969_v20 }
0x3110   :  { %7401 = vmatpush3.bf16.msra.mxu0 %v8900_v26  ;;  %7404 = vmatprep.mubr.msk.bf16.mxu0 %vm8537_vm0, %v11083_v4 }
0x3111   :  { %7402 = vmatprep.subr.bf16.mxu0 %v11083_v4 }
0x3114   :  { %7403 = vmatpush3.bf16.msra.mxu0 %v8904_v31 }
0x3115   :  { %7408 = vmatprep.subr.bf16.mxu0 %v11083_v4 }
0x31e2   :  { %v2007_v30 = vpop.f32.mrb[40].mxu0 }
0x31e3   :  { %v2017_v22 = vsel %vm41_vm1, %v2007_v30, %v2015_v34  ;;  %v7386_v47 = vpop.f32.mrb[41].mxu0 }
0x31e4   :  { %v2018_v53 = vpack.c.bf16 %v2017_v22, %v2017_v22  ;;  %v2010_v43 = vpop.f32.mrb[42].mxu0 }
0x31e5   :  { %v7387_v19 = vpop.f32.mrb[43].mxu0 }
0x31e6   :  { %7397 = vmatmul.mubr.msk.bf16.vlgmr.msra.gmra.mrb[48].mxu1 %vm68_vm2, %v2018_v53 }
0x31e7   :  { %7415 = vmatpush3.bf16.msra.mxu1 %v8981_v25  ;;  %7422 = vmatprep.mubr.msk.bf16.mxu1 %vm8537_vm0, %v11083_v4 }
0x31e8   :  { %7416 = vmatprep.subr.bf16.mxu1 %v11083_v4 }
0x31eb   :  { %7417 = vmatpush3.bf16.msra.mxu1 %v8990_v27 }
0x31ec   :  { %7418 = vmatprep.subr.bf16.mxu1 %v11083_v4 }
0x31ef   :  { %7419 = vmatpush3.bf16.msra.mxu1 %v9089_v51 }
0x31f0   :  { %7420 = vmatprep.subr.bf16.mxu1 %v11083_v4 }
0x31f3   :  { %7421 = vmatpush3.bf16.msra.mxu1 %v9098_v35 }
0x31f4   :  { %7446 = vmatprep.subr.bf16.mxu1 %v11083_v4 }
0x32b9   :  { %v2056_v54 = vpop.f32.mrb[48].mxu1 }
0x32ba   :  { %v2057_v25 = vadd.f32 %v9065_v59, %v2056_v54  ;;  %v7398_v55 = vpop.f32.mrb[49].mxu1 }
0x32bb   :  { %v2059_v7 = vpop.f32.mrb[50].mxu1 }
0x32bc   :  { %8138 = vtanh.f32 %v2057_v25  ;;  %v7399_v5 = vpop.f32.mrb[51].mxu1  ;;  %v2062_v27 = vsub.f32 0.0, %v2057_v25 }
0x32be   :  { %v2063_v58 = vmul.f32 1.442695, %v2062_v27 }
0x32c0   :  { %8140 = vpow2.f32 %v2063_v58 }
0x32c6   :  { %v8139_v16 = vpop.eup %8138 }
0x32c7   :  { %2070 = vrot.lane.b32.xlu1 %v8139_v16, %s8538_s24 }
0x32ca   :  { %v8141_v13 = vpop.eup %8140 }
0x32cb   :  { %v2065_v39 = vadd.f32 1.0, %v8141_v13 }
0x32cd   :  { %8142 = vrcp.f32 %v2065_v39 }
0x32d7   :  { %v8143_v10 = vpop.eup %8142 }
0x32d8   :  { %v2068_v30 = vmul.f32 %v8143_v10, %v9243_v44 }
0x3339   :  { %v2071_v20 = vpop.permute.xlu1 %2070 }
0x333a   :  { %v2073_v34 = vmul.f32 %v8143_v10, %v2071_v20 }
0x333c   :  { %2075 = vrot.lane.b32.xlu0 %v2073_v34, %s8538_s24 }
0x33ae   :  { %v2076_v22 = vpop.permute.xlu0 %2075 }
0x33af   :  { %v9306_v47 = vadd.f32 %v2076_v22, %v2068_v30 }
0x33b1   :  { %8144 = vtanh.f32 %v9306_v47 }
0x33bb   :  { %v8145_v53 = vpop.eup %8144 }
0x33bc   :  { %2081 = vrot.lane.b32.xlu1 %v8145_v53, %s8538_s24 }
0x342e   :  { %v2082_v43 = vpop.permute.xlu1 %2081 }
0x342f   :  { %v2084_v19 = vmul.f32 %v8143_v10, %v2082_v43 }
0x3431   :  { %v2085_v54 = vpack.c.bf16 %v2084_v19, %v2084_v19 }
0x3433   :  { %2087 = vrot.lane.b32.xlu0 %v2085_v54, %s8540_s11 }
0x34a5   :  { %v2088_v25 = vpop.permute.xlu0 %2087 }
0x34a6   :  { %7405 = vmatmul.mubr.msk.bf16.vlgmr.msra.gmra.mrb[44].mxu0 %vm41_vm1, %v2088_v25 }
0x34a7   :  { %7409 = vmatpush3.bf16.msra.mxu0 %v8952_v62  ;;  %7410 = vmatprep.mubr.msk.bf16.mxu0 %vm8537_vm0, %v11083_v4 }
0x34a8   :  { %7426 = vmatprep.subr.bf16.mxu0 %v11083_v4 }
0x3579   :  { %v2126_v44 = vpop.f32.mrb[44].mxu0 }
0x357a   :  { %v2127_v55 = vadd.f32 %v2126_v44, %v8919_v21  ;;  %v7406_v7 = vpop.f32.mrb[45].mxu0 }
0x357b   :  { %v2129_v5 = vpop.f32.mrb[46].mxu0 }
0x357c   :  { %v7407_v16 = vpop.f32.mrb[47].mxu0  ;;  %v2132_v27 = vsel %vm867_vm10, %v2127_v55, -inf }
0x357d   :  { %2133 = vmax.xlane.f32.xlu1 %v2132_v27 }
0x358e   :  { %2152 = vrot.lane.b32.xlu1 %v9136_v36, %s8556_s22  ;;  %s8563_s22 = smov 54  }
0x360a   :  { %v2134_v58 = vpop.xlane.xlu1 %2133 }
0x360b   :  { %v9319_v13 = vsub.f32 %v2127_v55, %v2134_v58 }
0x360d   :  { %11145 = vst [vmem:[#allocation16_spill] sm:$0xff] %v9319_v13  ;;  %v2136_v39 = vmul.f32 1.442695, %v9319_v13 }
0x360e   :  { %v2153_v53 = vpop.permute.xlu1 %2152 }
0x360f   :  { %8146 = vpow2.f32 %v2136_v39 }
0x3619   :  { %v8147_v10 = vpop.eup %8146 }
0x361a   :  { %v2138_v20 = vsel %vm867_vm10, %v8147_v10, 0.0 }
0x361b   :  { %2139 = vadd.xlane.f32.xlu0 %v2138_v20 }
0x36a8   :  { %v9323_v34 = vpop.xlane.xlu0 %2139 }
0x36a9   :  { %11146 = vst [vmem:[#allocation17_spill] sm:$0xff] %v9323_v34  ;;  %8148 = vrcp.f32 %v9323_v34 }
0x36b3   :  { %v8149_v30 = vpop.eup %8148 }
0x36b4   :  { %v9326_v22 = vmul.f32 %v8149_v30, %v8147_v10 }
0x36b6   :  { %11147 = vst [vmem:[#allocation18_spill] sm:$0xff] %v9326_v22  ;;  %2165 = vrot.lane.b32.xlu1 %v9326_v22, %s8545_s15  ;;  %2158 = vrot.lane.b32.xlu0 %v9326_v22, %s8546_s16  ;;  %vm2155_vm11 = vcmp.le.f32.partialorder %v9326_v22, %v2153_v53 }
0x36b7   :  { %v2156_v55 = vsel %vm2155_vm11, 1, %v11085_v23  ;;  %vm2497_vm11 = vcmask 257024  }
0x36ba   :  { %2172 = vrot.lane.b32.xlu0 %v9326_v22, %s8547_s17 }
0x36be   :  { %2247 = vrot.lane.b32.xlu0 %v2084_v19, %s8539_s10 }
0x3728   :  { %v2159_v43 = vpop.permute.xlu0 %2158  ;;  %v2166_v25 = vpop.permute.xlu1 %2165 }
0x3729   :  { %v2161_v54 = vadd.f32 %v2159_v43, %v9326_v22 }
0x372b   :  { %vm2162_vm12 = vcmp.le.f32.partialorder %v2161_v54, %v2153_v53  ;;  %v2168_v44 = vadd.f32 %v2166_v25, %v2161_v54 }
0x372c   :  { %v2163_v7 = vsel %vm2162_vm12, 1, %v11085_v23  ;;  %v2173_v5 = vpop.permute.xlu0 %2172  ;;  %vm11098_vm12 = vcmask 1043456  }
0x372d   :  { %v2164_v16 = vadd.s32 %v2163_v7, %v2156_v55  ;;  %vm2169_vm13 = vcmp.le.f32.partialorder %v2168_v44, %v2153_v53  ;;  %v2175_v27 = vadd.f32 %v2173_v5, %v2168_v44 }
0x372e   :  { %v2170_v58 = vsel %vm2169_vm13, 1, %v11085_v23 }
0x372f   :  { %v2171_v19 = vadd.s32 %v2170_v58, %v2164_v16  ;;  %vm2176_vm15 = vcmp.le.f32.partialorder %v2175_v27, %v2153_v53 }
0x3730   :  { %v2177_v39 = vsel %vm2176_vm15, 1, %v11085_v23  ;;  %v2248_v53 = vpop.permute.xlu0 %2247 }
0x3731   :  { %v9341_v10 = vadd.s32 %v2177_v39, %v2171_v19 }
0x3733   :  { %11148 = vst [vmem:[#allocation19_spill] sm:$0xff] %v9341_v10  ;;  %v2195_v20 = vadd.s32 1, %v9341_v10 }
0x3735   :  { %2197 = vperm.xlu1 %7991, %v2195_v20  }
0x37b4   :  { %v2198_v30 = vpop.permute.xlu1 %2197 }
0x37b5   :  { %vm2199_vm9 = vcmp.eq.s32.totalorder %v8965_v1, %v2198_v30 }
0x37b6   :  { %v6794_v43 = vsel %vm2199_vm9, 1.0, %v11083_v4 }
0x37b7   :  { %v2202_v54 = vpack.c.bf16 %v6794_v43, %v6794_v43 }
0x37b9   :  { %7411 = vmatmul.mubr.msk.bf16.vlgmr.msra.gmra.mrb[48].mxu0 %vm940_vm8, %v2202_v54 }
0x37ba   :  { %7427 = vmatpush3.bf16.msra.mxu0 %v8638_v3  ;;  %7430 = vmatprep.mubr.msk.bf16.mxu0 %vm8537_vm0, %v11083_v4 }
0x37bb   :  { %7428 = vmatprep.subr.bf16.mxu0 %v11083_v4 }
0x37be   :  { %7429 = vmatpush3.bf16.msra.mxu0 %v9050_v52 }
0x37bf   :  { %7434 = vmatprep.subr.bf16.mxu0 %v11083_v4 }
0x388c   :  { %v2240_v25 = vpop.f32.mrb[48].mxu0 }
0x388d   :  { %v2250_v44 = vsel %vm41_vm1, %v2240_v25, %v2248_v53  ;;  %v7412_v55 = vpop.f32.mrb[49].mxu0 }
0x388e   :  { %v2251_v7 = vpack.c.bf16 %v2250_v44, %v2250_v44  ;;  %v2243_v5 = vpop.f32.mrb[50].mxu0 }
0x388f   :  { %v7413_v16 = vpop.f32.mrb[51].mxu0 }
0x3890   :  { %7423 = vmatmul.mubr.msk.bf16.vlgmr.msra.gmra.mrb[52].mxu1 %vm68_vm2, %v2251_v7 }
0x3891   :  { %7447 = vmatpush3.bf16.msra.mxu1 %v8758_v32  ;;  %7450 = vmatprep.mubr.msk.bf16.mxu1 %vm8537_vm0, %v11083_v4 }
0x3892   :  { %7448 = vmatprep.subr.bf16.mxu1 %v11083_v4 }
0x3895   :  { %7449 = vmatpush3.bf16.msra.mxu1 %v8771_v37 }
0x3896   :  { %7454 = vmatprep.subr.bf16.mxu1 %v11083_v4 }
0x3963   :  { %v2289_v52 = vpop.f32.mrb[52].mxu1 }
0x3964   :  { %v2290_v27 = vadd.f32 %v9065_v59, %v2289_v52  ;;  %v7424_v58 = vpop.f32.mrb[53].mxu1 }
0x3965   :  { %v2292_v19 = vpop.f32.mrb[54].mxu1 }
0x3966   :  { %8150 = vtanh.f32 %v2290_v27  ;;  %v7425_v39 = vpop.f32.mrb[55].mxu1  ;;  %v2295_v30 = vsub.f32 0.0, %v2290_v27 }
0x3967   :  { %v9386_v39 = vld [vmem:[%s11077_s0 + $0x8] sm:$0xff]  }
0x3968   :  { %v2296_v43 = vmul.f32 1.442695, %v2295_v30 }
0x396a   :  { %8152 = vpow2.f32 %v2296_v43 }
0x3970   :  { %v8151_v20 = vpop.eup %8150 }
0x3971   :  { %2303 = vrot.lane.b32.xlu1 %v8151_v20, %s8538_s24 }
0x3974   :  { %v8153_v54 = vpop.eup %8152 }
0x3975   :  { %v2298_v53 = vadd.f32 1.0, %v8153_v54 }
0x3977   :  { %8154 = vrcp.f32 %v2298_v53 }
0x3981   :  { %v8155_v25 = vpop.eup %8154 }
0x3982   :  { %v2301_v59 = vmul.f32 %v8155_v25, %v9306_v47  ;;  %v9377_v47 = vld [vmem:[%s11077_s0] sm:$0xff]  }
0x39e3   :  { %v2304_v44 = vpop.permute.xlu1 %2303 }
0x39e4   :  { %v2306_v55 = vmul.f32 %v8155_v25, %v2304_v44  ;;  %v9407_v44 = vld [vmem:[%s11079_s2] sm:$0x1] }
0x39e6   :  { %2308 = vrot.lane.b32.xlu0 %v2306_v55, %s8538_s24 }
0x3a58   :  { %v2309_v7 = vpop.permute.xlu0 %2308 }
0x3a59   :  { %v2311_v5 = vadd.f32 %v2309_v7, %v2301_v59 }
0x3a5b   :  { %8156 = vtanh.f32 %v2311_v5 }
0x3a65   :  { %v8157_v16 = vpop.eup %8156 }
0x3a66   :  { %2314 = vrot.lane.b32.xlu1 %v8157_v16, %s8538_s24 }
0x3ad8   :  { %v2315_v52 = vpop.permute.xlu1 %2314 }
0x3ad9   :  { %v9366_v27 = vmul.f32 %v8155_v25, %v2315_v52 }
0x3adb   :  { %v2323_v58 = vpack.c.bf16 %v9366_v27, %v9366_v27  ;;  %2371 = vrot.lane.b32.xlu1 %v9366_v27, %s8539_s10 }
0x3add   :  { %2325 = vrot.lane.b32.xlu0 %v2323_v58, %s8540_s11 }
0x3b4d   :  { %v2372_v20 = vpop.permute.xlu1 %2371 }
0x3b4e   :  { %v2374_v30 = vsel %vm41_vm1, %v8677_v9, %v2372_v20 }
0x3b4f   :  { %v2326_v19 = vpop.permute.xlu0 %2325  ;;  %v2375_v43 = vpack.c.bf16 %v2374_v30, %v2374_v30 }
0x3b50   :  { %7431 = vmatmul.mubr.msk.bf16.vlgmr.msra.gmra.mrb[52].mxu0 %vm41_vm1, %v2326_v19 }
0x3b51   :  { %7435 = vmatpush3.bf16.msra.mxu0 %v9377_v47  ;;  %7442 = vmatprep.mubr.msk.bf16.mxu0 %vm8537_vm0, %v11083_v4 }
0x3b52   :  { %7436 = vmatprep.subr.bf16.mxu0 %v11083_v4 }
0x3b55   :  { %7437 = vmatpush3.bf16.msra.mxu0 %v9386_v39 }
0x3b56   :  { %7438 = vmatprep.subr.bf16.mxu0 %v11083_v4 }
0x3b59   :  { %7439 = vmatpush3.bf16.msra.mxu0 %v9089_v51 }
0x3b5a   :  { %7440 = vmatprep.subr.bf16.mxu0 %v11083_v4 }
0x3b5d   :  { %7441 = vmatpush3.bf16.msra.mxu0 %v9098_v35 }
0x3b5e   :  { %7466 = vmatprep.subr.bf16.mxu0 %v11083_v4 }
0x3b60   :  { %7443 = vmatmul.mubr.msk.bf16.vlgmr.msra.gmra.mrb[56].mxu0 %vm68_vm2, %v2375_v43 }
0x3b61   :  { %7467 = vmatpush3.bf16.msra.mxu0 %v8758_v32  ;;  %7470 = vmatprep.mubr.msk.bf16.mxu0 %vm8537_vm0, %v11083_v4 }
0x3b62   :  { %7468 = vmatprep.subr.bf16.mxu0 %v11083_v4 }
0x3b65   :  { %7469 = vmatpush3.bf16.msra.mxu0 %v8771_v37 }
0x3b66   :  { %7474 = vmatprep.subr.bf16.mxu0 %v11083_v4 }
0x3c23   :  { %v2364_v51 = vpop.f32.mrb[52].mxu0 }
0x3c24   :  { %2370 = vst.msk [vmem:[#allocation3 + $0x3] sm:$0x1] %vm135_vm3, %v2364_v51  ;;  %v7432_v35 = vpop.f32.mrb[53].mxu0 }
0x3c25   :  { %v2367_v54 = vpop.f32.mrb[54].mxu0 }
0x3c26   :  { %v7433_v53 = vpop.f32.mrb[55].mxu0 }
0x3c33   :  { %v2413_v25 = vpop.f32.mrb[56].mxu0 }
0x3c34   :  { %v2414_v55 = vadd.f32 %v9407_v44, %v2413_v25  ;;  %v7444_v59 = vpop.f32.mrb[57].mxu0 }
0x3c35   :  { %v2416_v7 = vpop.f32.mrb[58].mxu0 }
0x3c36   :  { %8158 = vtanh.f32 %v2414_v55  ;;  %v7445_v16 = vpop.f32.mrb[59].mxu0  ;;  %v2419_v58 = vsub.f32 0.0, %v2414_v55 }
0x3c38   :  { %v2420_v19 = vmul.f32 1.442695, %v2419_v58  ;;  %v9438_v58 = vld [vmem:[%s11077_s0 + $0x18] sm:$0xff]  }
0x3c3a   :  { %8160 = vpow2.f32 %v2420_v19 }
0x3c40   :  { %v8159_v52 = vpop.eup %8158 }
0x3c41   :  { %2427 = vrot.lane.b32.xlu0 %v8159_v52, %s8538_s24 }
0x3c44   :  { %v8161_v20 = vpop.eup %8160 }
0x3c45   :  { %v2422_v30 = vadd.f32 1.0, %v8161_v20 }
0x3c47   :  { %8162 = vrcp.f32 %v2422_v30 }
0x3c51   :  { %v8163_v43 = vpop.eup %8162 }
0x3c52   :  { %v2425_v54 = vmul.f32 %v8163_v43, %v2311_v5  ;;  %v9431_v5 = vld [vmem:[%s11077_s0 + $0x10] sm:$0xff]  }
0x3cb3   :  { %v2428_v51 = vpop.permute.xlu0 %2427 }
0x3cb4   :  { %v2430_v35 = vmul.f32 %v8163_v43, %v2428_v51 }
0x3cb6   :  { %2432 = vrot.lane.b32.xlu1 %v2430_v35, %s8538_s24 }
0x3d28   :  { %v2433_v53 = vpop.permute.xlu1 %2432 }
0x3d29   :  { %v9412_v25 = vadd.f32 %v2433_v53, %v2425_v54 }
0x3d2b   :  { %8164 = vtanh.f32 %v9412_v25 }
0x3d35   :  { %v8165_v59 = vpop.eup %8164 }
0x3d36   :  { %2438 = vrot.lane.b32.xlu0 %v8165_v59, %s8538_s24 }
0x3da8   :  { %v2439_v55 = vpop.permute.xlu0 %2438 }
0x3da9   :  { %v9416_v7 = vmul.f32 %v8163_v43, %v2439_v55  ;;  %v2442_v43 = vld [vmem:[#allocation3] sm:$0xf] }
0x3dab   :  { %v2443_v16 = vpack.c.bf16 %v9416_v7, %v9416_v7 }
0x3dad   :  { %2445 = vrot.lane.b32.xlu1 %v2443_v16, %s8540_s11 }
0x3db1   :  { %2540 = vrot.lane.b32.xlu1 %v9136_v36, %s8557_s9  ;;  %s8586_s9 = smov 124  }
0x3e1f   :  { %v2446_v52 = vpop.permute.xlu1 %2445 }
0x3e20   :  { %7451 = vmatmul.mubr.msk.bf16.vlgmr.msra.gmra.mrb[56].mxu1 %vm41_vm1, %v2446_v52 }
0x3e21   :  { %7455 = vmatpush3.bf16.msra.mxu1 %v9377_v47  ;;  %7462 = vmatprep.mubr.msk.bf16.mxu1 %vm8537_vm0, %v11083_v4 }
0x3e22   :  { %7456 = vmatprep.subr.bf16.mxu1 %v11083_v4 }
0x3e25   :  { %7457 = vmatpush3.bf16.msra.mxu1 %v9386_v39 }
0x3e26   :  { %7458 = vmatprep.subr.bf16.mxu1 %v11083_v4 }
0x3e29   :  { %7459 = vmatpush3.bf16.msra.mxu1 %v9431_v5 }
0x3e2a   :  { %7460 = vmatprep.subr.bf16.mxu1 %v11083_v4 }
0x3e2d   :  { %7461 = vmatpush3.bf16.msra.mxu1 %v9438_v58 }
0x3e2e   :  { %7486 = vmatprep.subr.bf16.mxu1 %v11083_v4 }
0x3ef3   :  { %v2484_v19 = vpop.f32.mrb[56].mxu1 }
0x3ef4   :  { %v2493_v20 = vrot.slane %v2484_v19, %v8793_v41  ;;  %v7452_v30 = vpop.f32.mrb[57].mxu1 }
0x3ef5   :  { %v2487_v51 = vpop.f32.mrb[58].mxu1 }
0x3ef6   :  { %v2494_v35 = vadd.f32 %v2493_v20, %v2442_v43  ;;  %v7453_v54 = vpop.f32.mrb[59].mxu1 }
0x3ef8   :  { %8166 = vtanh.f32 %v2494_v35 }
0x3f02   :  { %v8167_v53 = vpop.eup %8166 }
0x3f03   :  { %v2496_v59 = vmul.f32 %v8167_v53, %v8803_v50 }
0x3f05   :  { %v2498_v55 = vsel %vm2497_vm11, %v2496_v59, 0.0 }
0x3f06   :  { %2499 = vadd.xlane.f32.xlu0 %v2498_v55 }
0x3f93   :  { %v2500_v16 = vpop.xlane.xlu0 %2499 }
0x3f94   :  { %v2502_v36 = vsel %vm11098_vm12, %v2500_v16, -inf }
0x3f95   :  { %v2503_v52 = vrot.slane %v2502_v36, 4 }
0x3f97   :  { %v2504_v4 = vmax.f32 %v2502_v36, %v2503_v52 }
0x3f99   :  { %v2505_v19 = vrot.slane %v2504_v4, 2 }
0x3f9b   :  { %v2506_v30 = vmax.f32 %v2504_v4, %v2505_v19  ;;  %v2541_v19 = vpop.permute.xlu1 %2540 }
0x3f9d   :  { %v2507_v23 = vrot.slane %v2506_v30, 1 }
0x3f9f   :  { %v2508_v51 = vmax.f32 %v2506_v30, %v2507_v23 }
0x3fa1   :  { %v2509_v20 = vsub.f32 %v2500_v16, %v2508_v51 }
0x3fa3   :  { %v2510_v43 = vmul.f32 1.442695, %v2509_v20 }
0x3fa5   :  { %8168 = vpow2.f32 %v2510_v43  ;;  %v8558_v43 = vmov 72  }
0x3fa6   :  { %7992 = vset.pattern.permute.xlu1 %v8558_v43 }
0x3faf   :  { %v8169_v35 = vpop.eup %8168 }
0x3fb0   :  { %v2512_v54 = vsel %vm11098_vm12, %v8169_v35, 0.0 }
0x3fb1   :  { %v2513_v53 = vrot.slane %v2512_v54, 4 }
0x3fb3   :  { %v2514_v10 = vadd.f32 %v2513_v53, %v2512_v54 }
0x3fb5   :  { %v2515_v59 = vrot.slane %v2514_v10, 2 }
0x3fb7   :  { %v2516_v55 = vadd.f32 %v2515_v59, %v2514_v10 }
0x3fb9   :  { %v2517_v22 = vrot.slane %v2516_v55, 1 }
0x3fbb   :  { %v2518_v13 = vadd.f32 %v2517_v22, %v2516_v55  ;;  %v11151_v22 = vmov 0  }
0x3fbd   :  { %8170 = vrcp.f32 %v2518_v13 }
0x3fbe   :  { %8172 = vlog2.f32 %v2518_v13 }
0x3fc7   :  { %v8171_v34 = vpop.eup %8170 }
0x3fc8   :  { %v8173_v36 = vpop.eup %8172  ;;  %v9448_v52 = vmul.f32 %v8171_v34, %v8169_v35 }
0x3fc9   :  { %v2522_v4 = vmul.f32 0.6931472, %v8173_v36 }
0x3fca   :  { %11149 = vst [vmem:[#allocation20_spill] sm:$0xff] %v9448_v52  ;;  %v2537_v23 = vrot.slane %v9448_v52, 1  ;;  %v2548_v51 = vrot.slane %v9448_v52, 2 }
0x3fcb   :  { %v9451_v16 = vsub.f32 %v2509_v20, %v2522_v4  ;;  %v9462_v20 = vld [vmem:[%s11079_s2 + $0x1] sm:$0x1] }
0x3fcc   :  { %v2539_v30 = vadd.f32 %v2537_v23, %v9448_v52  ;;  %vm2534_vm9 = vcmp.le.f32.partialorder %v9448_v52, %v9462_v20 }
0x3fcd   :  { %11150 = vst [vmem:[#allocation21_spill] sm:$0xff] %v9451_v16  ;;  %v2535_v54 = vsel %vm2534_vm9, 1, %v11151_v22 }
0x3fce   :  { %v2550_v10 = vadd.f32 %v2548_v51, %v2539_v30  ;;  %vm2543_vm13 = vcmp.le.f32.partialorder %v2539_v30, %v2541_v19 }
0x3fcf   :  { %v2544_v13 = vsel %vm2543_vm13, 1, %v11151_v22 }
0x3fd0   :  { %vm2551_vm15 = vcmp.le.f32.partialorder %v2550_v10, %v2541_v19  ;;  %2545 = vrot.lane.b32.xlu1 %v2544_v13, %s8559_s12 }
0x3fd1   :  { %v2552_v34 = vsel %vm2551_vm15, 1, %v11151_v22 }
0x3fd4   :  { %2553 = vrot.lane.b32.xlu1 %v2552_v34, %s8559_s12 }
0x3fd8   :  { %2319 = vrot.lane.b32.xlu1 %v9366_v27, %s8540_s11  ;;  %v11153_v27 = vmov 0.0  }
0x4042   :  { %v2546_v35 = vpop.permute.xlu1 %2545 }
0x4043   :  { %v2547_v53 = vadd.s32 %v2546_v35, %v2535_v54 }
0x4046   :  { %v2554_v59 = vpop.permute.xlu1 %2553 }
0x4047   :  { %v9467_v55 = vadd.s32 %v2554_v59, %v2547_v53 }
0x4049   :  { %11152 = vst [vmem:[#allocation22_spill] sm:$0xff] %v9467_v55  ;;  %v2559_v36 = vrot.slane %v9467_v55, %v8793_v41 }
0x404a   :  { %v2320_v4 = vpop.permute.xlu1 %2319 }
0x404b   :  { %2322 = vst.msk [vmem:[#allocation2 + $0x3] sm:$0x1] %vm135_vm3, %v2320_v4  ;;  %vm2560_vm13 = vcmp.eq.s32.totalorder %v8790_v40, %v2559_v36 }
0x404c   :  { %v9474_v23 = vsel %vm2560_vm13, 1.0, %v11153_v27 }
0x404d   :  { %11154 = vst [vmem:[#allocation23_spill] sm:$0xff] %v9474_v23  ;;  %2586 = vperm.xlu1 %7992, %v9474_v23  }
0x4051   :  { %2598 = vrot.lane.b32.xlu1 %v9416_v7, %s8539_s10 }
0x4052   :  { %v2583_v19 = vld [vmem:[#allocation2] sm:$0xf]  ;;  %7995 = vset.pattern.permute.xlu1 %v11151_v22 }
0x4053   :  { %v9479_v30 = vld [vmem:[#allocation2] sm:$0xf] }
0x4054   :  { %3484 = vst.msk [vmem:[#allocation2] sm:$0x1] %vm135_vm3, %v11153_v27  ;;  %3605 = vst.msk [vmem:[#allocation2 + $0x1] sm:$0x1] %vm135_vm3, %v11153_v27 }
0x40cc   :  { %v2587_v51 = vpop.permute.xlu1 %2586 }
0x40cd   :  { %v2589_v43 = vmul.f32 %v2587_v51, %v2583_v19 }
0x40cf   :  { %v2590_v10 = vsel %vm2497_vm11, %v2589_v43, 0.0 }
0x40d0   :  { %v2591_v13 = vrot.slane %v2590_v10, 4  ;;  %v2599_v59 = vpop.permute.xlu1 %2598 }
0x40d2   :  { %v2592_v34 = vadd.f32 %v2591_v13, %v2590_v10 }
0x40d4   :  { %v2593_v35 = vrot.slane %v2592_v34, 2 }
0x40d6   :  { %v2594_v54 = vadd.f32 %v2593_v35, %v2592_v34 }
0x40d8   :  { %v2595_v7 = vrot.slane %v2594_v54, 1 }
0x40da   :  { %v2596_v53 = vadd.f32 %v2595_v7, %v2594_v54 }
0x40dc   :  { %v2601_v36 = vsel %vm41_vm1, %v2596_v53, %v2599_v59 }
0x40dd   :  { %v2602_v4 = vpack.c.bf16 %v2601_v36, %v2601_v36 }
0x40df   :  { %7463 = vmatmul.mubr.msk.bf16.vlgmr.msra.gmra.mrb[60].mxu1 %vm68_vm2, %v2602_v4 }
0x40e0   :  { %7487 = vmatpush3.bf16.msra.mxu1 %v8900_v26  ;;  %7490 = vmatprep.mubr.msk.bf16.mxu1 %vm8537_vm0, %v11153_v27 }
0x40e1   :  { %7488 = vmatprep.subr.bf16.mxu1 %v11153_v27 }
0x40e4   :  { %7489 = vmatpush3.bf16.msra.mxu1 %v8904_v31 }
0x40e5   :  { %7494 = vmatprep.subr.bf16.mxu1 %v11153_v27 }
0x41b2   :  { %v2640_v19 = vpop.f32.mrb[60].mxu1 }
0x41b3   :  { %v2641_v51 = vadd.f32 %v9407_v44, %v2640_v19  ;;  %v7464_v43 = vpop.f32.mrb[61].mxu1 }
0x41b4   :  { %v2643_v10 = vpop.f32.mrb[62].mxu1 }
0x41b5   :  { %8174 = vtanh.f32 %v2641_v51  ;;  %v7465_v13 = vpop.f32.mrb[63].mxu1  ;;  %v2646_v35 = vsub.f32 0.0, %v2641_v51 }
0x41b7   :  { %v2647_v54 = vmul.f32 1.442695, %v2646_v35 }
0x41b9   :  { %8176 = vpow2.f32 %v2647_v54 }
0x41bf   :  { %v8175_v34 = vpop.eup %8174 }
0x41c0   :  { %2654 = vrot.lane.b32.xlu1 %v8175_v34, %s8538_s24 }
0x41c3   :  { %v8177_v7 = vpop.eup %8176 }
0x41c4   :  { %v2649_v53 = vadd.f32 1.0, %v8177_v7 }
0x41c6   :  { %8178 = vrcp.f32 %v2649_v53 }
0x41d0   :  { %v8179_v59 = vpop.eup %8178 }
0x41d1   :  { %v2652_v19 = vmul.f32 %v8179_v59, %v9412_v25 }
0x4232   :  { %v2655_v36 = vpop.permute.xlu1 %2654 }
0x4233   :  { %v2657_v4 = vmul.f32 %v8179_v59, %v2655_v36 }
0x4235   :  { %2659 = vrot.lane.b32.xlu1 %v2657_v4, %s8538_s24 }
0x42a7   :  { %v2660_v43 = vpop.permute.xlu1 %2659 }
0x42a8   :  { %v9499_v10 = vadd.f32 %v2660_v43, %v2652_v19 }
0x42aa   :  { %8180 = vtanh.f32 %v9499_v10 }
0x42b4   :  { %v8181_v13 = vpop.eup %8180 }
0x42b5   :  { %2665 = vrot.lane.b32.xlu0 %v8181_v13, %s8538_s24 }
0x42b9   :  { %2765 = vrot.lane.b32.xlu0 %v9462_v20, %s8560_s20  ;;  %s8569_s20 = smov 48  }
0x4327   :  { %v2666_v51 = vpop.permute.xlu0 %2665 }
0x4328   :  { %v2668_v34 = vmul.f32 %v8179_v59, %v2666_v51  ;;  %v2669_v59 = vld [vmem:[#allocation3] sm:$0xf] }
0x432a   :  { %v2670_v35 = vpack.c.bf16 %v2668_v34, %v2668_v34 }
0x432c   :  { %2672 = vrot.lane.b32.xlu1 %v2670_v35, %s8540_s11 }
0x439e   :  { %v2673_v54 = vpop.permute.xlu1 %2672 }
0x439f   :  { %7471 = vmatmul.mubr.msk.bf16.vlgmr.msra.gmra.mrb[60].mxu0 %vm41_vm1, %v2673_v54 }
0x43a0   :  { %7475 = vmatpush3.bf16.msra.mxu0 %v9377_v47  ;;  %7482 = vmatprep.mubr.msk.bf16.mxu0 %vm8537_vm0, %v11153_v27 }
0x43a1   :  { %7476 = vmatprep.subr.bf16.mxu0 %v11153_v27 }
0x43a4   :  { %7477 = vmatpush3.bf16.msra.mxu0 %v9386_v39 }
0x43a5   :  { %7478 = vmatprep.subr.bf16.mxu0 %v11153_v27 }
0x43a8   :  { %7479 = vmatpush3.bf16.msra.mxu0 %v9431_v5 }
0x43a9   :  { %7480 = vmatprep.subr.bf16.mxu0 %v11153_v27 }
0x43ac   :  { %7481 = vmatpush3.bf16.msra.mxu0 %v9438_v58 }
0x43ad   :  { %7500 = vmatprep.subr.bf16.mxu0 %v11153_v27 }
0x4472   :  { %v2711_v25 = vpop.f32.mrb[60].mxu0 }
0x4473   :  { %v2720_v7 = vrot.slane %v2711_v25, %v8793_v41  ;;  %v7472_v53 = vpop.f32.mrb[61].mxu0 }
0x4474   :  { %v2714_v36 = vpop.f32.mrb[62].mxu0 }
0x4475   :  { %v2721_v4 = vadd.f32 %v2720_v7, %v2669_v59  ;;  %v7473_v19 = vpop.f32.mrb[63].mxu0 }
0x4477   :  { %8182 = vtanh.f32 %v2721_v4 }
0x4481   :  { %v8183_v43 = vpop.eup %8182 }
0x4482   :  { %v2723_v13 = vmul.f32 %v8183_v43, %v8803_v50 }
0x4484   :  { %v2724_v51 = vsel %vm2497_vm11, %v2723_v13, 0.0 }
0x4485   :  { %2725 = vadd.xlane.f32.xlu1 %v2724_v51 }
0x4496   :  { %2823 = vrot.lane.b32.xlu1 %v2668_v34, %s8539_s10 }
0x4512   :  { %v2726_v35 = vpop.xlane.xlu1 %2725 }
0x4513   :  { %v2727_v54 = vsel %vm11098_vm12, %v2726_v35, -inf }
0x4514   :  { %v2728_v55 = vrot.slane %v2727_v54, 4 }
0x4516   :  { %v2729_v23 = vmax.f32 %v2727_v54, %v2728_v55 }
0x4518   :  { %v2730_v25 = vrot.slane %v2729_v23, 2 }
0x451a   :  { %v2731_v53 = vmax.f32 %v2729_v23, %v2730_v25 }
0x451c   :  { %v2732_v16 = vrot.slane %v2731_v53, 1 }
0x451e   :  { %v2733_v36 = vmax.f32 %v2731_v53, %v2732_v16  ;;  %v2766_v53 = vpop.permute.xlu0 %2765 }
0x4520   :  { %v2734_v7 = vsub.f32 %v2726_v35, %v2733_v36  ;;  %v8561_v35 = vmov 73  }
0x4521   :  { %7993 = vset.pattern.permute.xlu0 %v8561_v35 }
0x4522   :  { %v2735_v59 = vmul.f32 1.442695, %v2734_v7 }
0x4524   :  { %8184 = vpow2.f32 %v2735_v59 }
0x452e   :  { %v8185_v4 = vpop.eup %8184 }
0x452f   :  { %v2737_v19 = vsel %vm11098_vm12, %v8185_v4, 0.0 }
0x4530   :  { %v2738_v43 = vrot.slane %v2737_v19, 4 }
0x4532   :  { %v2739_v13 = vadd.f32 %v2738_v43, %v2737_v19 }
0x4534   :  { %v2740_v51 = vrot.slane %v2739_v13, 2 }
0x4536   :  { %v2741_v52 = vadd.f32 %v2740_v51, %v2739_v13 }
0x4538   :  { %v2742_v34 = vrot.slane %v2741_v52, 1 }
0x453a   :  { %v2743_v33 = vadd.f32 %v2742_v34, %v2741_v52 }
0x453c   :  { %8186 = vrcp.f32 %v2743_v33 }
0x453d   :  { %8188 = vlog2.f32 %v2743_v33 }
0x4546   :  { %v8187_v6 = vpop.eup %8186 }
0x4547   :  { %v8189_v55 = vpop.eup %8188  ;;  %v9522_v54 = vmul.f32 %v8187_v6, %v8185_v4 }
0x4548   :  { %v2747_v23 = vmul.f32 0.6931472, %v8189_v55 }
0x4549   :  { %11155 = vst [vmem:[#allocation24_spill] sm:$0xff] %v9522_v54  ;;  %v2762_v16 = vrot.slane %v9522_v54, 1  ;;  %v2773_v59 = vrot.slane %v9522_v54, 2  ;;  %vm2759_vm13 = vcmp.le.f32.partialorder %v9522_v54, %v9462_v20 }
0x454a   :  { %v9525_v25 = vsub.f32 %v2734_v7, %v2747_v23  ;;  %v2760_v4 = vsel %vm2759_vm13, 1, %v11151_v22 }
0x454b   :  { %v2764_v36 = vadd.f32 %v2762_v16, %v9522_v54 }
0x454c   :  { %11156 = vst [vmem:[#allocation25_spill] sm:$0xff] %v9525_v25 }
0x454d   :  { %vm2768_vm15 = vcmp.le.f32.partialorder %v2764_v36, %v2766_v53  ;;  %v2775_v52 = vadd.f32 %v2773_v59, %v2764_v36 }
0x454e   :  { %v2769_v33 = vsel %vm2768_vm15, 1, %v11151_v22 }
0x454f   :  { %vm2776_vm9 = vcmp.le.f32.partialorder %v2775_v52, %v2766_v53  ;;  %2770 = vrot.lane.b32.xlu0 %v2769_v33, %s8562_s21 }
0x4550   :  { %v2777_v6 = vsel %vm2776_vm9, 1, %v11151_v22 }
0x4553   :  { %2778 = vrot.lane.b32.xlu0 %v2777_v6, %s8562_s21  ;;  %v2824_v6 = vpop.permute.xlu1 %2823  ;;  %s8567_s21 = smov 50  }
0x45c1   :  { %v2771_v7 = vpop.permute.xlu0 %2770 }
0x45c2   :  { %v2772_v19 = vadd.s32 %v2771_v7, %v2760_v4 }
0x45c5   :  { %v2779_v43 = vpop.permute.xlu0 %2778 }
0x45c6   :  { %v9534_v13 = vadd.s32 %v2779_v43, %v2772_v19 }
0x45c8   :  { %11157 = vst [vmem:[#allocation26_spill] sm:$0xff] %v9534_v13  ;;  %v2784_v51 = vrot.slane %v9534_v13, %v8793_v41 }
0x45ca   :  { %vm2785_vm15 = vcmp.eq.s32.totalorder %v8790_v40, %v2784_v51 }
0x45cb   :  { %v9540_v34 = vsel %vm2785_vm15, 1.0, %v11153_v27 }
0x45cc   :  { %11158 = vst [vmem:[#allocation27_spill] sm:$0xff] %v9540_v34  ;;  %2811 = vperm.xlu0 %7993, %v9540_v34  }
0x45d0   :  { %7994 = vset.pattern.permute.xlu0 %v11151_v22 }
0x464b   :  { %v2812_v55 = vpop.permute.xlu0 %2811 }
0x464c   :  { %v2814_v23 = vmul.f32 %v2812_v55, %v9479_v30 }
0x464e   :  { %v2815_v16 = vsel %vm2497_vm11, %v2814_v23, 0.0 }
0x464f   :  { %v2816_v35 = vrot.slane %v2815_v16, 4 }
0x4651   :  { %v2817_v53 = vadd.f32 %v2816_v35, %v2815_v16 }
0x4653   :  { %v2818_v36 = vrot.slane %v2817_v53, 2 }
0x4655   :  { %v2819_v59 = vadd.f32 %v2818_v36, %v2817_v53 }
0x4657   :  { %v2820_v52 = vrot.slane %v2819_v59, 1 }
0x4659   :  { %v2821_v33 = vadd.f32 %v2820_v52, %v2819_v59 }
0x465b   :  { %v2826_v7 = vsel %vm41_vm1, %v2821_v33, %v2824_v6 }
0x465c   :  { %v2827_v4 = vpack.c.bf16 %v2826_v7, %v2826_v7 }
0x465e   :  { %7483 = vmatmul.mubr.msk.bf16.vlgmr.msra.gmra.mrb[64].mxu0 %vm68_vm2, %v2827_v4 }
0x465f   :  { %7501 = vmatpush3.bf16.msra.mxu0 %v9377_v47  ;;  %7508 = vmatprep.mubr.msk.bf16.mxu0 %vm8537_vm0, %v11153_v27 }
0x4660   :  { %7502 = vmatprep.subr.bf16.mxu0 %v11153_v27 }
0x4663   :  { %7503 = vmatpush3.bf16.msra.mxu0 %v9386_v39 }
0x4664   :  { %7504 = vmatprep.subr.bf16.mxu0 %v11153_v27 }
0x4667   :  { %7505 = vmatpush3.bf16.msra.mxu0 %v9431_v5 }
0x4668   :  { %7506 = vmatprep.subr.bf16.mxu0 %v11153_v27 }
0x466b   :  { %7507 = vmatpush3.bf16.msra.mxu0 %v9438_v58 }
0x466c   :  { %7526 = vmatprep.subr.bf16.mxu0 %v11153_v27 }
0x4731   :  { %v2865_v30 = vpop.f32.mrb[64].mxu0 }
0x4732   :  { %v2866_v19 = vadd.f32 %v9407_v44, %v2865_v30  ;;  %v7484_v43 = vpop.f32.mrb[65].mxu0 }
0x4733   :  { %v2868_v51 = vpop.f32.mrb[66].mxu0 }
0x4734   :  { %8190 = vtanh.f32 %v2866_v19  ;;  %v7485_v55 = vpop.f32.mrb[67].mxu0  ;;  %v2871_v16 = vsub.f32 0.0, %v2866_v19 }
0x4736   :  { %v2872_v35 = vmul.f32 1.442695, %v2871_v16 }
0x4738   :  { %8192 = vpow2.f32 %v2872_v35 }
0x473e   :  { %v8191_v23 = vpop.eup %8190 }
0x473f   :  { %2879 = vrot.lane.b32.xlu0 %v8191_v23, %s8538_s24 }
0x4742   :  { %v8193_v53 = vpop.eup %8192 }
0x4743   :  { %v2874_v36 = vadd.f32 1.0, %v8193_v53 }
0x4745   :  { %8194 = vrcp.f32 %v2874_v36 }
0x474f   :  { %v8195_v59 = vpop.eup %8194 }
0x4750   :  { %v2877_v6 = vmul.f32 %v8195_v59, %v9499_v10 }
0x47b1   :  { %v2880_v52 = vpop.permute.xlu0 %2879 }
0x47b2   :  { %v2882_v33 = vmul.f32 %v8195_v59, %v2880_v52 }
0x47b4   :  { %2884 = vrot.lane.b32.xlu0 %v2882_v33, %s8538_s24 }
0x4826   :  { %v2885_v7 = vpop.permute.xlu0 %2884 }
0x4827   :  { %v9562_v4 = vadd.f32 %v2885_v7, %v2877_v6 }
0x4829   :  { %8196 = vtanh.f32 %v9562_v4 }
0x4833   :  { %v8197_v30 = vpop.eup %8196 }
0x4834   :  { %2890 = vrot.lane.b32.xlu0 %v8197_v30, %s8538_s24 }
0x48a6   :  { %v2891_v19 = vpop.permute.xlu0 %2890 }
0x48a7   :  { %v2893_v43 = vmul.f32 %v8195_v59, %v2891_v19 }
0x48a9   :  { %v2894_v51 = vpack.c.bf16 %v2893_v43, %v2893_v43 }
0x48ab   :  { %2896 = vrot.lane.b32.xlu0 %v2894_v51, %s8540_s11 }
0x491d   :  { %v2897_v55 = vpop.permute.xlu0 %2896 }
0x491e   :  { %7491 = vmatmul.mubr.msk.bf16.vlgmr.msra.gmra.mrb[64].mxu1 %vm41_vm1, %v2897_v55 }
0x491f   :  { %7495 = vmatpush3.bf16.msra.mxu1 %v8952_v62  ;;  %7496 = vmatprep.mubr.msk.bf16.mxu1 %vm8537_vm0, %v11153_v27 }
0x4920   :  { %7512 = vmatprep.subr.bf16.mxu1 %v11153_v27 }
0x49f1   :  { %v2935_v10 = vpop.f32.mrb[64].mxu1 }
0x49f2   :  { %v2936_v23 = vadd.f32 %v2935_v10, %v8919_v21  ;;  %v7492_v16 = vpop.f32.mrb[65].mxu1 }
0x49f3   :  { %v2938_v35 = vpop.f32.mrb[66].mxu1 }
0x49f4   :  { %v7493_v53 = vpop.f32.mrb[67].mxu1  ;;  %v2941_v36 = vsel %vm867_vm10, %v2936_v23, -inf }
0x49f5   :  { %2942 = vmax.xlane.f32.xlu0 %v2941_v36 }
0x4a82   :  { %v2943_v59 = vpop.xlane.xlu0 %2942 }
0x4a83   :  { %v9574_v52 = vsub.f32 %v2936_v23, %v2943_v59 }
0x4a85   :  { %11159 = vst [vmem:[#allocation28_spill] sm:$0xff] %v9574_v52  ;;  %v2945_v33 = vmul.f32 1.442695, %v9574_v52 }
0x4a87   :  { %8198 = vpow2.f32 %v2945_v33 }
0x4a91   :  { %v8199_v6 = vpop.eup %8198 }
0x4a92   :  { %v2947_v7 = vsel %vm867_vm10, %v8199_v6, 0.0 }
0x4a93   :  { %2948 = vadd.xlane.f32.xlu1 %v2947_v7 }
0x4aa4   :  { %2961 = vrot.lane.b32.xlu1 %v9462_v20, %s8563_s22  ;;  %s8571_s22 = smov 80  }
0x4b20   :  { %v9579_v30 = vpop.xlane.xlu1 %2948 }
0x4b21   :  { %11160 = vst [vmem:[#allocation29_spill] sm:$0xff] %v9579_v30  ;;  %8200 = vrcp.f32 %v9579_v30 }
0x4b24   :  { %v2962_v55 = vpop.permute.xlu1 %2961 }
0x4b2b   :  { %v8201_v19 = vpop.eup %8200 }
0x4b2c   :  { %v9582_v51 = vmul.f32 %v8201_v19, %v8199_v6 }
0x4b2e   :  { %11161 = vst [vmem:[#allocation30_spill] sm:$0xff] %v9582_v51  ;;  %2981 = vrot.lane.b32.xlu1 %v9582_v51, %s8547_s17  ;;  %2967 = vrot.lane.b32.xlu0 %v9582_v51, %s8546_s16  ;;  %vm2964_vm9 = vcmp.le.f32.partialorder %v9582_v51, %v2962_v55 }
0x4b2f   :  { %v2965_v36 = vsel %vm2964_vm9, 1, %v11151_v22 }
0x4b32   :  { %3056 = vrot.lane.b32.xlu1 %v2893_v43, %s8539_s10  ;;  %2974 = vrot.lane.b32.xlu0 %v9582_v51, %s8545_s15 }
0x4ba0   :  { %v2968_v10 = vpop.permute.xlu0 %2967  ;;  %v2982_v59 = vpop.permute.xlu1 %2981 }
0x4ba1   :  { %v2970_v23 = vadd.f32 %v2968_v10, %v9582_v51 }
0x4ba3   :  { %vm2971_vm13 = vcmp.le.f32.partialorder %v2970_v23, %v2962_v55 }
0x4ba4   :  { %v2972_v16 = vsel %vm2971_vm13, 1, %v11151_v22  ;;  %v2975_v35 = vpop.permute.xlu0 %2974 }
0x4ba5   :  { %v2977_v53 = vadd.f32 %v2975_v35, %v2970_v23  ;;  %v2973_v33 = vadd.s32 %v2972_v16, %v2965_v36 }
0x4ba7   :  { %vm2978_vm15 = vcmp.le.f32.partialorder %v2977_v53, %v2962_v55  ;;  %v2984_v43 = vadd.f32 %v2982_v59, %v2977_v53 }
0x4ba8   :  { %v2979_v6 = vsel %vm2978_vm15, 1, %v11151_v22 }
0x4ba9   :  { %v2980_v7 = vadd.s32 %v2979_v6, %v2973_v33  ;;  %vm2985_vm12 = vcmp.le.f32.partialorder %v2984_v43, %v2962_v55 }
0x4baa   :  { %v2986_v19 = vsel %vm2985_vm12, 1, %v11151_v22 }
0x4bab   :  { %v9597_v10 = vadd.s32 %v2986_v19, %v2980_v7 }
0x4bad   :  { %11162 = vst [vmem:[#allocation31_spill] sm:$0xff] %v9597_v10  ;;  %v3004_v13 = vadd.s32 1, %v9597_v10 }
0x4baf   :  { %3006 = vperm.xlu0 %7994, %v3004_v13   ;;  %v3057_v13 = vpop.permute.xlu1 %3056 }
0x4c2e   :  { %v3007_v34 = vpop.permute.xlu0 %3006 }
0x4c2f   :  { %vm3008_vm13 = vcmp.eq.s32.totalorder %v8965_v1, %v3007_v34 }
0x4c30   :  { %v6807_v23 = vsel %vm3008_vm13, 1.0, %v11153_v27 }
0x4c31   :  { %v3011_v35 = vpack.c.bf16 %v6807_v23, %v6807_v23 }
0x4c33   :  { %7497 = vmatmul.mubr.msk.bf16.vlgmr.msra.gmra.mrb[68].mxu1 %vm940_vm8, %v3011_v35 }
0x4c34   :  { %7513 = vmatpush3.bf16.msra.mxu1 %v8900_v26  ;;  %7516 = vmatprep.mubr.msk.bf16.mxu1 %vm8537_vm0, %v11153_v27 }
0x4c35   :  { %7514 = vmatprep.subr.bf16.mxu1 %v11153_v27 }
0x4c38   :  { %7515 = vmatpush3.bf16.msra.mxu1 %v8904_v31 }
0x4c39   :  { %7520 = vmatprep.subr.bf16.mxu1 %v11153_v27 }
0x4d06   :  { %v3049_v55 = vpop.f32.mrb[68].mxu1 }
0x4d07   :  { %v3059_v34 = vsel %vm41_vm1, %v3049_v55, %v3057_v13  ;;  %v7498_v16 = vpop.f32.mrb[69].mxu1 }
0x4d08   :  { %v3060_v53 = vpack.c.bf16 %v3059_v34, %v3059_v34  ;;  %v3052_v36 = vpop.f32.mrb[70].mxu1 }
0x4d09   :  { %v7499_v59 = vpop.f32.mrb[71].mxu1 }
0x4d0a   :  { %7509 = vmatmul.mubr.msk.bf16.vlgmr.msra.gmra.mrb[68].mxu0 %vm68_vm2, %v3060_v53 }
0x4d0b   :  { %7527 = vmatpush3.bf16.msra.mxu0 %v9377_v47  ;;  %7534 = vmatprep.mubr.msk.bf16.mxu0 %vm8537_vm0, %v11153_v27 }
0x4d0c   :  { %7528 = vmatprep.subr.bf16.mxu0 %v11153_v27 }
0x4d0f   :  { %7529 = vmatpush3.bf16.msra.mxu0 %v9386_v39 }
0x4d10   :  { %7530 = vmatprep.subr.bf16.mxu0 %v11153_v27 }
0x4d13   :  { %7531 = vmatpush3.bf16.msra.mxu0 %v9431_v5 }
0x4d14   :  { %7532 = vmatprep.subr.bf16.mxu0 %v11153_v27 }
0x4d17   :  { %7533 = vmatpush3.bf16.msra.mxu0 %v9438_v58 }
0x4d18   :  { %7558 = vmatprep.subr.bf16.mxu0 %v11153_v27 }
0x4ddd   :  { %v3098_v33 = vpop.f32.mrb[68].mxu0 }
0x4dde   :  { %v3099_v47 = vadd.f32 %v9407_v44, %v3098_v33  ;;  %v7510_v43 = vpop.f32.mrb[69].mxu0 }
0x4ddf   :  { %v3101_v6 = vpop.f32.mrb[70].mxu0 }
0x4de0   :  { %8202 = vtanh.f32 %v3099_v47  ;;  %v7511_v7 = vpop.f32.mrb[71].mxu0  ;;  %v3104_v39 = vsub.f32 0.0, %v3099_v47 }
0x4de2   :  { %v3105_v23 = vmul.f32 1.442695, %v3104_v39 }
0x4de4   :  { %8204 = vpow2.f32 %v3105_v23 }
0x4dea   :  { %v8203_v19 = vpop.eup %8202 }
0x4deb   :  { %3112 = vrot.lane.b32.xlu1 %v8203_v19, %s8538_s24 }
0x4dee   :  { %v8205_v35 = vpop.eup %8204 }
0x4def   :  { %v3107_v13 = vadd.f32 1.0, %v8205_v35 }
0x4df1   :  { %8206 = vrcp.f32 %v3107_v13 }
0x4dfb   :  { %v8207_v55 = vpop.eup %8206 }
0x4dfc   :  { %v3110_v53 = vmul.f32 %v8207_v55, %v9562_v4 }
0x4e5d   :  { %v3113_v34 = vpop.permute.xlu1 %3112 }
0x4e5e   :  { %v3115_v16 = vmul.f32 %v8207_v55, %v3113_v34 }
0x4e60   :  { %3117 = vrot.lane.b32.xlu0 %v3115_v16, %s8538_s24 }
0x4ed2   :  { %v3118_v36 = vpop.permute.xlu0 %3117 }
0x4ed3   :  { %v9625_v59 = vadd.f32 %v3118_v36, %v3110_v53 }
0x4ed5   :  { %8208 = vtanh.f32 %v9625_v59 }
0x4edf   :  { %v8209_v33 = vpop.eup %8208 }
0x4ee0   :  { %3123 = vrot.lane.b32.xlu1 %v8209_v33, %s8538_s24 }
0x4f52   :  { %v3124_v47 = vpop.permute.xlu1 %3123 }
0x4f53   :  { %v3126_v43 = vmul.f32 %v8207_v55, %v3124_v47 }
0x4f55   :  { %v3127_v6 = vpack.c.bf16 %v3126_v43, %v3126_v43 }
0x4f57   :  { %3129 = vrot.lane.b32.xlu0 %v3127_v6, %s8540_s11 }
0x4fc9   :  { %v3130_v7 = vpop.permute.xlu0 %3129 }
0x4fca   :  { %7517 = vmatmul.mubr.msk.bf16.vlgmr.msra.gmra.mrb[72].mxu1 %vm41_vm1, %v3130_v7 }
0x4fcb   :  { %7521 = vmatpush3.bf16.msra.mxu1 %v8952_v62  ;;  %7522 = vmatprep.mubr.msk.bf16.mxu1 %vm8537_vm0, %v11153_v27 }
0x4fcc   :  { %7538 = vmatprep.subr.bf16.mxu1 %v11153_v27 }
0x509d   :  { %v3168_v4 = vpop.f32.mrb[72].mxu1 }
0x509e   :  { %v3169_v19 = vadd.f32 %v3168_v4, %v8919_v21  ;;  %v7518_v39 = vpop.f32.mrb[73].mxu1 }
0x509f   :  { %v3171_v23 = vpop.f32.mrb[74].mxu1 }
0x50a0   :  { %v7519_v35 = vpop.f32.mrb[75].mxu1  ;;  %v3174_v13 = vsel %vm867_vm10, %v3169_v19, -inf }
0x50a1   :  { %3175 = vmax.xlane.f32.xlu1 %v3174_v13 }
0x50b2   :  { %3194 = vrot.lane.b32.xlu1 %v9462_v20, %s8564_s23 }
0x512e   :  { %v3176_v55 = vpop.xlane.xlu1 %3175 }
0x512f   :  { %v9638_v34 = vsub.f32 %v3169_v19, %v3176_v55 }
0x5131   :  { %11163 = vst [vmem:[#allocation32_spill] sm:$0xff] %v9638_v34  ;;  %v3178_v16 = vmul.f32 1.442695, %v9638_v34 }
0x5132   :  { %v3195_v20 = vpop.permute.xlu1 %3194 }
0x5133   :  { %8210 = vpow2.f32 %v3178_v16 }
0x513d   :  { %v8211_v53 = vpop.eup %8210 }
0x513e   :  { %v3180_v36 = vsel %vm867_vm10, %v8211_v53, 0.0 }
0x513f   :  { %3181 = vadd.xlane.f32.xlu0 %v3180_v36 }
0x51cc   :  { %v9642_v33 = vpop.xlane.xlu0 %3181 }
0x51cd   :  { %11164 = vst [vmem:[#allocation33_spill] sm:$0xff] %v9642_v33  ;;  %8212 = vrcp.f32 %v9642_v33 }
0x51d7   :  { %v8213_v47 = vpop.eup %8212 }
0x51d8   :  { %v9645_v6 = vmul.f32 %v8213_v47, %v8211_v53 }
0x51da   :  { %11165 = vst [vmem:[#allocation34_spill] sm:$0xff] %v9645_v6  ;;  %3207 = vrot.lane.b32.xlu1 %v9645_v6, %s8545_s15  ;;  %3200 = vrot.lane.b32.xlu0 %v9645_v6, %s8546_s16  ;;  %vm3197_vm12 = vcmp.le.f32.partialorder %v9645_v6, %v3195_v20 }
0x51db   :  { %v3198_v23 = vsel %vm3197_vm12, 1, %v11151_v22 }
0x51de   :  { %3214 = vrot.lane.b32.xlu0 %v9645_v6, %s8547_s17 }
0x51e2   :  { %3289 = vrot.lane.b32.xlu0 %v3126_v43, %s8539_s10 }
0x524c   :  { %v3201_v7 = vpop.permute.xlu0 %3200  ;;  %v3208_v19 = vpop.permute.xlu1 %3207 }
0x524d   :  { %v3203_v4 = vadd.f32 %v3201_v7, %v9645_v6 }
0x524f   :  { %vm3204_vm9 = vcmp.le.f32.partialorder %v3203_v4, %v3195_v20  ;;  %v3210_v39 = vadd.f32 %v3208_v19, %v3203_v4 }
0x5250   :  { %v3205_v35 = vsel %vm3204_vm9, 1, %v11151_v22  ;;  %v3215_v13 = vpop.permute.xlu0 %3214 }
0x5251   :  { %v3206_v55 = vadd.s32 %v3205_v35, %v3198_v23  ;;  %vm3211_vm15 = vcmp.le.f32.partialorder %v3210_v39, %v3195_v20  ;;  %v3217_v16 = vadd.f32 %v3215_v13, %v3210_v39 }
0x5252   :  { %v3212_v53 = vsel %vm3211_vm15, 1, %v11151_v22 }
0x5253   :  { %v3213_v43 = vadd.s32 %v3212_v53, %v3206_v55  ;;  %vm3218_vm13 = vcmp.le.f32.partialorder %v3217_v16, %v3195_v20  ;;  %v9673_v20 = vld [vmem:[%s11078_s1 + $0x8] sm:$0xff]  }
0x5254   :  { %v3219_v36 = vsel %vm3218_vm13, 1, %v11151_v22  ;;  %v3290_v39 = vpop.permute.xlu0 %3289 }
0x5255   :  { %v9660_v47 = vadd.s32 %v3219_v36, %v3213_v43 }
0x5257   :  { %11166 = vst [vmem:[#allocation35_spill] sm:$0xff] %v9660_v47  ;;  %v3237_v7 = vadd.s32 1, %v9660_v47 }
0x5259   :  { %3239 = vperm.xlu1 %7995, %v3237_v7  }
0x52d8   :  { %v3240_v4 = vpop.permute.xlu1 %3239 }
0x52d9   :  { %vm3241_vm12 = vcmp.eq.s32.totalorder %v8965_v1, %v3240_v4 }
0x52da   :  { %v6812_v19 = vsel %vm3241_vm12, 1.0, %v11153_v27 }
0x52db   :  { %v3244_v6 = vpack.c.bf16 %v6812_v19, %v6812_v19 }
0x52dd   :  { %7523 = vmatmul.mubr.msk.bf16.vlgmr.msra.gmra.mrb[76].mxu1 %vm940_vm8, %v3244_v6 }
0x52de   :  { %7539 = vmatpush3.bf16.msra.mxu1 %v8638_v3  ;;  %7542 = vmatprep.mubr.msk.bf16.mxu1 %vm8537_vm0, %v11153_v27 }
0x52df   :  { %7540 = vmatprep.subr.bf16.mxu1 %v11153_v27 }
0x52e2   :  { %7541 = vmatpush3.bf16.msra.mxu1 %v9673_v20 }
0x52e3   :  { %7546 = vmatprep.subr.bf16.mxu1 %v11153_v27 }
0x53b0   :  { %v3282_v23 = vpop.f32.mrb[76].mxu1 }
0x53b1   :  { %v3292_v6 = vsel %vm41_vm1, %v3282_v23, %v3290_v39  ;;  %v7524_v35 = vpop.f32.mrb[77].mxu1 }
0x53b2   :  { %v3293_v13 = vpack.c.bf16 %v3292_v6, %v3292_v6  ;;  %v3285_v55 = vpop.f32.mrb[78].mxu1 }
0x53b3   :  { %v7525_v16 = vpop.f32.mrb[79].mxu1 }
0x53b4   :  { %7535 = vmatmul.mubr.msk.bf16.vlgmr.msra.gmra.mrb[72].mxu0 %vm68_vm2, %v3293_v13 }
0x53b5   :  { %7559 = vmatpush3.bf16.msra.mxu0 %v8638_v3  ;;  %7562 = vmatprep.mubr.msk.bf16.mxu0 %vm8537_vm0, %v11153_v27 }
0x53b6   :  { %7560 = vmatprep.subr.bf16.mxu0 %v11153_v27 }
0x53b9   :  { %7561 = vmatpush3.bf16.msra.mxu0 %v9673_v20 }
0x53ba   :  { %7566 = vmatprep.subr.bf16.mxu0 %v11153_v27 }
0x5487   :  { %v3331_v53 = vpop.f32.mrb[72].mxu0 }
0x5488   :  { %v3332_v43 = vadd.f32 %v9407_v44, %v3331_v53  ;;  %v7536_v36 = vpop.f32.mrb[73].mxu0 }
0x5489   :  { %v3334_v7 = vpop.f32.mrb[74].mxu0 }
0x548a   :  { %8214 = vtanh.f32 %v3332_v43  ;;  %v7537_v4 = vpop.f32.mrb[75].mxu0  ;;  %v3337_v39 = vsub.f32 0.0, %v3332_v43 }
0x548c   :  { %v3338_v23 = vmul.f32 1.442695, %v3337_v39 }
0x548e   :  { %8216 = vpow2.f32 %v3338_v23  ;;  %v9710_v23 = vld [vmem:[%s11077_s0 + $0x8] sm:$0xff]  }
0x5494   :  { %v8215_v19 = vpop.eup %8214 }
0x5495   :  { %3345 = vrot.lane.b32.xlu1 %v8215_v19, %s8538_s24 }
0x5498   :  { %v8217_v6 = vpop.eup %8216 }
0x5499   :  { %v3340_v35 = vadd.f32 1.0, %v8217_v6 }
0x549b   :  { %8218 = vrcp.f32 %v3340_v35 }
0x54a5   :  { %v8219_v13 = vpop.eup %8218 }
0x54a6   :  { %v3343_v44 = vmul.f32 %v8219_v13, %v9625_v59  ;;  %v9701_v59 = vld [vmem:[%s11077_s0] sm:$0xff]  }
0x5507   :  { %v3346_v55 = vpop.permute.xlu1 %3345 }
0x5508   :  { %v3348_v16 = vmul.f32 %v8219_v13, %v3346_v55 }
0x550a   :  { %3350 = vrot.lane.b32.xlu0 %v3348_v16, %s8538_s24 }
0x557c   :  { %v3351_v53 = vpop.permute.xlu0 %3350 }
0x557d   :  { %v3353_v36 = vadd.f32 %v3351_v53, %v3343_v44  ;;  %v9730_v53 = vld [vmem:[%s11079_s2] sm:$0x1] }
0x557f   :  { %8220 = vtanh.f32 %v3353_v36 }
0x5589   :  { %v8221_v7 = vpop.eup %8220 }
0x558a   :  { %3356 = vrot.lane.b32.xlu1 %v8221_v7, %s8538_s24 }
0x55fc   :  { %v3357_v4 = vpop.permute.xlu1 %3356 }
0x55fd   :  { %v9690_v43 = vmul.f32 %v8219_v13, %v3357_v4 }
0x55ff   :  { %11167 = vst [vmem:[#allocation36_spill] sm:$0xff] %v9690_v43  ;;  %v3365_v19 = vpack.c.bf16 %v9690_v43, %v9690_v43  ;;  %3413 = vrot.lane.b32.xlu1 %v9690_v43, %s8539_s10 }
0x5601   :  { %3367 = vrot.lane.b32.xlu0 %v3365_v19, %s8540_s11 }
0x5671   :  { %v3414_v6 = vpop.permute.xlu1 %3413 }
0x5672   :  { %v3416_v35 = vsel %vm41_vm1, %v8677_v9, %v3414_v6 }
0x5673   :  { %v3368_v39 = vpop.permute.xlu0 %3367  ;;  %v3417_v13 = vpack.c.bf16 %v3416_v35, %v3416_v35 }
0x5674   :  { %7543 = vmatmul.mubr.msk.bf16.vlgmr.msra.gmra.mrb[80].mxu1 %vm41_vm1, %v3368_v39 }
0x5675   :  { %7547 = vmatpush3.bf16.msra.mxu1 %v9701_v59  ;;  %7554 = vmatprep.mubr.msk.bf16.mxu1 %vm8537_vm0, %v11153_v27 }
0x5676   :  { %7548 = vmatprep.subr.bf16.mxu1 %v11153_v27 }
0x5679   :  { %7549 = vmatpush3.bf16.msra.mxu1 %v9710_v23 }
0x567a   :  { %7550 = vmatprep.subr.bf16.mxu1 %v11153_v27 }
0x567d   :  { %7551 = vmatpush3.bf16.msra.mxu1 %v9431_v5 }
0x567e   :  { %7552 = vmatprep.subr.bf16.mxu1 %v11153_v27 }
0x5681   :  { %7553 = vmatpush3.bf16.msra.mxu1 %v9438_v58 }
0x5682   :  { %7578 = vmatprep.subr.bf16.mxu1 %v11153_v27 }
0x5684   :  { %7555 = vmatmul.mubr.msk.bf16.vlgmr.msra.gmra.mrb[84].mxu1 %vm68_vm2, %v3417_v13 }
0x5685   :  { %7579 = vmatpush3.bf16.msra.mxu1 %v8638_v3  ;;  %7582 = vmatprep.mubr.msk.bf16.mxu1 %vm8537_vm0, %v11153_v27 }
0x5686   :  { %7580 = vmatprep.subr.bf16.mxu1 %v11153_v27 }
0x5689   :  { %7581 = vmatpush3.bf16.msra.mxu1 %v9673_v20 }
0x568a   :  { %7586 = vmatprep.subr.bf16.mxu1 %v11153_v27 }
0x5747   :  { %v3406_v5 = vpop.f32.mrb[80].mxu1 }
0x5748   :  { %v7544_v55 = vpop.f32.mrb[81].mxu1 }
0x5749   :  { %v3409_v16 = vpop.f32.mrb[82].mxu1 }
0x574a   :  { %v7545_v58 = vpop.f32.mrb[83].mxu1 }
0x5757   :  { %v3455_v44 = vpop.f32.mrb[84].mxu1 }
0x5758   :  { %v3456_v7 = vadd.f32 %v9730_v53, %v3455_v44  ;;  %v7556_v4 = vpop.f32.mrb[85].mxu1 }
0x5759   :  { %v3458_v19 = vpop.f32.mrb[86].mxu1 }
0x575a   :  { %8222 = vtanh.f32 %v3456_v7  ;;  %v7557_v39 = vpop.f32.mrb[87].mxu1  ;;  %v3461_v20 = vsub.f32 0.0, %v3456_v7 }
0x575c   :  { %v3462_v35 = vmul.f32 1.442695, %v3461_v20 }
0x575e   :  { %8224 = vpow2.f32 %v3462_v35 }
0x5764   :  { %v8223_v6 = vpop.eup %8222 }
0x5765   :  { %3469 = vrot.lane.b32.xlu0 %v8223_v6, %s8538_s24 }
0x5768   :  { %v8225_v13 = vpop.eup %8224 }
0x5769   :  { %v3464_v5 = vadd.f32 1.0, %v8225_v13  ;;  %v9757_v13 = vld [vmem:[%s11077_s0 + $0x18] sm:$0xff]  }
0x576b   :  { %8226 = vrcp.f32 %v3464_v5 }
0x5775   :  { %v8227_v55 = vpop.eup %8226 }
0x5776   :  { %v3467_v43 = vmul.f32 %v8227_v55, %v3353_v36 }
0x57d7   :  { %v3470_v16 = vpop.permute.xlu0 %3469 }
0x57d8   :  { %v3472_v58 = vmul.f32 %v8227_v55, %v3470_v16 }
0x57da   :  { %3474 = vrot.lane.b32.xlu1 %v3472_v58, %s8538_s24 }
0x584c   :  { %v3475_v44 = vpop.permute.xlu1 %3474 }
0x584d   :  { %v3477_v4 = vadd.f32 %v3475_v44, %v3467_v43  ;;  %v9748_v43 = vld [vmem:[%s11077_s0 + $0x10] sm:$0xff]  }
0x584f   :  { %8228 = vtanh.f32 %v3477_v4 }
0x5859   :  { %v8229_v19 = vpop.eup %8228 }
0x585a   :  { %3480 = vrot.lane.b32.xlu0 %v8229_v19, %s8538_s24 }
0x58cc   :  { %v3481_v39 = vpop.permute.xlu0 %3480 }
0x58cd   :  { %v3483_v6 = vmul.f32 %v8227_v55, %v3481_v39 }
0x58cf   :  { %v3485_v7 = vpack.c.bf16 %v3483_v6, %v3483_v6  ;;  %3534 = vrot.lane.b32.xlu0 %v3483_v6, %s8539_s10 }
0x58d1   :  { %3487 = vrot.lane.b32.xlu1 %v3485_v7, %s8540_s11 }
0x5941   :  { %v3535_v36 = vpop.permute.xlu0 %3534 }
0x5942   :  { %v3537_v35 = vsel %vm41_vm1, %v8677_v9, %v3535_v36 }
0x5943   :  { %v3488_v20 = vpop.permute.xlu1 %3487  ;;  %v3538_v5 = vpack.c.bf16 %v3537_v35, %v3537_v35 }
0x5944   :  { %7563 = vmatmul.mubr.msk.bf16.vlgmr.msra.gmra.mrb[76].mxu0 %vm41_vm1, %v3488_v20 }
0x5945   :  { %7567 = vmatpush3.bf16.msra.mxu0 %v9701_v59  ;;  %7574 = vmatprep.mubr.msk.bf16.mxu0 %vm8537_vm0, %v11153_v27 }
0x5946   :  { %7568 = vmatprep.subr.bf16.mxu0 %v11153_v27 }
0x5949   :  { %7569 = vmatpush3.bf16.msra.mxu0 %v9710_v23 }
0x594a   :  { %7570 = vmatprep.subr.bf16.mxu0 %v11153_v27 }
0x594d   :  { %7571 = vmatpush3.bf16.msra.mxu0 %v9748_v43 }
0x594e   :  { %7572 = vmatprep.subr.bf16.mxu0 %v11153_v27 }
0x5951   :  { %7573 = vmatpush3.bf16.msra.mxu0 %v9757_v13 }
0x5952   :  { %7598 = vmatprep.subr.bf16.mxu0 %v11153_v27 }
0x5954   :  { %7575 = vmatmul.mubr.msk.bf16.vlgmr.msra.gmra.mrb[80].mxu0 %vm68_vm2, %v3538_v5 }
0x5955   :  { %7599 = vmatpush3.bf16.msra.mxu0 %v8758_v32  ;;  %7602 = vmatprep.mubr.msk.bf16.mxu0 %vm8537_vm0, %v11153_v27 }
0x5956   :  { %7600 = vmatprep.subr.bf16.mxu0 %v11153_v27 }
0x5959   :  { %7601 = vmatpush3.bf16.msra.mxu0 %v8771_v37 }
0x595a   :  { %7606 = vmatprep.subr.bf16.mxu0 %v11153_v27 }
0x5a17   :  { %v3526_v55 = vpop.f32.mrb[76].mxu0 }
0x5a18   :  { %3532 = vst.msk [vmem:[#allocation3] sm:$0x1] %vm135_vm3, %v3526_v55  ;;  %v7564_v16 = vpop.f32.mrb[77].mxu0 }
0x5a19   :  { %v3529_v58 = vpop.f32.mrb[78].mxu0 }
0x5a1a   :  { %v7565_v44 = vpop.f32.mrb[79].mxu0 }
0x5a27   :  { %v3576_v19 = vpop.f32.mrb[80].mxu0 }
0x5a28   :  { %v3577_v39 = vadd.f32 %v9730_v53, %v3576_v19  ;;  %v7576_v6 = vpop.f32.mrb[81].mxu0 }
0x5a29   :  { %v3579_v7 = vpop.f32.mrb[82].mxu0 }
0x5a2a   :  { %8230 = vtanh.f32 %v3577_v39  ;;  %v7577_v20 = vpop.f32.mrb[83].mxu0  ;;  %v3582_v35 = vsub.f32 0.0, %v3577_v39 }
0x5a2c   :  { %v3583_v5 = vmul.f32 1.442695, %v3582_v35 }
0x5a2e   :  { %8232 = vpow2.f32 %v3583_v5 }
0x5a34   :  { %v8231_v36 = vpop.eup %8230 }
0x5a35   :  { %3590 = vrot.lane.b32.xlu1 %v8231_v36, %s8538_s24 }
0x5a38   :  { %v8233_v34 = vpop.eup %8232 }
0x5a39   :  { %v3585_v51 = vadd.f32 1.0, %v8233_v34 }
0x5a3b   :  { %8234 = vrcp.f32 %v3585_v51 }
0x5a45   :  { %v8235_v55 = vpop.eup %8234 }
0x5a46   :  { %v3588_v44 = vmul.f32 %v8235_v55, %v3477_v4 }
0x5aa7   :  { %v3591_v16 = vpop.permute.xlu1 %3590 }
0x5aa8   :  { %v3593_v58 = vmul.f32 %v8235_v55, %v3591_v16 }
0x5aaa   :  { %3595 = vrot.lane.b32.xlu0 %v3593_v58, %s8538_s24 }
0x5b1c   :  { %v3596_v19 = vpop.permute.xlu0 %3595 }
0x5b1d   :  { %v3598_v6 = vadd.f32 %v3596_v19, %v3588_v44 }
0x5b1f   :  { %8236 = vtanh.f32 %v3598_v6 }
0x5b29   :  { %v8237_v7 = vpop.eup %8236 }
0x5b2a   :  { %3601 = vrot.lane.b32.xlu1 %v8237_v7, %s8538_s24 }
0x5b9c   :  { %v3602_v20 = vpop.permute.xlu1 %3601 }
0x5b9d   :  { %v3604_v36 = vmul.f32 %v8235_v55, %v3602_v20 }
0x5b9f   :  { %v3606_v39 = vpack.c.bf16 %v3604_v36, %v3604_v36  ;;  %3655 = vrot.lane.b32.xlu1 %v3604_v36, %s8539_s10 }
0x5ba1   :  { %3608 = vrot.lane.b32.xlu0 %v3606_v39, %s8540_s11 }
0x5c11   :  { %v3656_v34 = vpop.permute.xlu1 %3655 }
0x5c12   :  { %v3658_v4 = vsel %vm41_vm1, %v8677_v9, %v3656_v34 }
0x5c13   :  { %v3609_v51 = vpop.permute.xlu0 %3608  ;;  %v3659_v35 = vpack.c.bf16 %v3658_v4, %v3658_v4 }
0x5c14   :  { %7583 = vmatmul.mubr.msk.bf16.vlgmr.msra.gmra.mrb[88].mxu1 %vm41_vm1, %v3609_v51 }
0x5c15   :  { %7587 = vmatpush3.bf16.msra.mxu1 %v9701_v59  ;;  %7594 = vmatprep.mubr.msk.bf16.mxu1 %vm8537_vm0, %v11153_v27 }
0x5c16   :  { %7588 = vmatprep.subr.bf16.mxu1 %v11153_v27 }
0x5c19   :  { %7589 = vmatpush3.bf16.msra.mxu1 %v9710_v23 }
0x5c1a   :  { %7590 = vmatprep.subr.bf16.mxu1 %v11153_v27 }
0x5c1d   :  { %7591 = vmatpush3.bf16.msra.mxu1 %v9748_v43 }
0x5c1e   :  { %7592 = vmatprep.subr.bf16.mxu1 %v11153_v27 }
0x5c21   :  { %7593 = vmatpush3.bf16.msra.mxu1 %v9757_v13 }
0x5c22   :  { %7618 = vmatprep.subr.bf16.mxu1 %v11153_v27 }
0x5c24   :  { %7595 = vmatmul.mubr.msk.bf16.vlgmr.msra.gmra.mrb[92].mxu1 %vm68_vm2, %v3659_v35 }
0x5c25   :  { %7619 = vmatpush3.bf16.msra.mxu1 %v8758_v32  ;;  %7622 = vmatprep.mubr.msk.bf16.mxu1 %vm8537_vm0, %v11153_v27 }
0x5c26   :  { %7620 = vmatprep.subr.bf16.mxu1 %v11153_v27 }
0x5c29   :  { %7621 = vmatpush3.bf16.msra.mxu1 %v8771_v37 }
0x5c2a   :  { %7626 = vmatprep.subr.bf16.mxu1 %v11153_v27 }
0x5ce7   :  { %v3647_v5 = vpop.f32.mrb[88].mxu1 }
0x5ce8   :  { %3653 = vst.msk [vmem:[#allocation3 + $0x1] sm:$0x1] %vm135_vm3, %v3647_v5  ;;  %v7584_v55 = vpop.f32.mrb[89].mxu1 }
0x5ce9   :  { %v3650_v16 = vpop.f32.mrb[90].mxu1 }
0x5cea   :  { %v7585_v58 = vpop.f32.mrb[91].mxu1 }
0x5cf7   :  { %v3697_v44 = vpop.f32.mrb[92].mxu1 }
0x5cf8   :  { %v3698_v19 = vadd.f32 %v9730_v53, %v3697_v44  ;;  %v7596_v7 = vpop.f32.mrb[93].mxu1 }
0x5cf9   :  { %v3700_v20 = vpop.f32.mrb[94].mxu1 }
0x5cfa   :  { %8238 = vtanh.f32 %v3698_v19  ;;  %v7597_v36 = vpop.f32.mrb[95].mxu1  ;;  %v3703_v51 = vsub.f32 0.0, %v3698_v19 }
0x5cfc   :  { %v3704_v34 = vmul.f32 1.442695, %v3703_v51 }
0x5cfe   :  { %8240 = vpow2.f32 %v3704_v34 }
0x5d04   :  { %v8239_v39 = vpop.eup %8238 }
0x5d05   :  { %3711 = vrot.lane.b32.xlu0 %v8239_v39, %s8538_s24 }
0x5d08   :  { %v8241_v4 = vpop.eup %8240 }
0x5d09   :  { %v3706_v35 = vadd.f32 1.0, %v8241_v4 }
0x5d0b   :  { %8242 = vrcp.f32 %v3706_v35  ;;  %v3726_v35 = vld [vmem:[#allocation3] sm:$0x3] }
0x5d15   :  { %v8243_v5 = vpop.eup %8242 }
0x5d16   :  { %v3709_v58 = vmul.f32 %v8243_v5, %v3598_v6 }
0x5d77   :  { %v3712_v55 = vpop.permute.xlu0 %3711 }
0x5d78   :  { %v3714_v16 = vmul.f32 %v8243_v5, %v3712_v55 }
0x5d7a   :  { %3716 = vrot.lane.b32.xlu1 %v3714_v16, %s8538_s24 }
0x5dec   :  { %v3717_v44 = vpop.permute.xlu1 %3716 }
0x5ded   :  { %v9799_v7 = vadd.f32 %v3717_v44, %v3709_v58 }
0x5def   :  { %8244 = vtanh.f32 %v9799_v7 }
0x5df9   :  { %v8245_v20 = vpop.eup %8244 }
0x5dfa   :  { %3722 = vrot.lane.b32.xlu0 %v8245_v20, %s8538_s24 }
0x5e6c   :  { %v3723_v19 = vpop.permute.xlu0 %3722 }
0x5e6d   :  { %v9803_v36 = vmul.f32 %v8243_v5, %v3723_v19  ;;  %v8565_v19 = vmov 76  }
0x5e6e   :  { %7996 = vset.pattern.permute.xlu1 %v8565_v19 }
0x5e6f   :  { %v3727_v39 = vpack.c.bf16 %v9803_v36, %v9803_v36 }
0x5e71   :  { %3729 = vrot.lane.b32.xlu1 %v3727_v39, %s8540_s11 }
0x5ee3   :  { %v3730_v51 = vpop.permute.xlu1 %3729 }
0x5ee4   :  { %7603 = vmatmul.mubr.msk.bf16.vlgmr.msra.gmra.mrb[84].mxu0 %vm41_vm1, %v3730_v51 }
0x5ee5   :  { %7607 = vmatpush3.bf16.msra.mxu0 %v9701_v59  ;;  %7614 = vmatprep.mubr.msk.bf16.mxu0 %vm8537_vm0, %v11153_v27 }
0x5ee6   :  { %7608 = vmatprep.subr.bf16.mxu0 %v11153_v27 }
0x5ee9   :  { %7609 = vmatpush3.bf16.msra.mxu0 %v9710_v23 }
0x5eea   :  { %7610 = vmatprep.subr.bf16.mxu0 %v11153_v27 }
0x5eed   :  { %7611 = vmatpush3.bf16.msra.mxu0 %v9748_v43 }
0x5eee   :  { %7612 = vmatprep.subr.bf16.mxu0 %v11153_v27 }
0x5ef1   :  { %7613 = vmatpush3.bf16.msra.mxu0 %v9757_v13 }
0x5ef2   :  { %7638 = vmatprep.subr.bf16.mxu0 %v11153_v27 }
0x5fb7   :  { %v3768_v6 = vpop.f32.mrb[84].mxu0 }
0x5fb8   :  { %v3777_v34 = vrot.slane %v3768_v6, %v8793_v41  ;;  %v7604_v4 = vpop.f32.mrb[85].mxu0 }
0x5fb9   :  { %v3771_v5 = vpop.f32.mrb[86].mxu0 }
0x5fba   :  { %v3778_v55 = vadd.f32 %v3777_v34, %v3726_v35  ;;  %v7605_v16 = vpop.f32.mrb[87].mxu0 }
0x5fbc   :  { %8246 = vtanh.f32 %v3778_v55 }
0x5fc6   :  { %v8247_v58 = vpop.eup %8246 }
0x5fc7   :  { %v3780_v44 = vmul.f32 %v8247_v58, %v8803_v50 }
0x5fc9   :  { %v3781_v20 = vsel %vm455_vm4, %v3780_v44, 0.0 }
0x5fca   :  { %3782 = vadd.xlane.f32.xlu0 %v3781_v20 }
0x6057   :  { %v3783_v39 = vpop.xlane.xlu0 %3782 }
0x6058   :  { %v3784_v51 = vsel %vm459_vm5, %v3783_v39, -inf }
0x6059   :  { %v3785_v33 = vrot.slane %v3784_v51, 4 }
0x605b   :  { %v3786_v52 = vmax.f32 %v3784_v51, %v3785_v33 }
0x605d   :  { %v3787_v6 = vrot.slane %v3786_v52, 2 }
0x605f   :  { %v3788_v4 = vmax.f32 %v3786_v52, %v3787_v6 }
0x6061   :  { %v3789_v30 = vrot.slane %v3788_v4, 1 }
0x6063   :  { %v3790_v5 = vmax.f32 %v3788_v4, %v3789_v30  ;;  %v9827_v30 = vld [vmem:[%s11079_s2 + $0x1] sm:$0x1] }
0x6065   :  { %v3791_v34 = vsub.f32 %v3783_v39, %v3790_v5  ;;  %v3840_v5 = vld [vmem:[#allocation2] sm:$0x3] }
0x6067   :  { %v3792_v35 = vmul.f32 1.442695, %v3791_v34 }
0x6069   :  { %8248 = vpow2.f32 %v3792_v35 }
0x6073   :  { %v8249_v55 = vpop.eup %8248 }
0x6074   :  { %v3794_v16 = vsel %vm459_vm5, %v8249_v55, 0.0 }
0x6075   :  { %v3795_v58 = vrot.slane %v3794_v16, 4 }
0x6077   :  { %v3796_v44 = vadd.f32 %v3795_v58, %v3794_v16 }
0x6079   :  { %v3797_v20 = vrot.slane %v3796_v44, 2 }
0x607b   :  { %v3798_v25 = vadd.f32 %v3797_v20, %v3796_v44 }
0x607d   :  { %v3799_v19 = vrot.slane %v3798_v25, 1 }
0x607f   :  { %v3800_v54 = vadd.f32 %v3799_v19, %v3798_v25 }
0x6081   :  { %8250 = vrcp.f32 %v3800_v54 }
0x6082   :  { %8252 = vlog2.f32 %v3800_v54 }
0x608b   :  { %v8251_v47 = vpop.eup %8250 }
0x608c   :  { %v8253_v33 = vpop.eup %8252  ;;  %v3802_v51 = vmul.f32 %v8251_v47, %v8249_v55 }
0x608d   :  { %v3804_v52 = vmul.f32 0.6931472, %v8253_v33 }
0x608e   :  { %vm3816_vm9 = vcmp.le.f32.partialorder %v3802_v51, %v9827_v30 }
0x608f   :  { %v3805_v39 = vsub.f32 %v3791_v34, %v3804_v52  ;;  %v9831_v6 = vsel %vm3816_vm9, 1, %v11151_v22 }
0x6090   :  { %11168 = vst [vmem:[#allocation37_spill] sm:$0xff] %v9831_v6  ;;  %v3821_v25 = vrot.slane %v9831_v6, %v8793_v41 }
0x6091   :  { %v9835_v4 = vmul.f32 %v3805_v39, %v3802_v51 }
0x6092   :  { %vm3822_vm15 = vcmp.eq.s32.totalorder %v8790_v40, %v3821_v25 }
0x6093   :  { %v6822_v54 = vsel %vm3822_vm15, 1.0, %v11153_v27 }
0x6094   :  { %3843 = vperm.xlu1 %7996, %v6822_v54   ;;  %v9839_v47 = vmul.f32 %v6822_v54, %v3805_v39 }
0x6096   :  { %11169 = vst [vmem:[#allocation38_spill] sm:$0xff] %v9839_v47 }
0x6098   :  { %3855 = vrot.lane.b32.xlu1 %v9803_v36, %s8539_s10 }
0x6099   :  { %7999 = vset.pattern.permute.xlu1 %v11151_v22 }
0x6113   :  { %v3844_v34 = vpop.permute.xlu1 %3843 }
0x6114   :  { %v3846_v35 = vmul.f32 %v3844_v34, %v3840_v5 }
0x6116   :  { %v3847_v55 = vsel %vm455_vm4, %v3846_v35, 0.0 }
0x6117   :  { %v3848_v16 = vrot.slane %v3847_v55, 4  ;;  %v3856_v51 = vpop.permute.xlu1 %3855 }
0x6119   :  { %v3849_v58 = vadd.f32 %v3848_v16, %v3847_v55 }
0x611b   :  { %v3850_v44 = vrot.slane %v3849_v58, 2 }
0x611d   :  { %v3851_v20 = vadd.f32 %v3850_v44, %v3849_v58 }
0x611f   :  { %v3852_v19 = vrot.slane %v3851_v20, 1 }
0x6121   :  { %v3853_v33 = vadd.f32 %v3852_v19, %v3851_v20 }
0x6123   :  { %v3858_v52 = vsel %vm41_vm1, %v3853_v33, %v3856_v51 }
0x6124   :  { %v3859_v39 = vpack.c.bf16 %v3858_v52, %v3858_v52 }
0x6126   :  { %7615 = vmatmul.mubr.msk.bf16.vlgmr.msra.gmra.mrb[88].mxu0 %vm68_vm2, %v3859_v39 }
0x6127   :  { %7639 = vmatpush3.bf16.msra.mxu0 %v8900_v26  ;;  %7642 = vmatprep.mubr.msk.bf16.mxu0 %vm8537_vm0, %v11153_v27 }
0x6128   :  { %7640 = vmatprep.subr.bf16.mxu0 %v11153_v27 }
0x612b   :  { %7641 = vmatpush3.bf16.msra.mxu0 %v8904_v31 }
0x612c   :  { %7646 = vmatprep.subr.bf16.mxu0 %v11153_v27 }
0x61f9   :  { %v3897_v36 = vpop.f32.mrb[88].mxu0 }
0x61fa   :  { %v3898_v25 = vadd.f32 %v9730_v53, %v3897_v36  ;;  %v7616_v54 = vpop.f32.mrb[89].mxu0 }
0x61fb   :  { %v3900_v5 = vpop.f32.mrb[90].mxu0 }
0x61fc   :  { %8254 = vtanh.f32 %v3898_v25  ;;  %v7617_v34 = vpop.f32.mrb[91].mxu0  ;;  %v3903_v55 = vsub.f32 0.0, %v3898_v25 }
0x61fe   :  { %v3904_v16 = vmul.f32 1.442695, %v3903_v55 }
0x6200   :  { %8256 = vpow2.f32 %v3904_v16  ;;  %v3926_v16 = vld [vmem:[#allocation3] sm:$0x3] }
0x6206   :  { %v8255_v35 = vpop.eup %8254 }
0x6207   :  { %3911 = vrot.lane.b32.xlu1 %v8255_v35, %s8538_s24 }
0x620a   :  { %v8257_v58 = vpop.eup %8256 }
0x620b   :  { %v3906_v44 = vadd.f32 1.0, %v8257_v58 }
0x620d   :  { %8258 = vrcp.f32 %v3906_v44 }
0x6217   :  { %v8259_v20 = vpop.eup %8258 }
0x6218   :  { %v3909_v51 = vmul.f32 %v8259_v20, %v9799_v7 }
0x6279   :  { %v3912_v19 = vpop.permute.xlu1 %3911 }
0x627a   :  { %v3914_v33 = vmul.f32 %v8259_v20, %v3912_v19 }
0x627c   :  { %3916 = vrot.lane.b32.xlu1 %v3914_v33, %s8538_s24 }
0x62ee   :  { %v3917_v52 = vpop.permute.xlu1 %3916 }
0x62ef   :  { %v9857_v39 = vadd.f32 %v3917_v52, %v3909_v51  ;;  %v8566_v52 = vmov 77  }
0x62f0   :  { %7997 = vset.pattern.permute.xlu0 %v8566_v52 }
0x62f1   :  { %8260 = vtanh.f32 %v9857_v39 }
0x62fb   :  { %v8261_v36 = vpop.eup %8260 }
0x62fc   :  { %3922 = vrot.lane.b32.xlu1 %v8261_v36, %s8538_s24 }
0x636e   :  { %v3923_v25 = vpop.permute.xlu1 %3922 }
0x636f   :  { %v3925_v54 = vmul.f32 %v8259_v20, %v3923_v25 }
0x6371   :  { %v3927_v5 = vpack.c.bf16 %v3925_v54, %v3925_v54 }
0x6373   :  { %3929 = vrot.lane.b32.xlu1 %v3927_v5, %s8540_s11 }
0x63e5   :  { %v3930_v34 = vpop.permute.xlu1 %3929 }
0x63e6   :  { %7623 = vmatmul.mubr.msk.bf16.vlgmr.msra.gmra.mrb[96].mxu1 %vm41_vm1, %v3930_v34 }
0x63e7   :  { %7627 = vmatpush3.bf16.msra.mxu1 %v9701_v59  ;;  %7634 = vmatprep.mubr.msk.bf16.mxu1 %vm8537_vm0, %v11153_v27 }
0x63e8   :  { %7628 = vmatprep.subr.bf16.mxu1 %v11153_v27 }
0x63eb   :  { %7629 = vmatpush3.bf16.msra.mxu1 %v9710_v23 }
0x63ec   :  { %7630 = vmatprep.subr.bf16.mxu1 %v11153_v27 }
0x63ef   :  { %7631 = vmatpush3.bf16.msra.mxu1 %v9748_v43 }
0x63f0   :  { %7632 = vmatprep.subr.bf16.mxu1 %v11153_v27 }
0x63f3   :  { %7633 = vmatpush3.bf16.msra.mxu1 %v9757_v13 }
0x63f4   :  { %7652 = vmatprep.subr.bf16.mxu1 %v11153_v27 }
0x64b9   :  { %v3968_v7 = vpop.f32.mrb[96].mxu1 }
0x64ba   :  { %v3977_v35 = vrot.slane %v3968_v7, %v8793_v41  ;;  %v7624_v55 = vpop.f32.mrb[97].mxu1 }
0x64bb   :  { %v3971_v58 = vpop.f32.mrb[98].mxu1 }
0x64bc   :  { %v3978_v44 = vadd.f32 %v3977_v35, %v3926_v16  ;;  %v7625_v20 = vpop.f32.mrb[99].mxu1 }
0x64be   :  { %8262 = vtanh.f32 %v3978_v44 }
0x64c8   :  { %v8263_v19 = vpop.eup %8262 }
0x64c9   :  { %v3980_v33 = vmul.f32 %v8263_v19, %v8803_v50 }
0x64cb   :  { %v3981_v51 = vsel %vm455_vm4, %v3980_v33, 0.0 }
0x64cc   :  { %3982 = vadd.xlane.f32.xlu1 %v3981_v51 }
0x64dd   :  { %4059 = vrot.lane.b32.xlu1 %v3925_v54, %s8539_s10 }
0x6559   :  { %v3983_v36 = vpop.xlane.xlu1 %3982 }
0x655a   :  { %v3984_v25 = vsel %vm459_vm5, %v3983_v36, -inf }
0x655b   :  { %v3985_v5 = vrot.slane %v3984_v25, 4 }
0x655d   :  { %v3986_v34 = vmax.f32 %v3984_v25, %v3985_v5  ;;  %v3807_v25 = vsel %vm459_vm5, %v9835_v4, 0.0  ;;  %v4060_v38 = vpop.permute.xlu1 %4059 }
0x655e   :  { %v3808_v5 = vrot.slane %v3807_v25, 4 }
0x655f   :  { %v3987_v7 = vrot.slane %v3986_v34, 2 }
0x6561   :  { %v3988_v55 = vmax.f32 %v3986_v34, %v3987_v7 }
0x6563   :  { %v3989_v35 = vrot.slane %v3988_v55, 1 }
0x6565   :  { %v3990_v16 = vmax.f32 %v3988_v55, %v3989_v35 }
0x6567   :  { %v3991_v58 = vsub.f32 %v3983_v36, %v3990_v16  ;;  %v3809_v36 = vadd.f32 %v3808_v5, %v3807_v25 }
0x6569   :  { %v3992_v44 = vmul.f32 1.442695, %v3991_v58 }
0x656b   :  { %8264 = vpow2.f32 %v3992_v44 }
0x6575   :  { %v8265_v20 = vpop.eup %8264 }
0x6576   :  { %v3994_v19 = vsel %vm459_vm5, %v8265_v20, 0.0 }
0x6577   :  { %v3995_v33 = vrot.slane %v3994_v19, 4 }
0x6579   :  { %v3996_v51 = vadd.f32 %v3995_v33, %v3994_v19  ;;  %v3810_v19 = vrot.slane %v3809_v36, 2 }
0x657b   :  { %v3997_v54 = vrot.slane %v3996_v51, 2 }
0x657d   :  { %v3998_v47 = vadd.f32 %v3997_v54, %v3996_v51  ;;  %v3811_v54 = vadd.f32 %v3810_v19, %v3809_v36 }
0x657f   :  { %v3999_v52 = vrot.slane %v3998_v47, 1 }
0x6581   :  { %v4000_v6 = vadd.f32 %v3999_v52, %v3998_v47  ;;  %v3812_v52 = vrot.slane %v3811_v54, 1 }
0x6583   :  { %8266 = vrcp.f32 %v4000_v6 }
0x6584   :  { %8268 = vlog2.f32 %v4000_v6 }
0x658d   :  { %v8267_v34 = vpop.eup %8266 }
0x658e   :  { %v8269_v7 = vpop.eup %8268  ;;  %v4002_v55 = vmul.f32 %v8267_v34, %v8265_v20  ;;  %v3813_v34 = vadd.f32 %v3812_v52, %v3811_v54 }
0x658f   :  { %v4004_v35 = vmul.f32 0.6931472, %v8269_v7 }
0x6590   :  { %vm4016_vm13 = vcmp.le.f32.partialorder %v4002_v55, %v9827_v30 }
0x6591   :  { %v4005_v16 = vsub.f32 %v3991_v58, %v4004_v35  ;;  %v9883_v44 = vsel %vm4016_vm13, 1, %v11151_v22  ;;  %v3814_v35 = vsub.f32 0.0, %v3813_v34 }
0x6592   :  { %11170 = vst [vmem:[#allocation39_spill] sm:$0xff] %v9883_v44  ;;  %v4021_v47 = vrot.slane %v9883_v44, %v8793_v41 }
0x6593   :  { %v4006_v6 = vmul.f32 %v4005_v16, %v4002_v55 }
0x6594   :  { %vm4022_vm12 = vcmp.eq.s32.totalorder %v8790_v40, %v4021_v47 }
0x6595   :  { %v4007_v4 = vsel %vm459_vm5, %v4006_v6, 0.0  ;;  %v6825_v33 = vsel %vm4022_vm12, 1.0, %v11153_v27  ;;  %v4044_v6 = vld [vmem:[#allocation2] sm:$0x3] }
0x6596   :  { %v4008_v51 = vrot.slane %v4007_v4, 4  ;;  %4047 = vperm.xlu0 %7997, %v6825_v33   ;;  %v9890_v20 = vmul.f32 %v6825_v33, %v4005_v16 }
0x6598   :  { %11171 = vst [vmem:[#allocation40_spill] sm:$0xff] %v9890_v20  ;;  %v4009_v58 = vadd.f32 %v4008_v51, %v4007_v4 }
0x659a   :  { %7998 = vset.pattern.permute.xlu0 %v11151_v22  ;;  %v4010_v25 = vrot.slane %v4009_v58, 2 }
0x659c   :  { %v4011_v5 = vadd.f32 %v4010_v25, %v4009_v58 }
0x659e   :  { %v4012_v7 = vrot.slane %v4011_v5, 1 }
0x65a0   :  { %v4013_v55 = vadd.f32 %v4012_v7, %v4011_v5 }
0x65a2   :  { %v4014_v47 = vsub.f32 0.0, %v4013_v55 }
0x65a4   :  { %v9893_v44 = vadd.f32 %v4014_v47, %v3814_v35 }
0x65a6   :  { %11172 = vst [vmem:[#allocation41_spill] sm:$0xff] %v9893_v44 }
0x6615   :  { %v4048_v10 = vpop.permute.xlu0 %4047 }
0x6616   :  { %v4050_v49 = vmul.f32 %v4048_v10, %v4044_v6 }
0x6618   :  { %v4051_v16 = vsel %vm455_vm4, %v4050_v49, 0.0 }
0x6619   :  { %v4052_v33 = vrot.slane %v4051_v16, 4 }
0x661b   :  { %v4053_v36 = vadd.f32 %v4052_v33, %v4051_v16 }
0x661d   :  { %v4054_v19 = vrot.slane %v4053_v36, 2 }
0x661f   :  { %v4055_v4 = vadd.f32 %v4054_v19, %v4053_v36 }
0x6621   :  { %v4056_v51 = vrot.slane %v4055_v4, 1 }
0x6623   :  { %v4057_v20 = vadd.f32 %v4056_v51, %v4055_v4 }
0x6625   :  { %v4062_v54 = vsel %vm41_vm1, %v4057_v20, %v4060_v38 }
0x6626   :  { %v4063_v58 = vpack.c.bf16 %v4062_v54, %v4062_v54 }
0x6628   :  { %7635 = vmatmul.mubr.msk.bf16.vlgmr.msra.gmra.mrb[100].mxu1 %vm68_vm2, %v4063_v58 }
0x6629   :  { %7653 = vmatpush3.bf16.msra.mxu1 %v9701_v59  ;;  %7660 = vmatprep.mubr.msk.bf16.mxu1 %vm8537_vm0, %v11153_v27 }
0x662a   :  { %7654 = vmatprep.subr.bf16.mxu1 %v11153_v27 }
0x662d   :  { %7655 = vmatpush3.bf16.msra.mxu1 %v9710_v23 }
0x662e   :  { %7656 = vmatprep.subr.bf16.mxu1 %v11153_v27 }
0x6631   :  { %7657 = vmatpush3.bf16.msra.mxu1 %v9748_v43 }
0x6632   :  { %7658 = vmatprep.subr.bf16.mxu1 %v11153_v27 }
0x6635   :  { %7659 = vmatpush3.bf16.msra.mxu1 %v9757_v13 }
0x6636   :  { %7678 = vmatprep.subr.bf16.mxu1 %v11153_v27 }
0x66fb   :  { %v4101_v38 = vpop.f32.mrb[100].mxu1 }
0x66fc   :  { %v4102_v49 = vadd.f32 %v9730_v53, %v4101_v38  ;;  %v7636_v10 = vpop.f32.mrb[101].mxu1 }
0x66fd   :  { %v4104_v20 = vpop.f32.mrb[102].mxu1 }
0x66fe   :  { %8270 = vtanh.f32 %v4102_v49  ;;  %v7637_v52 = vpop.f32.mrb[103].mxu1  ;;  %v4107_v5 = vsub.f32 0.0, %v4102_v49 }
0x6700   :  { %v4108_v34 = vmul.f32 1.442695, %v4107_v5 }
0x6702   :  { %8272 = vpow2.f32 %v4108_v34 }
0x6708   :  { %v8271_v25 = vpop.eup %8270 }
0x6709   :  { %4115 = vrot.lane.b32.xlu0 %v8271_v25, %s8538_s24 }
0x670c   :  { %v8273_v7 = vpop.eup %8272 }
0x670d   :  { %v4110_v55 = vadd.f32 1.0, %v8273_v7 }
0x670f   :  { %8274 = vrcp.f32 %v4110_v55 }
0x6719   :  { %v8275_v35 = vpop.eup %8274 }
0x671a   :  { %v4113_v16 = vmul.f32 %v8275_v35, %v9857_v39 }
0x677b   :  { %v4116_v47 = vpop.permute.xlu0 %4115 }
0x677c   :  { %v4118_v6 = vmul.f32 %v8275_v35, %v4116_v47 }
0x677e   :  { %4120 = vrot.lane.b32.xlu1 %v4118_v6, %s8538_s24 }
0x67f0   :  { %v4121_v33 = vpop.permute.xlu1 %4120 }
0x67f1   :  { %v9912_v36 = vadd.f32 %v4121_v33, %v4113_v16 }
0x67f3   :  { %8276 = vtanh.f32 %v9912_v36 }
0x67fd   :  { %v8277_v19 = vpop.eup %8276 }
0x67fe   :  { %4126 = vrot.lane.b32.xlu0 %v8277_v19, %s8538_s24 }
0x6870   :  { %v4127_v4 = vpop.permute.xlu0 %4126 }
0x6871   :  { %v4129_v51 = vmul.f32 %v8275_v35, %v4127_v4 }
0x6873   :  { %v4130_v54 = vpack.c.bf16 %v4129_v51, %v4129_v51 }
0x6875   :  { %4132 = vrot.lane.b32.xlu1 %v4130_v54, %s8540_s11 }
0x68e7   :  { %v4133_v58 = vpop.permute.xlu1 %4132 }
0x68e8   :  { %7643 = vmatmul.mubr.msk.bf16.vlgmr.msra.gmra.mrb[92].mxu0 %vm41_vm1, %v4133_v58 }
0x68e9   :  { %7647 = vmatpush3.bf16.msra.mxu0 %v8952_v62  ;;  %7648 = vmatprep.mubr.msk.bf16.mxu0 %vm8537_vm0, %v11153_v27 }
0x68ea   :  { %7664 = vmatprep.subr.bf16.mxu0 %v11153_v27 }
0x69bb   :  { %v4171_v39 = vpop.f32.mrb[92].mxu0 }
0x69bc   :  { %v4172_v38 = vadd.f32 %v4171_v39, %v8919_v21  ;;  %v7644_v49 = vpop.f32.mrb[93].mxu0 }
0x69bd   :  { %v4174_v10 = vpop.f32.mrb[94].mxu0 }
0x69be   :  { %v7645_v20 = vpop.f32.mrb[95].mxu0  ;;  %v4177_v52 = vsel %vm867_vm10, %v4172_v38, -inf }
0x69bf   :  { %4178 = vmax.xlane.f32.xlu0 %v4177_v52 }
0x6a4c   :  { %v4179_v25 = vpop.xlane.xlu0 %4178 }
0x6a4d   :  { %v9924_v5 = vsub.f32 %v4172_v38, %v4179_v25 }
0x6a4f   :  { %11173 = vst [vmem:[#allocation42_spill] sm:$0xff] %v9924_v5  ;;  %v4181_v34 = vmul.f32 1.442695, %v9924_v5 }
0x6a51   :  { %8278 = vpow2.f32 %v4181_v34 }
0x6a5b   :  { %v8279_v7 = vpop.eup %8278 }
0x6a5c   :  { %v4183_v55 = vsel %vm867_vm10, %v8279_v7, 0.0 }
0x6a5d   :  { %4184 = vadd.xlane.f32.xlu1 %v4183_v55 }
0x6a6e   :  { %4197 = vrot.lane.b32.xlu1 %v9827_v30, %s8567_s21 }
0x6aea   :  { %v9930_v35 = vpop.xlane.xlu1 %4184 }
0x6aeb   :  { %11174 = vst [vmem:[#allocation43_spill] sm:$0xff] %v9930_v35  ;;  %8280 = vrcp.f32 %v9930_v35 }
0x6aee   :  { %v4198_v16 = vpop.permute.xlu1 %4197 }
0x6af5   :  { %v8281_v47 = vpop.eup %8280 }
0x6af6   :  { %v9933_v6 = vmul.f32 %v8281_v47, %v8279_v7 }
0x6af8   :  { %11175 = vst [vmem:[#allocation44_spill] sm:$0xff] %v9933_v6  ;;  %4217 = vrot.lane.b32.xlu1 %v9933_v6, %s8547_s17  ;;  %4203 = vrot.lane.b32.xlu0 %v9933_v6, %s8546_s16  ;;  %vm4200_vm4 = vcmp.le.f32.partialorder %v9933_v6, %v4198_v16 }
0x6af9   :  { %v4201_v39 = vsel %vm4200_vm4, 1, %v11151_v22 }
0x6afc   :  { %4290 = vrot.lane.b32.xlu1 %v4129_v51, %s8539_s10  ;;  %4210 = vrot.lane.b32.xlu0 %v9933_v6, %s8545_s15 }
0x6b6a   :  { %v4204_v33 = vpop.permute.xlu0 %4203  ;;  %v4218_v38 = vpop.permute.xlu1 %4217 }
0x6b6b   :  { %v4206_v19 = vadd.f32 %v4204_v33, %v9933_v6 }
0x6b6d   :  { %vm4207_vm5 = vcmp.le.f32.partialorder %v4206_v19, %v4198_v16 }
0x6b6e   :  { %v4208_v4 = vsel %vm4207_vm5, 1, %v11151_v22  ;;  %v4211_v54 = vpop.permute.xlu0 %4210 }
0x6b6f   :  { %v4213_v58 = vadd.f32 %v4211_v54, %v4206_v19  ;;  %v4209_v49 = vadd.s32 %v4208_v4, %v4201_v39 }
0x6b71   :  { %vm4214_vm9 = vcmp.le.f32.partialorder %v4213_v58, %v4198_v16  ;;  %v4220_v51 = vadd.f32 %v4218_v38, %v4213_v58 }
0x6b72   :  { %v4215_v10 = vsel %vm4214_vm9, 1, %v11151_v22 }
0x6b73   :  { %v4216_v20 = vadd.s32 %v4215_v10, %v4209_v49  ;;  %vm4221_vm15 = vcmp.le.f32.partialorder %v4220_v51, %v4198_v16  ;;  %v4291_v16 = vpop.permute.xlu1 %4290 }
0x6b74   :  { %v4222_v52 = vsel %vm4221_vm15, 1, %v11151_v22 }
0x6b75   :  { %v9948_v25 = vadd.s32 %v4222_v52, %v4216_v20 }
0x6b77   :  { %v4238_v34 = vadd.s32 1, %v9948_v25  ;;  %4237 = vst.msk [vmem:[%s11080_s3 + $0x3] sm:$0x1] %vm517_vm6, %v9948_v25 }
0x6b79   :  { %4240 = vperm.xlu0 %7998, %v4238_v34  }
0x6bf8   :  { %v4241_v7 = vpop.permute.xlu0 %4240 }
0x6bf9   :  { %vm4242_vm13 = vcmp.eq.s32.totalorder %v8965_v1, %v4241_v7 }
0x6bfa   :  { %v6829_v55 = vsel %vm4242_vm13, 1.0, %v11153_v27 }
0x6bfb   :  { %v4245_v47 = vpack.c.bf16 %v6829_v55, %v6829_v55 }
0x6bfd   :  { %7649 = vmatmul.mubr.msk.bf16.vlgmr.msra.gmra.mrb[96].mxu0 %vm940_vm8, %v4245_v47 }
0x6bfe   :  { %7665 = vmatpush3.bf16.msra.mxu0 %v8900_v26  ;;  %7668 = vmatprep.mubr.msk.bf16.mxu0 %vm8537_vm0, %v11153_v27 }
0x6bff   :  { %7666 = vmatprep.subr.bf16.mxu0 %v11153_v27 }
0x6c02   :  { %7667 = vmatpush3.bf16.msra.mxu0 %v8904_v31 }
0x6c03   :  { %7672 = vmatprep.subr.bf16.mxu0 %v11153_v27 }
0x6cd0   :  { %v4283_v33 = vpop.f32.mrb[96].mxu0 }
0x6cd1   :  { %v4293_v19 = vsel %vm41_vm1, %v4283_v33, %v4291_v16  ;;  %v7650_v4 = vpop.f32.mrb[97].mxu0 }
0x6cd2   :  { %v4294_v54 = vpack.c.bf16 %v4293_v19, %v4293_v19  ;;  %v4286_v58 = vpop.f32.mrb[98].mxu0 }
0x6cd3   :  { %v7651_v39 = vpop.f32.mrb[99].mxu0 }
0x6cd4   :  { %7661 = vmatmul.mubr.msk.bf16.vlgmr.msra.gmra.mrb[104].mxu1 %vm68_vm2, %v4294_v54 }
0x6cd5   :  { %7679 = vmatpush3.bf16.msra.mxu1 %v9701_v59  ;;  %7686 = vmatprep.mubr.msk.bf16.mxu1 %vm8537_vm0, %v11153_v27 }
0x6cd6   :  { %7680 = vmatprep.subr.bf16.mxu1 %v11153_v27 }
0x6cd9   :  { %7681 = vmatpush3.bf16.msra.mxu1 %v9710_v23 }
0x6cda   :  { %7682 = vmatprep.subr.bf16.mxu1 %v11153_v27 }
0x6cdd   :  { %7683 = vmatpush3.bf16.msra.mxu1 %v9748_v43 }
0x6cde   :  { %7684 = vmatprep.subr.bf16.mxu1 %v11153_v27 }
0x6ce1   :  { %7685 = vmatpush3.bf16.msra.mxu1 %v9757_v13 }
0x6ce2   :  { %7710 = vmatprep.subr.bf16.mxu1 %v11153_v27 }
0x6da7   :  { %v4332_v38 = vpop.f32.mrb[104].mxu1 }
0x6da8   :  { %v4333_v59 = vadd.f32 %v9730_v53, %v4332_v38  ;;  %v7662_v49 = vpop.f32.mrb[105].mxu1 }
0x6da9   :  { %v4335_v51 = vpop.f32.mrb[106].mxu1 }
0x6daa   :  { %8282 = vtanh.f32 %v4333_v59  ;;  %v7663_v10 = vpop.f32.mrb[107].mxu1  ;;  %v4338_v23 = vsub.f32 0.0, %v4333_v59 }
0x6dac   :  { %v4339_v52 = vmul.f32 1.442695, %v4338_v23 }
0x6dae   :  { %8284 = vpow2.f32 %v4339_v52 }
0x6db4   :  { %v8283_v20 = vpop.eup %8282 }
0x6db5   :  { %4346 = vrot.lane.b32.xlu1 %v8283_v20, %s8538_s24 }
0x6db8   :  { %v8285_v43 = vpop.eup %8284 }
0x6db9   :  { %v4341_v34 = vadd.f32 1.0, %v8285_v43 }
0x6dbb   :  { %8286 = vrcp.f32 %v4341_v34 }
0x6dc5   :  { %v8287_v7 = vpop.eup %8286 }
0x6dc6   :  { %v4344_v53 = vmul.f32 %v8287_v7, %v9912_v36 }
0x6e27   :  { %v4347_v13 = vpop.permute.xlu1 %4346 }
0x6e28   :  { %v4349_v55 = vmul.f32 %v8287_v7, %v4347_v13 }
0x6e2a   :  { %4351 = vrot.lane.b32.xlu0 %v4349_v55, %s8538_s24 }
0x6e9c   :  { %v4352_v47 = vpop.permute.xlu0 %4351 }
0x6e9d   :  { %v9981_v16 = vadd.f32 %v4352_v47, %v4344_v53 }
0x6e9f   :  { %8288 = vtanh.f32 %v9981_v16 }
0x6ea9   :  { %v8289_v33 = vpop.eup %8288 }
0x6eaa   :  { %4357 = vrot.lane.b32.xlu1 %v8289_v33, %s8538_s24 }
0x6f1c   :  { %v4358_v19 = vpop.permute.xlu1 %4357 }
0x6f1d   :  { %v4360_v4 = vmul.f32 %v8287_v7, %v4358_v19 }
0x6f1f   :  { %v4361_v54 = vpack.c.bf16 %v4360_v4, %v4360_v4 }
0x6f21   :  { %4363 = vrot.lane.b32.xlu0 %v4361_v54, %s8540_s11 }
0x6f93   :  { %v4364_v58 = vpop.permute.xlu0 %4363 }
0x6f94   :  { %7669 = vmatmul.mubr.msk.bf16.vlgmr.msra.gmra.mrb[100].mxu0 %vm41_vm1, %v4364_v58 }
0x6f95   :  { %7673 = vmatpush3.bf16.msra.mxu0 %v8952_v62  ;;  %7674 = vmatprep.mubr.msk.bf16.mxu0 %vm8537_vm0, %v11153_v27 }
0x6f96   :  { %7690 = vmatprep.subr.bf16.mxu0 %v11153_v27 }
0x7067   :  { %v4402_v36 = vpop.f32.mrb[100].mxu0 }
0x7068   :  { %v4403_v39 = vadd.f32 %v4402_v36, %v8919_v21  ;;  %v7670_v38 = vpop.f32.mrb[101].mxu0 }
0x7069   :  { %v4405_v59 = vpop.f32.mrb[102].mxu0 }
0x706a   :  { %v7671_v49 = vpop.f32.mrb[103].mxu0  ;;  %v4408_v51 = vsel %vm867_vm10, %v4403_v39, -inf }
0x706b   :  { %4409 = vmax.xlane.f32.xlu1 %v4408_v51 }
0x707c   :  { %4428 = vrot.lane.b32.xlu1 %v9827_v30, %s8568_s25  ;;  %s8577_s25 = smov 44  }
0x70f8   :  { %v4410_v10 = vpop.xlane.xlu1 %4409 }
0x70f9   :  { %v9994_v20 = vsub.f32 %v4403_v39, %v4410_v10 }
0x70fb   :  { %11176 = vst [vmem:[#allocation45_spill] sm:$0xff] %v9994_v20  ;;  %v4412_v23 = vmul.f32 1.442695, %v9994_v20 }
0x70fc   :  { %v4429_v55 = vpop.permute.xlu1 %4428 }
0x70fd   :  { %8290 = vpow2.f32 %v4412_v23 }
0x7107   :  { %v8291_v52 = vpop.eup %8290 }
0x7108   :  { %v4414_v43 = vsel %vm867_vm10, %v8291_v52, 0.0 }
0x7109   :  { %4415 = vadd.xlane.f32.xlu0 %v4414_v43 }
0x7196   :  { %v9998_v34 = vpop.xlane.xlu0 %4415 }
0x7197   :  { %11177 = vst [vmem:[#allocation46_spill] sm:$0xff] %v9998_v34  ;;  %8292 = vrcp.f32 %v9998_v34 }
0x71a1   :  { %v8293_v7 = vpop.eup %8292 }
0x71a2   :  { %v10001_v13 = vmul.f32 %v8293_v7, %v8291_v52  ;;  %v10029_v7 = vld [vmem:[%s11078_s1 + $0x8] sm:$0xff]  }
0x71a4   :  { %11178 = vst [vmem:[#allocation47_spill] sm:$0xff] %v10001_v13  ;;  %4441 = vrot.lane.b32.xlu1 %v10001_v13, %s8545_s15  ;;  %4434 = vrot.lane.b32.xlu0 %v10001_v13, %s8546_s16  ;;  %vm4431_vm12 = vcmp.le.f32.partialorder %v10001_v13, %v4429_v55 }
0x71a5   :  { %v4432_v54 = vsel %vm4431_vm12, 1, %v11151_v22 }
0x71a8   :  { %4448 = vrot.lane.b32.xlu0 %v10001_v13, %s8547_s17 }
0x71ac   :  { %4523 = vrot.lane.b32.xlu0 %v4360_v4, %s8539_s10 }
0x7216   :  { %v4435_v53 = vpop.permute.xlu0 %4434  ;;  %v4442_v33 = vpop.permute.xlu1 %4441 }
0x7217   :  { %v4437_v47 = vadd.f32 %v4435_v53, %v10001_v13 }
0x7219   :  { %vm4438_vm4 = vcmp.le.f32.partialorder %v4437_v47, %v4429_v55  ;;  %v4444_v19 = vadd.f32 %v4442_v33, %v4437_v47 }
0x721a   :  { %v4439_v58 = vsel %vm4438_vm4, 1, %v11151_v22  ;;  %v4449_v36 = vpop.permute.xlu0 %4448 }
0x721b   :  { %v4440_v39 = vadd.s32 %v4439_v58, %v4432_v54  ;;  %vm4445_vm5 = vcmp.le.f32.partialorder %v4444_v19, %v4429_v55  ;;  %v4451_v38 = vadd.f32 %v4449_v36, %v4444_v19 }
0x721c   :  { %v4446_v59 = vsel %vm4445_vm5, 1, %v11151_v22 }
0x721d   :  { %v4447_v4 = vadd.s32 %v4446_v59, %v4440_v39  ;;  %vm4452_vm9 = vcmp.le.f32.partialorder %v4451_v38, %v4429_v55  ;;  %v10044_v39 = vld [vmem:[%s11079_s2] sm:$0x1] }
0x721e   :  { %v4453_v49 = vsel %vm4452_vm9, 1, %v11151_v22  ;;  %v4524_v55 = vpop.permute.xlu0 %4523 }
0x721f   :  { %v10016_v51 = vadd.s32 %v4453_v49, %v4447_v4 }
0x7221   :  { %v4471_v10 = vadd.s32 1, %v10016_v51 }
0x7223   :  { %4473 = vperm.xlu1 %7999, %v4471_v10  }
0x72a2   :  { %v4474_v23 = vpop.permute.xlu1 %4473 }
0x72a3   :  { %vm4475_vm15 = vcmp.eq.s32.totalorder %v8965_v1, %v4474_v23 }
0x72a4   :  { %v6834_v52 = vsel %vm4475_vm15, 1.0, %v11153_v27 }
0x72a5   :  { %v4478_v43 = vpack.c.bf16 %v6834_v52, %v6834_v52 }
0x72a7   :  { %7675 = vmatmul.mubr.msk.bf16.vlgmr.msra.gmra.mrb[104].mxu0 %vm940_vm8, %v4478_v43 }
0x72a8   :  { %7691 = vmatpush3.bf16.msra.mxu0 %v8638_v3  ;;  %7694 = vmatprep.mubr.msk.bf16.mxu0 %vm8537_vm0, %v11153_v27 }
0x72a9   :  { %7692 = vmatprep.subr.bf16.mxu0 %v11153_v27 }
0x72ac   :  { %7693 = vmatpush3.bf16.msra.mxu0 %v10029_v7 }
0x72ad   :  { %7698 = vmatprep.subr.bf16.mxu0 %v11153_v27 }
0x737a   :  { %v4516_v53 = vpop.f32.mrb[104].mxu0 }
0x737b   :  { %v4526_v47 = vsel %vm41_vm1, %v4516_v53, %v4524_v55  ;;  %v7676_v33 = vpop.f32.mrb[105].mxu0 }
0x737c   :  { %v4527_v19 = vpack.c.bf16 %v4526_v47, %v4526_v47  ;;  %v4519_v54 = vpop.f32.mrb[106].mxu0 }
0x737d   :  { %v7677_v58 = vpop.f32.mrb[107].mxu0 }
0x737e   :  { %7687 = vmatmul.mubr.msk.bf16.vlgmr.msra.gmra.mrb[108].mxu1 %vm68_vm2, %v4527_v19 }
0x737f   :  { %7711 = vmatpush3.bf16.msra.mxu1 %v8758_v32  ;;  %7714 = vmatprep.mubr.msk.bf16.mxu1 %vm8537_vm0, %v11153_v27 }
0x7380   :  { %7712 = vmatprep.subr.bf16.mxu1 %v11153_v27 }
0x7383   :  { %7713 = vmatpush3.bf16.msra.mxu1 %v8771_v37 }
0x7384   :  { %7718 = vmatprep.subr.bf16.mxu1 %v11153_v27 }
0x7451   :  { %v4565_v36 = vpop.f32.mrb[108].mxu1 }
0x7452   :  { %v4566_v38 = vadd.f32 %v10044_v39, %v4565_v36  ;;  %v7688_v59 = vpop.f32.mrb[109].mxu1 }
0x7453   :  { %v4568_v4 = vpop.f32.mrb[110].mxu1 }
0x7454   :  { %8294 = vtanh.f32 %v4566_v38  ;;  %v7689_v49 = vpop.f32.mrb[111].mxu1  ;;  %v4571_v23 = vsub.f32 0.0, %v4566_v38 }
0x7456   :  { %v4572_v52 = vmul.f32 1.442695, %v4571_v23 }
0x7458   :  { %8296 = vpow2.f32 %v4572_v52  ;;  %v10078_v52 = vld [vmem:[%s11077_s0 + $0x10] sm:$0xff]  }
0x745e   :  { %v8295_v10 = vpop.eup %8294 }
0x745f   :  { %4579 = vrot.lane.b32.xlu1 %v8295_v10, %s8538_s24  ;;  %v10071_v10 = vld [vmem:[%s11077_s0 + $0x8] sm:$0xff]  }
0x7462   :  { %v8297_v43 = vpop.eup %8296 }
0x7463   :  { %v4574_v55 = vadd.f32 1.0, %v8297_v43 }
0x7465   :  { %8298 = vrcp.f32 %v4574_v55  ;;  %v10087_v55 = vld [vmem:[%s11077_s0 + $0x18] sm:$0xff]  }
0x746f   :  { %v8299_v53 = vpop.eup %8298 }
0x7470   :  { %v4577_v19 = vmul.f32 %v8299_v53, %v9981_v16  ;;  %v10062_v16 = vld [vmem:[%s11077_s0] sm:$0xff]  }
0x74d1   :  { %v4580_v47 = vpop.permute.xlu1 %4579 }
0x74d2   :  { %v4582_v33 = vmul.f32 %v8299_v53, %v4580_v47 }
0x74d4   :  { %4584 = vrot.lane.b32.xlu0 %v4582_v33, %s8538_s24 }
0x7546   :  { %v4585_v54 = vpop.permute.xlu0 %4584 }
0x7547   :  { %v4587_v58 = vadd.f32 %v4585_v54, %v4577_v19 }
0x7549   :  { %8300 = vtanh.f32 %v4587_v58 }
0x7553   :  { %v8301_v36 = vpop.eup %8300 }
0x7554   :  { %4590 = vrot.lane.b32.xlu1 %v8301_v36, %s8538_s24 }
0x75c6   :  { %v4591_v59 = vpop.permute.xlu1 %4590 }
0x75c7   :  { %v10051_v38 = vmul.f32 %v8299_v53, %v4591_v59 }
0x75c9   :  { %v4599_v4 = vpack.c.bf16 %v10051_v38, %v10051_v38  ;;  %4647 = vrot.lane.b32.xlu1 %v10051_v38, %s8539_s10 }
0x75cb   :  { %4601 = vrot.lane.b32.xlu0 %v4599_v4, %s8540_s11 }
0x763b   :  { %v4648_v23 = vpop.permute.xlu1 %4647 }
0x763c   :  { %v4650_v43 = vsel %vm41_vm1, %v8677_v9, %v4648_v23 }
0x763d   :  { %v4602_v49 = vpop.permute.xlu0 %4601  ;;  %v4651_v53 = vpack.c.bf16 %v4650_v43, %v4650_v43 }
0x763e   :  { %7695 = vmatmul.mubr.msk.bf16.vlgmr.msra.gmra.mrb[108].mxu0 %vm41_vm1, %v4602_v49 }
0x763f   :  { %7699 = vmatpush3.bf16.msra.mxu0 %v10062_v16  ;;  %7706 = vmatprep.mubr.msk.bf16.mxu0 %vm8537_vm0, %v11153_v27 }
0x7640   :  { %7700 = vmatprep.subr.bf16.mxu0 %v11153_v27 }
0x7643   :  { %7701 = vmatpush3.bf16.msra.mxu0 %v10071_v10 }
0x7644   :  { %7702 = vmatprep.subr.bf16.mxu0 %v11153_v27 }
0x7647   :  { %7703 = vmatpush3.bf16.msra.mxu0 %v10078_v52 }
0x7648   :  { %7704 = vmatprep.subr.bf16.mxu0 %v11153_v27 }
0x764b   :  { %7705 = vmatpush3.bf16.msra.mxu0 %v10087_v55 }
0x764c   :  { %7730 = vmatprep.subr.bf16.mxu0 %v11153_v27 }
0x764e   :  { %7707 = vmatmul.mubr.msk.bf16.vlgmr.msra.gmra.mrb[112].mxu0 %vm68_vm2, %v4651_v53 }
0x764f   :  { %7731 = vmatpush3.bf16.msra.mxu0 %v8758_v32  ;;  %7734 = vmatprep.mubr.msk.bf16.mxu0 %vm8537_vm0, %v11153_v27 }
0x7650   :  { %7732 = vmatprep.subr.bf16.mxu0 %v11153_v27 }
0x7653   :  { %7733 = vmatpush3.bf16.msra.mxu0 %v8771_v37 }
0x7654   :  { %7738 = vmatprep.subr.bf16.mxu0 %v11153_v27 }
0x7711   :  { %v4640_v47 = vpop.f32.mrb[108].mxu0 }
0x7712   :  { %4646 = vst.msk [vmem:[#allocation3 + $0x2] sm:$0x1] %vm135_vm3, %v4640_v47  ;;  %v7696_v33 = vpop.f32.mrb[109].mxu0 }
0x7713   :  { %v4643_v19 = vpop.f32.mrb[110].mxu0 }
0x7714   :  { %v7697_v54 = vpop.f32.mrb[111].mxu0 }
0x7721   :  { %v4689_v36 = vpop.f32.mrb[112].mxu0 }
0x7722   :  { %v4690_v59 = vadd.f32 %v10044_v39, %v4689_v36  ;;  %v7708_v4 = vpop.f32.mrb[113].mxu0 }
0x7723   :  { %v4692_v49 = vpop.f32.mrb[114].mxu0 }
0x7724   :  { %8302 = vtanh.f32 %v4690_v59  ;;  %v7709_v23 = vpop.f32.mrb[115].mxu0  ;;  %v4695_v53 = vsub.f32 0.0, %v4690_v59 }
0x7726   :  { %v4696_v44 = vmul.f32 1.442695, %v4695_v53  ;;  %v4718_v53 = vld [vmem:[#allocation3] sm:$0x7] }
0x7728   :  { %8304 = vpow2.f32 %v4696_v44 }
0x772e   :  { %v8303_v43 = vpop.eup %8302 }
0x772f   :  { %4703 = vrot.lane.b32.xlu0 %v8303_v43, %s8538_s24 }
0x7732   :  { %v8305_v6 = vpop.eup %8304 }
0x7733   :  { %v4698_v13 = vadd.f32 1.0, %v8305_v6 }
0x7735   :  { %8306 = vrcp.f32 %v4698_v13 }
0x773f   :  { %v8307_v47 = vpop.eup %8306 }
0x7740   :  { %v4701_v54 = vmul.f32 %v8307_v47, %v4587_v58 }
0x77a1   :  { %v4704_v33 = vpop.permute.xlu0 %4703 }
0x77a2   :  { %v4706_v19 = vmul.f32 %v8307_v47, %v4704_v33 }
0x77a4   :  { %4708 = vrot.lane.b32.xlu1 %v4706_v19, %s8538_s24 }
0x7816   :  { %v4709_v36 = vpop.permute.xlu1 %4708 }
0x7817   :  { %v10102_v4 = vadd.f32 %v4709_v36, %v4701_v54 }
0x7819   :  { %8308 = vtanh.f32 %v10102_v4 }
0x7823   :  { %v8309_v49 = vpop.eup %8308 }
0x7824   :  { %4714 = vrot.lane.b32.xlu0 %v8309_v49, %s8538_s24 }
0x7896   :  { %v4715_v59 = vpop.permute.xlu0 %4714 }
0x7897   :  { %v10106_v23 = vmul.f32 %v8307_v47, %v4715_v59 }
0x7899   :  { %v4719_v44 = vpack.c.bf16 %v10106_v23, %v10106_v23 }
0x789b   :  { %4721 = vrot.lane.b32.xlu1 %v4719_v44, %s8540_s11 }
0x789f   :  { %4814 = vrot.lane.b32.xlu1 %v9827_v30, %s8569_s20 }
0x790d   :  { %v4722_v6 = vpop.permute.xlu1 %4721 }
0x790e   :  { %7715 = vmatmul.mubr.msk.bf16.vlgmr.msra.gmra.mrb[112].mxu1 %vm41_vm1, %v4722_v6 }
0x790f   :  { %7719 = vmatpush3.bf16.msra.mxu1 %v10062_v16  ;;  %7726 = vmatprep.mubr.msk.bf16.mxu1 %vm8537_vm0, %v11153_v27 }
0x7910   :  { %7720 = vmatprep.subr.bf16.mxu1 %v11153_v27 }
0x7913   :  { %7721 = vmatpush3.bf16.msra.mxu1 %v10071_v10 }
0x7914   :  { %7722 = vmatprep.subr.bf16.mxu1 %v11153_v27 }
0x7917   :  { %7723 = vmatpush3.bf16.msra.mxu1 %v10078_v52 }
0x7918   :  { %7724 = vmatprep.subr.bf16.mxu1 %v11153_v27 }
0x791b   :  { %7725 = vmatpush3.bf16.msra.mxu1 %v10087_v55 }
0x791c   :  { %7750 = vmatprep.subr.bf16.mxu1 %v11153_v27 }
0x79e1   :  { %v4760_v13 = vpop.f32.mrb[112].mxu1 }
0x79e2   :  { %v4769_v58 = vrot.slane %v4760_v13, %v8793_v41  ;;  %v7716_v43 = vpop.f32.mrb[113].mxu1 }
0x79e3   :  { %v4763_v47 = vpop.f32.mrb[114].mxu1 }
0x79e4   :  { %v4770_v33 = vadd.f32 %v4769_v58, %v4718_v53  ;;  %v7717_v19 = vpop.f32.mrb[115].mxu1 }
0x79e6   :  { %8310 = vtanh.f32 %v4770_v33 }
0x79f0   :  { %v8311_v54 = vpop.eup %8310 }
0x79f1   :  { %v4772_v36 = vmul.f32 %v8311_v54, %v8803_v50 }
0x79f3   :  { %v4773_v49 = vsel %vm1472_vm7, %v4772_v36, 0.0 }
0x79f4   :  { %4774 = vadd.xlane.f32.xlu0 %v4773_v49 }
0x7a81   :  { %v4775_v59 = vpop.xlane.xlu0 %4774 }
0x7a82   :  { %v4776_v44 = vsel %vm944_vm14, %v4775_v59, -inf }
0x7a83   :  { %v4777_v6 = vrot.slane %v4776_v44, 4 }
0x7a85   :  { %v4778_v20 = vmax.f32 %v4776_v44, %v4777_v6 }
0x7a87   :  { %v4779_v34 = vrot.slane %v4778_v20, 2 }
0x7a89   :  { %v4780_v5 = vmax.f32 %v4778_v20, %v4779_v34  ;;  %v8570_v20 = vmov 80  }
0x7a8a   :  { %8000 = vset.pattern.permute.xlu1 %v8570_v20 }
0x7a8b   :  { %v4781_v13 = vrot.slane %v4780_v5, 1 }
0x7a8d   :  { %v4782_v43 = vmax.f32 %v4780_v5, %v4781_v13  ;;  %v4815_v13 = vpop.permute.xlu1 %4814 }
0x7a8f   :  { %v4783_v35 = vsub.f32 %v4775_v59, %v4782_v43 }
0x7a91   :  { %v4784_v47 = vmul.f32 1.442695, %v4783_v35 }
0x7a93   :  { %8312 = vpow2.f32 %v4784_v47 }
0x7a9d   :  { %v8313_v58 = vpop.eup %8312 }
0x7a9e   :  { %v4786_v53 = vsel %vm944_vm14, %v8313_v58, 0.0 }
0x7a9f   :  { %v4787_v33 = vrot.slane %v4786_v53, 4 }
0x7aa1   :  { %v4788_v19 = vadd.f32 %v4787_v33, %v4786_v53 }
0x7aa3   :  { %v4789_v54 = vrot.slane %v4788_v19, 2 }
0x7aa5   :  { %v4790_v36 = vadd.f32 %v4789_v54, %v4788_v19 }
0x7aa7   :  { %v4791_v49 = vrot.slane %v4790_v36, 1 }
0x7aa9   :  { %v4792_v45 = vadd.f32 %v4791_v49, %v4790_v36 }
0x7aab   :  { %8314 = vrcp.f32 %v4792_v45 }
0x7aac   :  { %8316 = vlog2.f32 %v4792_v45 }
0x7ab5   :  { %v8315_v56 = vpop.eup %8314 }
0x7ab6   :  { %v8317_v44 = vpop.eup %8316  ;;  %v10129_v6 = vmul.f32 %v8315_v56, %v8313_v58 }
0x7ab7   :  { %v4796_v5 = vmul.f32 0.6931472, %v8317_v44 }
0x7ab8   :  { %11179 = vst [vmem:[#allocation48_spill] sm:$0xff] %v10129_v6  ;;  %v4811_v34 = vrot.slane %v10129_v6, 1  ;;  %vm4808_vm12 = vcmp.le.f32.partialorder %v10129_v6, %v9827_v30 }
0x7ab9   :  { %v10132_v59 = vsub.f32 %v4783_v35, %v4796_v5  ;;  %v4809_v56 = vsel %vm4808_vm12, 1, %v11151_v22 }
0x7aba   :  { %v4813_v43 = vadd.f32 %v4811_v34, %v10129_v6 }
0x7abc   :  { %vm4817_vm13 = vcmp.le.f32.partialorder %v4813_v43, %v4815_v13 }
0x7abd   :  { %v4818_v47 = vsel %vm4817_vm13, 1, %v11151_v22 }
0x7abe   :  { %4819 = vrot.lane.b32.xlu1 %v4818_v47, %s8571_s22 }
0x7ac2   :  { %4595 = vrot.lane.b32.xlu1 %v10051_v38, %s8540_s11 }
0x7b30   :  { %v4820_v45 = vpop.permute.xlu1 %4819 }
0x7b31   :  { %v10141_v58 = vadd.s32 %v4820_v45, %v4809_v56 }
0x7b33   :  { %11180 = vst [vmem:[#allocation49_spill] sm:$0xff] %v10141_v58  ;;  %v4825_v35 = vrot.slane %v10141_v58, %v8793_v41 }
0x7b34   :  { %v4596_v53 = vpop.permute.xlu1 %4595 }
0x7b35   :  { %4598 = vst.msk [vmem:[#allocation2 + $0x2] sm:$0x1] %vm135_vm3, %v4596_v53  ;;  %vm4826_vm4 = vcmp.eq.s32.totalorder %v8790_v40, %v4825_v35 }
0x7b36   :  { %v10148_v33 = vsel %vm4826_vm4, 1.0, %v11153_v27 }
0x7b37   :  { %11181 = vst [vmem:[#allocation50_spill] sm:$0xff] %v10148_v33  ;;  %4851 = vperm.xlu1 %8000, %v10148_v33   ;;  %v8573_v33 = vmov 81  }
0x7b38   :  { %8001 = vset.pattern.permute.xlu0 %v8573_v33 }
0x7b3b   :  { %4863 = vrot.lane.b32.xlu1 %v10106_v23, %s8539_s10 }
0x7b3c   :  { %8003 = vset.pattern.permute.xlu1 %v11151_v22  ;;  %v4848_v30 = vld [vmem:[#allocation2] sm:$0x7] }
0x7bb6   :  { %v4852_v38 = vpop.permute.xlu1 %4851 }
0x7bb7   :  { %v4854_v19 = vmul.f32 %v4852_v38, %v4848_v30 }
0x7bb9   :  { %v4855_v54 = vsel %vm1472_vm7, %v4854_v19, 0.0 }
0x7bba   :  { %v4856_v36 = vrot.slane %v4855_v54, 4  ;;  %v4864_v13 = vpop.permute.xlu1 %4863 }
0x7bbc   :  { %v4857_v49 = vadd.f32 %v4856_v36, %v4855_v54 }
0x7bbe   :  { %v4858_v44 = vrot.slane %v4857_v49, 2 }
0x7bc0   :  { %v4859_v20 = vadd.f32 %v4858_v44, %v4857_v49 }
0x7bc2   :  { %v4860_v5 = vrot.slane %v4859_v20, 1 }
0x7bc4   :  { %v4861_v34 = vadd.f32 %v4860_v5, %v4859_v20 }
0x7bc6   :  { %v4866_v43 = vsel %vm41_vm1, %v4861_v34, %v4864_v13 }
0x7bc7   :  { %v4867_v47 = vpack.c.bf16 %v4866_v43, %v4866_v43 }
0x7bc9   :  { %7727 = vmatmul.mubr.msk.bf16.vlgmr.msra.gmra.mrb[116].mxu1 %vm68_vm2, %v4867_v47 }
0x7bca   :  { %7751 = vmatpush3.bf16.msra.mxu1 %v8900_v26  ;;  %7754 = vmatprep.mubr.msk.bf16.mxu1 %vm8537_vm0, %v11153_v27 }
0x7bcb   :  { %7752 = vmatprep.subr.bf16.mxu1 %v11153_v27 }
0x7bce   :  { %7753 = vmatpush3.bf16.msra.mxu1 %v8904_v31 }
0x7bcf   :  { %7758 = vmatprep.subr.bf16.mxu1 %v11153_v27 }
0x7c9c   :  { %v4905_v23 = vpop.f32.mrb[116].mxu1 }
0x7c9d   :  { %v4906_v56 = vadd.f32 %v10044_v39, %v4905_v23  ;;  %v7728_v45 = vpop.f32.mrb[117].mxu1 }
0x7c9e   :  { %v4908_v35 = vpop.f32.mrb[118].mxu1 }
0x7c9f   :  { %8318 = vtanh.f32 %v4906_v56  ;;  %v7729_v53 = vpop.f32.mrb[119].mxu1  ;;  %v4911_v38 = vsub.f32 0.0, %v4906_v56 }
0x7ca1   :  { %v4912_v19 = vmul.f32 1.442695, %v4911_v38  ;;  %v4934_v38 = vld [vmem:[#allocation3] sm:$0x7] }
0x7ca3   :  { %8320 = vpow2.f32 %v4912_v19 }
0x7ca9   :  { %v8319_v30 = vpop.eup %8318 }
0x7caa   :  { %4919 = vrot.lane.b32.xlu1 %v8319_v30, %s8538_s24 }
0x7cad   :  { %v8321_v54 = vpop.eup %8320 }
0x7cae   :  { %v4914_v36 = vadd.f32 1.0, %v8321_v54 }
0x7cb0   :  { %8322 = vrcp.f32 %v4914_v36 }
0x7cba   :  { %v8323_v49 = vpop.eup %8322 }
0x7cbb   :  { %v4917_v5 = vmul.f32 %v8323_v49, %v10102_v4  ;;  %v10190_v4 = vld [vmem:[%s11079_s2 + $0x1] sm:$0x1] }
0x7d1c   :  { %v4920_v44 = vpop.permute.xlu1 %4919 }
0x7d1d   :  { %v4922_v20 = vmul.f32 %v8323_v49, %v4920_v44 }
0x7d1f   :  { %4924 = vrot.lane.b32.xlu1 %v4922_v20, %s8538_s24 }
0x7d91   :  { %v4925_v34 = vpop.permute.xlu1 %4924 }
0x7d92   :  { %v10167_v13 = vadd.f32 %v4925_v34, %v4917_v5 }
0x7d94   :  { %8324 = vtanh.f32 %v10167_v13 }
0x7d9e   :  { %v8325_v43 = vpop.eup %8324 }
0x7d9f   :  { %4930 = vrot.lane.b32.xlu1 %v8325_v43, %s8538_s24 }
0x7e11   :  { %v4931_v47 = vpop.permute.xlu1 %4930 }
0x7e12   :  { %v10171_v23 = vmul.f32 %v8323_v49, %v4931_v47 }
0x7e14   :  { %v4935_v56 = vpack.c.bf16 %v10171_v23, %v10171_v23 }
0x7e16   :  { %4937 = vrot.lane.b32.xlu0 %v4935_v56, %s8540_s11 }
0x7e1a   :  { %5030 = vrot.lane.b32.xlu0 %v10190_v4, %s8572_s26  ;;  %s8580_s26 = smov 43  }
0x7e88   :  { %v4938_v45 = vpop.permute.xlu0 %4937 }
0x7e89   :  { %7735 = vmatmul.mubr.msk.bf16.vlgmr.msra.gmra.mrb[116].mxu0 %vm41_vm1, %v4938_v45 }
0x7e8a   :  { %7739 = vmatpush3.bf16.msra.mxu0 %v10062_v16  ;;  %7746 = vmatprep.mubr.msk.bf16.mxu0 %vm8537_vm0, %v11153_v27 }
0x7e8b   :  { %7740 = vmatprep.subr.bf16.mxu0 %v11153_v27 }
0x7e8e   :  { %7741 = vmatpush3.bf16.msra.mxu0 %v10071_v10 }
0x7e8f   :  { %7742 = vmatprep.subr.bf16.mxu0 %v11153_v27 }
0x7e92   :  { %7743 = vmatpush3.bf16.msra.mxu0 %v10078_v52 }
0x7e93   :  { %7744 = vmatprep.subr.bf16.mxu0 %v11153_v27 }
0x7e96   :  { %7745 = vmatpush3.bf16.msra.mxu0 %v10087_v55 }
0x7e97   :  { %7764 = vmatprep.subr.bf16.mxu0 %v11153_v27 }
0x7f5c   :  { %v4976_v35 = vpop.f32.mrb[116].mxu0 }
0x7f5d   :  { %v4985_v53 = vrot.slane %v4976_v35, %v8793_v41  ;;  %v7736_v30 = vpop.f32.mrb[117].mxu0 }
0x7f5e   :  { %v4979_v19 = vpop.f32.mrb[118].mxu0 }
0x7f5f   :  { %v4986_v54 = vadd.f32 %v4985_v53, %v4934_v38  ;;  %v7737_v36 = vpop.f32.mrb[119].mxu0 }
0x7f61   :  { %8326 = vtanh.f32 %v4986_v54 }
0x7f6b   :  { %v8327_v49 = vpop.eup %8326 }
0x7f6c   :  { %v4988_v44 = vmul.f32 %v8327_v49, %v8803_v50 }
0x7f6e   :  { %v4989_v20 = vsel %vm1472_vm7, %v4988_v44, 0.0 }
0x7f6f   :  { %4990 = vadd.xlane.f32.xlu1 %v4989_v20 }
0x7ffc   :  { %v4991_v5 = vpop.xlane.xlu1 %4990 }
0x7ffd   :  { %v4992_v34 = vsel %vm944_vm14, %v4991_v5, -inf }
0x7ffe   :  { %v4993_v43 = vrot.slane %v4992_v34, 4 }
0x8000   :  { %v4994_v47 = vmax.f32 %v4992_v34, %v4993_v43 }
0x8002   :  { %v4995_v56 = vrot.slane %v4994_v47, 2 }
0x8004   :  { %v4996_v45 = vmax.f32 %v4994_v47, %v4995_v56 }
0x8006   :  { %v4997_v35 = vrot.slane %v4996_v45, 1 }
0x8008   :  { %v4998_v30 = vmax.f32 %v4996_v45, %v4997_v35  ;;  %v5031_v35 = vpop.permute.xlu0 %5030 }
0x800a   :  { %v4999_v6 = vsub.f32 %v4991_v5, %v4998_v30 }
0x800c   :  { %v5000_v19 = vmul.f32 1.442695, %v4999_v6 }
0x800e   :  { %8328 = vpow2.f32 %v5000_v19 }
0x8018   :  { %v8329_v53 = vpop.eup %8328 }
0x8019   :  { %v5002_v38 = vsel %vm944_vm14, %v8329_v53, 0.0 }
0x801a   :  { %v5003_v54 = vrot.slane %v5002_v38, 4 }
0x801c   :  { %v5004_v36 = vadd.f32 %v5003_v54, %v5002_v38  ;;  %v5064_v54 = vld [vmem:[#allocation2] sm:$0x7] }
0x801e   :  { %v5005_v49 = vrot.slane %v5004_v36, 2 }
0x8020   :  { %v5006_v44 = vadd.f32 %v5005_v49, %v5004_v36 }
0x8022   :  { %v5007_v20 = vrot.slane %v5006_v44, 1 }
0x8024   :  { %v5008_v58 = vadd.f32 %v5007_v20, %v5006_v44 }
0x8026   :  { %8330 = vrcp.f32 %v5008_v58 }
0x8027   :  { %8332 = vlog2.f32 %v5008_v58 }
0x8030   :  { %v8331_v34 = vpop.eup %8330 }
0x8031   :  { %v8333_v43 = vpop.eup %8332  ;;  %v10198_v47 = vmul.f32 %v8331_v34, %v8329_v53 }
0x8032   :  { %v5012_v5 = vmul.f32 0.6931472, %v8333_v43 }
0x8033   :  { %11182 = vst [vmem:[#allocation51_spill] sm:$0xff] %v10198_v47  ;;  %v5027_v56 = vrot.slane %v10198_v47, 1  ;;  %vm5024_vm9 = vcmp.le.f32.partialorder %v10198_v47, %v10190_v4 }
0x8034   :  { %v10201_v45 = vsub.f32 %v4999_v6, %v5012_v5  ;;  %v5025_v33 = vsel %vm5024_vm9, 1, %v11151_v22 }
0x8035   :  { %v5029_v30 = vadd.f32 %v5027_v56, %v10198_v47 }
0x8036   :  { %11183 = vst [vmem:[#allocation52_spill] sm:$0xff] %v10201_v45 }
0x8037   :  { %vm5033_vm5 = vcmp.le.f32.partialorder %v5029_v30, %v5031_v35 }
0x8038   :  { %v5034_v19 = vsel %vm5033_vm5, 1, %v11151_v22 }
0x8039   :  { %5035 = vrot.lane.b32.xlu0 %v5034_v19, %s8574_s27  ;;  %s8582_s27 = smov 85  }
0x80ab   :  { %v5036_v58 = vpop.permute.xlu0 %5035 }
0x80ac   :  { %v10208_v53 = vadd.s32 %v5036_v58, %v5025_v33 }
0x80ae   :  { %11184 = vst [vmem:[#allocation53_spill] sm:$0xff] %v10208_v53  ;;  %v5041_v6 = vrot.slane %v10208_v53, %v8793_v41 }
0x80b0   :  { %vm5042_vm15 = vcmp.eq.s32.totalorder %v8790_v40, %v5041_v6 }
0x80b1   :  { %v10214_v38 = vsel %vm5042_vm15, 1.0, %v11153_v27 }
0x80b2   :  { %11185 = vst [vmem:[#allocation54_spill] sm:$0xff] %v10214_v38  ;;  %5067 = vperm.xlu0 %8001, %v10214_v38  }
0x80b6   :  { %5079 = vrot.lane.b32.xlu0 %v10171_v23, %s8539_s10 }
0x80b7   :  { %8002 = vset.pattern.permute.xlu0 %v11151_v22 }
0x8131   :  { %v5068_v36 = vpop.permute.xlu0 %5067 }
0x8132   :  { %v5070_v49 = vmul.f32 %v5068_v36, %v5064_v54 }
0x8134   :  { %v5071_v44 = vsel %vm1472_vm7, %v5070_v49, 0.0 }
0x8135   :  { %v5072_v20 = vrot.slane %v5071_v44, 4  ;;  %v5080_v30 = vpop.permute.xlu0 %5079 }
0x8137   :  { %v5073_v34 = vadd.f32 %v5072_v20, %v5071_v44 }
0x8139   :  { %v5074_v43 = vrot.slane %v5073_v34, 2 }
0x813b   :  { %v5075_v5 = vadd.f32 %v5074_v43, %v5073_v34 }
0x813d   :  { %v5076_v56 = vrot.slane %v5075_v5, 1 }
0x813f   :  { %v5077_v35 = vadd.f32 %v5076_v56, %v5075_v5 }
0x8141   :  { %v5082_v19 = vsel %vm41_vm1, %v5077_v35, %v5080_v30 }
0x8142   :  { %v5083_v58 = vpack.c.bf16 %v5082_v19, %v5082_v19 }
0x8144   :  { %7747 = vmatmul.mubr.msk.bf16.vlgmr.msra.gmra.mrb[120].mxu0 %vm68_vm2, %v5083_v58 }
0x8145   :  { %7765 = vmatpush3.bf16.msra.mxu0 %v10062_v16  ;;  %7772 = vmatprep.mubr.msk.bf16.mxu0 %vm8537_vm0, %v11153_v27 }
0x8146   :  { %7766 = vmatprep.subr.bf16.mxu0 %v11153_v27 }
0x8149   :  { %7767 = vmatpush3.bf16.msra.mxu0 %v10071_v10 }
0x814a   :  { %7768 = vmatprep.subr.bf16.mxu0 %v11153_v27 }
0x814d   :  { %7769 = vmatpush3.bf16.msra.mxu0 %v10078_v52 }
0x814e   :  { %7770 = vmatprep.subr.bf16.mxu0 %v11153_v27 }
0x8151   :  { %7771 = vmatpush3.bf16.msra.mxu0 %v10087_v55 }
0x8152   :  { %7790 = vmatprep.subr.bf16.mxu0 %v11153_v27 }
0x8217   :  { %v5121_v23 = vpop.f32.mrb[120].mxu0 }
0x8218   :  { %v5122_v33 = vadd.f32 %v10044_v39, %v5121_v23  ;;  %v7748_v6 = vpop.f32.mrb[121].mxu0 }
0x8219   :  { %v5124_v54 = vpop.f32.mrb[122].mxu0 }
0x821a   :  { %8334 = vtanh.f32 %v5122_v33  ;;  %v7749_v36 = vpop.f32.mrb[123].mxu0  ;;  %v5127_v44 = vsub.f32 0.0, %v5122_v33 }
0x821c   :  { %v5128_v20 = vmul.f32 1.442695, %v5127_v44 }
0x821e   :  { %8336 = vpow2.f32 %v5128_v20 }
0x8224   :  { %v8335_v49 = vpop.eup %8334 }
0x8225   :  { %5135 = vrot.lane.b32.xlu1 %v8335_v49, %s8538_s24 }
0x8228   :  { %v8337_v34 = vpop.eup %8336 }
0x8229   :  { %v5130_v43 = vadd.f32 1.0, %v8337_v34 }
0x822b   :  { %8338 = vrcp.f32 %v5130_v43 }
0x8235   :  { %v8339_v5 = vpop.eup %8338 }
0x8236   :  { %v5133_v30 = vmul.f32 %v8339_v5, %v10167_v13 }
0x8297   :  { %v5136_v56 = vpop.permute.xlu1 %5135 }
0x8298   :  { %v5138_v35 = vmul.f32 %v8339_v5, %v5136_v56 }
0x829a   :  { %5140 = vrot.lane.b32.xlu0 %v5138_v35, %s8538_s24 }
0x830c   :  { %v5141_v19 = vpop.permute.xlu0 %5140 }
0x830d   :  { %v10237_v58 = vadd.f32 %v5141_v19, %v5133_v30 }
0x830f   :  { %8340 = vtanh.f32 %v10237_v58 }
0x8319   :  { %v8341_v23 = vpop.eup %8340 }
0x831a   :  { %5146 = vrot.lane.b32.xlu0 %v8341_v23, %s8538_s24 }
0x838c   :  { %v5147_v33 = vpop.permute.xlu0 %5146 }
0x838d   :  { %v5149_v6 = vmul.f32 %v8339_v5, %v5147_v33 }
0x838f   :  { %v5150_v54 = vpack.c.bf16 %v5149_v6, %v5149_v6 }
0x8391   :  { %5152 = vrot.lane.b32.xlu0 %v5150_v54, %s8540_s11 }
0x8403   :  { %v5153_v36 = vpop.permute.xlu0 %5152 }
0x8404   :  { %7755 = vmatmul.mubr.msk.bf16.vlgmr.msra.gmra.mrb[120].mxu1 %vm41_vm1, %v5153_v36 }
0x8405   :  { %7759 = vmatpush3.bf16.msra.mxu1 %v8952_v62  ;;  %7760 = vmatprep.mubr.msk.bf16.mxu1 %vm8537_vm0, %v11153_v27 }
0x8406   :  { %7776 = vmatprep.subr.bf16.mxu1 %v11153_v27 }
0x84d7   :  { %v5191_v13 = vpop.f32.mrb[120].mxu1 }
0x84d8   :  { %v5192_v49 = vadd.f32 %v5191_v13, %v8919_v21  ;;  %v7756_v44 = vpop.f32.mrb[121].mxu1 }
0x84d9   :  { %v5194_v20 = vpop.f32.mrb[122].mxu1 }
0x84da   :  { %v7757_v34 = vpop.f32.mrb[123].mxu1  ;;  %v5197_v43 = vsel %vm867_vm10, %v5192_v49, -inf }
0x84db   :  { %5198 = vmax.xlane.f32.xlu0 %v5197_v43 }
0x8568   :  { %v5199_v5 = vpop.xlane.xlu0 %5198 }
0x8569   :  { %v10249_v56 = vsub.f32 %v5192_v49, %v5199_v5 }
0x856b   :  { %11186 = vst [vmem:[#allocation55_spill] sm:$0xff] %v10249_v56  ;;  %v5201_v35 = vmul.f32 1.442695, %v10249_v56 }
0x856d   :  { %8342 = vpow2.f32 %v5201_v35 }
0x8577   :  { %v8343_v30 = vpop.eup %8342 }
0x8578   :  { %v5203_v19 = vsel %vm867_vm10, %v8343_v30, 0.0 }
0x8579   :  { %5204 = vadd.xlane.f32.xlu1 %v5203_v19 }
0x858a   :  { %5217 = vrot.lane.b32.xlu1 %v10190_v4, %s8575_s28  ;;  %s8590_s28 = smov 119  }
0x8606   :  { %v10254_v23 = vpop.xlane.xlu1 %5204 }
0x8607   :  { %8344 = vrcp.f32 %v10254_v23 }
0x860a   :  { %v5218_v36 = vpop.permute.xlu1 %5217 }
0x8611   :  { %v8345_v33 = vpop.eup %8344 }
0x8612   :  { %v10257_v54 = vmul.f32 %v8345_v33, %v8343_v30 }
0x8614   :  { %11187 = vst [vmem:[#allocation56_spill] sm:$0xff] %v10257_v54  ;;  %5237 = vrot.lane.b32.xlu1 %v10257_v54, %s8547_s17  ;;  %5223 = vrot.lane.b32.xlu0 %v10257_v54, %s8546_s16  ;;  %vm5220_vm7 = vcmp.le.f32.partialorder %v10257_v54, %v5218_v36 }
0x8615   :  { %v5221_v43 = vsel %vm5220_vm7, 1, %v11151_v22 }
0x8618   :  { %5312 = vrot.lane.b32.xlu1 %v5149_v6, %s8539_s10  ;;  %5230 = vrot.lane.b32.xlu0 %v10257_v54, %s8545_s15 }
0x8686   :  { %v5224_v13 = vpop.permute.xlu0 %5223  ;;  %v5238_v5 = vpop.permute.xlu1 %5237 }
0x8687   :  { %v5226_v49 = vadd.f32 %v5224_v13, %v10257_v54 }
0x8689   :  { %vm5227_vm13 = vcmp.le.f32.partialorder %v5226_v49, %v5218_v36 }
0x868a   :  { %v5228_v44 = vsel %vm5227_vm13, 1, %v11151_v22  ;;  %v5231_v20 = vpop.permute.xlu0 %5230 }
0x868b   :  { %v5233_v34 = vadd.f32 %v5231_v20, %v5226_v49  ;;  %v5229_v35 = vadd.s32 %v5228_v44, %v5221_v43 }
0x868d   :  { %vm5234_vm12 = vcmp.le.f32.partialorder %v5233_v34, %v5218_v36  ;;  %v5240_v6 = vadd.f32 %v5238_v5, %v5233_v34 }
0x868e   :  { %v5235_v30 = vsel %vm5234_vm12, 1, %v11151_v22 }
0x868f   :  { %v5236_v19 = vadd.s32 %v5235_v30, %v5229_v35  ;;  %vm5241_vm4 = vcmp.le.f32.partialorder %v5240_v6, %v5218_v36 }
0x8690   :  { %v5242_v33 = vsel %vm5241_vm4, 1, %v11151_v22  ;;  %vm11191_vm4 = vcmask 1043456  }
0x8691   :  { %v10272_v13 = vadd.s32 %v5242_v33, %v5236_v19 }
0x8693   :  { %v5260_v47 = vadd.s32 1, %v10272_v13 }
0x8695   :  { %5262 = vperm.xlu0 %8002, %v5260_v47   ;;  %v5313_v47 = vpop.permute.xlu1 %5312 }
0x8714   :  { %v5263_v53 = vpop.permute.xlu0 %5262 }
0x8715   :  { %vm5264_vm5 = vcmp.eq.s32.totalorder %v8965_v1, %v5263_v53 }
0x8716   :  { %v6847_v49 = vsel %vm5264_vm5, 1.0, %v11153_v27  ;;  %vm11192_vm5 = vmmov %vm11191_vm4 }
0x8717   :  { %v5267_v20 = vpack.c.bf16 %v6847_v49, %v6847_v49 }
0x8719   :  { %7761 = vmatmul.mubr.msk.bf16.vlgmr.msra.gmra.mrb[124].mxu1 %vm940_vm8, %v5267_v20 }
0x871a   :  { %7777 = vmatpush3.bf16.msra.mxu1 %v8900_v26  ;;  %7780 = vmatprep.mubr.msk.bf16.mxu1 %vm8537_vm0, %v11153_v27 }
0x871b   :  { %7778 = vmatprep.subr.bf16.mxu1 %v11153_v27 }
0x871e   :  { %7779 = vmatpush3.bf16.msra.mxu1 %v8904_v31 }
0x871f   :  { %7784 = vmatprep.subr.bf16.mxu1 %v11153_v27 }
0x87ec   :  { %v5305_v36 = vpop.f32.mrb[124].mxu1 }
0x87ed   :  { %v5315_v53 = vsel %vm41_vm1, %v5305_v36, %v5313_v47  ;;  %v7762_v44 = vpop.f32.mrb[125].mxu1 }
0x87ee   :  { %v5316_v34 = vpack.c.bf16 %v5315_v53, %v5315_v53  ;;  %v5308_v43 = vpop.f32.mrb[126].mxu1 }
0x87ef   :  { %v7763_v5 = vpop.f32.mrb[127].mxu1 }
0x87f0   :  { %7773 = vmatmul.mubr.msk.bf16.vlgmr.msra.gmra.mrb[124].mxu0 %vm68_vm2, %v5316_v34 }
0x87f1   :  { %7791 = vmatpush3.bf16.msra.mxu0 %v10062_v16  ;;  %7798 = vmatprep.mubr.msk.bf16.mxu0 %vm8537_vm0, %v11153_v27 }
0x87f2   :  { %7792 = vmatprep.subr.bf16.mxu0 %v11153_v27 }
0x87f5   :  { %7793 = vmatpush3.bf16.msra.mxu0 %v10071_v10 }
0x87f6   :  { %7794 = vmatprep.subr.bf16.mxu0 %v11153_v27 }
0x87f9   :  { %7795 = vmatpush3.bf16.msra.mxu0 %v10078_v52 }
0x87fa   :  { %7796 = vmatprep.subr.bf16.mxu0 %v11153_v27 }
0x87fd   :  { %7797 = vmatpush3.bf16.msra.mxu0 %v10087_v55 }
0x87fe   :  { %7822 = vmatprep.subr.bf16.mxu0 %v11153_v27 }
0x88c3   :  { %v5354_v35 = vpop.f32.mrb[124].mxu0 }
0x88c4   :  { %v5355_v6 = vadd.f32 %v10044_v39, %v5354_v35  ;;  %v7774_v30 = vpop.f32.mrb[125].mxu0 }
0x88c5   :  { %v5357_v19 = vpop.f32.mrb[126].mxu0 }
0x88c6   :  { %8346 = vtanh.f32 %v5355_v6  ;;  %v7775_v33 = vpop.f32.mrb[127].mxu0  ;;  %v5360_v20 = vsub.f32 0.0, %v5355_v6 }
0x88c8   :  { %v5361_v47 = vmul.f32 1.442695, %v5360_v20 }
0x88ca   :  { %8348 = vpow2.f32 %v5361_v47 }
0x88d0   :  { %v8347_v49 = vpop.eup %8346 }
0x88d1   :  { %5368 = vrot.lane.b32.xlu1 %v8347_v49, %s8538_s24 }
0x88d4   :  { %v8349_v36 = vpop.eup %8348 }
0x88d5   :  { %v5363_v53 = vadd.f32 1.0, %v8349_v36 }
0x88d7   :  { %8350 = vrcp.f32 %v5363_v53 }
0x88e1   :  { %v8351_v44 = vpop.eup %8350 }
0x88e2   :  { %v5366_v5 = vmul.f32 %v8351_v44, %v10237_v58 }
0x8943   :  { %v5369_v34 = vpop.permute.xlu1 %5368 }
0x8944   :  { %v5371_v43 = vmul.f32 %v8351_v44, %v5369_v34 }
0x8946   :  { %5373 = vrot.lane.b32.xlu0 %v5371_v43, %s8538_s24 }
0x89b8   :  { %v5374_v35 = vpop.permute.xlu0 %5373 }
0x89b9   :  { %v10300_v30 = vadd.f32 %v5374_v35, %v5366_v5 }
0x89bb   :  { %8352 = vtanh.f32 %v10300_v30 }
0x89c5   :  { %v8353_v19 = vpop.eup %8352 }
0x89c6   :  { %5379 = vrot.lane.b32.xlu1 %v8353_v19, %s8538_s24 }
0x8a38   :  { %v5380_v6 = vpop.permute.xlu1 %5379 }
0x8a39   :  { %v5382_v33 = vmul.f32 %v8351_v44, %v5380_v6 }
0x8a3b   :  { %v5383_v49 = vpack.c.bf16 %v5382_v33, %v5382_v33 }
0x8a3d   :  { %5385 = vrot.lane.b32.xlu0 %v5383_v49, %s8540_s11 }
0x8aaf   :  { %v5386_v20 = vpop.permute.xlu0 %5385 }
0x8ab0   :  { %7781 = vmatmul.mubr.msk.bf16.vlgmr.msra.gmra.mrb[128].mxu1 %vm41_vm1, %v5386_v20 }
0x8ab1   :  { %7785 = vmatpush3.bf16.msra.mxu1 %v8952_v62  ;;  %7786 = vmatprep.mubr.msk.bf16.mxu1 %vm8537_vm0, %v11153_v27 }
0x8ab2   :  { %7802 = vmatprep.subr.bf16.mxu1 %v11153_v27 }
0x8b83   :  { %v5424_v58 = vpop.f32.mrb[128].mxu1 }
0x8b84   :  { %v5425_v47 = vadd.f32 %v5424_v58, %v8919_v21  ;;  %v7782_v36 = vpop.f32.mrb[129].mxu1 }
0x8b85   :  { %v5427_v53 = vpop.f32.mrb[130].mxu1 }
0x8b86   :  { %v7783_v34 = vpop.f32.mrb[131].mxu1  ;;  %v5430_v44 = vsel %vm867_vm10, %v5425_v47, -inf }
0x8b87   :  { %5431 = vmax.xlane.f32.xlu1 %v5430_v44 }
0x8b98   :  { %5450 = vrot.lane.b32.xlu1 %v10190_v4, %s8576_s29  ;;  %s8592_s29 = smov 4  }
0x8c14   :  { %v5432_v43 = vpop.xlane.xlu1 %5431 }
0x8c15   :  { %v10313_v5 = vsub.f32 %v5425_v47, %v5432_v43 }
0x8c17   :  { %11188 = vst [vmem:[#allocation57_spill] sm:$0xff] %v10313_v5  ;;  %v5434_v35 = vmul.f32 1.442695, %v10313_v5 }
0x8c18   :  { %v5451_v47 = vpop.permute.xlu1 %5450 }
0x8c19   :  { %8354 = vpow2.f32 %v5434_v35 }
0x8c23   :  { %v8355_v19 = vpop.eup %8354 }
0x8c24   :  { %v5436_v6 = vsel %vm867_vm10, %v8355_v19, 0.0 }
0x8c25   :  { %5437 = vadd.xlane.f32.xlu0 %v5436_v6 }
0x8cb2   :  { %v10317_v49 = vpop.xlane.xlu0 %5437 }
0x8cb3   :  { %11189 = vst [vmem:[#allocation58_spill] sm:$0xff] %v10317_v49  ;;  %8356 = vrcp.f32 %v10317_v49 }
0x8cbd   :  { %v8357_v20 = vpop.eup %8356 }
0x8cbe   :  { %v10320_v58 = vmul.f32 %v8357_v20, %v8355_v19 }
0x8cc0   :  { %11190 = vst [vmem:[#allocation59_spill] sm:$0xff] %v10320_v58  ;;  %5463 = vrot.lane.b32.xlu1 %v10320_v58, %s8545_s15  ;;  %5456 = vrot.lane.b32.xlu0 %v10320_v58, %s8546_s16  ;;  %vm5453_vm9 = vcmp.le.f32.partialorder %v10320_v58, %v5451_v47 }
0x8cc1   :  { %v5454_v43 = vsel %vm5453_vm9, 1, %v11151_v22 }
0x8cc4   :  { %5470 = vrot.lane.b32.xlu0 %v10320_v58, %s8547_s17 }
0x8cc8   :  { %5545 = vrot.lane.b32.xlu0 %v5382_v33, %s8539_s10 }
0x8d32   :  { %v5457_v36 = vpop.permute.xlu0 %5456  ;;  %v5464_v34 = vpop.permute.xlu1 %5463 }
0x8d33   :  { %v5459_v53 = vadd.f32 %v5457_v36, %v10320_v58 }
0x8d35   :  { %vm5460_vm15 = vcmp.le.f32.partialorder %v5459_v53, %v5451_v47  ;;  %v5466_v44 = vadd.f32 %v5464_v34, %v5459_v53 }
0x8d36   :  { %v5461_v35 = vsel %vm5460_vm15, 1, %v11151_v22  ;;  %v5471_v19 = vpop.permute.xlu0 %5470 }
0x8d37   :  { %v5462_v6 = vadd.s32 %v5461_v35, %v5454_v43  ;;  %vm5467_vm7 = vcmp.le.f32.partialorder %v5466_v44, %v5451_v47  ;;  %v5473_v20 = vadd.f32 %v5471_v19, %v5466_v44 }
0x8d38   :  { %v5468_v54 = vsel %vm5467_vm7, 1, %v11151_v22 }
0x8d39   :  { %v5469_v33 = vadd.s32 %v5468_v54, %v5462_v6  ;;  %vm5474_vm13 = vcmp.le.f32.partialorder %v5473_v20, %v5451_v47 }
0x8d3a   :  { %v5475_v5 = vsel %vm5474_vm13, 1, %v11151_v22  ;;  %v5546_v54 = vpop.permute.xlu0 %5545 }
0x8d3b   :  { %v10335_v49 = vadd.s32 %v5475_v5, %v5469_v33 }
0x8d3d   :  { %v5493_v36 = vadd.s32 1, %v10335_v49 }
0x8d3f   :  { %5495 = vperm.xlu1 %8003, %v5493_v36  }
0x8dbe   :  { %v5496_v53 = vpop.permute.xlu1 %5495 }
0x8dbf   :  { %vm5497_vm12 = vcmp.eq.s32.totalorder %v8965_v1, %v5496_v53 }
0x8dc0   :  { %v6852_v34 = vsel %vm5497_vm12, 1.0, %v11153_v27 }
0x8dc1   :  { %v5500_v58 = vpack.c.bf16 %v6852_v34, %v6852_v34 }
0x8dc3   :  { %7787 = vmatmul.mubr.msk.bf16.vlgmr.msra.gmra.mrb[132].mxu1 %vm940_vm8, %v5500_v58 }
0x8dc4   :  { %7803 = vmatpush3.bf16.msra.mxu1 %v8638_v3  ;;  %7806 = vmatprep.mubr.msk.bf16.mxu1 %vm8537_vm0, %v11153_v27 }
0x8dc5   :  { %7804 = vmatprep.subr.bf16.mxu1 %v11153_v27 }
0x8dc8   :  { %7805 = vmatpush3.bf16.msra.mxu1 %v10029_v7 }
0x8dc9   :  { %7810 = vmatprep.subr.bf16.mxu1 %v11153_v27 }
0x8e96   :  { %v5538_v5 = vpop.f32.mrb[132].mxu1 }
0x8e97   :  { %v5548_v47 = vsel %vm41_vm1, %v5538_v5, %v5546_v54  ;;  %v7788_v44 = vpop.f32.mrb[133].mxu1 }
0x8e98   :  { %v5549_v43 = vpack.c.bf16 %v5548_v47, %v5548_v47  ;;  %v5541_v35 = vpop.f32.mrb[134].mxu1 }
0x8e99   :  { %v7789_v19 = vpop.f32.mrb[135].mxu1 }
0x8e9a   :  { %7799 = vmatmul.mubr.msk.bf16.vlgmr.msra.gmra.mrb[128].mxu0 %vm68_vm2, %v5549_v43 }
0x8e9b   :  { %7823 = vmatpush3.bf16.msra.mxu0 %v8758_v32  ;;  %7826 = vmatprep.mubr.msk.bf16.mxu0 %vm8537_vm0, %v11153_v27 }
0x8e9c   :  { %7824 = vmatprep.subr.bf16.mxu0 %v11153_v27 }
0x8e9f   :  { %7825 = vmatpush3.bf16.msra.mxu0 %v8771_v37 }
0x8ea0   :  { %7830 = vmatprep.subr.bf16.mxu0 %v11153_v27 }
0x8f6d   :  { %v5587_v7 = vpop.f32.mrb[128].mxu0 }
0x8f6e   :  { %v5588_v58 = vadd.f32 %v10044_v39, %v5587_v7  ;;  %v7800_v6 = vpop.f32.mrb[129].mxu0 }
0x8f6f   :  { %v5590_v20 = vpop.f32.mrb[130].mxu0 }
0x8f70   :  { %8358 = vtanh.f32 %v5588_v58  ;;  %v7801_v33 = vpop.f32.mrb[131].mxu0  ;;  %v5593_v53 = vsub.f32 0.0, %v5588_v58 }
0x8f72   :  { %v5594_v34 = vmul.f32 1.442695, %v5593_v53 }
0x8f74   :  { %8360 = vpow2.f32 %v5594_v34 }
0x8f7a   :  { %v8359_v36 = vpop.eup %8358 }
0x8f7b   :  { %5601 = vrot.lane.b32.xlu1 %v8359_v36, %s8538_s24 }
0x8f7e   :  { %v8361_v54 = vpop.eup %8360 }
0x8f7f   :  { %v5596_v5 = vadd.f32 1.0, %v8361_v54 }
0x8f81   :  { %8362 = vrcp.f32 %v5596_v5 }
0x8f8b   :  { %v8363_v47 = vpop.eup %8362 }
0x8f8c   :  { %v5599_v39 = vmul.f32 %v8363_v47, %v10300_v30 }
0x8fed   :  { %v5602_v44 = vpop.permute.xlu1 %5601 }
0x8fee   :  { %v5604_v43 = vmul.f32 %v8363_v47, %v5602_v44 }
0x8ff0   :  { %5606 = vrot.lane.b32.xlu0 %v5604_v43, %s8538_s24 }
0x9062   :  { %v5607_v35 = vpop.permute.xlu0 %5606 }
0x9063   :  { %v5609_v19 = vadd.f32 %v5607_v35, %v5599_v39 }
0x9065   :  { %8364 = vtanh.f32 %v5609_v19 }
0x906f   :  { %v8365_v7 = vpop.eup %8364 }
0x9070   :  { %5612 = vrot.lane.b32.xlu1 %v8365_v7, %s8538_s24 }
0x90e2   :  { %v5613_v6 = vpop.permute.xlu1 %5612 }
0x90e3   :  { %v10360_v58 = vmul.f32 %v8363_v47, %v5613_v6 }
0x90e5   :  { %v5621_v20 = vpack.c.bf16 %v10360_v58, %v10360_v58  ;;  %5669 = vrot.lane.b32.xlu1 %v10360_v58, %s8539_s10 }
0x90e7   :  { %5623 = vrot.lane.b32.xlu0 %v5621_v20, %s8540_s11 }
0x9157   :  { %v5670_v30 = vpop.permute.xlu1 %5669 }
0x9158   :  { %v5672_v36 = vsel %vm41_vm1, %v8677_v9, %v5670_v30 }
0x9159   :  { %v5624_v33 = vpop.permute.xlu0 %5623 }
0x915a   :  { %7807 = vmatmul.mubr.msk.bf16.vlgmr.msra.gmra.mrb[136].mxu1 %vm41_vm1, %v5624_v33 }
0x915b   :  { %7811 = vmatpush3.bf16.msra.mxu1 %v10062_v16  ;;  %7818 = vmatprep.mubr.msk.bf16.mxu1 %vm8537_vm0, %v11153_v27  ;;  %v5673_v16 = vpack.c.bf16 %v5672_v36, %v5672_v36 }
0x915c   :  { %7812 = vmatprep.subr.bf16.mxu1 %v11153_v27 }
0x915f   :  { %7813 = vmatpush3.bf16.msra.mxu1 %v10071_v10 }
0x9160   :  { %7814 = vmatprep.subr.bf16.mxu1 %v11153_v27 }
0x9163   :  { %7815 = vmatpush3.bf16.msra.mxu1 %v10078_v52 }
0x9164   :  { %7816 = vmatprep.subr.bf16.mxu1 %v11153_v27 }
0x9167   :  { %7817 = vmatpush3.bf16.msra.mxu1 %v10087_v55 }
0x9168   :  { %7842 = vmatprep.subr.bf16.mxu1 %v11153_v27 }
0x916a   :  { %7819 = vmatmul.mubr.msk.bf16.vlgmr.msra.gmra.mrb[140].mxu1 %vm68_vm2, %v5673_v16 }
0x916b   :  { %7843 = vmatpush3.bf16.msra.mxu1 %v8758_v32  ;;  %7846 = vmatprep.mubr.msk.bf16.mxu1 %vm8537_vm0, %v11153_v27  ;;  %v10391_v32 = vld [vmem:[%s11079_s2] sm:$0x1] }
0x916c   :  { %7844 = vmatprep.subr.bf16.mxu1 %v11153_v27 }
0x916f   :  { %7845 = vmatpush3.bf16.msra.mxu1 %v8771_v37 }
0x9170   :  { %7850 = vmatprep.subr.bf16.mxu1 %v11153_v27 }
0x922d   :  { %v5662_v10 = vpop.f32.mrb[136].mxu1 }
0x922e   :  { %5668 = vst.msk [vmem:[#allocation3 + $0x3] sm:$0x1] %vm135_vm3, %v5662_v10  ;;  %v7808_v9 = vpop.f32.mrb[137].mxu1 }
0x922f   :  { %v5665_v52 = vpop.f32.mrb[138].mxu1 }
0x9230   :  { %v7809_v55 = vpop.f32.mrb[139].mxu1 }
0x923d   :  { %v5711_v53 = vpop.f32.mrb[140].mxu1 }
0x923e   :  { %v5712_v34 = vadd.f32 %v10391_v32, %v5711_v53  ;;  %v7820_v54 = vpop.f32.mrb[141].mxu1  ;;  %v10418_v53 = vld [vmem:[%s11077_s0 + $0x8] sm:$0xff]  }
0x923f   :  { %v5714_v5 = vpop.f32.mrb[142].mxu1  ;;  %v10432_v54 = vld [vmem:[%s11077_s0 + $0x18] sm:$0xff]  }
0x9240   :  { %8366 = vtanh.f32 %v5712_v34  ;;  %v7821_v37 = vpop.f32.mrb[143].mxu1  ;;  %v5717_v44 = vsub.f32 0.0, %v5712_v34  ;;  %v10425_v34 = vld [vmem:[%s11077_s0 + $0x10] sm:$0xff]  }
0x9242   :  { %v5718_v43 = vmul.f32 1.442695, %v5717_v44  ;;  %v5740_v44 = vld [vmem:[#allocation3] sm:$0xf] }
0x9244   :  { %8368 = vpow2.f32 %v5718_v43 }
0x924a   :  { %v8367_v47 = vpop.eup %8366 }
0x924b   :  { %5725 = vrot.lane.b32.xlu0 %v8367_v47, %s8538_s24 }
0x924e   :  { %v8369_v39 = vpop.eup %8368 }
0x924f   :  { %v5720_v35 = vadd.f32 1.0, %v8369_v39 }
0x9251   :  { %8370 = vrcp.f32 %v5720_v35 }
0x925b   :  { %v8371_v7 = vpop.eup %8370 }
0x925c   :  { %v5723_v33 = vmul.f32 %v8371_v7, %v5609_v19  ;;  %v10409_v19 = vld [vmem:[%s11077_s0] sm:$0xff]   ;;  %s8579_s0 = smov 84  }
0x92bd   :  { %v5726_v6 = vpop.permute.xlu0 %5725 }
0x92be   :  { %v5728_v20 = vmul.f32 %v8371_v7, %v5726_v6 }
0x92c0   :  { %5730 = vrot.lane.b32.xlu1 %v5728_v20, %s8538_s24 }
0x9332   :  { %v5731_v30 = vpop.permute.xlu1 %5730 }
0x9333   :  { %v10396_v36 = vadd.f32 %v5731_v30, %v5723_v33 }
0x9335   :  { %8372 = vtanh.f32 %v10396_v36 }
0x933f   :  { %v8373_v16 = vpop.eup %8372 }
0x9340   :  { %5736 = vrot.lane.b32.xlu0 %v8373_v16, %s8538_s24 }
0x93b2   :  { %v5737_v10 = vpop.permute.xlu0 %5736 }
0x93b3   :  { %v10400_v9 = vmul.f32 %v8371_v7, %v5737_v10 }
0x93b5   :  { %v5741_v52 = vpack.c.bf16 %v10400_v9, %v10400_v9 }
0x93b7   :  { %5743 = vrot.lane.b32.xlu1 %v5741_v52, %s8540_s11 }
0x93bb   :  { %5836 = vrot.lane.b32.xlu1 %v10190_v4, %s8577_s25 }
0x9429   :  { %v5744_v55 = vpop.permute.xlu1 %5743 }
0x942a   :  { %7827 = vmatmul.mubr.msk.bf16.vlgmr.msra.gmra.mrb[132].mxu0 %vm41_vm1, %v5744_v55 }
0x942b   :  { %7831 = vmatpush3.bf16.msra.mxu0 %v10409_v19  ;;  %7838 = vmatprep.mubr.msk.bf16.mxu0 %vm8537_vm0, %v11153_v27 }
0x942c   :  { %7832 = vmatprep.subr.bf16.mxu0 %v11153_v27 }
0x942f   :  { %7833 = vmatpush3.bf16.msra.mxu0 %v10418_v53 }
0x9430   :  { %7834 = vmatprep.subr.bf16.mxu0 %v11153_v27 }
0x9433   :  { %7835 = vmatpush3.bf16.msra.mxu0 %v10425_v34 }
0x9434   :  { %7836 = vmatprep.subr.bf16.mxu0 %v11153_v27 }
0x9437   :  { %7837 = vmatpush3.bf16.msra.mxu0 %v10432_v54 }
0x9438   :  { %7862 = vmatprep.subr.bf16.mxu0 %v11153_v27 }
0x94fd   :  { %v5782_v5 = vpop.f32.mrb[132].mxu0 }
0x94fe   :  { %v5791_v37 = vrot.slane %v5782_v5, %v8793_v41  ;;  %v7828_v47 = vpop.f32.mrb[133].mxu0 }
0x94ff   :  { %v5785_v43 = vpop.f32.mrb[134].mxu0 }
0x9500   :  { %v5792_v39 = vadd.f32 %v5791_v37, %v5740_v44  ;;  %v7829_v35 = vpop.f32.mrb[135].mxu0 }
0x9502   :  { %8374 = vtanh.f32 %v5792_v39 }
0x950c   :  { %v8375_v7 = vpop.eup %8374 }
0x950d   :  { %v5794_v6 = vmul.f32 %v8375_v7, %v8803_v50 }
0x950f   :  { %v5795_v20 = vsel %vm2497_vm11, %v5794_v6, 0.0 }
0x9510   :  { %5796 = vadd.xlane.f32.xlu0 %v5795_v20 }
0x959d   :  { %v5797_v33 = vpop.xlane.xlu0 %5796 }
0x959e   :  { %v5798_v30 = vsel %vm11191_vm4, %v5797_v33, -inf }
0x959f   :  { %v5799_v16 = vrot.slane %v5798_v30, 4 }
0x95a1   :  { %v5800_v10 = vmax.f32 %v5798_v30, %v5799_v16 }
0x95a3   :  { %v5801_v52 = vrot.slane %v5800_v10, 2 }
0x95a5   :  { %v5802_v55 = vmax.f32 %v5800_v10, %v5801_v52 }
0x95a7   :  { %v5803_v5 = vrot.slane %v5802_v55, 1 }
0x95a9   :  { %v5804_v47 = vmax.f32 %v5802_v55, %v5803_v5  ;;  %v5837_v55 = vpop.permute.xlu1 %5836 }
0x95ab   :  { %v5805_v38 = vsub.f32 %v5797_v33, %v5804_v47 }
0x95ad   :  { %v5806_v43 = vmul.f32 1.442695, %v5805_v38 }
0x95af   :  { %8376 = vpow2.f32 %v5806_v43  ;;  %v8578_v43 = vmov 84  }
0x95b0   :  { %8004 = vset.pattern.permute.xlu1 %v8578_v43 }
0x95b9   :  { %v8377_v37 = vpop.eup %8376 }
0x95ba   :  { %v5808_v44 = vsel %vm11192_vm5, %v8377_v37, 0.0 }
0x95bb   :  { %v5809_v39 = vrot.slane %v5808_v44, 4 }
0x95bd   :  { %v5810_v35 = vadd.f32 %v5809_v39, %v5808_v44 }
0x95bf   :  { %v5811_v7 = vrot.slane %v5810_v35, 2 }
0x95c1   :  { %v5812_v6 = vadd.f32 %v5811_v7, %v5810_v35 }
0x95c3   :  { %v5813_v20 = vrot.slane %v5812_v6, 1 }
0x95c5   :  { %v5814_v45 = vadd.f32 %v5813_v20, %v5812_v6 }
0x95c7   :  { %8378 = vrcp.f32 %v5814_v45 }
0x95c8   :  { %8380 = vlog2.f32 %v5814_v45 }
0x95d1   :  { %v8379_v56 = vpop.eup %8378 }
0x95d2   :  { %v8381_v30 = vpop.eup %8380  ;;  %v10442_v16 = vmul.f32 %v8379_v56, %v8377_v37 }
0x95d3   :  { %v5818_v10 = vmul.f32 0.6931472, %v8381_v30 }
0x95d4   :  { %11193 = vst [vmem:[#allocation60_spill] sm:$0xff] %v10442_v16  ;;  %v5833_v33 = vrot.slane %v10442_v16, 1  ;;  %v5844_v47 = vrot.slane %v10442_v16, 2  ;;  %vm5830_vm7 = vcmp.le.f32.partialorder %v10442_v16, %v10190_v4 }
0x95d5   :  { %v10445_v52 = vsub.f32 %v5805_v38, %v5818_v10  ;;  %v5831_v37 = vsel %vm5830_vm7, 1, %v11151_v22 }
0x95d6   :  { %v5835_v5 = vadd.f32 %v5833_v33, %v10442_v16 }
0x95d8   :  { %vm5839_vm9 = vcmp.le.f32.partialorder %v5835_v5, %v5837_v55  ;;  %v5846_v44 = vadd.f32 %v5844_v47, %v5835_v5 }
0x95d9   :  { %v5840_v45 = vsel %vm5839_vm9, 1, %v11151_v22 }
0x95da   :  { %vm5847_vm15 = vcmp.le.f32.partialorder %v5846_v44, %v5837_v55  ;;  %5841 = vrot.lane.b32.xlu1 %v5840_v45, %s8579_s0 }
0x95db   :  { %v5848_v56 = vsel %vm5847_vm15, 1, %v11151_v22 }
0x95de   :  { %5849 = vrot.lane.b32.xlu1 %v5848_v56, %s8579_s0  ;;  %s8588_s0 = smov 123  }
0x95e2   :  { %5617 = vrot.lane.b32.xlu1 %v10360_v58, %s8540_s11 }
0x964c   :  { %v5842_v38 = vpop.permute.xlu1 %5841 }
0x964d   :  { %v5843_v39 = vadd.s32 %v5842_v38, %v5831_v37 }
0x9650   :  { %v5850_v35 = vpop.permute.xlu1 %5849 }
0x9651   :  { %v10456_v7 = vadd.s32 %v5850_v35, %v5843_v39 }
0x9653   :  { %v5855_v6 = vrot.slane %v10456_v7, %v8793_v41 }
0x9654   :  { %v5618_v20 = vpop.permute.xlu1 %5617 }
0x9655   :  { %5620 = vst.msk [vmem:[#allocation2 + $0x3] sm:$0x1] %vm135_vm3, %v5618_v20  ;;  %vm5856_vm13 = vcmp.eq.s32.totalorder %v8790_v40, %v5855_v6  ;;  %vm11194_vm3 = vmmov %vm11191_vm4 }
0x9656   :  { %v10463_v58 = vsel %vm5856_vm13, 1.0, %v11153_v27  ;;  %vm11195_vm12 = vmmov %vm11194_vm3 }
0x9657   :  { %5881 = vperm.xlu1 %8004, %v10463_v58  }
0x965b   :  { %5893 = vrot.lane.b32.xlu1 %v10400_v9, %s8539_s10 }
0x965c   :  { %8007 = vset.pattern.permute.xlu1 %v11151_v22  ;;  %v5878_v30 = vld [vmem:[#allocation2] sm:$0xf] }
0x96d6   :  { %v5882_v10 = vpop.permute.xlu1 %5881 }
0x96d7   :  { %v5884_v33 = vmul.f32 %v5882_v10, %v5878_v30 }
0x96d9   :  { %v5885_v55 = vsel %vm2497_vm11, %v5884_v33, 0.0 }
0x96da   :  { %v5886_v5 = vrot.slane %v5885_v55, 4  ;;  %v5894_v38 = vpop.permute.xlu1 %5893 }
0x96dc   :  { %v5887_v47 = vadd.f32 %v5886_v5, %v5885_v55 }
0x96de   :  { %v5888_v43 = vrot.slane %v5887_v47, 2 }
0x96e0   :  { %v5889_v44 = vadd.f32 %v5888_v43, %v5887_v47 }
0x96e2   :  { %v5890_v45 = vrot.slane %v5889_v44, 1 }
0x96e4   :  { %v5891_v56 = vadd.f32 %v5890_v45, %v5889_v44 }
0x96e6   :  { %v5896_v37 = vsel %vm41_vm1, %v5891_v56, %v5894_v38 }
0x96e7   :  { %v5897_v39 = vpack.c.bf16 %v5896_v37, %v5896_v37 }
0x96e9   :  { %7839 = vmatmul.mubr.msk.bf16.vlgmr.msra.gmra.mrb[136].mxu0 %vm68_vm2, %v5897_v39 }
0x96ea   :  { %7863 = vmatpush3.bf16.msra.mxu0 %v8900_v26  ;;  %7866 = vmatprep.mubr.msk.bf16.mxu0 %vm8537_vm0, %v11153_v27 }
0x96eb   :  { %7864 = vmatprep.subr.bf16.mxu0 %v11153_v27 }
0x96ee   :  { %7865 = vmatpush3.bf16.msra.mxu0 %v8904_v31 }
0x96ef   :  { %7870 = vmatprep.subr.bf16.mxu0 %v11153_v27 }
0x97bc   :  { %v5935_v9 = vpop.f32.mrb[136].mxu0 }
0x97bd   :  { %v5936_v35 = vadd.f32 %v10391_v32, %v5935_v9  ;;  %v7840_v6 = vpop.f32.mrb[137].mxu0 }
0x97be   :  { %v5938_v20 = vpop.f32.mrb[138].mxu0 }
0x97bf   :  { %8382 = vtanh.f32 %v5936_v35  ;;  %v7841_v30 = vpop.f32.mrb[139].mxu0  ;;  %v5941_v33 = vsub.f32 0.0, %v5936_v35 }
0x97c1   :  { %v5942_v55 = vmul.f32 1.442695, %v5941_v33  ;;  %v5964_v33 = vld [vmem:[#allocation3] sm:$0xf] }
0x97c3   :  { %8384 = vpow2.f32 %v5942_v55 }
0x97c9   :  { %v8383_v10 = vpop.eup %8382 }
0x97ca   :  { %5949 = vrot.lane.b32.xlu1 %v8383_v10, %s8538_s24 }
0x97cd   :  { %v8385_v5 = vpop.eup %8384 }
0x97ce   :  { %v5944_v47 = vadd.f32 1.0, %v8385_v5 }
0x97d0   :  { %8386 = vrcp.f32 %v5944_v47 }
0x97da   :  { %v8387_v43 = vpop.eup %8386 }
0x97db   :  { %v5947_v56 = vmul.f32 %v8387_v43, %v10396_v36 }
0x983c   :  { %v5950_v44 = vpop.permute.xlu1 %5949 }
0x983d   :  { %v5952_v45 = vmul.f32 %v8387_v43, %v5950_v44 }
0x983f   :  { %5954 = vrot.lane.b32.xlu1 %v5952_v45, %s8538_s24 }
0x98b1   :  { %v5955_v38 = vpop.permute.xlu1 %5954 }
0x98b2   :  { %v10482_v37 = vadd.f32 %v5955_v38, %v5947_v56 }
0x98b4   :  { %8388 = vtanh.f32 %v10482_v37 }
0x98be   :  { %v8389_v39 = vpop.eup %8388 }
0x98bf   :  { %5960 = vrot.lane.b32.xlu0 %v8389_v39, %s8538_s24 }
0x98c3   :  { %6060 = vrot.lane.b32.xlu0 %v10190_v4, %s8580_s26 }
0x9931   :  { %v5961_v9 = vpop.permute.xlu0 %5960 }
0x9932   :  { %v10486_v35 = vmul.f32 %v8387_v43, %v5961_v9 }
0x9934   :  { %v5965_v6 = vpack.c.bf16 %v10486_v35, %v10486_v35 }
0x9936   :  { %5967 = vrot.lane.b32.xlu1 %v5965_v6, %s8540_s11 }
0x99a8   :  { %v5968_v20 = vpop.permute.xlu1 %5967 }
0x99a9   :  { %7847 = vmatmul.mubr.msk.bf16.vlgmr.msra.gmra.mrb[144].mxu1 %vm41_vm1, %v5968_v20 }
0x99aa   :  { %7851 = vmatpush3.bf16.msra.mxu1 %v10409_v19  ;;  %7858 = vmatprep.mubr.msk.bf16.mxu1 %vm8537_vm0, %v11153_v27 }
0x99ab   :  { %7852 = vmatprep.subr.bf16.mxu1 %v11153_v27 }
0x99ae   :  { %7853 = vmatpush3.bf16.msra.mxu1 %v10418_v53 }
0x99af   :  { %7854 = vmatprep.subr.bf16.mxu1 %v11153_v27 }
0x99b2   :  { %7855 = vmatpush3.bf16.msra.mxu1 %v10425_v34 }
0x99b3   :  { %7856 = vmatprep.subr.bf16.mxu1 %v11153_v27 }
0x99b6   :  { %7857 = vmatpush3.bf16.msra.mxu1 %v10432_v54 }
0x99b7   :  { %7876 = vmatprep.subr.bf16.mxu1 %v11153_v27 }
0x9a7c   :  { %v6006_v36 = vpop.f32.mrb[144].mxu1 }
0x9a7d   :  { %v6015_v30 = vrot.slane %v6006_v36, %v8793_v41  ;;  %v7848_v10 = vpop.f32.mrb[145].mxu1 }
0x9a7e   :  { %v6009_v55 = vpop.f32.mrb[146].mxu1 }
0x9a7f   :  { %v6016_v5 = vadd.f32 %v6015_v30, %v5964_v33  ;;  %v7849_v47 = vpop.f32.mrb[147].mxu1 }
0x9a81   :  { %8390 = vtanh.f32 %v6016_v5 }
0x9a8b   :  { %v8391_v43 = vpop.eup %8390 }
0x9a8c   :  { %v6018_v44 = vmul.f32 %v8391_v43, %v8803_v50 }
0x9a8e   :  { %v6019_v45 = vsel %vm2497_vm11, %v6018_v44, 0.0 }
0x9a8f   :  { %6020 = vadd.xlane.f32.xlu1 %v6019_v45 }
0x9b1c   :  { %v6021_v56 = vpop.xlane.xlu1 %6020 }
0x9b1d   :  { %v6022_v38 = vsel %vm11194_vm3, %v6021_v56, -inf }
0x9b1e   :  { %v6023_v39 = vrot.slane %v6022_v38, 4 }
0x9b20   :  { %v6024_v4 = vmax.f32 %v6022_v38, %v6023_v39 }
0x9b22   :  { %v6025_v9 = vrot.slane %v6024_v4, 2 }
0x9b24   :  { %v6026_v6 = vmax.f32 %v6024_v4, %v6025_v9  ;;  %v8581_v9 = vmov 85  }
0x9b25   :  { %8005 = vset.pattern.permute.xlu0 %v8581_v9 }
0x9b26   :  { %v6027_v20 = vrot.slane %v6026_v6, 1 }
0x9b28   :  { %v6028_v36 = vmax.f32 %v6026_v6, %v6027_v20  ;;  %v6061_v20 = vpop.permute.xlu0 %6060 }
0x9b2a   :  { %v6029_v10 = vsub.f32 %v6021_v56, %v6028_v36 }
0x9b2c   :  { %v6030_v55 = vmul.f32 1.442695, %v6029_v10 }
0x9b2e   :  { %8392 = vpow2.f32 %v6030_v55 }
0x9b38   :  { %v8393_v30 = vpop.eup %8392 }
0x9b39   :  { %v6032_v33 = vsel %vm11195_vm12, %v8393_v30, 0.0 }
0x9b3a   :  { %v6033_v5 = vrot.slane %v6032_v33, 4 }
0x9b3c   :  { %v6034_v50 = vadd.f32 %v6033_v5, %v6032_v33 }
0x9b3e   :  { %v6035_v47 = vrot.slane %v6034_v50, 2 }
0x9b40   :  { %v6036_v43 = vadd.f32 %v6035_v47, %v6034_v50 }
0x9b42   :  { %v6037_v44 = vrot.slane %v6036_v43, 1 }
0x9b44   :  { %v6038_v45 = vadd.f32 %v6037_v44, %v6036_v43 }
0x9b46   :  { %8394 = vrcp.f32 %v6038_v45 }
0x9b47   :  { %8396 = vlog2.f32 %v6038_v45 }
0x9b50   :  { %v8395_v16 = vpop.eup %8394 }
0x9b51   :  { %v8397_v38 = vpop.eup %8396  ;;  %v10508_v39 = vmul.f32 %v8395_v16, %v8393_v30 }
0x9b52   :  { %v6042_v4 = vmul.f32 0.6931472, %v8397_v38 }
0x9b53   :  { %11196 = vst [vmem:[#allocation61_spill] sm:$0xff] %v10508_v39  ;;  %v6057_v56 = vrot.slane %v10508_v39, 1  ;;  %v6068_v55 = vrot.slane %v10508_v39, 2 }
0x9b54   :  { %v10511_v6 = vsub.f32 %v6029_v10, %v6042_v4  ;;  %v10520_v10 = vld [vmem:[%s11079_s2 + $0x1] sm:$0x1]  ;;  %s8583_s2 = smov 42  }
0x9b55   :  { %v6059_v36 = vadd.f32 %v6057_v56, %v10508_v39  ;;  %vm6054_vm9 = vcmp.le.f32.partialorder %v10508_v39, %v10520_v10  ;;  %v6102_v4 = vld [vmem:[#allocation2] sm:$0xf] }
0x9b56   :  { %v6055_v50 = vsel %vm6054_vm9, 1, %v11151_v22 }
0x9b57   :  { %v6070_v33 = vadd.f32 %v6068_v55, %v6059_v36  ;;  %vm6063_vm4 = vcmp.le.f32.partialorder %v6059_v36, %v6061_v20 }
0x9b58   :  { %v6064_v5 = vsel %vm6063_vm4, 1, %v11151_v22 }
0x9b59   :  { %vm6071_vm5 = vcmp.le.f32.partialorder %v6070_v33, %v6061_v20  ;;  %6065 = vrot.lane.b32.xlu0 %v6064_v5, %s8582_s27 }
0x9b5a   :  { %v6072_v16 = vsel %vm6071_vm5, 1, %v11151_v22 }
0x9b5d   :  { %6073 = vrot.lane.b32.xlu0 %v6072_v16, %s8582_s27 }
0x9bcb   :  { %v6066_v30 = vpop.permute.xlu0 %6065 }
0x9bcc   :  { %v6067_v47 = vadd.s32 %v6066_v30, %v6055_v50 }
0x9bcf   :  { %v6074_v43 = vpop.permute.xlu0 %6073 }
0x9bd0   :  { %v10525_v44 = vadd.s32 %v6074_v43, %v6067_v47 }
0x9bd2   :  { %v6079_v45 = vrot.slane %v10525_v44, %v8793_v41 }
0x9bd4   :  { %vm6080_vm15 = vcmp.eq.s32.totalorder %v8790_v40, %v6079_v45 }
0x9bd5   :  { %v10531_v38 = vsel %vm6080_vm15, 1.0, %v11153_v27 }
0x9bd6   :  { %6105 = vperm.xlu0 %8005, %v10531_v38  }
0x9bda   :  { %6117 = vrot.lane.b32.xlu0 %v10486_v35, %s8539_s10 }
0x9bdb   :  { %8006 = vset.pattern.permute.xlu0 %v11151_v22 }
0x9c55   :  { %v6106_v56 = vpop.permute.xlu0 %6105 }
0x9c56   :  { %v6108_v9 = vmul.f32 %v6106_v56, %v6102_v4 }
0x9c58   :  { %v6109_v20 = vsel %vm2497_vm11, %v6108_v9, 0.0 }
0x9c59   :  { %v6110_v36 = vrot.slane %v6109_v20, 4  ;;  %v6118_v16 = vpop.permute.xlu0 %6117 }
0x9c5b   :  { %v6111_v55 = vadd.f32 %v6110_v36, %v6109_v20 }
0x9c5d   :  { %v6112_v41 = vrot.slane %v6111_v55, 2 }
0x9c5f   :  { %v6113_v33 = vadd.f32 %v6112_v41, %v6111_v55 }
0x9c61   :  { %v6114_v40 = vrot.slane %v6113_v33, 1 }
0x9c63   :  { %v6115_v5 = vadd.f32 %v6114_v40, %v6113_v33 }
0x9c65   :  { %v6120_v30 = vsel %vm41_vm1, %v6115_v5, %v6118_v16 }
0x9c66   :  { %v6121_v50 = vpack.c.bf16 %v6120_v30, %v6120_v30 }
0x9c68   :  { %7859 = vmatmul.mubr.msk.bf16.vlgmr.msra.gmra.mrb[148].mxu1 %vm68_vm2, %v6121_v50 }
0x9c69   :  { %7877 = vmatpush3.bf16.msra.mxu1 %v10409_v19  ;;  %7884 = vmatprep.mubr.msk.bf16.mxu1 %vm8537_vm0, %v11153_v27 }
0x9c6a   :  { %7878 = vmatprep.subr.bf16.mxu1 %v11153_v27 }
0x9c6d   :  { %7879 = vmatpush3.bf16.msra.mxu1 %v10418_v53 }
0x9c6e   :  { %7880 = vmatprep.subr.bf16.mxu1 %v11153_v27 }
0x9c71   :  { %7881 = vmatpush3.bf16.msra.mxu1 %v10425_v34 }
0x9c72   :  { %7882 = vmatprep.subr.bf16.mxu1 %v11153_v27 }
0x9c75   :  { %7883 = vmatpush3.bf16.msra.mxu1 %v10432_v54 }
0x9c76   :  { %7902 = vmatprep.subr.bf16.mxu1 %v11153_v27 }
0x9d3b   :  { %v6159_v35 = vpop.f32.mrb[148].mxu1 }
0x9d3c   :  { %v6160_v47 = vadd.f32 %v10391_v32, %v6159_v35  ;;  %v7860_v43 = vpop.f32.mrb[149].mxu1 }
0x9d3d   :  { %v6162_v45 = vpop.f32.mrb[150].mxu1 }
0x9d3e   :  { %8398 = vtanh.f32 %v6160_v47  ;;  %v7861_v4 = vpop.f32.mrb[151].mxu1  ;;  %v6165_v9 = vsub.f32 0.0, %v6160_v47 }
0x9d40   :  { %v6166_v20 = vmul.f32 1.442695, %v6165_v9 }
0x9d42   :  { %8400 = vpow2.f32 %v6166_v20 }
0x9d48   :  { %v8399_v56 = vpop.eup %8398 }
0x9d49   :  { %6173 = vrot.lane.b32.xlu1 %v8399_v56, %s8538_s24 }
0x9d4c   :  { %v8401_v36 = vpop.eup %8400 }
0x9d4d   :  { %v6168_v55 = vadd.f32 1.0, %v8401_v36 }
0x9d4f   :  { %8402 = vrcp.f32 %v6168_v55 }
0x9d59   :  { %v8403_v41 = vpop.eup %8402 }
0x9d5a   :  { %v6171_v5 = vmul.f32 %v8403_v41, %v10482_v37 }
0x9dbb   :  { %v6174_v33 = vpop.permute.xlu1 %6173 }
0x9dbc   :  { %v6176_v40 = vmul.f32 %v8403_v41, %v6174_v33 }
0x9dbe   :  { %6178 = vrot.lane.b32.xlu0 %v6176_v40, %s8538_s24 }
0x9e30   :  { %v6179_v16 = vpop.permute.xlu0 %6178 }
0x9e31   :  { %v10554_v30 = vadd.f32 %v6179_v16, %v6171_v5 }
0x9e33   :  { %8404 = vtanh.f32 %v10554_v30 }
0x9e3d   :  { %v8405_v50 = vpop.eup %8404 }
0x9e3e   :  { %6184 = vrot.lane.b32.xlu0 %v8405_v50, %s8538_s24 }
0x9eb0   :  { %v6185_v35 = vpop.permute.xlu0 %6184 }
0x9eb1   :  { %v6187_v47 = vmul.f32 %v8403_v41, %v6185_v35 }
0x9eb3   :  { %v6188_v43 = vpack.c.bf16 %v6187_v47, %v6187_v47 }
0x9eb5   :  { %6190 = vrot.lane.b32.xlu0 %v6188_v43, %s8540_s11 }
0x9f27   :  { %v6191_v45 = vpop.permute.xlu0 %6190 }
0x9f28   :  { %7867 = vmatmul.mubr.msk.bf16.vlgmr.msra.gmra.mrb[140].mxu0 %vm41_vm1, %v6191_v45 }
0x9f29   :  { %7871 = vmatpush3.bf16.msra.mxu0 %v8952_v62  ;;  %7872 = vmatprep.mubr.msk.bf16.mxu0 %vm8537_vm0, %v11153_v27 }
0x9f2a   :  { %7888 = vmatprep.subr.bf16.mxu0 %v11153_v27 }
0x9ffb   :  { %v6229_v37 = vpop.f32.mrb[140].mxu0 }
0x9ffc   :  { %v6230_v4 = vadd.f32 %v6229_v37, %v8919_v21  ;;  %v7868_v56 = vpop.f32.mrb[141].mxu0 }
0x9ffd   :  { %v6232_v9 = vpop.f32.mrb[142].mxu0 }
0x9ffe   :  { %v7869_v20 = vpop.f32.mrb[143].mxu0  ;;  %v6235_v36 = vsel %vm867_vm10, %v6230_v4, -inf }
0x9fff   :  { %6236 = vmax.xlane.f32.xlu0 %v6235_v36 }
0xa08c   :  { %v6237_v55 = vpop.xlane.xlu0 %6236 }
0xa08d   :  { %v10566_v41 = vsub.f32 %v6230_v4, %v6237_v55 }
0xa08f   :  { %v6239_v33 = vmul.f32 1.442695, %v10566_v41 }
0xa091   :  { %8406 = vpow2.f32 %v6239_v33 }
0xa09b   :  { %v8407_v40 = vpop.eup %8406 }
0xa09c   :  { %v6241_v5 = vsel %vm867_vm10, %v8407_v40, 0.0 }
0xa09d   :  { %6242 = vadd.xlane.f32.xlu1 %v6241_v5 }
0xa0ae   :  { %6255 = vrot.lane.b32.xlu1 %v10520_v10, %s8583_s2 }
0xa12a   :  { %v10571_v16 = vpop.xlane.xlu1 %6242 }
0xa12b   :  { %8408 = vrcp.f32 %v10571_v16 }
0xa12e   :  { %v6256_v43 = vpop.permute.xlu1 %6255 }
0xa135   :  { %v8409_v50 = vpop.eup %8408 }
0xa136   :  { %v10574_v35 = vmul.f32 %v8409_v50, %v8407_v40 }
0xa138   :  { %6275 = vrot.lane.b32.xlu1 %v10574_v35, %s8547_s17  ;;  %6261 = vrot.lane.b32.xlu0 %v10574_v35, %s8546_s16  ;;  %vm6258_vm11 = vcmp.le.f32.partialorder %v10574_v35, %v6256_v43 }
0xa139   :  { %v6259_v20 = vsel %vm6258_vm11, 1, %v11151_v22  ;;  %vm722_vm11 = vcmask 8200  }
0xa13c   :  { %6350 = vrot.lane.b32.xlu1 %v6187_v47, %s8539_s10  ;;  %6268 = vrot.lane.b32.xlu0 %v10574_v35, %s8545_s15 }
0xa1aa   :  { %v6262_v45 = vpop.permute.xlu0 %6261  ;;  %v6276_v36 = vpop.permute.xlu1 %6275 }
0xa1ab   :  { %v6264_v37 = vadd.f32 %v6262_v45, %v10574_v35 }
0xa1ad   :  { %vm6265_vm7 = vcmp.le.f32.partialorder %v6264_v37, %v6256_v43 }
0xa1ae   :  { %v6266_v4 = vsel %vm6265_vm7, 1, %v11151_v22  ;;  %v6269_v56 = vpop.permute.xlu0 %6268 }
0xa1af   :  { %v6271_v9 = vadd.f32 %v6269_v56, %v6264_v37  ;;  %v6267_v55 = vadd.s32 %v6266_v4, %v6259_v20 }
0xa1b1   :  { %vm6272_vm13 = vcmp.le.f32.partialorder %v6271_v9, %v6256_v43  ;;  %v6278_v47 = vadd.f32 %v6276_v36, %v6271_v9 }
0xa1b2   :  { %v6273_v33 = vsel %vm6272_vm13, 1, %v11151_v22 }
0xa1b3   :  { %v6274_v40 = vadd.s32 %v6273_v33, %v6267_v55  ;;  %vm6279_vm3 = vcmp.le.f32.partialorder %v6278_v47, %v6256_v43  ;;  %v6351_v43 = vpop.permute.xlu1 %6350 }
0xa1b4   :  { %v6280_v5 = vsel %vm6279_vm3, 1, %v11151_v22  ;;  %vm1747_vm3 = vcmask 567848  }
0xa1b5   :  { %v10589_v50 = vadd.s32 %v6280_v5, %v6274_v40 }
0xa1b7   :  { %v6298_v45 = vadd.s32 1, %v10589_v50 }
0xa1b9   :  { %6300 = vperm.xlu0 %8006, %v6298_v45  }
0xa238   :  { %v6301_v39 = vpop.permute.xlu0 %6300 }
0xa239   :  { %vm6302_vm12 = vcmp.eq.s32.totalorder %v8965_v1, %v6301_v39 }
0xa23a   :  { %v6865_v37 = vsel %vm6302_vm12, 1.0, %v11153_v27 }
0xa23b   :  { %v6305_v56 = vpack.c.bf16 %v6865_v37, %v6865_v37 }
0xa23d   :  { %7873 = vmatmul.mubr.msk.bf16.vlgmr.msra.gmra.mrb[144].mxu0 %vm940_vm8, %v6305_v56 }
0xa23e   :  { %7889 = vmatpush3.bf16.msra.mxu0 %v8900_v26  ;;  %7892 = vmatprep.mubr.msk.bf16.mxu0 %vm8537_vm0, %v11153_v27 }
0xa23f   :  { %7890 = vmatprep.subr.bf16.mxu0 %v11153_v27 }
0xa242   :  { %7891 = vmatpush3.bf16.msra.mxu0 %v8904_v31 }
0xa243   :  { %7896 = vmatprep.subr.bf16.mxu0 %v11153_v27 }
0xa310   :  { %v6343_v4 = vpop.f32.mrb[144].mxu0 }
0xa311   :  { %v6353_v39 = vsel %vm41_vm1, %v6343_v4, %v6351_v43  ;;  %v7874_v9 = vpop.f32.mrb[145].mxu0 }
0xa312   :  { %v6354_v20 = vpack.c.bf16 %v6353_v39, %v6353_v39  ;;  %v6346_v36 = vpop.f32.mrb[146].mxu0 }
0xa313   :  { %v7875_v55 = vpop.f32.mrb[147].mxu0 }
0xa314   :  { %7885 = vmatmul.mubr.msk.bf16.vlgmr.msra.gmra.mrb[152].mxu1 %vm68_vm2, %v6354_v20 }
0xa315   :  { %7903 = vmatpush3.bf16.msra.mxu1 %v10409_v19  ;;  %7910 = vmatprep.mubr.msk.bf16.mxu1 %vm8537_vm0, %v11153_v27 }
0xa316   :  { %7904 = vmatprep.subr.bf16.mxu1 %v11153_v27 }
0xa319   :  { %7905 = vmatpush3.bf16.msra.mxu1 %v10418_v53 }
0xa31a   :  { %7906 = vmatprep.subr.bf16.mxu1 %v11153_v27 }
0xa31d   :  { %7907 = vmatpush3.bf16.msra.mxu1 %v10425_v34 }
0xa31e   :  { %7908 = vmatprep.subr.bf16.mxu1 %v11153_v27 }
0xa321   :  { %7909 = vmatpush3.bf16.msra.mxu1 %v10432_v54 }
0xa3e7   :  { %v6392_v26 = vpop.f32.mrb[152].mxu1 }
0xa3e8   :  { %v6393_v31 = vadd.f32 %v10391_v32, %v6392_v26  ;;  %v7886_v47 = vpop.f32.mrb[153].mxu1 }
0xa3e9   :  { %v6395_v19 = vpop.f32.mrb[154].mxu1 }
0xa3ea   :  { %8410 = vtanh.f32 %v6393_v31  ;;  %v7887_v33 = vpop.f32.mrb[155].mxu1  ;;  %v6398_v5 = vsub.f32 0.0, %v6393_v31 }
0xa3ec   :  { %v6399_v53 = vmul.f32 1.442695, %v6398_v5 }
0xa3ee   :  { %8412 = vpow2.f32 %v6399_v53 }
0xa3f4   :  { %v8411_v40 = vpop.eup %8410 }
0xa3f5   :  { %6406 = vrot.lane.b32.xlu1 %v8411_v40, %s8538_s24 }
0xa3f8   :  { %v8413_v45 = vpop.eup %8412 }
0xa3f9   :  { %v6401_v37 = vadd.f32 1.0, %v8413_v45 }
0xa3fb   :  { %8414 = vrcp.f32 %v6401_v37 }
0xa405   :  { %v8415_v34 = vpop.eup %8414 }
0xa406   :  { %v6404_v54 = vmul.f32 %v8415_v34, %v10554_v30 }
0xa467   :  { %v6407_v56 = vpop.permute.xlu1 %6406 }
0xa468   :  { %v6409_v43 = vmul.f32 %v8415_v34, %v6407_v56 }
0xa46a   :  { %6411 = vrot.lane.b32.xlu0 %v6409_v43, %s8538_s24 }
0xa4dc   :  { %v6412_v4 = vpop.permute.xlu0 %6411 }
0xa4dd   :  { %v10616_v39 = vadd.f32 %v6412_v4, %v6404_v54 }
0xa4df   :  { %8416 = vtanh.f32 %v10616_v39 }
0xa4e9   :  { %v8417_v9 = vpop.eup %8416 }
0xa4ea   :  { %6417 = vrot.lane.b32.xlu1 %v8417_v9, %s8538_s24 }
0xa55c   :  { %v6418_v20 = vpop.permute.xlu1 %6417 }
0xa55d   :  { %v6420_v36 = vmul.f32 %v8415_v34, %v6418_v20 }
0xa55f   :  { %v6421_v55 = vpack.c.bf16 %v6420_v36, %v6420_v36 }
0xa561   :  { %6423 = vrot.lane.b32.xlu0 %v6421_v55, %s8540_s11 }
0xa5d3   :  { %v6424_v26 = vpop.permute.xlu0 %6423 }
0xa5d4   :  { %7893 = vmatmul.mubr.msk.bf16.vlgmr.msra.gmra.mrb[148].mxu0 %vm41_vm1, %v6424_v26 }
0xa5d5   :  { %7897 = vmatpush3.bf16.msra.mxu0 %v8952_v62  ;;  %7898 = vmatprep.mubr.msk.bf16.mxu0 %vm8537_vm0, %v11153_v27 }
0xa5d6   :  { %7914 = vmatprep.subr.bf16.mxu0 %v11153_v27 }
0xa6a7   :  { %v6462_v30 = vpop.f32.mrb[148].mxu0 }
0xa6a8   :  { %v6463_v31 = vadd.f32 %v6462_v30, %v8919_v21  ;;  %v7894_v47 = vpop.f32.mrb[149].mxu0 }
0xa6a9   :  { %v6465_v19 = vpop.f32.mrb[150].mxu0 }
0xa6aa   :  { %v7895_v33 = vpop.f32.mrb[151].mxu0  ;;  %v6468_v40 = vsel %vm867_vm10, %v6463_v31, -inf }
0xa6ab   :  { %6469 = vmax.xlane.f32.xlu1 %v6468_v40 }
0xa6bc   :  { %6488 = vrot.lane.b32.xlu1 %v10520_v10, %s8584_s30 }
0xa738   :  { %v6470_v5 = vpop.xlane.xlu1 %6469 }
0xa739   :  { %v10629_v53 = vsub.f32 %v6463_v31, %v6470_v5 }
0xa73b   :  { %v6472_v62 = vmul.f32 1.442695, %v10629_v53 }
0xa73c   :  { %v6489_v10 = vpop.permute.xlu1 %6488 }
0xa73d   :  { %8418 = vpow2.f32 %v6472_v62 }
0xa747   :  { %v8419_v45 = vpop.eup %8418 }
0xa748   :  { %v6474_v37 = vsel %vm867_vm10, %v8419_v45, 0.0 }
0xa749   :  { %6475 = vadd.xlane.f32.xlu0 %v6474_v37 }
0xa7d6   :  { %v10633_v21 = vpop.xlane.xlu0 %6475 }
0xa7d7   :  { %8420 = vrcp.f32 %v10633_v21 }
0xa7d8   :  { %8422 = vlog2.f32 %v8929_v46 }
0xa7e1   :  { %v8421_v34 = vpop.eup %8420 }
0xa7e2   :  { %v10636_v56 = vmul.f32 %v8421_v34, %v8419_v45 }
0xa7e4   :  { %6501 = vrot.lane.b32.xlu1 %v10636_v56, %s8545_s15  ;;  %6494 = vrot.lane.b32.xlu0 %v10636_v56, %s8546_s16  ;;  %vm6491_vm4 = vcmp.le.f32.partialorder %v10636_v56, %v6489_v10 }
0xa7e5   :  { %v6492_v20 = vsel %vm6491_vm4, 1, %v11151_v22  ;;  %vm1547_vm4 = vcmask 16400  }
0xa7e8   :  { %6508 = vrot.lane.b32.xlu0 %v10636_v56, %s8547_s17 }
0xa7ec   :  { %6583 = vrot.lane.b32.xlu0 %v6420_v36, %s8539_s10 }
0xa7f0   :  { %515 = vrot.lane.b32.xlu0 %v8811_v24, %s8540_s11 }
0xa7f4   :  { %720 = vrot.lane.b32.xlu0 %v8862_v11, %s8540_s11 }
0xa7f8   :  { %916 = vperm.xlu0 %8006, %v8949_v61  }
0xa856   :  { %v6495_v43 = vpop.permute.xlu0 %6494  ;;  %v6502_v4 = vpop.permute.xlu1 %6501 }
0xa857   :  { %v6497_v54 = vadd.f32 %v6495_v43, %v10636_v56 }
0xa859   :  { %vm6498_vm5 = vcmp.le.f32.partialorder %v6497_v54, %v6489_v10  ;;  %v6504_v9 = vadd.f32 %v6502_v4, %v6497_v54 }
0xa85a   :  { %v6499_v36 = vsel %vm6498_vm5, 1, %v11151_v22  ;;  %v6509_v55 = vpop.permute.xlu0 %6508  ;;  %vm1764_vm5 = vcmask 24600  }
0xa85b   :  { %v6500_v24 = vadd.s32 %v6499_v36, %v6492_v20  ;;  %vm6505_vm9 = vcmp.le.f32.partialorder %v6504_v9, %v6489_v10  ;;  %v6511_v26 = vadd.f32 %v6509_v55, %v6504_v9 }
0xa85c   :  { %v6506_v11 = vsel %vm6505_vm9, 1, %v11151_v22 }
0xa85d   :  { %v6507_v61 = vadd.s32 %v6506_v11, %v6500_v24  ;;  %vm6512_vm15 = vcmp.le.f32.partialorder %v6511_v26, %v6489_v10 }
0xa85e   :  { %v6513_v30 = vsel %vm6512_vm15, 1, %v11151_v22  ;;  %v6584_v31 = vpop.permute.xlu0 %6583  ;;  %v8423_v22 = vpop.eup %8422 }
0xa85f   :  { %v10656_v47 = vadd.s32 %v6513_v30, %v6507_v61  ;;  %v880_v5 = vmul.f32 0.6931472, %v8423_v22 }
0xa861   :  { %v6531_v19 = vadd.s32 1, %v10656_v47  ;;  %v881_v45 = vsub.f32 %v8925_v42, %v880_v5  ;;  %v8487_v42 = vld [vmem:[%s11078_s1 + $0x8] sm:$0xff]   ;;  %s8585_s1 = smov 1  }
0xa862   :  { %v516_v33 = vpop.permute.xlu0 %515 }
0xa863   :  { %518 = vst.msk [vmem:[%s11080_s3] sm:$0x1] %vm517_vm6, %v516_v33  ;;  %6533 = vperm.xlu1 %8007, %v6531_v19  }
0xa866   :  { %v721_v40 = vpop.permute.xlu0 %720 }
0xa867   :  { %723 = vst.msk [vmem:[%s11080_s3] sm:$0x1] %vm722_vm11, %v721_v40 }
0xa877   :  { %v917_v62 = vpop.permute.xlu0 %916 }
0xa878   :  { %vm918_vm7 = vcmp.eq.s32.totalorder %v8965_v1, %v917_v62 }
0xa879   :  { %v6769_v37 = vsel %vm918_vm7, 1.0, %v11153_v27 }
0xa87a   :  { %v921_v34 = vmul.f32 %v6769_v37, %v881_v45 }
0xa87c   :  { %v922_v10 = vsel %vm867_vm10, %v921_v34, 0.0 }
0xa87d   :  { %923 = vadd.xlane.f32.xlu0 %v922_v10 }
0xa8e2   :  { %v6534_v43 = vpop.permute.xlu1 %6533 }
0xa8e3   :  { %vm6535_vm13 = vcmp.eq.s32.totalorder %v8965_v1, %v6534_v43  ;;  %v882_v43 = vmul.f32 %v881_v45, %v8932_v14 }
0xa8e4   :  { %v6870_v46 = vsel %vm6535_vm13, 1.0, %v11153_v27 }
0xa8e5   :  { %v6538_v54 = vpack.c.bf16 %v6870_v46, %v6870_v46  ;;  %v1529_v46 = vmul.f32 %v9164_v15, %v9148_v57 }
0xa8e7   :  { %7899 = vmatmul.mubr.msk.bf16.vlgmr.msra.gmra.mrb[152].mxu0 %vm940_vm8, %v6538_v54  ;;  %vm705_vm8 = vcmask 534024   ;;  %v883_v54 = vsel %vm867_vm10, %v882_v43, 0.0 }
0xa8e8   :  { %7915 = vmatpush3.bf16.msra.mxu0 %v8638_v3  ;;  %7918 = vmatprep.mubr.msk.bf16.mxu0 %vm8537_vm0, %v11153_v27  ;;  %v706_v3 = vsel %vm705_vm8, %v8869_v18, 0.0  ;;  %vm1530_vm0 = vcmask 559648   ;;  %vm4830_vm8 = vcmask 658048  }
0xa8e9   :  { %7916 = vmatprep.subr.bf16.mxu0 %v11153_v27  ;;  %v707_v26 = vrot.slane %v706_v3, 4 }
0xa8eb   :  { %v708_v11 = vadd.f32 %v707_v26, %v706_v3 }
0xa8ec   :  { %7917 = vmatpush3.bf16.msra.mxu0 %v8487_v42 }
0xa8ed   :  { %v709_v61 = vrot.slane %v708_v11, 2 }
0xa9ba   :  { %v6576_v4 = vpop.f32.mrb[152].mxu0 }
0xa9bb   :  { %v6586_v9 = vsel %vm41_vm1, %v6576_v4, %v6584_v31  ;;  %v7900_v20 = vpop.f32.mrb[153].mxu0  ;;  %v710_v31 = vadd.f32 %v709_v61, %v708_v11  ;;  %v1531_v4 = vsel %vm1530_vm0, %v1529_v46, 0.0 }
0xa9bc   :  { %v6587_v36 = vpack.c.bf16 %v6586_v9, %v6586_v9  ;;  %v6579_v55 = vpop.f32.mrb[154].mxu0  ;;  %v1532_v9 = vrot.slane %v1531_v4, 4 }
0xa9bd   :  { %v7901_v24 = vpop.f32.mrb[155].mxu0  ;;  %v711_v5 = vrot.slane %v710_v31, 1 }
0xa9be   :  { %7911 = vmatmul.mubr.msk.bf16.vlgmr.msra.gmra.mrb[156].mxu1 %vm68_vm2, %v6587_v36  ;;  %v1533_v20 = vadd.f32 %v1532_v9, %v1531_v4  ;;  %vm504_vm2 = vcmask 525824  }
0xa9bf   :  { %v712_v62 = vadd.f32 %v711_v5, %v710_v31  ;;  %v1498_v31 = vmul.f32 %v9148_v57, %v9145_v12  ;;  %v11197_v5 = vld [vmem:[#allocation11_spill] sm:$0xff]  ;;  %v11198_v12 = vld [vmem:[#allocation12_spill] sm:$0xff] }
0xa9c0   :  { %v1534_v14 = vrot.slane %v1533_v20, 2  ;;  %v1746_v57 = vmul.f32 %v11198_v12, %v11197_v5 }
0xa9c1   :  { %v713_v34 = vsub.f32 0.0, %v712_v62  ;;  %v1715_v62 = vmul.f32 %v11197_v5, %v9206_v8  ;;  %v11199_v8 = vld [vmem:[#allocation10_spill] sm:$0xff] }
0xa9c2   :  { %v1535_v45 = vadd.f32 %v1534_v14, %v1533_v20 }
0xaa91   :  { %v6625_v30 = vpop.f32.mrb[156].mxu1 }
0xaa92   :  { %v6626_v19 = vadd.f32 %v10391_v32, %v6625_v30  ;;  %v7912_v33 = vpop.f32.mrb[157].mxu1 }
0xaa93   :  { %v6628_v40 = vpop.f32.mrb[158].mxu1 }
0xaa94   :  { %8424 = vtanh.f32 %v6626_v19  ;;  %v7913_v22 = vpop.f32.mrb[159].mxu1 }
0xaa95   :  { %8426 = vlog2.f32 %v9019_v29 }
0xaa9e   :  { %v8425_v37 = vpop.eup %8424 }
0xaa9f   :  { %6639 = vrot.lane.b32.xlu1 %v8425_v37, %s8538_s24  ;;  %v8427_v18 = vpop.eup %8426  ;;  %v1716_v37 = vsel %vm944_vm14, %v1715_v62, 0.0 }
0xaaa0   :  { %v1119_v10 = vmul.f32 0.6931472, %v8427_v18  ;;  %v1717_v18 = vrot.slane %v1716_v37, 4 }
0xaaa2   :  { %v10691_v32 = vsub.f32 %v9014_v2, %v1119_v10  ;;  %v1536_v2 = vrot.slane %v1535_v45, 1  ;;  %v1718_v43 = vadd.f32 %v1717_v18, %v1716_v37 }
0xaaa3   :  { %715 = vrot.lane.b32.xlu1 %v713_v34, %s8546_s16 }
0xaaa4   :  { %v1121_v42 = vmul.f32 %v10691_v32, %v9022_v17  ;;  %v1537_v36 = vadd.f32 %v1536_v2, %v1535_v45  ;;  %v6631_v17 = vsub.f32 0.0, %v6626_v19 }
0xaaa6   :  { %v1122_v29 = vsel %vm867_vm10, %v1121_v42, 0.0  ;;  %v1538_v15 = vsub.f32 0.0, %v1537_v36  ;;  %v6632_v55 = vmul.f32 1.442695, %v6631_v17 }
0xaaa8   :  { %8428 = vpow2.f32 %v6632_v55  ;;  %v1748_v55 = vsel %vm1747_vm3, %v1746_v57, 0.0  ;;  %vm5860_vm3 = vcmask 691872  }
0xaab2   :  { %v8429_v3 = vpop.eup %8428 }
0xaac7   :  { %884 = vadd.xlane.f32.xlu1 %v883_v54  ;;  %v1719_v54 = vrot.slane %v1718_v43, 2 }
0xaac9   :  { %v1720_v4 = vadd.f32 %v1719_v54, %v1718_v43  ;;  %v11200_v54 = vld [vmem:[#allocation14_spill] sm:$0xff] }
0xaacb   :  { %1123 = vadd.xlane.f32.xlu1 %v1122_v29  ;;  %v1721_v14 = vrot.slane %v1720_v4, 1 }
0xaacd   :  { %v1722_v17 = vadd.f32 %v1721_v14, %v1720_v4 }
0xaadc   :  { %1155 = vperm.xlu1 %8007, %v9037_v48  }
0xaae0   :  { %1167 = vrot.lane.b32.xlu1 %v9037_v48, %s8585_s1  ;;  %v505_v48 = vsel %vm504_vm2, %v8819_v28, 0.0  ;;  %vm5046_vm2 = vcmask 666248  }
0xaae1   :  { %v506_v24 = vrot.slane %v505_v48, 4 }
0xaae4   :  { %1540 = vrot.lane.b32.xlu1 %v1538_v15, %s8586_s9 }
0xaae8   :  { %1545 = vrot.lane.b32.xlu1 %v9157_v60, %s8544_s14  ;;  %v507_v60 = vadd.f32 %v506_v24, %v505_v48 }
0xaaea   :  { %v508_v26 = vrot.slane %v507_v60, 2 }
0xaaec   :  { %1762 = vrot.lane.b32.xlu1 %v9216_v63, %s8544_s14  ;;  %v6634_v63 = vadd.f32 1.0, %v8429_v3  ;;  %s8587_s14 = smov 2  }
0xaaee   :  { %8430 = vrcp.f32 %v6634_v63  ;;  %v1723_v63 = vsub.f32 0.0, %v1722_v17 }
0xaaef   :  { %8432 = vlog2.f32 %v10571_v16 }
0xaaf0   :  { %1947 = vperm.xlu1 %8007, %v9278_v0   ;;  %8434 = vlog2.f32 %v11200_v54 }
0xaaf4   :  { %4225 = vperm.xlu1 %8007, %v9948_v25   ;;  %v509_v25 = vadd.f32 %v508_v26, %v507_v60  ;;  %v1749_v26 = vrot.slane %v1748_v55, 4 }
0xaaf6   :  { %v510_v28 = vrot.slane %v509_v25, 1 }
0xaaf8   :  { %4456 = vperm.xlu1 %8007, %v10016_v51   ;;  %v511_v11 = vadd.f32 %v510_v28, %v509_v25  ;;  %v10717_v61 = vpop.eup %8430 }
0xaafa   :  { %v512_v33 = vsub.f32 0.0, %v511_v11 }
0xaafc   :  { %5245 = vperm.xlu1 %8007, %v10272_v13  }
0xab00   :  { %5478 = vperm.xlu1 %8007, %v10335_v49  }
0xab04   :  { %6283 = vperm.xlu1 %8007, %v10589_v50  }
0xab08   :  { %6516 = vperm.xlu1 %8007, %v10656_v47  }
0xab0c   :  { %1959 = vrot.lane.b32.xlu1 %v9278_v0, %s8587_s14  ;;  %v1499_v0 = vsel %vm944_vm14, %v1498_v31, 0.0 }
0xab0d   :  { %v1500_v34 = vrot.slane %v1499_v0, 4 }
0xab0f   :  { %v1501_v10 = vadd.f32 %v1500_v34, %v1499_v0 }
0xab11   :  { %v6640_v30 = vpop.permute.xlu1 %6639  ;;  %v1502_v46 = vrot.slane %v1501_v10, 2 }
0xab12   :  { %v6642_v19 = vmul.f32 %v10717_v61, %v6640_v30 }
0xab13   :  { %v1503_v42 = vadd.f32 %v1502_v46, %v1501_v10 }
0xab14   :  { %6644 = vrot.lane.b32.xlu0 %v6642_v19, %s8538_s24 }
0xab15   :  { %v716_v40 = vpop.permute.xlu1 %715  ;;  %v1504_v9 = vrot.slane %v1503_v42, 1 }
0xab16   :  { %v10721_v22 = vadd.f32 %v716_v40, %v512_v33  ;;  %v1750_v33 = vadd.f32 %v1749_v26, %v1748_v55 }
0xab17   :  { %v1505_v2 = vadd.f32 %v1504_v9, %v1503_v42  ;;  %v8433_v42 = vpop.eup %8432 }
0xab18   :  { %v1751_v31 = vrot.slane %v1750_v33, 2  ;;  %v6247_v9 = vmul.f32 0.6931472, %v8433_v42  ;;  %v8435_v14 = vpop.eup %8434 }
0xab19   :  { %v1506_v48 = vsub.f32 0.0, %v1505_v2  ;;  %v11201_v2 = vld [vmem:[#allocation13_spill] sm:$0xff] }
0xab54   :  { %v885_v29 = vpop.xlane.xlu1 %884 }
0xab55   :  { %v886_v20 = vsub.f32 0.0, %v885_v29 }
0xab57   :  { %v927_v45 = vadd.f32 %v886_v20, %v11199_v8  ;;  %v10762_v20 = vsub.f32 %v10566_v41, %v6247_v9  ;;  %v1911_v8 = vmul.f32 0.6931472, %v8435_v14  ;;  %v11202_v41 = vld [vmem:[#allocation15_spill] sm:$0xff] }
0xab58   :  { %v1124_v36 = vpop.xlane.xlu1 %1123 }
0xab59   :  { %v1125_v15 = vsub.f32 0.0, %v1124_v36  ;;  %v1912_v36 = vsub.f32 %v11201_v2, %v1911_v8 }
0xab5b   :  { %v1166_v24 = vadd.f32 %v1125_v15, %v927_v45  ;;  %v1913_v15 = vmul.f32 %v1912_v36, %v11202_v41 }
0xab5c   :  { %v1156_v3 = vpop.permute.xlu1 %1155 }
0xab5d   :  { %v1544_v60 = vadd.f32 %v1506_v48, %v1166_v24  ;;  %vm1157_vm12 = vcmp.eq.s32.totalorder %v8965_v1, %v1156_v3  ;;  %v1914_v48 = vsel %vm867_vm10, %v1913_v15, 0.0  ;;  %v924_v3 = vpop.xlane.xlu0 %923 }
0xab5e   :  { %v6775_v25 = vsel %vm1157_vm12, 1.0, %v11153_v27  ;;  %vm6084_vm12 = vcmask 700072  }
0xab5f   :  { %v1160_v28 = vmul.f32 %v6775_v25, %v10691_v32  ;;  %v10735_v11 = vadd.f32 %v1723_v63, %v1544_v60  ;;  %v1752_v32 = vadd.f32 %v1751_v31, %v1750_v33  ;;  %v6637_v63 = vmul.f32 %v10717_v61, %v10616_v39 }
0xab60   :  { %v1168_v30 = vpop.permute.xlu1 %1167 }
0xab61   :  { %1169 = vst.msk [vmem:[%s11080_s3 + $0x1] sm:$0x1] %vm722_vm11, %v1168_v30  ;;  %v1161_v19 = vsel %vm867_vm10, %v1160_v28, 0.0  ;;  %v1753_v0 = vrot.slane %v1752_v32, 1  ;;  %v11203_v28 = vld [vmem:[#allocation17_spill] sm:$0xff]  ;;  %v11204_v30 = vld [vmem:[#allocation43_spill] sm:$0xff] }
0xab62   :  { %1162 = vadd.xlane.f32.xlu0 %v1161_v19 }
0xab63   :  { %v1754_v34 = vadd.f32 %v1753_v0, %v1752_v32  ;;  %v11206_v0 = vld [vmem:[#allocation18_spill] sm:$0xff] }
0xab64   :  { %v10742_v40 = vpop.permute.xlu1 %1540 }
0xab65   :  { %v1755_v10 = vsub.f32 0.0, %v1754_v34  ;;  %v11207_v34 = vld [vmem:[#allocation42_spill] sm:$0xff] }
0xab68   :  { %v1546_v5 = vpop.permute.xlu1 %1545 }
0xab69   :  { %1548 = vst.msk [vmem:[%s11080_s3] sm:$0x1] %vm1547_vm4, %v1546_v5  ;;  %v11205_v5 = vld [vmem:[#allocation16_spill] sm:$0xff] }
0xab6c   :  { %v1763_v62 = vpop.permute.xlu1 %1762 }
0xab6d   :  { %1765 = vst.msk [vmem:[%s11080_s3] sm:$0x1] %vm1764_vm5, %v1763_v62 }
0xab70   :  { %v1948_v37 = vpop.permute.xlu1 %1947 }
0xab71   :  { %vm1949_vm15 = vcmp.eq.s32.totalorder %v8965_v1, %v1948_v37 }
0xab72   :  { %v6788_v17 = vsel %vm1949_vm15, 1.0, %v11153_v27 }
0xab73   :  { %v1952_v55 = vmul.f32 %v6788_v17, %v1912_v36 }
0xab74   :  { %v4226_v18 = vpop.permute.xlu1 %4225 }
0xab75   :  { %v1953_v24 = vsel %vm867_vm10, %v1952_v55, 0.0  ;;  %vm4227_vm7 = vcmp.eq.s32.totalorder %v8965_v1, %v4226_v18  ;;  %v11209_v18 = vld [vmem:[#allocation35_spill] sm:$0xff] }
0xab76   :  { %v6828_v37 = vsel %vm4227_vm7, 1.0, %v11153_v27  ;;  %vm4026_vm7 = vcmask 632424  }
0xab78   :  { %v10753_v43 = vpop.permute.xlu1 %4456  ;;  %1757 = vrot.lane.b32.xlu0 %v1755_v10, %s8588_s0 }
0xab7c   :  { %v10756_v46 = vpop.permute.xlu1 %5245 }
0xab7d   :  { %vm5247_vm13 = vcmp.eq.s32.totalorder %v8965_v1, %v10756_v46  ;;  %v11213_v46 = vld [vmem:[#allocation54_spill] sm:$0xff] }
0xab80   :  { %v10759_v4 = vpop.permute.xlu1 %5478 }
0xab84   :  { %v6284_v29 = vpop.permute.xlu1 %6283 }
0xab85   :  { %vm6285_vm9 = vcmp.eq.s32.totalorder %v8965_v1, %v6284_v29  ;;  %v11208_v29 = vld [vmem:[#allocation31_spill] sm:$0xff] }
0xab86   :  { %v6864_v16 = vsel %vm6285_vm9, 1.0, %v11153_v27  ;;  %v6645_v60 = vpop.permute.xlu0 %6644  ;;  %vm11220_vm9 = vcmask 1043456  }
0xab87   :  { %v10767_v12 = vmul.f32 %v6864_v16, %v10762_v20  ;;  %v6647_v26 = vadd.f32 %v6645_v60, %v6637_v63  ;;  %v925_v16 = vsub.f32 0.0, %v924_v3  ;;  %vm11222_vm15 = vmmov %vm11220_vm9 }
0xab88   :  { %v6517_v57 = vpop.permute.xlu1 %6516 }
0xab89   :  { %8436 = vtanh.f32 %v6647_v26  ;;  %v926_v8 = vadd.f32 %v925_v16, %v10721_v22  ;;  %v6846_v22 = vsel %vm5247_vm13, 1.0, %v11153_v27  ;;  %vm6518_vm0 = vcmp.eq.s32.totalorder %v8965_v1, %v6517_v57 }
0xab8a   :  { %8438 = vlog2.f32 %v11203_v28  ;;  %v6869_v26 = vsel %vm6518_vm0, 1.0, %v11153_v27  ;;  %v5859_v57 = vmul.f32 %v10463_v58, %v10445_v52  ;;  %vm4458_vm13 = vcmp.eq.s32.totalorder %v8965_v1, %v10753_v43 }
0xab8b   :  { %8440 = vlog2.f32 %v11204_v30 }
0xab8c   :  { %v1960_v45 = vpop.permute.xlu1 %1959  ;;  %8442 = vlog2.f32 %v10254_v23 }
0xab8d   :  { %1961 = vst.msk [vmem:[%s11080_s3 + $0x1] sm:$0x1] %vm1547_vm4, %v1960_v45  ;;  %8444 = vlog2.f32 %v10633_v21 }
0xab93   :  { %v8437_v25 = vpop.eup %8436 }
0xab94   :  { %v8439_v19 = vpop.eup %8438 }
0xab95   :  { %v2144_v33 = vmul.f32 0.6931472, %v8439_v19  ;;  %v8441_v31 = vpop.eup %8440 }
0xab96   :  { %v4189_v62 = vmul.f32 0.6931472, %v8441_v31  ;;  %v8443_v17 = vpop.eup %8442 }
0xab97   :  { %1915 = vadd.xlane.f32.xlu0 %v1914_v48  ;;  %v10785_v32 = vsub.f32 %v11205_v5, %v2144_v33  ;;  %v5209_v55 = vmul.f32 0.6931472, %v8443_v17  ;;  %v8445_v48 = vpop.eup %8444 }
0xab98   :  { %v10792_v10 = vsub.f32 %v11207_v34, %v4189_v62  ;;  %v6480_v60 = vmul.f32 0.6931472, %v8445_v48 }
0xab99   :  { %v2146_v39 = vmul.f32 %v10785_v32, %v11206_v0 }
0xab9a   :  { %v4230_v54 = vmul.f32 %v6828_v37, %v10792_v10  ;;  %v10817_v30 = vsub.f32 %v10629_v53, %v6480_v60  ;;  %v5861_v37 = vsel %vm5860_vm3, %v5859_v57, 0.0  ;;  %v6083_v53 = vmul.f32 %v10531_v38, %v10511_v6 }
0xab9b   :  { %1954 = vadd.xlane.f32.xlu0 %v1953_v24  ;;  %v2147_v42 = vsel %vm867_vm10, %v2146_v39, 0.0  ;;  %v11210_v24 = vld [vmem:[#allocation50_spill] sm:$0xff] }
0xab9c   :  { %v4231_v9 = vsel %vm867_vm10, %v4230_v54, 0.0  ;;  %v4829_v3 = vmul.f32 %v11210_v24, %v10132_v59  ;;  %v6521_v33 = vmul.f32 %v6869_v26, %v10817_v30 }
0xab9e   :  { %v4831_v21 = vsel %vm4830_vm8, %v4829_v3, 0.0  ;;  %v6522_v0 = vsel %vm867_vm10, %v6521_v33, 0.0  ;;  %vm5480_vm8 = vcmp.eq.s32.totalorder %v8965_v1, %v10759_v4 }
0xab9f   :  { %v4832_v19 = vrot.slane %v4831_v21, 4 }
0xaba1   :  { %v4833_v62 = vadd.f32 %v4832_v19, %v4831_v21 }
0xaba3   :  { %v4834_v34 = vrot.slane %v4833_v62, 2 }
0xaba5   :  { %v4835_v16 = vadd.f32 %v4834_v34, %v4833_v62  ;;  %v11217_v34 = vld [vmem:[#allocation46_spill] sm:$0xff] }
0xaba6   :  { %8446 = vlog2.f32 %v11217_v34 }
0xaba7   :  { %v4836_v58 = vrot.slane %v4835_v16, 1 }
0xaba9   :  { %v4837_v17 = vadd.f32 %v4836_v58, %v4835_v16 }
0xabb1   :  { %6650 = vrot.lane.b32.xlu0 %v8437_v25, %s8538_s24  ;;  %v11212_v25 = vld [vmem:[#allocation52_spill] sm:$0xff]  ;;  %s8589_s24 = smov 120  }
0xabb2   :  { %v5045_v28 = vmul.f32 %v11213_v46, %v11212_v25 }
0xabb4   :  { %v5047_v5 = vsel %vm5046_vm2, %v5045_v28, 0.0  ;;  %vm2564_vm2 = vcmask 593472  }
0xabb5   :  { %v5048_v39 = vrot.slane %v5047_v5, 4 }
0xabb7   :  { %v5049_v54 = vadd.f32 %v5048_v39, %v5047_v5 }
0xabd0   :  { %2148 = vadd.xlane.f32.xlu0 %v2147_v42  ;;  %v5862_v42 = vrot.slane %v5861_v37, 4 }
0xabd4   :  { %4232 = vadd.xlane.f32.xlu0 %v4231_v9  ;;  %v6085_v9 = vsel %vm6084_vm12, %v6083_v53, 0.0  ;;  %v11216_v53 = vld [vmem:[#allocation21_spill] sm:$0xff] }
0xabea   :  { %2989 = vperm.xlu0 %8006, %v11208_v29  }
0xabee   :  { %3222 = vperm.xlu0 %8006, %v11209_v18  }
0xabef   :  { %v1163_v14 = vpop.xlane.xlu0 %1162 }
0xabf0   :  { %v1164_v45 = vsub.f32 0.0, %v1163_v14  ;;  %v5050_v14 = vrot.slane %v5049_v54, 2 }
0xabf2   :  { %v1165_v2 = vadd.f32 %v1164_v45, %v926_v8  ;;  %v5863_v8 = vadd.f32 %v5862_v42, %v5861_v37  ;;  %v6086_v45 = vrot.slane %v6085_v9, 4  ;;  %v11215_v37 = vld [vmem:[#allocation20_spill] sm:$0xff]  ;;  %v11219_v42 = vld [vmem:[#allocation25_spill] sm:$0xff] }
0xabf3   :  { %v1758_v41 = vpop.permute.xlu0 %1757 }
0xabf4   :  { %v1543_v36 = vadd.f32 %v10742_v40, %v1165_v2  ;;  %v11211_v40 = vld [vmem:[#allocation55_spill] sm:$0xff]  ;;  %v5051_v2 = vadd.f32 %v5050_v14, %v5049_v54  ;;  %v11218_v54 = vld [vmem:[#allocation24_spill] sm:$0xff]  ;;  %v11221_v14 = vld [vmem:[#allocation58_spill] sm:$0xff] }
0xabf5   :  { %v10809_v63 = vsub.f32 %v11211_v40, %v5209_v55  ;;  %8448 = vlog2.f32 %v11221_v14 }
0xabf6   :  { %v1760_v15 = vadd.f32 %v1758_v41, %v1543_v36  ;;  %v5864_v36 = vrot.slane %v5863_v8, 2  ;;  %v6087_v41 = vadd.f32 %v6086_v45, %v6085_v9  ;;  %v5052_v24 = vrot.slane %v5051_v2, 1 }
0xabf7   :  { %v5250_v23 = vmul.f32 %v6846_v22, %v10809_v63  ;;  %v4838_v22 = vsub.f32 0.0, %v4837_v17  ;;  %v2749_v9 = vmul.f32 %v11219_v42, %v11218_v54 }
0xabf8   :  { %v5865_v55 = vadd.f32 %v5864_v36, %v5863_v8  ;;  %v6088_v48 = vrot.slane %v6087_v41, 2  ;;  %v5053_v40 = vadd.f32 %v5052_v24, %v5051_v2  ;;  %v8447_v2 = vpop.eup %8446  ;;  %v11223_v24 = vld [vmem:[#allocation40_spill] sm:$0xff] }
0xabf9   :  { %v5251_v31 = vsel %vm867_vm10, %v5250_v23, 0.0  ;;  %v2750_v8 = vsel %vm11222_vm15, %v2749_v9, 0.0  ;;  %v4420_v17 = vmul.f32 0.6931472, %v8447_v2  ;;  %vm2581_vm15 = vcmask 32800  }
0xabfa   :  { %v6089_v38 = vadd.f32 %v6088_v48, %v6087_v41  ;;  %v5866_v23 = vrot.slane %v5865_v55, 1  ;;  %v5054_v28 = vsub.f32 0.0, %v5053_v40  ;;  %v2751_v58 = vrot.slane %v2750_v8, 4 }
0xabfc   :  { %v5867_v19 = vadd.f32 %v5866_v23, %v5865_v55  ;;  %v6090_v33 = vrot.slane %v6089_v38, 1  ;;  %v2752_v41 = vadd.f32 %v2751_v58, %v2750_v8 }
0xabfe   :  { %v5868_v62 = vsub.f32 0.0, %v5867_v19  ;;  %v2753_v23 = vrot.slane %v2752_v41, 2  ;;  %v6851_v19 = vsel %vm5480_vm8, 1.0, %v11153_v27 }
0xabff   :  { %v8449_v55 = vpop.eup %8448 }
0xac0d   :  { %5252 = vadd.xlane.f32.xlu0 %v5251_v31 }
0xac11   :  { %6523 = vadd.xlane.f32.xlu0 %v6522_v0  ;;  %v6091_v0 = vadd.f32 %v6090_v33, %v6089_v38  ;;  %v5442_v38 = vmul.f32 0.6931472, %v8449_v55  ;;  %v11225_v33 = vld [vmem:[#allocation57_spill] sm:$0xff] }
0xac13   :  { %v6092_v39 = vsub.f32 0.0, %v6091_v0  ;;  %v5443_v43 = vsub.f32 %v11225_v33, %v5442_v38  ;;  %v11227_v38 = vld [vmem:[#allocation28_spill] sm:$0xff] }
0xac15   :  { %v5483_v0 = vmul.f32 %v6851_v19, %v5443_v43  ;;  %v11229_v19 = vld [vmem:[#allocation47_spill] sm:$0xff] }
0xac17   :  { %v5484_v4 = vsel %vm867_vm10, %v5483_v0, 0.0 }
0xac24   :  { %v1916_v3 = vpop.xlane.xlu0 %1915 }
0xac25   :  { %v1917_v60 = vsub.f32 0.0, %v1916_v3  ;;  %v4027_v3 = vsel %vm4026_vm7, %v11223_v24, 0.0  ;;  %vm2806_vm7 = vcmask 41000  }
0xac27   :  { %v10827_v21 = vadd.f32 %v1917_v60, %v10735_v11  ;;  %4840 = vrot.lane.b32.xlu0 %v4838_v22, %s8586_s9  ;;  %v6833_v22 = vsel %vm4458_vm13, 1.0, %v11153_v27  ;;  %v11224_v60 = vld [vmem:[#allocation45_spill] sm:$0xff] }
0xac28   :  { %v1955_v26 = vpop.xlane.xlu0 %1954  ;;  %v4421_v40 = vsub.f32 %v11224_v60, %v4420_v17 }
0xac29   :  { %v1956_v46 = vsub.f32 0.0, %v1955_v26  ;;  %v4028_v26 = vrot.slane %v4027_v3, 4 }
0xac2a   :  { %v4422_v33 = vmul.f32 %v4421_v40, %v11229_v19 }
0xac2b   :  { %v10830_v31 = vadd.f32 %v1956_v46, %v1760_v15  ;;  %5056 = vrot.lane.b32.xlu0 %v5054_v28, %s8588_s0  ;;  %v11214_v15 = vld [vmem:[#allocation19_spill] sm:$0xff]  ;;  %v4461_v46 = vmul.f32 %v6833_v22, %v4421_v40  ;;  %v11233_v40 = vld [vmem:[#allocation32_spill] sm:$0xff] }
0xac2c   :  { %v6651_v5 = vpop.permute.xlu0 %6650 }
0xac2d   :  { %v10834_v57 = vmul.f32 %v10717_v61, %v6651_v5  ;;  %v2524_v61 = vmul.f32 %v11216_v53, %v11215_v37  ;;  %v2754_v5 = vadd.f32 %v2753_v23, %v2752_v41  ;;  %v11226_v37 = vld [vmem:[#allocation29_spill] sm:$0xff] }
0xac2e   :  { %8450 = vlog2.f32 %v11226_v37 }
0xac2f   :  { %v6659_v11 = vpack.c.bf16 %v10834_v57, %v10834_v57  ;;  %5870 = vrot.lane.b32.xlu0 %v5868_v62, %s8589_s24  ;;  %v2525_v16 = vsel %vm11220_vm9, %v2524_v61, 0.0  ;;  %v4029_v62 = vadd.f32 %v4028_v26, %v4027_v3  ;;  %v2755_v61 = vrot.slane %v2754_v5, 1 }
0xac30   :  { %v2526_v45 = vrot.slane %v2525_v16, 4  ;;  %vm3826_vm9 = vcmask 624224  }
0xac31   :  { %6661 = vrot.lane.b32.xlu1 %v6659_v11, %s8540_s11  ;;  %v4462_v11 = vsel %vm867_vm10, %v4461_v46, 0.0  ;;  %v4030_v34 = vrot.slane %v4029_v62, 2  ;;  %v2756_v14 = vadd.f32 %v2755_v61, %v2754_v5  ;;  %v4423_v5 = vsel %vm867_vm10, %v4422_v33, 0.0 }
0xac32   :  { %v2527_v36 = vadd.f32 %v2526_v45, %v2525_v16 }
0xac33   :  { %6094 = vrot.lane.b32.xlu0 %v6092_v39, %s8590_s28  ;;  %v4031_v8 = vadd.f32 %v4030_v34, %v4029_v62  ;;  %v11230_v62 = vld [vmem:[#allocation56_spill] sm:$0xff] }
0xac34   :  { %v2528_v48 = vrot.slane %v2527_v36, 2  ;;  %v5211_v0 = vmul.f32 %v10809_v63, %v11230_v62  ;;  %v6249_v63 = vmul.f32 %v10762_v20, %v10574_v35  ;;  %v11235_v35 = vld [vmem:[#allocation37_spill] sm:$0xff] }
0xac35   :  { %2180 = vperm.xlu1 %8007, %v11214_v15   ;;  %v4032_v17 = vrot.slane %v4031_v8, 1 }
0xac36   :  { %v2529_v28 = vadd.f32 %v2528_v48, %v2527_v36  ;;  %v2757_v36 = vsub.f32 0.0, %v2756_v14 }
0xac37   :  { %v4033_v3 = vadd.f32 %v4032_v17, %v4031_v8  ;;  %v6250_v8 = vsel %vm867_vm10, %v6249_v63, 0.0 }
0xac38   :  { %v2530_v39 = vrot.slane %v2529_v28, 1  ;;  %v8451_v41 = vpop.eup %8450 }
0xac39   :  { %v2953_v24 = vmul.f32 0.6931472, %v8451_v41  ;;  %v4034_v46 = vsub.f32 0.0, %v4033_v3  ;;  %v6289_v41 = vsel %vm867_vm10, %v10767_v12, 0.0 }
0xac3a   :  { %v2531_v54 = vadd.f32 %v2530_v39, %v2529_v28  ;;  %v11231_v39 = vld [vmem:[#allocation59_spill] sm:$0xff] }
0xac3b   :  { %v2954_v60 = vsub.f32 %v11227_v38, %v2953_v24  ;;  %v5444_v37 = vmul.f32 %v5443_v43, %v11231_v39  ;;  %v11238_v24 = vld [vmem:[#allocation22_spill] sm:$0xff] }
0xac3c   :  { %v2532_v45 = vsub.f32 0.0, %v2531_v54  ;;  %v11232_v54 = vld [vmem:[#allocation30_spill] sm:$0xff] }
0xac59   :  { %4463 = vadd.xlane.f32.xlu1 %v4462_v11  ;;  %v5212_v11 = vsel %vm867_vm10, %v5211_v0, 0.0 }
0xac5d   :  { %5485 = vadd.xlane.f32.xlu1 %v5484_v4  ;;  %v2149_v9 = vpop.xlane.xlu0 %2148  ;;  %v5445_v4 = vsel %vm867_vm10, %v5444_v37, 0.0 }
0xac5e   :  { %v2150_v16 = vsub.f32 0.0, %v2149_v9  ;;  %v2955_v9 = vmul.f32 %v2954_v60, %v11232_v54 }
0xac60   :  { %v2191_v58 = vadd.f32 %v2150_v16, %v10827_v21  ;;  %v11228_v21 = vld [vmem:[#allocation33_spill] sm:$0xff]  ;;  %v2956_v14 = vsel %vm867_vm10, %v2955_v9, 0.0 }
0xac61   :  { %v10865_v48 = vpop.xlane.xlu0 %4232  ;;  %8452 = vlog2.f32 %v11228_v21 }
0xac62   :  { %v2578_v2 = vadd.f32 %v2532_v45, %v2191_v58  ;;  %v11234_v45 = vld [vmem:[#allocation34_spill] sm:$0xff] }
0xac64   :  { %v10863_v55 = vadd.f32 %v2757_v36, %v2578_v2  ;;  %v6482_v2 = vmul.f32 %v10817_v30, %v10636_v56  ;;  %v11236_v56 = vld [vmem:[#allocation53_spill] sm:$0xff]  ;;  %v11237_v30 = vld [vmem:[#allocation23_spill] sm:$0xff] }
0xac65   :  { %v2563_v12 = vmul.f32 %v11237_v30, %v11216_v53 }
0xac66   :  { %v6483_v36 = vsel %vm867_vm10, %v6482_v2, 0.0 }
0xac67   :  { %v2565_v3 = vsel %vm2564_vm2, %v2563_v12, 0.0 }
0xac69   :  { %v2990_v22 = vpop.permute.xlu0 %2989 }
0xac6a   :  { %vm2991_vm0 = vcmp.eq.s32.totalorder %v8965_v1, %v2990_v22  ;;  %v11239_v22 = vld [vmem:[#allocation27_spill] sm:$0xff] }
0xac6b   :  { %v6806_v23 = vsel %vm2991_vm0, 1.0, %v11153_v27  ;;  %v8453_v61 = vpop.eup %8452  ;;  %v2788_v38 = vmul.f32 %v11239_v22, %v11219_v42 }
0xac6c   :  { %v2994_v26 = vmul.f32 %v6806_v23, %v2954_v60  ;;  %v3186_v34 = vmul.f32 0.6931472, %v8453_v61  ;;  %v11240_v60 = vld [vmem:[#allocation36_spill] sm:$0xff] }
0xac6d   :  { %v3223_v17 = vpop.permute.xlu0 %3222 }
0xac6e   :  { %4036 = vrot.lane.b32.xlu1 %v4034_v46, %s8546_s16  ;;  %v2995_v28 = vsel %vm867_vm10, %v2994_v26, 0.0  ;;  %v3187_v16 = vsub.f32 %v11233_v40, %v3186_v34  ;;  %s8591_s16 = smov 52   ;;  %vm3224_vm3 = vcmp.eq.s32.totalorder %v8965_v1, %v3223_v17 }
0xac6f   :  { %2996 = vadd.xlane.f32.xlu0 %v2995_v28  ;;  %v6811_v23 = vsel %vm3224_vm3, 1.0, %v11153_v27 }
0xac70   :  { %v3188_v43 = vmul.f32 %v3187_v16, %v11234_v45  ;;  %v3227_v42 = vmul.f32 %v6811_v23, %v3187_v16 }
0xac72   :  { %v3189_v58 = vsel %vm867_vm10, %v3188_v43, 0.0  ;;  %v3228_v62 = vsel %vm867_vm10, %v3227_v42, 0.0 }
0xac73   :  { %4424 = vadd.xlane.f32.xlu0 %v4423_v5  ;;  %v11241_v5 = vld [vmem:[#allocation26_spill] sm:$0xff] }
0xac77   :  { %5213 = vadd.xlane.f32.xlu0 %v5212_v11 }
0xac7b   :  { %5446 = vadd.xlane.f32.xlu0 %v5445_v4  ;;  %v11242_v4 = vld [vmem:[#allocation38_spill] sm:$0xff] }
0xac7c   :  { %v3827_v54 = vsel %vm3826_vm9, %v11242_v4, 0.0 }
0xac7d   :  { %v3828_v9 = vrot.slane %v3827_v54, 4 }
0xac7f   :  { %2957 = vadd.xlane.f32.xlu0 %v2956_v14  ;;  %v3829_v40 = vadd.f32 %v3828_v9, %v3827_v54 }
0xac81   :  { %v3830_v16 = vrot.slane %v3829_v40, 2 }
0xac83   :  { %6251 = vadd.xlane.f32.xlu0 %v6250_v8  ;;  %v3831_v63 = vadd.f32 %v3830_v16, %v3829_v40 }
0xac87   :  { %3190 = vadd.xlane.f32.xlu0 %v3189_v58 }
0xac8b   :  { %6484 = vadd.xlane.f32.xlu0 %v6483_v36 }
0xac92   :  { %6290 = vadd.xlane.f32.xlu1 %v6289_v41 }
0xaca1   :  { %3837 = vrot.lane.b32.xlu0 %v11235_v35, %s8591_s16  ;;  %v4234_v35 = vsub.f32 0.0, %v10865_v48 }
0xaca3   :  { %v6662_v20 = vpop.permute.xlu1 %6661 }
0xaca4   :  { %7919 = vmatmul.mubr.msk.bf16.vlgmr.msra.gmra.mrb[156].mxu0 %vm41_vm1, %v6662_v20  ;;  %vm2789_vm1 = vcmask 601672  }
0xaca5   :  { %4468 = vrot.lane.b32.xlu0 %v10016_v51, %s8585_s1  ;;  %v2790_v53 = vsel %vm2789_vm1, %v2788_v38, 0.0 }
0xaca6   :  { %v2791_v28 = vrot.slane %v2790_v53, 4 }
0xaca8   :  { %v2792_v33 = vadd.f32 %v2791_v28, %v2790_v53 }
0xaca9   :  { %5257 = vrot.lane.b32.xlu0 %v10272_v13, %s8587_s14  ;;  %v2566_v13 = vrot.slane %v2565_v3, 4  ;;  %s8594_s14 = smov 3  }
0xacab   :  { %v2567_v21 = vadd.f32 %v2566_v13, %v2565_v3 }
0xacad   :  { %5061 = vrot.lane.b32.xlu0 %v11236_v56, %s8567_s21 }
0xacb1   :  { %2579 = vrot.lane.b32.xlu0 %v11238_v24, %s8549_s13 }
0xacb4   :  { %v2181_v51 = vpop.permute.xlu1 %2180 }
0xacb5   :  { %vm2182_vm12 = vcmp.eq.s32.totalorder %v8965_v1, %v2181_v51  ;;  %3361 = vrot.lane.b32.xlu0 %v11240_v60, %s8540_s11  ;;  %v2568_v1 = vrot.slane %v2567_v21, 2 }
0xacb6   :  { %v6793_v26 = vsel %vm2182_vm12, 1.0, %v11153_v27 }
0xacb7   :  { %v2185_v46 = vmul.f32 %v6793_v26, %v10785_v32  ;;  %v2569_v27 = vadd.f32 %v2568_v1, %v2567_v21  ;;  %v2793_v32 = vrot.slane %v2792_v33, 2 }
0xacb9   :  { %6295 = vrot.lane.b32.xlu0 %v10589_v50, %s8592_s29  ;;  %v2186_v19 = vsel %vm867_vm10, %v2185_v46, 0.0  ;;  %v2794_v0 = vadd.f32 %v2793_v32, %v2792_v33  ;;  %v2570_v50 = vrot.slane %v2569_v27, 1 }
0xacba   :  { %2187 = vadd.xlane.f32.xlu1 %v2186_v19 }
0xacbb   :  { %v2571_v11 = vadd.f32 %v2570_v50, %v2569_v27  ;;  %v2795_v39 = vrot.slane %v2794_v0, 1 }
0xacbd   :  { %2804 = vrot.lane.b32.xlu0 %v11241_v5, %s8549_s13  ;;  %v2572_v37 = vsub.f32 0.0, %v2571_v11  ;;  %v2796_v61 = vadd.f32 %v2795_v39, %v2794_v0 }
0xacbe   :  { %3229 = vadd.xlane.f32.xlu1 %v3228_v62 }
0xacbf   :  { %v2797_v34 = vsub.f32 0.0, %v2796_v61 }
0xacc1   :  { %6099 = vrot.lane.b32.xlu0 %v10525_v44, %s8569_s20  ;;  %v5253_v44 = vpop.xlane.xlu0 %5252 }
0xacc2   :  { %v5254_v46 = vsub.f32 0.0, %v5253_v44 }
0xacc5   :  { %6655 = vrot.lane.b32.xlu0 %v10834_v57, %s8540_s11  ;;  %v6524_v14 = vpop.xlane.xlu0 %6523  ;;  %v3832_v57 = vrot.slane %v3831_v63, 1 }
0xacc6   :  { %v6525_v11 = vsub.f32 0.0, %v6524_v14  ;;  %v11243_v14 = vld [vmem:[#allocation44_spill] sm:$0xff] }
0xacc7   :  { %v3833_v43 = vadd.f32 %v3832_v57, %v3831_v63  ;;  %v4191_v63 = vmul.f32 %v10792_v10, %v11243_v14 }
0xacc9   :  { %v4841_v8 = vpop.permute.xlu0 %4840  ;;  %v3834_v36 = vsub.f32 0.0, %v3833_v43 }
0xaccd   :  { %v5057_v2 = vpop.permute.xlu0 %5056 }
0xaccf   :  { %2574 = vrot.lane.b32.xlu1 %v2572_v37, %s8589_s24 }
0xacd1   :  { %v5871_v30 = vpop.permute.xlu0 %5870 }
0xacd3   :  { %2799 = vrot.lane.b32.xlu1 %v2797_v34, %s8590_s28  ;;  %s8596_s28 = smov [#allocation4]  }
0xacd5   :  { %v6095_v12 = vpop.permute.xlu0 %6094 }
0xace6   :  { %v4464_v45 = vpop.xlane.xlu1 %4463 }
0xace7   :  { %v4465_v22 = vsub.f32 0.0, %v4464_v45 }
0xacea   :  { %v5486_v58 = vpop.xlane.xlu1 %5485 }
0xaceb   :  { %v5487_v19 = vsub.f32 0.0, %v5486_v58 }
0xacee   :  { %v4037_v41 = vpop.permute.xlu1 %4036 }
0xacef   :  { %v4039_v20 = vadd.f32 %v4037_v41, %v3834_v36 }
0xacf1   :  { %v4235_v56 = vadd.f32 %v4234_v35, %v4039_v20 }
0xacf3   :  { %v4466_v38 = vadd.f32 %v4465_v22, %v4235_v56 }
0xacf5   :  { %v4843_v13 = vadd.f32 %v4841_v8, %v4466_v38  ;;  %v4192_v8 = vsel %vm867_vm10, %v4191_v63, 0.0  ;;  %vm11250_vm10 = vcmask 1043456  }
0xacf6   :  { %vm11251_vm13 = vmmov %vm11250_vm10 }
0xacf7   :  { %v5059_v26 = vadd.f32 %v5057_v2, %v4843_v13 }
0xacf9   :  { %v5255_v28 = vadd.f32 %v5254_v46, %v5059_v26 }
0xacfb   :  { %v5488_v5 = vadd.f32 %v5487_v19, %v5255_v28  ;;  %v11249_v19 = vld [vmem:[#allocation61_spill] sm:$0xff] }
0xacfc   :  { %v2997_v17 = vpop.xlane.xlu0 %2996 }
0xacfd   :  { %v5873_v27 = vadd.f32 %v5871_v30, %v5488_v5  ;;  %v2998_v35 = vsub.f32 0.0, %v2997_v17  ;;  %v11244_v30 = vld [vmem:[#allocation39_spill] sm:$0xff] }
0xacff   :  { %v6097_v32 = vadd.f32 %v6095_v12, %v5873_v27  ;;  %v11245_v12 = vld [vmem:[#allocation49_spill] sm:$0xff] }
0xad00   :  { %v10929_v24 = vpop.xlane.xlu0 %4424 }
0xad01   :  { %v4426_v63 = vsub.f32 0.0, %v10929_v24 }
0xad04   :  { %v10931_v3 = vpop.xlane.xlu0 %5213 }
0xad08   :  { %v10933_v51 = vpop.xlane.xlu0 %5446 }
0xad0c   :  { %v2958_v60 = vpop.xlane.xlu0 %2957 }
0xad0d   :  { %v2959_v53 = vsub.f32 0.0, %v2958_v60 }
0xad0f   :  { %v3000_v23 = vadd.f32 %v2959_v53, %v10863_v55 }
0xad10   :  { %v10936_v48 = vpop.xlane.xlu0 %6251 }
0xad14   :  { %v3191_v21 = vpop.xlane.xlu0 %3190 }
0xad15   :  { %v3192_v42 = vsub.f32 0.0, %v3191_v21  ;;  %v11248_v21 = vld [vmem:[#allocation60_spill] sm:$0xff] }
0xad16   :  { %v5820_v28 = vmul.f32 %v10445_v52, %v11248_v21 }
0xad17   :  { %v10938_v1 = vadd.f32 %v3192_v42, %v3000_v23 }
0xad18   :  { %v10940_v33 = vpop.xlane.xlu0 %6484 }
0xad1c   :  { %v3838_v62 = vpop.permute.xlu0 %3837 }
0xad1d   :  { %3839 = vst.msk [vmem:[%s11080_s3 + $0x2] sm:$0x1] %vm517_vm6, %v3838_v62 }
0xad1f   :  { %v6291_v55 = vpop.xlane.xlu1 %6290 }
0xad20   :  { %v6292_v0 = vsub.f32 0.0, %v6291_v55  ;;  %v4469_v50 = vpop.permute.xlu0 %4468 }
0xad21   :  { %4470 = vst.msk [vmem:[%s11080_s3 + $0x3] sm:$0x1] %vm722_vm11, %v4469_v50 }
0xad22   :  { %v6293_v39 = vadd.f32 %v6292_v0, %v6097_v32 }
0xad24   :  { %v6526_v37 = vadd.f32 %v6525_v11, %v6293_v39  ;;  %v5258_v61 = vpop.permute.xlu0 %5257 }
0xad25   :  { %5259 = vst.msk [vmem:[%s11080_s3 + $0x3] sm:$0x1] %vm1547_vm4, %v5258_v61 }
0xad26   :  { %6710 = vrot.lane.b32.xlu1 %v6526_v37, %s8593_s6 }
0xad28   :  { %v10954_v34 = vpop.permute.xlu0 %5061 }
0xad2c   :  { %v2580_v4 = vpop.permute.xlu0 %2579 }
0xad2d   :  { %2582 = vst.msk [vmem:[%s11080_s3] sm:$0x1] %vm2581_vm15, %v2580_v4 }
0xad30   :  { %v3362_v54 = vpop.permute.xlu0 %3361 }
0xad34   :  { %v10960_v9 = vpop.permute.xlu0 %6295 }
0xad38   :  { %v2805_v40 = vpop.permute.xlu0 %2804 }
0xad39   :  { %2807 = vst.msk [vmem:[%s11080_s3] sm:$0x1] %vm2806_vm7, %v2805_v40 }
0xad3c   :  { %v10966_v44 = vpop.permute.xlu0 %6099 }
0xad40   :  { %v6656_v16 = vpop.permute.xlu0 %6655 }
0xad47   :  { %v2188_v57 = vpop.xlane.xlu1 %2187 }
0xad48   :  { %v2189_v43 = vsub.f32 0.0, %v2188_v57 }
0xad4a   :  { %4193 = vadd.xlane.f32.xlu1 %v4192_v8  ;;  %v2190_v2 = vadd.f32 %v2189_v43, %v10830_v31  ;;  %v11252_v8 = vld [vmem:[#allocation41_spill] sm:$0xff] }
0xad4b   :  { %v3230_v45 = vpop.xlane.xlu1 %3229 }
0xad4c   :  { %v3231_v38 = vsub.f32 0.0, %v3230_v45 }
0xad4f   :  { %v2575_v58 = vpop.permute.xlu1 %2574 }
0xad50   :  { %v2577_v36 = vadd.f32 %v2575_v58, %v2190_v2 }
0xad53   :  { %v2800_v41 = vpop.permute.xlu1 %2799 }
0xad54   :  { %v2802_v20 = vadd.f32 %v2800_v41, %v2577_v36 }
0xad56   :  { %v2999_v56 = vadd.f32 %v2998_v35, %v2802_v20 }
0xad58   :  { %v3232_v13 = vadd.f32 %v3231_v38, %v2999_v56 }
0xad5b   :  { %4041 = vrot.lane.b32.xlu1 %v11244_v30, %s8591_s16  ;;  %v5215_v30 = vsub.f32 0.0, %v10931_v3  ;;  %s6727_s16 = sshll.u32 %s8596_s28, 4  ;;  %s6728_s16 = int_to_ptr.vmem [resolvable:$true] %s6727_s16 }
0xad5c   :  { %s8488_s17 = scalar_lea.vmem %s6728_s16, 16  ;;  %s8492_s6 = scalar_lea.vmem %s6728_s16, 32 }
0xad5d   :  { %p8489_p0 = scmp.ne.s32.totalorder %s6728_s16, %s8488_s17  ;;  %p8493_p1 = scmp.lt.s32.totalorder %s6728_s16, %s6728_s16 }
0xad5e   :  { %p8494_p2 = scmp.lt.s32.totalorder %s8492_s6, %s8488_s17 }
0xad5f   :  { %4845 = vrot.lane.b32.xlu1 %v11245_v12, %s8567_s21  ;;  %s8595_s21 = smov 5  }
0xad60   :  { %p8495_p3 = por %p8494_p2, %p8493_p1 }
0xad62   :  { %p8496_p4 = pnand %p8495_p3, %p8489_p0 }
0xad63   :  { %2192 = vrot.lane.b32.xlu1 %v11214_v15, %s8594_s14  ;;  %v11247_v15 = vld [vmem:[#allocation51_spill] sm:$0xff] }
0xad67   :  { %5490 = vrot.lane.b32.xlu1 %v10335_v49, %s8594_s14  ;;  %v11246_v49 = vld [vmem:[#allocation48_spill] sm:$0xff] }
0xad6b   :  { %3001 = vrot.lane.b32.xlu1 %v11208_v29, %s8592_s29  ;;  %v4798_v29 = vmul.f32 %v10132_v59, %v11246_v49  ;;  %v6253_v49 = vsub.f32 0.0, %v10936_v48 }
0xad6d   :  { %v4799_v23 = vsel %vm944_vm14, %v4798_v29, 0.0 }
0xad6e   :  { %v4800_v46 = vrot.slane %v4799_v23, 4 }
0xad6f   :  { %5875 = vrot.lane.b32.xlu1 %v10456_v7, %s8569_s20  ;;  %v5014_v7 = vmul.f32 %v11212_v25, %v11247_v15 }
0xad70   :  { %v4801_v5 = vadd.f32 %v4800_v46, %v4799_v23 }
0xad71   :  { %v5015_v26 = vsel %vm944_vm14, %v5014_v7, 0.0 }
0xad72   :  { %v5016_v42 = vrot.slane %v5015_v26, 4  ;;  %v4802_v27 = vrot.slane %v4801_v5, 2 }
0xad74   :  { %v5017_v62 = vadd.f32 %v5016_v42, %v5015_v26  ;;  %v4803_v50 = vadd.f32 %v4802_v27, %v4801_v5 }
0xad76   :  { %v5018_v55 = vrot.slane %v5017_v62, 2  ;;  %v4804_v52 = vrot.slane %v4803_v50, 1 }
0xad77   :  { %v6700_v10 = vpop.f32.mrb[156].mxu0 }
0xad78   :  { %v7920_v31 = vpop.f32.mrb[157].mxu0  ;;  %v5019_v11 = vadd.f32 %v5018_v55, %v5017_v62  ;;  %v4805_v40 = vadd.f32 %v4804_v52, %v4803_v50  ;;  %v5448_v10 = vsub.f32 0.0, %v10933_v51 }
0xad79   :  { %v6703_v17 = vpop.f32.mrb[158].mxu0 }
0xad7a   :  { %v7921_v22 = vpop.f32.mrb[159].mxu0  ;;  %v5020_v4 = vrot.slane %v5019_v11, 1  ;;  %v4806_v2 = vsub.f32 0.0, %v4805_v40 }
0xad7c   :  { %v5021_v57 = vadd.f32 %v5020_v4, %v5019_v11 }
0xad7e   :  { %v5022_v41 = vsub.f32 0.0, %v5021_v57 }
0xad98   :  { %v6711_v60 = vpop.permute.xlu1 %6710 }
0xad99   :  { %v6713_v53 = vadd.f32 %v6711_v60, %v3232_v13 }
0xad9b   :  { %6715 = vrot.lane.b32.xlu1 %v6713_v53, %s8540_s11 }
0xad9f   :  { %3234 = vrot.lane.b32.xlu1 %v11209_v18, %s8595_s21  ;;  %v6044_v18 = vmul.f32 %v10511_v6, %v11249_v19 }
0xada1   :  { %v6045_v59 = vsel %vm11251_vm13, %v6044_v18, 0.0 }
0xada2   :  { %v6046_v32 = vrot.slane %v6045_v59, 4 }
0xada3   :  { %6528 = vrot.lane.b32.xlu1 %v10656_v47, %s8595_s21  ;;  %v5821_v47 = vsel %vm11250_vm10, %v5820_v28, 0.0 }
0xada4   :  { %v5822_v25 = vrot.slane %v5821_v47, 4  ;;  %v6047_v39 = vadd.f32 %v6046_v32, %v6045_v59 }
0xada6   :  { %v5823_v0 = vadd.f32 %v5822_v25, %v5821_v47  ;;  %v6048_v61 = vrot.slane %v6047_v39, 2 }
0xada8   :  { %v5824_v37 = vrot.slane %v5823_v0, 2  ;;  %v6049_v14 = vadd.f32 %v6048_v61, %v6047_v39 }
0xadaa   :  { %v5825_v6 = vadd.f32 %v5824_v37, %v5823_v0  ;;  %v6050_v20 = vrot.slane %v6049_v14, 1 }
0xadac   :  { %v5826_v58 = vrot.slane %v5825_v6, 1  ;;  %v6051_v17 = vadd.f32 %v6050_v20, %v6049_v14 }
0xadae   :  { %v5827_v24 = vadd.f32 %v5826_v58, %v5825_v6  ;;  %v6052_v60 = vsub.f32 0.0, %v6051_v17 }
0xadb0   :  { %v5828_v38 = vsub.f32 0.0, %v5827_v24 }
0xadd7   :  { %v4194_v54 = vpop.xlane.xlu1 %4193 }
0xadd8   :  { %v4195_v16 = vsub.f32 0.0, %v4194_v54 }
0xadda   :  { %v4236_v45 = vadd.f32 %v4195_v16, %v11252_v8 }
0xaddb   :  { %v4042_v43 = vpop.permute.xlu1 %4041 }
0xaddc   :  { %v4467_v36 = vadd.f32 %v4426_v63, %v4236_v45  ;;  %4043 = vst.msk [vmem:[%s11080_s3 + $0x2] sm:$0x1] %vm722_vm11, %v4042_v43 }
0xadde   :  { %v4844_v35 = vadd.f32 %v4806_v2, %v4467_v36 }
0xaddf   :  { %v4846_v56 = vpop.permute.xlu1 %4845 }
0xade0   :  { %v5060_v12 = vadd.f32 %v5022_v41, %v4844_v35  ;;  %4847 = vst.msk [vmem:[%s11080_s3 + $0x2] sm:$0x1] %vm1547_vm4, %v4846_v56 }
0xade1   :  { %5063 = vst.msk [vmem:[%s11080_s3 + $0x2] sm:$0x1] %vm1764_vm5, %v10954_v34  ;;  %v6486_v34 = vsub.f32 0.0, %v10940_v33 }
0xade2   :  { %v5256_v31 = vadd.f32 %v5215_v30, %v5060_v12 }
0xade3   :  { %v2193_v22 = vpop.permute.xlu1 %2192 }
0xade4   :  { %2194 = vst.msk [vmem:[%s11080_s3 + $0x1] sm:$0x1] %vm1764_vm5, %v2193_v22  ;;  %v5489_v3 = vadd.f32 %v5448_v10, %v5256_v31 }
0xade6   :  { %v5874_v13 = vadd.f32 %v5828_v38, %v5489_v3 }
0xade7   :  { %v5491_v53 = vpop.permute.xlu1 %5490 }
0xade8   :  { %5492 = vst.msk [vmem:[%s11080_s3 + $0x3] sm:$0x1] %vm1764_vm5, %v5491_v53  ;;  %v6098_v51 = vadd.f32 %v6052_v60, %v5874_v13 }
0xade9   :  { %6297 = vst.msk [vmem:[%s11080_s3 + $0x3] sm:$0x1] %vm2581_vm15, %v10960_v9 }
0xadea   :  { %v6294_v29 = vadd.f32 %v6253_v49, %v6098_v51 }
0xadeb   :  { %v3002_v15 = vpop.permute.xlu1 %3001 }
0xadec   :  { %3003 = vst.msk [vmem:[%s11080_s3 + $0x1] sm:$0x1] %vm2581_vm15, %v3002_v15  ;;  %v6527_v48 = vadd.f32 %v6486_v34, %v6294_v29 }
0xadee   :  { %v6707_v7 = vadd.f32 %v6527_v48, %v10938_v1 }
0xadef   :  { %v5876_v23 = vpop.permute.xlu1 %5875 }
0xadf0   :  { %5877 = vst.msk [vmem:[%s11080_s3 + $0x2] sm:$0x1] %vm2581_vm15, %v5876_v23 }
0xadf1   :  { %6708 = vst.msk [vmem:[#allocation4] sm:$0x1] %vm517_vm6, %v6707_v7 }
0xadf2   :  { %6101 = vst.msk [vmem:[%s11080_s3 + $0x2] sm:$0x1] %vm2806_vm7, %v10966_v44 }
0xadf3   :  { %8499 = shalt.err (!%p8496_p4)
}
0xadf4   :  { %s8500_s1 = scalar_lea.hbm %s11081_s4, 16 }
0xadf5   :  { %p8501_p5 = scmp.ne.s32.totalorder %s11081_s4, %s8500_s1  ;;  %p8504_p6 = scmp.lt.u32.totalorder %s8500_s1, %s11081_s4 }
0xadf7   :  { %p8506_p7 = pnand %p8504_p6, %p8501_p5 }
0xadf9   :  { %8509 = shalt.err (!%p8506_p7)
}
0xadfa   :  { %6730 = dma.vmem_to_hbm [thread:$0]  %s6728_s16, 16, %s11081_s4, [#allocation5]  }
0xadfb   :  { %s8597_s18 = smov [#allocation6]  }
0xadfc   :  { %s6737_s19 = sshll.u32 %s8597_s18, 4  ;;  %s6738_s19 = int_to_ptr.vmem [resolvable:$true] %s6737_s19 }
0xadfd   :  { %s8510_s22 = scalar_lea.vmem %s6738_s19, 16  ;;  %s8514_s23 = scalar_lea.vmem %s6738_s19, 32 }
0xadfe   :  { %p8511_p8 = scmp.ne.s32.totalorder %s6738_s19, %s8510_s22  ;;  %p8515_p9 = scmp.lt.s32.totalorder %s6738_s19, %s6738_s19 }
0xadff   :  { %p8516_p10 = scmp.lt.s32.totalorder %s8514_s23, %s8510_s22 }
0xae01   :  { %p8517_p11 = por %p8516_p10, %p8515_p9 }
0xae03   :  { %p8518_p12 = pnand %p8517_p11, %p8511_p8 }
0xae0d   :  { %v6716_v1 = vpop.permute.xlu1 %6715 }
0xae0e   :  { %6718 = vst.msk [vmem:[#allocation6] sm:$0x1] %vm517_vm6, %v6716_v1 }
0xae0f   :  { %8521 = shalt.err (!%p8518_p12)
}
0xae10   :  { %s8522_s26 = scalar_lea.hbm %s11082_s5, 16 }
0xae11   :  { %p8523_p13 = scmp.ne.s32.totalorder %s11082_s5, %s8522_s26  ;;  %p8526_p0 = scmp.lt.u32.totalorder %s8522_s26, %s11082_s5 }
0xae13   :  { %p8528_p1 = pnand %p8526_p0, %p8523_p13 }
0xae15   :  { %8531 = shalt.err (!%p8528_p1)
}
0xae16   :  { %6740 = dma.vmem_to_hbm [thread:$0]  %s6738_s19, 16, %s11082_s5, [#allocation7]   ;;  %v3235_v33 = vpop.permute.xlu1 %3234 }
0xae17   :  { %3236 = vst.msk [vmem:[%s11080_s3 + $0x1] sm:$0x1] %vm2806_vm7, %v3235_v33 }
0xae1a   :  { %v6529_v9 = vpop.permute.xlu1 %6528 }
0xae1b   :  { %6530 = vst.msk [vmem:[%s11080_s3 + $0x3] sm:$0x1] %vm2806_vm7, %v6529_v9 }
0xae1c   :  { %8532 = dma.done.wait [#allocation5], 16  }
0xae1d   :  { %8533 = vsyncadd [#allocation5], 4294967280 }
0xae1e   :  { %8534 = dma.done.wait [#allocation7], 16  }
0xae1f   :  { %8535 = vsyncadd [#allocation7], 4294967280 }
0xae20   :  { %6749 = vsyncpa [#allocation5], 1 }
0xae21   :  { %6750 = vsyncpa [#allocation7], 1 }

</bundles_post_ra>
